<compile_context>
chip_gen: v5e
topology: v5e:2x2
jax: 0.10.0
libtpu: 0.0.40
codegen_flags: <defaults>
</compile_context>

<pallas_src>
import functools

import jax
import jax.numpy as jnp
from jax.experimental import pallas as pl
from jax.experimental.pallas import tpu as pltpu

BN_EPS = 1e-5
LANE = 128


def _round_up(x, m):
    return ((x + m - 1) // m) * m


def _pad_ch(c):
    return _round_up(c, LANE)


def _pick_tile(dim, cap, align):
    """Largest multiple of `align` that divides round_up(dim, align), <= cap."""
    dim_p = _round_up(max(dim, 1), align)
    units = dim_p // align
    best = align
    for d in range(1, units + 1):
        if units % d == 0 and d * align <= cap:
            best = d * align
    return best


def _hw_defaults():
    """Generation-aware tile caps / VMEM budget (review items for v5e/v6e/v7x)."""
    kind = ""
    try:
        kind = jax.devices()[0].device_kind.lower()
    except Exception:
        pass
    if "v6" in kind:                       # v6e: 128 MiB VMEM, go big
        return {"tm": 1024, "tn": 1024, "tk": 512, "vmem": 96 * 1024 * 1024}
    if "v7" in kind or "tpu7" in kind:     # v7x: 64 MiB VMEM, cap the budget
        return {"tm": 512, "tn": 512, "tk": 512, "vmem": 48 * 1024 * 1024}
    # v5e / unknown: 512 tiles fit the 16 MiB default scoped VMEM
    return {"tm": 512, "tn": 512, "tk": 512, "vmem": None}


_HW = _hw_defaults()


def _compiler_params(dims):
    kwargs = {"dimension_semantics": dims}
    if _HW["vmem"] is not None:
        kwargs["vmem_limit_bytes"] = _HW["vmem"]
    return pltpu.CompilerParams(**kwargs)


# --------------------- fused (matmul * scale + bias) kernel ------------------

def _fused_mm_kernel(*refs, apply_relu, has_scale, has_residual):
    """Tiled matmul with K-accumulation and fused BN/residual/ReLU epilogue.

    refs = (x, w, [scale], bias, [residual], out, acc_scratch)
    """
    it = iter(refs)
    x_ref = next(it)
    w_ref = next(it)
    s_ref = next(it) if has_scale else None
    b_ref = next(it)
    r_ref = next(it) if has_residual else None
    o_ref = next(it)
    acc_ref = next(it)

    k = pl.program_id(2)

    @pl.when(k == 0)
    def _():
        acc_ref[...] = jnp.zeros_like(acc_ref)

    # bf16 operands on the MXU, f32 accumulation.
    acc_ref[...] += jnp.dot(x_ref[...], w_ref[...],
                            preferred_element_type=jnp.float32)

    @pl.when(k == pl.num_programs(2) - 1)
    def _():
        out = acc_ref[...]
        if has_scale:
            out = out * s_ref[...]
        out = out + b_ref[...]
        if has_residual:
            out = out + r_ref[...].astype(jnp.float32)
        if apply_relu:
            out = jnp.maximum(out, 0.0)
        o_ref[...] = out.astype(o_ref.dtype)


def matmul_scale_bias(x, w, scale, bias, relu=False, residual=None,
                      out_dtype=jnp.bfloat16):
    """out = relu_opt((x @ w) * scale + bias [+ residual]), bf16 MXU / f32 acc."""
    M, K = x.shape
    K2, N = w.shape
    assert K == K2
    tm = _pick_tile(M, _HW["tm"], 16)      # 16: bf16 sublane packing
    tn = _pick_tile(N, _HW["tn"], LANE)
    tk = _pick_tile(K, _HW["tk"], LANE)
    Mp, Np, Kp = _round_up(M, tm), _round_up(N, tn), _round_up(K, tk)

    def _prep2d(a, rows, cols, dtype):
        a = a.astype(dtype)
        if a.shape != (rows, cols):
            a = jnp.pad(a, ((0, rows - a.shape[0]), (0, cols - a.shape[1])))
        return a

    operands = [_prep2d(x, Mp, Kp, jnp.bfloat16),
                _prep2d(w, Kp, Np, jnp.bfloat16)]
    in_specs = [pl.BlockSpec((tm, tk), lambda i, j, k: (i, k)),
                pl.BlockSpec((tk, tn), lambda i, j, k: (k, j))]

    has_scale = scale is not None
    if has_scale:
        s = scale.astype(jnp.float32)
        if s.shape[0] != Np:
            s = jnp.pad(s, (0, Np - s.shape[0]))
        operands.append(s.reshape(1, Np))
        in_specs.append(pl.BlockSpec((1, tn), lambda i, j, k: (0, j)))

    b = bias.astype(jnp.float32)
    if b.shape[0] != Np:
        b = jnp.pad(b, (0, Np - b.shape[0]))
    operands.append(b.reshape(1, Np))
    in_specs.append(pl.BlockSpec((1, tn), lambda i, j, k: (0, j)))

    has_residual = residual is not None
    if has_residual:
        operands.append(_prep2d(residual, Mp, Np, jnp.bfloat16))
        in_specs.append(pl.BlockSpec((tm, tn), lambda i, j, k: (i, j)))

    kern = functools.partial(_fused_mm_kernel, apply_relu=relu,
                             has_scale=has_scale, has_residual=has_residual)
    out = pl.pallas_call(
        kern,
        out_shape=jax.ShapeDtypeStruct((Mp, Np), out_dtype),
        grid=(Mp // tm, Np // tn, Kp // tk),
        in_specs=in_specs,
        out_specs=pl.BlockSpec((tm, tn), lambda i, j, k: (i, j)),
        scratch_shapes=[pltpu.VMEM((tm, tn), jnp.float32)],
        compiler_params=_compiler_params(("parallel", "parallel", "arbitrary")),
    )(*operands)
    if Mp != M or Np != N:
        out = out[:M, :N]
    return out


# ----------------------- direct 3x3 conv (no HBM im2col) ---------------------

def _conv3x3_kernel(x_ref, w_ref, s_ref, b_ref, o_ref, *, relu):
    """x_ref: (1, H+2, W+2, Cp) halo block; w_ref: (3,3,Cp,tn); o_ref: (1,H,W,tn)."""
    H, W, tn = o_ref.shape[1], o_ref.shape[2], o_ref.shape[3]
    Cp = x_ref.shape[3]
    xv = x_ref[0]                       # (H+2, W+2, Cp) resident in VMEM
    wv = w_ref[...]                     # (3, 3, Cp, tn)
    acc = jnp.zeros((H * W, tn), jnp.float32)
    for kh in range(3):                 # 9 shifted windows formed in VMEM
        for kw in range(3):
            patch = xv[kh:kh + H, kw:kw + W, :].reshape(H * W, Cp)
            acc = acc + jnp.dot(patch, wv[kh, kw],
                                preferred_element_type=jnp.float32)
    out = acc * s_ref[...] + b_ref[...]
    if relu:
        out = jnp.maximum(out, 0.0)
    o_ref[...] = out.reshape(1, H, W, tn).astype(o_ref.dtype)


def conv3x3_bn(x, w, scale, bias, relu=True):
    """3x3 / stride-1 / pad-1 conv + folded BN (+ReLU), windowed reads from VMEM."""
    B, H, W, Cp = x.shape
    coutP = w.shape[-1]
    xp = jnp.pad(x, ((0, 0), (1, 1), (1, 1), (0, 0)))      # single halo pad pass
    tn = _pick_tile(coutP, _HW["tn"], LANE)
    return pl.pallas_call(
        functools.partial(_conv3x3_kernel, relu=relu),
        out_shape=jax.ShapeDtypeStruct((B, H, W, coutP), jnp.bfloat16),
        grid=(B, coutP // tn),
        in_specs=[
            pl.BlockSpec((1, H + 2, W + 2, Cp), lambda b, j: (b, 0, 0, 0)),
            pl.BlockSpec((3, 3, Cp, tn), lambda b, j: (0, 0, 0, j)),
            pl.BlockSpec((1, tn), lambda b, j: (0, j)),
            pl.BlockSpec((1, tn), lambda b, j: (0, j)),
        ],
        out_specs=pl.BlockSpec((1, H, W, tn), lambda b, j: (b, 0, 0, j)),
        compiler_params=_compiler_params(("parallel", "parallel")),
    )(xp, w, scale.reshape(1, coutP), bias.reshape(1, coutP))


# ------------------------------- avg-pool 2x2 ---------------------------------

def _avgpool2_kernel(x_ref, o_ref, *, C):
    v = x_ref[...].astype(jnp.float32)      # (Ho, 2, Wo, 2C); C is a 128-multiple
    s = v[:, 0] + v[:, 1]                   # sum over the two input rows
    o_ref[...] = ((s[:, :, :C] + s[:, :, C:]) * 0.25).astype(o_ref.dtype)


def avgpool2(x):
    """AvgPool2d(2) on channel-padded NHWC (lane-dense: C is a 128-multiple)."""
    B, H, W, C = x.shape
    Ho, Wo = H // 2, W // 2
    if H % 2 or W % 2:
        x = x[:, :Ho * 2, :Wo * 2, :]
    x4 = x.reshape(B * Ho, 2, Wo, 2 * C)    # free reshape of trailing dims
    out = pl.pallas_call(
        functools.partial(_avgpool2_kernel, C=C),
        out_shape=jax.ShapeDtypeStruct((B * Ho, Wo, C), jnp.bfloat16),
        grid=(B,),
        in_specs=[pl.BlockSpec((Ho, 2, Wo, 2 * C), lambda b: (b, 0, 0, 0))],
        out_specs=pl.BlockSpec((Ho, Wo, C), lambda b: (b, 0, 0)),
        compiler_params=_compiler_params(("parallel",)),
    )(x4)
    return out.reshape(B, Ho, Wo, C)


# ------------------------------- attention core -------------------------------

def _attn_kernel(q_ref, k_ref, v_ref, o_ref):
    # q is pre-scaled on the host; operands are bf16, softmax in f32.
    s = jnp.einsum('bqd,bsd->bqs', q_ref[...], k_ref[...],
                   preferred_element_type=jnp.float32)
    m = jnp.max(s, axis=-1, keepdims=True)
    p = jnp.exp(s - m)
    p = p * pl.reciprocal(jnp.sum(p, axis=-1, keepdims=True), approx=True)
    o_ref[...] = jnp.einsum('bqs,bsd->bqd', p.astype(v_ref.dtype), v_ref[...],
                            preferred_element_type=jnp.float32)


def attention_core(q, k, v):
    """Single-query multi-head attention; heads batched into the leading dim."""
    BH, S, Dh = k.shape
    out = pl.pallas_call(
        _attn_kernel,
        out_shape=jax.ShapeDtypeStruct((BH, 1, Dh), jnp.float32),
        in_specs=[pl.BlockSpec(memory_space=pltpu.MemorySpace.VMEM)] * 3,
        out_specs=pl.BlockSpec(memory_space=pltpu.MemorySpace.VMEM),
    )(q, k, v)
    return out.reshape(BH, Dh)


# ------------------------------- im2col (stem conv1 only) ---------------------

def im2col(x, ksize, stride, pad):
    """NHWC -> (B*Ho*Wo, k*k*C) patches, feature order [kh, kw, cin] (bf16)."""
    B, H, W, C = x.shape
    if pad:
        x = jnp.pad(x, ((0, 0), (pad, pad), (pad, pad), (0, 0)))
    Ho = (H + 2 * pad - ksize) // stride + 1
    Wo = (W + 2 * pad - ksize) // stride + 1
    cols = []
    for kh in range(ksize):
        for kw in range(ksize):
            cols.append(x[:, kh:kh + stride * Ho:stride,
                          kw:kw + stride * Wo:stride, :])
    patches = jnp.concatenate(cols, axis=-1)
    return patches.reshape(B * Ho * Wo, ksize * ksize * C), (B, Ho, Wo)


# ------------------------------- Bottleneck ------------------------------------

def bottleneck(x, p, stride):
    B, H, W, Cp = x.shape
    # conv1 (1x1) + bn1 + relu  -> plain lane-dense matmul
    out = matmul_scale_bias(x.reshape(B * H * W, Cp), p['w1'], p['s1'], p['b1'],
                            relu=True).reshape(B, H, W, -1)
    # conv2 (3x3, stride 1) + bn2 + relu  -> direct windowed kernel
    out = conv3x3_bn(out, p['w2'], p['s2'], p['b2'], relu=True)
    if stride > 1:
        out = avgpool2(out)
    Bo, Ho, Wo, CoP = out.shape
    # identity / downsample branch (computed first so it fuses into conv3)
    if 'wd' in p:
        identity = avgpool2(x) if stride > 1 else x
        res2d = matmul_scale_bias(identity.reshape(Bo * Ho * Wo, Cp),
                                  p['wd'], p['sd'], p['bd'], relu=False)
    else:
        res2d = x.reshape(B * H * W, Cp)
    # conv3 (1x1) + bn3 + residual add + ReLU fused in one matmul epilogue
    out2d = matmul_scale_bias(out.reshape(Bo * Ho * Wo, CoP), p['w3'],
                              p['s3'], p['b3'], relu=True, residual=res2d)
    return out2d.reshape(Bo, Ho, Wo, -1)


# ----------------------------- AttentionPool2d ---------------------------------

def attention_pool(x, ap):
    B, H, W, Cp = x.shape
    C = ap['embed_dim']
    if Cp != C:
        x = x[..., :C]
    HW = H * W
    heads = ap['num_heads']
    Dh = C // heads

    xs = x.reshape(B, HW, C).transpose(1, 0, 2).astype(jnp.float32)     # (HW,B,C)
    xs = jnp.concatenate([xs.mean(axis=0, keepdims=True), xs], axis=0)  # (S,B,C)
    xs = xs + ap['pos_emb'][:, None, :]
    S = HW + 1

    # Fused QKV projection: one lane-dense matmul with N = 3*C.
    qkv = matmul_scale_bias(xs.reshape(S * B, C), ap['w_qkv'], None, ap['b_qkv'])
    qkv = qkv.reshape(S, B, 3, C)

    q = (qkv[0, :, 0, :].astype(jnp.float32) * (Dh ** -0.5)).astype(jnp.bfloat16)
    k = qkv[:, :, 1, :]
    v = qkv[:, :, 2, :]

    qh = q.reshape(B * heads, 1, Dh)
    kh = k.transpose(1, 0, 2).reshape(B, S, heads, Dh).transpose(0, 2, 1, 3)
    kh = kh.reshape(B * heads, S, Dh)
    vh = v.transpose(1, 0, 2).reshape(B, S, heads, Dh).transpose(0, 2, 1, 3)
    vh = vh.reshape(B * heads, S, Dh)

    attn = attention_core(qh, kh, vh).reshape(B, C).astype(jnp.bfloat16)
    return matmul_scale_bias(attn, ap['w_c'], None, ap['b_c'],
                             out_dtype=jnp.float32)


# ----------------------------- parameter init ----------------------------------

class KeyGen:
    def __init__(self, key):
        self.key = key

    def __call__(self):
        self.key, sub = jax.random.split(self.key)
        return sub


def init_conv(kg, kh, kw, cin, cout):
    fan_in = kh * kw * cin
    return jax.random.normal(kg(), (kh, kw, cin, cout), jnp.float32) / jnp.sqrt(fan_in)


def init_bn(kg, c):
    gamma = 1.0 + 0.1 * jax.random.normal(kg(), (c,), jnp.float32)
    beta = 0.1 * jax.random.normal(kg(), (c,), jnp.float32)
    mean = 0.1 * jax.random.normal(kg(), (c,), jnp.float32)
    var = 1.0 + 0.1 * jax.random.uniform(kg(), (c,), jnp.float32)
    return (gamma, beta, mean, var)


def init_bottleneck(kg, inplanes, planes, stride):
    p = {
        'conv1': init_conv(kg, 1, 1, inplanes, planes), 'bn1': init_bn(kg, planes),
        'conv2': init_conv(kg, 3, 3, planes, planes), 'bn2': init_bn(kg, planes),
        'conv3': init_conv(kg, 1, 1, planes, planes * 4), 'bn3': init_bn(kg, planes * 4),
    }
    if stride > 1 or inplanes != planes * 4:
        p['ds_conv'] = init_conv(kg, 1, 1, inplanes, planes * 4)
        p['ds_bn'] = init_bn(kg, planes * 4)
    return p


def init_modified_resnet(kg, layers, output_dim, heads, input_resolution, width):
    p = {
        'conv1': init_conv(kg, 3, 3, 3, width // 2), 'bn1': init_bn(kg, width // 2),
        'conv2': init_conv(kg, 3, 3, width // 2, width // 2), 'bn2': init_bn(kg, width // 2),
        'conv3': init_conv(kg, 3, 3, width // 2, width), 'bn3': init_bn(kg, width),
    }
    inplanes = width
    for li, (mult, nblocks, stride) in enumerate(
            zip([1, 2, 4, 8], layers, [1, 2, 2, 2]), start=1):
        planes = width * mult
        blocks = [(init_bottleneck(kg, inplanes, planes, stride), stride)]
        inplanes = planes * 4
        for _ in range(1, nblocks):
            blocks.append((init_bottleneck(kg, inplanes, planes, 1), 1))
        p[f'layer{li}'] = blocks

    embed_dim = width * 32
    spacial = input_resolution // 32
    ap = {'pos_emb': jax.random.normal(kg(), (spacial ** 2 + 1, embed_dim),
                                       jnp.float32) / embed_dim ** 0.5,
          'num_heads': heads}
    for name, od in [('q', embed_dim), ('k', embed_dim), ('v', embed_dim), ('c', output_dim)]:
        ap[name + '_w'] = 0.05 * jax.random.normal(kg(), (od, embed_dim), jnp.float32)
        ap[name + '_b'] = 0.05 * jax.random.normal(kg(), (od,), jnp.float32)
    p['attnpool'] = ap
    return p


# -------------------- one-time prepare: fold BN, pad, cast bf16 ----------------

def _fold_bn(bn, coutP):
    gamma, beta, mean, var = bn
    scale = gamma / jnp.sqrt(var + BN_EPS)
    bias = beta - mean * scale
    pad = coutP - scale.shape[0]
    return (jnp.pad(scale, (0, pad)).astype(jnp.float32),
            jnp.pad(bias, (0, pad)).astype(jnp.float32))


def prep_conv_bn(w, bn):
    kh, kw, cin, cout = w.shape
    cinP, coutP = _pad_ch(cin), _pad_ch(cout)
    wp = jnp.pad(w, ((0, 0), (0, 0), (0, cinP - cin),
                     (0, coutP - cout))).astype(jnp.bfloat16)
    if kh == 1 and kw == 1:
        wp = wp.reshape(cinP, coutP)
    s, b = _fold_bn(bn, coutP)
    return wp, s, b


def prepare_params(p):
    out = {}
    # Stem conv1: cin stays 3 (raw image), cout padded; flattened for im2col.
    w1 = p['conv1']
    coutP = _pad_ch(w1.shape[-1])
    stem = {'w1': jnp.pad(w1, ((0, 0), (0, 0), (0, 0),
                               (0, coutP - w1.shape[-1])))
                    .astype(jnp.bfloat16).reshape(-1, coutP)}
    stem['s1'], stem['b1'] = _fold_bn(p['bn1'], coutP)
    stem['w2'], stem['s2'], stem['b2'] = prep_conv_bn(p['conv2'], p['bn2'])
    stem['w3'], stem['s3'], stem['b3'] = prep_conv_bn(p['conv3'], p['bn3'])
    out['stem'] = stem

    for li in range(1, 5):
        blocks = []
        for bp, stride in p[f'layer{li}']:
            q = {}
            q['w1'], q['s1'], q['b1'] = prep_conv_bn(bp['conv1'], bp['bn1'])
            q['w2'], q['s2'], q['b2'] = prep_conv_bn(bp['conv2'], bp['bn2'])
            q['w3'], q['s3'], q['b3'] = prep_conv_bn(bp['conv3'], bp['bn3'])
            if 'ds_conv' in bp:
                q['wd'], q['sd'], q['bd'] = prep_conv_bn(bp['ds_conv'], bp['ds_bn'])
            blocks.append((q, stride))
        out[f'layer{li}'] = blocks

    ap = p['attnpool']
    C = ap['q_w'].shape[1]
    out['attnpool'] = {
        'pos_emb': ap['pos_emb'].astype(jnp.float32),
        'num_heads': ap['num_heads'],
        'embed_dim': C,
        'w_qkv': jnp.concatenate([ap['q_w'], ap['k_w'], ap['v_w']],
                                 axis=0).T.astype(jnp.bfloat16),
        'b_qkv': jnp.concatenate([ap['q_b'], ap['k_b'], ap['v_b']],
                                 axis=0).astype(jnp.float32),
        'w_c': ap['c_w'].T.astype(jnp.bfloat16),
        'b_c': ap['c_b'].astype(jnp.float32),
    }
    return out


# ------------------------------ full forward -----------------------------------

def modified_resnet_forward(prepared, x_nchw):
    x = jnp.transpose(x_nchw, (0, 2, 3, 1)).astype(jnp.bfloat16)   # NCHW -> NHWC
    st = prepared['stem']
    # stem conv1: 3x3 stride 2 on the 3-channel image (im2col glue, bf16)
    cols, (B, Ho, Wo) = im2col(x, 3, 2, 1)
    x = matmul_scale_bias(cols, st['w1'], st['s1'], st['b1'],
                          relu=True).reshape(B, Ho, Wo, -1)
    # stem conv2 / conv3: direct windowed 3x3 kernels
    x = conv3x3_bn(x, st['w2'], st['s2'], st['b2'], relu=True)
    x = conv3x3_bn(x, st['w3'], st['s3'], st['b3'], relu=True)
    x = avgpool2(x)
    for li in range(1, 5):
        for bp, stride in prepared[f'layer{li}']:
            x = bottleneck(x, bp, stride)
    return attention_pool(x, prepared['attnpool'])


if __name__ == "__main__":
    layers = (1, 1, 1, 1)       # one Bottleneck per stage (small synthetic config)
    width = 4                   # embed_dim = width * 32 = 128
    heads = 4
    output_dim = 16
    input_resolution = 32       # -> attnpool spatial 1x1

    kg = KeyGen(jax.random.PRNGKey(42))
    logical_params = init_modified_resnet(kg, layers, output_dim, heads,
                                          input_resolution, width)
    prepared = prepare_params(logical_params)

    x = jax.random.normal(jax.random.PRNGKey(0),
                          (2, 3, input_resolution, input_resolution), jnp.float32)

    fwd = jax.jit(lambda inp: modified_resnet_forward(prepared, inp))
    out = jax.block_until_ready(fwd(x))
    assert out.shape == (2, output_dim), out.shape
    assert bool(jnp.all(jnp.isfinite(out)))
    print("KERNEL_OK")
</pallas_src>

<mosaic_0001>
module attributes {stable_mosaic.version = 11 : i64} {
  func.func @_fused_mm_kernel(%arg0: i32, %arg1: i32, %arg2: i32, %arg3: memref<512x128xbf16, #tpu.memory_space<vmem>>, %arg4: memref<128x128xbf16, #tpu.memory_space<vmem>>, %arg5: memref<1x128xf32, #tpu.memory_space<vmem>>, %arg6: memref<1x128xf32, #tpu.memory_space<vmem>>, %arg7: memref<512x128xbf16, #tpu.memory_space<vmem>>, %arg8: memref<512x128xf32, #tpu.memory_space<vmem>>) attributes {dimension_semantics = [#tpu.dimension_semantics<parallel>, #tpu.dimension_semantics<parallel>, #tpu.dimension_semantics<arbitrary>], iteration_bounds = array<i64: 1, 1, 1>, scalar_prefetch = 0 : i64, scratch_operands = 1 : i64, tpu.core_type = #tpu.core_type<tc>, window_params = [{transform_indices = @transform_0, window_bounds = array<i64: 512, 128>}, {transform_indices = @transform_1, window_bounds = array<i64: 128, 128>}, {transform_indices = @transform_2, window_bounds = array<i64: 1, 128>}, {transform_indices = @transform_3, window_bounds = array<i64: 1, 128>}, {transform_indices = @transform_4, window_bounds = array<i64: 512, 128>}]} {
    %c0_i32 = arith.constant 0 : i32
    %0 = arith.cmpi eq, %arg2, %c0_i32 : i32
    %1 = arith.extui %0 : i1 to i32
    %c0_i32_0 = arith.constant 0 : i32
    %2 = arith.cmpi ne, %1, %c0_i32_0 : i32
    scf.if %2 {
      %cst_10 = arith.constant 0.000000e+00 : f32
      %12 = vector.broadcast %cst_10 : f32 to vector<512x128xf32>
      %c0_11 = arith.constant 0 : index
      %c0_12 = arith.constant 0 : index
      %13 = vector.load %arg8[%c0_11, %c0_12] : memref<512x128xf32, #tpu.memory_space<vmem>>, vector<512x128xf32>
      tpu.vector_store %arg8[%c0_11, %c0_12], %12 {strides = array<i32>} : memref<512x128xf32, #tpu.memory_space<vmem>>, vector<512x128xf32>,
    } else {
    }
    %c0 = arith.constant 0 : index
    %c0_1 = arith.constant 0 : index
    %3 = vector.load %arg8[%c0, %c0_1] : memref<512x128xf32, #tpu.memory_space<vmem>>, vector<512x128xf32>
    %c0_2 = arith.constant 0 : index
    %c0_3 = arith.constant 0 : index
    %4 = vector.load %arg3[%c0_2, %c0_3] : memref<512x128xbf16, #tpu.memory_space<vmem>>, vector<512x128xbf16>
    %c0_4 = arith.constant 0 : index
    %c0_5 = arith.constant 0 : index
    %5 = vector.load %arg4[%c0_4, %c0_5] : memref<128x128xbf16, #tpu.memory_space<vmem>>, vector<128x128xbf16>
    %cst = arith.constant dense<0.000000e+00> : vector<512x128xf32>
    %6 = tpu.matmul %4, %5, %cst {dimension_numbers = #tpu.dot_dimension_numbers<[1], [0], [0], [1], [0, 0, 1, 1], [], []>} : vector<512x128xbf16>, vector<128x128xbf16>, vector<512x128xf32> -> vector<512x128xf32>
    %7 = arith.addf %3, %6 : vector<512x128xf32>
    %c0_6 = arith.constant 0 : index
    %c0_7 = arith.constant 0 : index
    %8 = vector.load %arg8[%c0_6, %c0_7] : memref<512x128xf32, #tpu.memory_space<vmem>>, vector<512x128xf32>
    tpu.vector_store %arg8[%c0_6, %c0_7], %7 {strides = array<i32>} : memref<512x128xf32, #tpu.memory_space<vmem>>, vector<512x128xf32>,
    %c0_i32_8 = arith.constant 0 : i32
    %9 = arith.cmpi eq, %arg2, %c0_i32_8 : i32
    %10 = arith.extui %9 : i1 to i32
    %c0_i32_9 = arith.constant 0 : i32
    %11 = arith.cmpi ne, %10, %c0_i32_9 : i32
    scf.if %11 {
      %c0_10 = arith.constant 0 : index
      %c0_11 = arith.constant 0 : index
      %12 = vector.load %arg8[%c0_10, %c0_11] : memref<512x128xf32, #tpu.memory_space<vmem>>, vector<512x128xf32>
      %c0_12 = arith.constant 0 : index
      %c0_13 = arith.constant 0 : index
      %13 = vector.load %arg5[%c0_12, %c0_13] : memref<1x128xf32, #tpu.memory_space<vmem>>, vector<1x128xf32>
      %14 = vector.broadcast %13 : vector<1x128xf32> to vector<512x128xf32>
      %15 = arith.mulf %12, %14 : vector<512x128xf32>
      %c0_14 = arith.constant 0 : index
      %c0_15 = arith.constant 0 : index
      %16 = vector.load %arg6[%c0_14, %c0_15] : memref<1x128xf32, #tpu.memory_space<vmem>>, vector<1x128xf32>
      %17 = vector.broadcast %16 : vector<1x128xf32> to vector<512x128xf32>
      %18 = arith.addf %15, %17 : vector<512x128xf32>
      %cst_16 = arith.constant 0.000000e+00 : f32
      %19 = vector.broadcast %cst_16 : f32 to vector<512x128xf32>
      %20 = arith.maximumf %18, %19 : vector<512x128xf32>
      %21 = arith.truncf %20 : vector<512x128xf32> to vector<512x128xbf16>
      %c0_17 = arith.constant 0 : index
      %c0_18 = arith.constant 0 : index
      %22 = vector.load %arg7[%c0_17, %c0_18] : memref<512x128xbf16, #tpu.memory_space<vmem>>, vector<512x128xbf16>
      tpu.vector_store %arg7[%c0_17, %c0_18], %21 {strides = array<i32>} : memref<512x128xbf16, #tpu.memory_space<vmem>>, vector<512x128xbf16>,
    } else {
    }
    return
  }
  func.func @transform_0(%arg0: i32, %arg1: i32, %arg2: i32) -> (i32, i32) {
    %c0_i32 = arith.constant 0 : i32
    return %arg0, %arg2 : i32, i32
  }
  func.func @transform_1(%arg0: i32, %arg1: i32, %arg2: i32) -> (i32, i32) {
    %c0_i32 = arith.constant 0 : i32
    return %arg2, %arg1 : i32, i32
  }
  func.func @transform_2(%arg0: i32, %arg1: i32, %arg2: i32) -> (i32, i32) {
    %c0_i32 = arith.constant 0 : i32
    %c0_i32_0 = arith.constant 0 : i32
    return %c0_i32, %arg1 : i32, i32
  }
  func.func @transform_3(%arg0: i32, %arg1: i32, %arg2: i32) -> (i32, i32) {
    %c0_i32 = arith.constant 0 : i32
    %c0_i32_0 = arith.constant 0 : i32
    return %c0_i32, %arg1 : i32, i32
  }
  func.func @transform_4(%arg0: i32, %arg1: i32, %arg2: i32) -> (i32, i32) {
    %c0_i32 = arith.constant 0 : i32
    return %arg0, %arg1 : i32, i32
  }
}

module attributes {stable_mosaic.version = 11 : i64} {
  func.func @_conv3x3_kernel(%arg0: i32, %arg1: i32, %arg2: memref<1x18x18x128xbf16, #tpu.memory_space<vmem>>, %arg3: memref<3x3x128x128xbf16, #tpu.memory_space<vmem>>, %arg4: memref<1x128xf32, #tpu.memory_space<vmem>>, %arg5: memref<1x128xf32, #tpu.memory_space<vmem>>, %arg6: memref<1x16x16x128xbf16, #tpu.memory_space<vmem>>) attributes {dimension_semantics = [#tpu.dimension_semantics<parallel>, #tpu.dimension_semantics<parallel>], iteration_bounds = array<i64: 2, 1>, scalar_prefetch = 0 : i64, scratch_operands = 0 : i64, tpu.core_type = #tpu.core_type<tc>, window_params = [{transform_indices = @transform_0, window_bounds = array<i64: 1, 18, 18, 128>}, {transform_indices = @transform_1, window_bounds = array<i64: 3, 3, 128, 128>}, {transform_indices = @transform_2, window_bounds = array<i64: 1, 128>}, {transform_indices = @transform_3, window_bounds = array<i64: 1, 128>}, {transform_indices = @transform_4, window_bounds = array<i64: 1, 16, 16, 128>}]} {
    %c0 = arith.constant 0 : index
    %c0_0 = arith.constant 0 : index
    %c0_1 = arith.constant 0 : index
    %c0_2 = arith.constant 0 : index
    %0 = vector.load %arg2[%c0, %c0_0, %c0_1, %c0_2] : memref<1x18x18x128xbf16, #tpu.memory_space<vmem>>, vector<1x18x18x128xbf16>
    %1 = vector.shape_cast %0 : vector<1x18x18x128xbf16> to vector<18x18x128xbf16>
    %c0_3 = arith.constant 0 : index
    %c0_4 = arith.constant 0 : index
    %c0_5 = arith.constant 0 : index
    %c0_6 = arith.constant 0 : index
    %2 = vector.load %arg3[%c0_3, %c0_4, %c0_5, %c0_6] : memref<3x3x128x128xbf16, #tpu.memory_space<vmem>>, vector<3x3x128x128xbf16>
    %cst = arith.constant 0.000000e+00 : f32
    %3 = vector.broadcast %cst : f32 to vector<256x128xf32>
    %4 = vector.extract_strided_slice %1 {offsets = [0, 0, 0], sizes = [16, 16, 128], strides = [1, 1, 1]} : vector<18x18x128xbf16> to vector<16x16x128xbf16>
    %5 = vector.shape_cast %4 : vector<16x16x128xbf16> to vector<256x128xbf16>
    %6 = vector.extract_strided_slice %2 {offsets = [0, 0, 0, 0], sizes = [1, 1, 128, 128], strides = [1, 1, 1, 1]} : vector<3x3x128x128xbf16> to vector<1x1x128x128xbf16>
    %7 = vector.shape_cast %6 : vector<1x1x128x128xbf16> to vector<128x128xbf16>
    %cst_7 = arith.constant dense<0.000000e+00> : vector<256x128xf32>
    %8 = tpu.matmul %5, %7, %cst_7 {dimension_numbers = #tpu.dot_dimension_numbers<[1], [0], [0], [1], [0, 0, 1, 1], [], []>} : vector<256x128xbf16>, vector<128x128xbf16>, vector<256x128xf32> -> vector<256x128xf32>
    %9 = arith.addf %3, %8 : vector<256x128xf32>
    %10 = vector.extract_strided_slice %1 {offsets = [0, 1, 0], sizes = [16, 16, 128], strides = [1, 1, 1]} : vector<18x18x128xbf16> to vector<16x16x128xbf16>
    %11 = vector.shape_cast %10 : vector<16x16x128xbf16> to vector<256x128xbf16>
    %12 = vector.extract_strided_slice %2 {offsets = [0, 1, 0, 0], sizes = [1, 1, 128, 128], strides = [1, 1, 1, 1]} : vector<3x3x128x128xbf16> to vector<1x1x128x128xbf16>
    %13 = vector.shape_cast %12 : vector<1x1x128x128xbf16> to vector<128x128xbf16>
    %cst_8 = arith.constant dense<0.000000e+00> : vector<256x128xf32>
    %14 = tpu.matmul %11, %13, %cst_8 {dimension_numbers = #tpu.dot_dimension_numbers<[1], [0], [0], [1], [0, 0, 1, 1], [], []>} : vector<256x128xbf16>, vector<128x128xbf16>, vector<256x128xf32> -> vector<256x128xf32>
    %15 = arith.addf %9, %14 : vector<256x128xf32>
    %16 = vector.extract_strided_slice %1 {offsets = [0, 2, 0], sizes = [16, 16, 128], strides = [1, 1, 1]} : vector<18x18x128xbf16> to vector<16x16x128xbf16>
    %17 = vector.shape_cast %16 : vector<16x16x128xbf16> to vector<256x128xbf16>
    %18 = vector.extract_strided_slice %2 {offsets = [0, 2, 0, 0], sizes = [1, 1, 128, 128], strides = [1, 1, 1, 1]} : vector<3x3x128x128xbf16> to vector<1x1x128x128xbf16>
    %19 = vector.shape_cast %18 : vector<1x1x128x128xbf16> to vector<128x128xbf16>
    %cst_9 = arith.constant dense<0.000000e+00> : vector<256x128xf32>
    %20 = tpu.matmul %17, %19, %cst_9 {dimension_numbers = #tpu.dot_dimension_numbers<[1], [0], [0], [1], [0, 0, 1, 1], [], []>} : vector<256x128xbf16>, vector<128x128xbf16>, vector<256x128xf32> -> vector<256x128xf32>
    %21 = arith.addf %15, %20 : vector<256x128xf32>
    %22 = vector.extract_strided_slice %1 {offsets = [1, 0, 0], sizes = [16, 16, 128], strides = [1, 1, 1]} : vector<18x18x128xbf16> to vector<16x16x128xbf16>
    %23 = vector.shape_cast %22 : vector<16x16x128xbf16> to vector<256x128xbf16>
    %24 = vector.extract_strided_slice %2 {offsets = [1, 0, 0, 0], sizes = [1, 1, 128, 128], strides = [1, 1, 1, 1]} : vector<3x3x128x128xbf16> to vector<1x1x128x128xbf16>
    %25 = vector.shape_cast %24 : vector<1x1x128x128xbf16> to vector<128x128xbf16>
    %cst_10 = arith.constant dense<0.000000e+00> : vector<256x128xf32>
    %26 = tpu.matmul %23, %25, %cst_10 {dimension_numbers = #tpu.dot_dimension_numbers<[1], [0], [0], [1], [0, 0, 1, 1], [], []>} : vector<256x128xbf16>, vector<128x128xbf16>, vector<256x128xf32> -> vector<256x128xf32>
    %27 = arith.addf %21, %26 : vector<256x128xf32>
    %28 = vector.extract_strided_slice %1 {offsets = [1, 1, 0], sizes = [16, 16, 128], strides = [1, 1, 1]} : vector<18x18x128xbf16> to vector<16x16x128xbf16>
    %29 = vector.shape_cast %28 : vector<16x16x128xbf16> to vector<256x128xbf16>
    %30 = vector.extract_strided_slice %2 {offsets = [1, 1, 0, 0], sizes = [1, 1, 128, 128], strides = [1, 1, 1, 1]} : vector<3x3x128x128xbf16> to vector<1x1x128x128xbf16>
    %31 = vector.shape_cast %30 : vector<1x1x128x128xbf16> to vector<128x128xbf16>
    %cst_11 = arith.constant dense<0.000000e+00> : vector<256x128xf32>
    %32 = tpu.matmul %29, %31, %cst_11 {dimension_numbers = #tpu.dot_dimension_numbers<[1], [0], [0], [1], [0, 0, 1, 1], [], []>} : vector<256x128xbf16>, vector<128x128xbf16>, vector<256x128xf32> -> vector<256x128xf32>
    %33 = arith.addf %27, %32 : vector<256x128xf32>
    %34 = vector.extract_strided_slice %1 {offsets = [1, 2, 0], sizes = [16, 16, 128], strides = [1, 1, 1]} : vector<18x18x128xbf16> to vector<16x16x128xbf16>
    %35 = vector.shape_cast %34 : vector<16x16x128xbf16> to vector<256x128xbf16>
    %36 = vector.extract_strided_slice %2 {offsets = [1, 2, 0, 0], sizes = [1, 1, 128, 128], strides = [1, 1, 1, 1]} : vector<3x3x128x128xbf16> to vector<1x1x128x128xbf16>
    %37 = vector.shape_cast %36 : vector<1x1x128x128xbf16> to vector<128x128xbf16>
    %cst_12 = arith.constant dense<0.000000e+00> : vector<256x128xf32>
    %38 = tpu.matmul %35, %37, %cst_12 {dimension_numbers = #tpu.dot_dimension_numbers<[1], [0], [0], [1], [0, 0, 1, 1], [], []>} : vector<256x128xbf16>, vector<128x128xbf16>, vector<256x128xf32> -> vector<256x128xf32>
    %39 = arith.addf %33, %38 : vector<256x128xf32>
    %40 = vector.extract_strided_slice %1 {offsets = [2, 0, 0], sizes = [16, 16, 128], strides = [1, 1, 1]} : vector<18x18x128xbf16> to vector<16x16x128xbf16>
    %41 = vector.shape_cast %40 : vector<16x16x128xbf16> to vector<256x128xbf16>
    %42 = vector.extract_strided_slice %2 {offsets = [2, 0, 0, 0], sizes = [1, 1, 128, 128], strides = [1, 1, 1, 1]} : vector<3x3x128x128xbf16> to vector<1x1x128x128xbf16>
    %43 = vector.shape_cast %42 : vector<1x1x128x128xbf16> to vector<128x128xbf16>
    %cst_13 = arith.constant dense<0.000000e+00> : vector<256x128xf32>
    %44 = tpu.matmul %41, %43, %cst_13 {dimension_numbers = #tpu.dot_dimension_numbers<[1], [0], [0], [1], [0, 0, 1, 1], [], []>} : vector<256x128xbf16>, vector<128x128xbf16>, vector<256x128xf32> -> vector<256x128xf32>
    %45 = arith.addf %39, %44 : vector<256x128xf32>
    %46 = vector.extract_strided_slice %1 {offsets = [2, 1, 0], sizes = [16, 16, 128], strides = [1, 1, 1]} : vector<18x18x128xbf16> to vector<16x16x128xbf16>
    %47 = vector.shape_cast %46 : vector<16x16x128xbf16> to vector<256x128xbf16>
    %48 = vector.extract_strided_slice %2 {offsets = [2, 1, 0, 0], sizes = [1, 1, 128, 128], strides = [1, 1, 1, 1]} : vector<3x3x128x128xbf16> to vector<1x1x128x128xbf16>
    %49 = vector.shape_cast %48 : vector<1x1x128x128xbf16> to vector<128x128xbf16>
    %cst_14 = arith.constant dense<0.000000e+00> : vector<256x128xf32>
    %50 = tpu.matmul %47, %49, %cst_14 {dimension_numbers = #tpu.dot_dimension_numbers<[1], [0], [0], [1], [0, 0, 1, 1], [], []>} : vector<256x128xbf16>, vector<128x128xbf16>, vector<256x128xf32> -> vector<256x128xf32>
    %51 = arith.addf %45, %50 : vector<256x128xf32>
    %52 = vector.extract_strided_slice %1 {offsets = [2, 2, 0], sizes = [16, 16, 128], strides = [1, 1, 1]} : vector<18x18x128xbf16> to vector<16x16x128xbf16>
    %53 = vector.shape_cast %52 : vector<16x16x128xbf16> to vector<256x128xbf16>
    %54 = vector.extract_strided_slice %2 {offsets = [2, 2, 0, 0], sizes = [1, 1, 128, 128], strides = [1, 1, 1, 1]} : vector<3x3x128x128xbf16> to vector<1x1x128x128xbf16>
    %55 = vector.shape_cast %54 : vector<1x1x128x128xbf16> to vector<128x128xbf16>
    %cst_15 = arith.constant dense<0.000000e+00> : vector<256x128xf32>
    %56 = tpu.matmul %53, %55, %cst_15 {dimension_numbers = #tpu.dot_dimension_numbers<[1], [0], [0], [1], [0, 0, 1, 1], [], []>} : vector<256x128xbf16>, vector<128x128xbf16>, vector<256x128xf32> -> vector<256x128xf32>
    %57 = arith.addf %51, %56 : vector<256x128xf32>
    %c0_16 = arith.constant 0 : index
    %c0_17 = arith.constant 0 : index
    %58 = vector.load %arg4[%c0_16, %c0_17] : memref<1x128xf32, #tpu.memory_space<vmem>>, vector<1x128xf32>
    %59 = vector.broadcast %58 : vector<1x128xf32> to vector<256x128xf32>
    %60 = arith.mulf %57, %59 : vector<256x128xf32>
    %c0_18 = arith.constant 0 : index
    %c0_19 = arith.constant 0 : index
    %61 = vector.load %arg5[%c0_18, %c0_19] : memref<1x128xf32, #tpu.memory_space<vmem>>, vector<1x128xf32>
    %62 = vector.broadcast %61 : vector<1x128xf32> to vector<256x128xf32>
    %63 = arith.addf %60, %62 : vector<256x128xf32>
    %cst_20 = arith.constant 0.000000e+00 : f32
    %64 = vector.broadcast %cst_20 : f32 to vector<256x128xf32>
    %65 = arith.maximumf %63, %64 : vector<256x128xf32>
    %66 = vector.shape_cast %65 : vector<256x128xf32> to vector<1x16x16x128xf32>
    %67 = arith.truncf %66 : vector<1x16x16x128xf32> to vector<1x16x16x128xbf16>
    %c0_21 = arith.constant 0 : index
    %c0_22 = arith.constant 0 : index
    %c0_23 = arith.constant 0 : index
    %c0_24 = arith.constant 0 : index
    %68 = vector.load %arg6[%c0_21, %c0_22, %c0_23, %c0_24] : memref<1x16x16x128xbf16, #tpu.memory_space<vmem>>, vector<1x16x16x128xbf16>
    tpu.vector_store %arg6[%c0_21, %c0_22, %c0_23, %c0_24], %67 {strides = array<i32>} : memref<1x16x16x128xbf16, #tpu.memory_space<vmem>>, vector<1x16x16x128xbf16>,
    return
  }
  func.func @transform_0(%arg0: i32, %arg1: i32) -> (i32, i32, i32, i32) {
    %c0_i32 = arith.constant 0 : i32
    %c0_i32_0 = arith.constant 0 : i32
    %c0_i32_1 = arith.constant 0 : i32
    %c0_i32_2 = arith.constant 0 : i32
    return %arg0, %c0_i32, %c0_i32_0, %c0_i32_1 : i32, i32, i32, i32
  }
  func.func @transform_1(%arg0: i32, %arg1: i32) -> (i32, i32, i32, i32) {
    %c0_i32 = arith.constant 0 : i32
    %c0_i32_0 = arith.constant 0 : i32
    %c0_i32_1 = arith.constant 0 : i32
    %c0_i32_2 = arith.constant 0 : i32
    return %c0_i32, %c0_i32_0, %c0_i32_1, %arg1 : i32, i32, i32, i32
  }
  func.func @transform_2(%arg0: i32, %arg1: i32) -> (i32, i32) {
    %c0_i32 = arith.constant 0 : i32
    %c0_i32_0 = arith.constant 0 : i32
    return %c0_i32, %arg1 : i32, i32
  }
  func.func @transform_3(%arg0: i32, %arg1: i32) -> (i32, i32) {
    %c0_i32 = arith.constant 0 : i32
    %c0_i32_0 = arith.constant 0 : i32
    return %c0_i32, %arg1 : i32, i32
  }
  func.func @transform_4(%arg0: i32, %arg1: i32) -> (i32, i32, i32, i32) {
    %c0_i32 = arith.constant 0 : i32
    %c0_i32_0 = arith.constant 0 : i32
    %c0_i32_1 = arith.constant 0 : i32
    return %arg0, %c0_i32, %c0_i32_0, %arg1 : i32, i32, i32, i32
  }
}

module attributes {stable_mosaic.version = 11 : i64} {
  func.func @_avgpool2_kernel(%arg0: i32, %arg1: memref<8x2x8x256xbf16, #tpu.memory_space<vmem>>, %arg2: memref<8x8x128xbf16, #tpu.memory_space<vmem>>) attributes {dimension_semantics = [#tpu.dimension_semantics<parallel>], iteration_bounds = array<i64: 2>, scalar_prefetch = 0 : i64, scratch_operands = 0 : i64, tpu.core_type = #tpu.core_type<tc>, window_params = [{transform_indices = @transform_0, window_bounds = array<i64: 8, 2, 8, 256>}, {transform_indices = @transform_1, window_bounds = array<i64: 8, 8, 128>}]} {
    %c0 = arith.constant 0 : index
    %c0_0 = arith.constant 0 : index
    %c0_1 = arith.constant 0 : index
    %c0_2 = arith.constant 0 : index
    %0 = vector.load %arg1[%c0, %c0_0, %c0_1, %c0_2] : memref<8x2x8x256xbf16, #tpu.memory_space<vmem>>, vector<8x2x8x256xbf16>
    %1 = arith.extf %0 : vector<8x2x8x256xbf16> to vector<8x2x8x256xf32>
    %2 = vector.extract_strided_slice %1 {offsets = [0, 0, 0, 0], sizes = [8, 1, 8, 256], strides = [1, 1, 1, 1]} : vector<8x2x8x256xf32> to vector<8x1x8x256xf32>
    %3 = vector.shape_cast %2 : vector<8x1x8x256xf32> to vector<8x8x256xf32>
    %4 = vector.extract_strided_slice %1 {offsets = [0, 1, 0, 0], sizes = [8, 1, 8, 256], strides = [1, 1, 1, 1]} : vector<8x2x8x256xf32> to vector<8x1x8x256xf32>
    %5 = vector.shape_cast %4 : vector<8x1x8x256xf32> to vector<8x8x256xf32>
    %6 = arith.addf %3, %5 : vector<8x8x256xf32>
    %7 = vector.extract_strided_slice %6 {offsets = [0, 0, 0], sizes = [8, 8, 128], strides = [1, 1, 1]} : vector<8x8x256xf32> to vector<8x8x128xf32>
    %8 = vector.extract_strided_slice %6 {offsets = [0, 0, 128], sizes = [8, 8, 128], strides = [1, 1, 1]} : vector<8x8x256xf32> to vector<8x8x128xf32>
    %9 = arith.addf %7, %8 : vector<8x8x128xf32>
    %cst = arith.constant 2.500000e-01 : f32
    %10 = vector.broadcast %cst : f32 to vector<8x8x128xf32>
    %11 = arith.mulf %9, %10 : vector<8x8x128xf32>
    %12 = arith.truncf %11 : vector<8x8x128xf32> to vector<8x8x128xbf16>
    %c0_3 = arith.constant 0 : index
    %c0_4 = arith.constant 0 : index
    %c0_5 = arith.constant 0 : index
    %13 = vector.load %arg2[%c0_3, %c0_4, %c0_5] : memref<8x8x128xbf16, #tpu.memory_space<vmem>>, vector<8x8x128xbf16>
    tpu.vector_store %arg2[%c0_3, %c0_4, %c0_5], %12 {strides = array<i32>} : memref<8x8x128xbf16, #tpu.memory_space<vmem>>, vector<8x8x128xbf16>,
    return
  }
  func.func @transform_0(%arg0: i32) -> (i32, i32, i32, i32) {
    %c0_i32 = arith.constant 0 : i32
    %c0_i32_0 = arith.constant 0 : i32
    %c0_i32_1 = arith.constant 0 : i32
    %c0_i32_2 = arith.constant 0 : i32
    return %arg0, %c0_i32, %c0_i32_0, %c0_i32_1 : i32, i32, i32, i32
  }
  func.func @transform_1(%arg0: i32) -> (i32, i32, i32) {
    %c0_i32 = arith.constant 0 : i32
    %c0_i32_0 = arith.constant 0 : i32
    %c0_i32_1 = arith.constant 0 : i32
    return %arg0, %c0_i32, %c0_i32_0 : i32, i32, i32
  }
}

module attributes {stable_mosaic.version = 11 : i64} {
  func.func @_fused_mm_kernel(%arg0: i32, %arg1: i32, %arg2: i32, %arg3: memref<128x128xbf16, #tpu.memory_space<vmem>>, %arg4: memref<128x128xbf16, #tpu.memory_space<vmem>>, %arg5: memref<1x128xf32, #tpu.memory_space<vmem>>, %arg6: memref<1x128xf32, #tpu.memory_space<vmem>>, %arg7: memref<128x128xbf16, #tpu.memory_space<vmem>>, %arg8: memref<128x128xf32, #tpu.memory_space<vmem>>) attributes {dimension_semantics = [#tpu.dimension_semantics<parallel>, #tpu.dimension_semantics<parallel>, #tpu.dimension_semantics<arbitrary>], iteration_bounds = array<i64: 1, 1, 1>, scalar_prefetch = 0 : i64, scratch_operands = 1 : i64, tpu.core_type = #tpu.core_type<tc>, window_params = [{transform_indices = @transform_0, window_bounds = array<i64: 128, 128>}, {transform_indices = @transform_1, window_bounds = array<i64: 128, 128>}, {transform_indices = @transform_2, window_bounds = array<i64: 1, 128>}, {transform_indices = @transform_3, window_bounds = array<i64: 1, 128>}, {transform_indices = @transform_4, window_bounds = array<i64: 128, 128>}]} {
    %c0_i32 = arith.constant 0 : i32
    %0 = arith.cmpi eq, %arg2, %c0_i32 : i32
    %1 = arith.extui %0 : i1 to i32
    %c0_i32_0 = arith.constant 0 : i32
    %2 = arith.cmpi ne, %1, %c0_i32_0 : i32
    scf.if %2 {
      %cst_10 = arith.constant 0.000000e+00 : f32
      %12 = vector.broadcast %cst_10 : f32 to vector<128x128xf32>
      %c0_11 = arith.constant 0 : index
      %c0_12 = arith.constant 0 : index
      %13 = vector.load %arg8[%c0_11, %c0_12] : memref<128x128xf32, #tpu.memory_space<vmem>>, vector<128x128xf32>
      tpu.vector_store %arg8[%c0_11, %c0_12], %12 {strides = array<i32>} : memref<128x128xf32, #tpu.memory_space<vmem>>, vector<128x128xf32>,
    } else {
    }
    %c0 = arith.constant 0 : index
    %c0_1 = arith.constant 0 : index
    %3 = vector.load %arg8[%c0, %c0_1] : memref<128x128xf32, #tpu.memory_space<vmem>>, vector<128x128xf32>
    %c0_2 = arith.constant 0 : index
    %c0_3 = arith.constant 0 : index
    %4 = vector.load %arg3[%c0_2, %c0_3] : memref<128x128xbf16, #tpu.memory_space<vmem>>, vector<128x128xbf16>
    %c0_4 = arith.constant 0 : index
    %c0_5 = arith.constant 0 : index
    %5 = vector.load %arg4[%c0_4, %c0_5] : memref<128x128xbf16, #tpu.memory_space<vmem>>, vector<128x128xbf16>
    %cst = arith.constant dense<0.000000e+00> : vector<128x128xf32>
    %6 = tpu.matmul %4, %5, %cst {dimension_numbers = #tpu.dot_dimension_numbers<[1], [0], [0], [1], [0, 0, 1, 1], [], []>} : vector<128x128xbf16>, vector<128x128xbf16>, vector<128x128xf32> -> vector<128x128xf32>
    %7 = arith.addf %3, %6 : vector<128x128xf32>
    %c0_6 = arith.constant 0 : index
    %c0_7 = arith.constant 0 : index
    %8 = vector.load %arg8[%c0_6, %c0_7] : memref<128x128xf32, #tpu.memory_space<vmem>>, vector<128x128xf32>
    tpu.vector_store %arg8[%c0_6, %c0_7], %7 {strides = array<i32>} : memref<128x128xf32, #tpu.memory_space<vmem>>, vector<128x128xf32>,
    %c0_i32_8 = arith.constant 0 : i32
    %9 = arith.cmpi eq, %arg2, %c0_i32_8 : i32
    %10 = arith.extui %9 : i1 to i32
    %c0_i32_9 = arith.constant 0 : i32
    %11 = arith.cmpi ne, %10, %c0_i32_9 : i32
    scf.if %11 {
      %c0_10 = arith.constant 0 : index
      %c0_11 = arith.constant 0 : index
      %12 = vector.load %arg8[%c0_10, %c0_11] : memref<128x128xf32, #tpu.memory_space<vmem>>, vector<128x128xf32>
      %c0_12 = arith.constant 0 : index
      %c0_13 = arith.constant 0 : index
      %13 = vector.load %arg5[%c0_12, %c0_13] : memref<1x128xf32, #tpu.memory_space<vmem>>, vector<1x128xf32>
      %14 = vector.broadcast %13 : vector<1x128xf32> to vector<128x128xf32>
      %15 = arith.mulf %12, %14 : vector<128x128xf32>
      %c0_14 = arith.constant 0 : index
      %c0_15 = arith.constant 0 : index
      %16 = vector.load %arg6[%c0_14, %c0_15] : memref<1x128xf32, #tpu.memory_space<vmem>>, vector<1x128xf32>
      %17 = vector.broadcast %16 : vector<1x128xf32> to vector<128x128xf32>
      %18 = arith.addf %15, %17 : vector<128x128xf32>
      %cst_16 = arith.constant 0.000000e+00 : f32
      %19 = vector.broadcast %cst_16 : f32 to vector<128x128xf32>
      %20 = arith.maximumf %18, %19 : vector<128x128xf32>
      %21 = arith.truncf %20 : vector<128x128xf32> to vector<128x128xbf16>
      %c0_17 = arith.constant 0 : index
      %c0_18 = arith.constant 0 : index
      %22 = vector.load %arg7[%c0_17, %c0_18] : memref<128x128xbf16, #tpu.memory_space<vmem>>, vector<128x128xbf16>
      tpu.vector_store %arg7[%c0_17, %c0_18], %21 {strides = array<i32>} : memref<128x128xbf16, #tpu.memory_space<vmem>>, vector<128x128xbf16>,
    } else {
    }
    return
  }
  func.func @transform_0(%arg0: i32, %arg1: i32, %arg2: i32) -> (i32, i32) {
    %c0_i32 = arith.constant 0 : i32
    return %arg0, %arg2 : i32, i32
  }
  func.func @transform_1(%arg0: i32, %arg1: i32, %arg2: i32) -> (i32, i32) {
    %c0_i32 = arith.constant 0 : i32
    return %arg2, %arg1 : i32, i32
  }
  func.func @transform_2(%arg0: i32, %arg1: i32, %arg2: i32) -> (i32, i32) {
    %c0_i32 = arith.constant 0 : i32
    %c0_i32_0 = arith.constant 0 : i32
    return %c0_i32, %arg1 : i32, i32
  }
  func.func @transform_3(%arg0: i32, %arg1: i32, %arg2: i32) -> (i32, i32) {
    %c0_i32 = arith.constant 0 : i32
    %c0_i32_0 = arith.constant 0 : i32
    return %c0_i32, %arg1 : i32, i32
  }
  func.func @transform_4(%arg0: i32, %arg1: i32, %arg2: i32) -> (i32, i32) {
    %c0_i32 = arith.constant 0 : i32
    return %arg0, %arg1 : i32, i32
  }
}

module attributes {stable_mosaic.version = 11 : i64} {
  func.func @_conv3x3_kernel(%arg0: i32, %arg1: i32, %arg2: memref<1x10x10x128xbf16, #tpu.memory_space<vmem>>, %arg3: memref<3x3x128x128xbf16, #tpu.memory_space<vmem>>, %arg4: memref<1x128xf32, #tpu.memory_space<vmem>>, %arg5: memref<1x128xf32, #tpu.memory_space<vmem>>, %arg6: memref<1x8x8x128xbf16, #tpu.memory_space<vmem>>) attributes {dimension_semantics = [#tpu.dimension_semantics<parallel>, #tpu.dimension_semantics<parallel>], iteration_bounds = array<i64: 2, 1>, scalar_prefetch = 0 : i64, scratch_operands = 0 : i64, tpu.core_type = #tpu.core_type<tc>, window_params = [{transform_indices = @transform_0, window_bounds = array<i64: 1, 10, 10, 128>}, {transform_indices = @transform_1, window_bounds = array<i64: 3, 3, 128, 128>}, {transform_indices = @transform_2, window_bounds = array<i64: 1, 128>}, {transform_indices = @transform_3, window_bounds = array<i64: 1, 128>}, {transform_indices = @transform_4, window_bounds = array<i64: 1, 8, 8, 128>}]} {
    %c0 = arith.constant 0 : index
    %c0_0 = arith.constant 0 : index
    %c0_1 = arith.constant 0 : index
    %c0_2 = arith.constant 0 : index
    %0 = vector.load %arg2[%c0, %c0_0, %c0_1, %c0_2] : memref<1x10x10x128xbf16, #tpu.memory_space<vmem>>, vector<1x10x10x128xbf16>
    %1 = vector.shape_cast %0 : vector<1x10x10x128xbf16> to vector<10x10x128xbf16>
    %c0_3 = arith.constant 0 : index
    %c0_4 = arith.constant 0 : index
    %c0_5 = arith.constant 0 : index
    %c0_6 = arith.constant 0 : index
    %2 = vector.load %arg3[%c0_3, %c0_4, %c0_5, %c0_6] : memref<3x3x128x128xbf16, #tpu.memory_space<vmem>>, vector<3x3x128x128xbf16>
    %cst = arith.constant 0.000000e+00 : f32
    %3 = vector.broadcast %cst : f32 to vector<64x128xf32>
    %4 = vector.extract_strided_slice %1 {offsets = [0, 0, 0], sizes = [8, 8, 128], strides = [1, 1, 1]} : vector<10x10x128xbf16> to vector<8x8x128xbf16>
    %5 = vector.shape_cast %4 : vector<8x8x128xbf16> to vector<64x128xbf16>
    %6 = vector.extract_strided_slice %2 {offsets = [0, 0, 0, 0], sizes = [1, 1, 128, 128], strides = [1, 1, 1, 1]} : vector<3x3x128x128xbf16> to vector<1x1x128x128xbf16>
    %7 = vector.shape_cast %6 : vector<1x1x128x128xbf16> to vector<128x128xbf16>
    %cst_7 = arith.constant dense<0.000000e+00> : vector<64x128xf32>
    %8 = tpu.matmul %5, %7, %cst_7 {dimension_numbers = #tpu.dot_dimension_numbers<[1], [0], [0], [1], [0, 0, 1, 1], [], []>} : vector<64x128xbf16>, vector<128x128xbf16>, vector<64x128xf32> -> vector<64x128xf32>
    %9 = arith.addf %3, %8 : vector<64x128xf32>
    %10 = vector.extract_strided_slice %1 {offsets = [0, 1, 0], sizes = [8, 8, 128], strides = [1, 1, 1]} : vector<10x10x128xbf16> to vector<8x8x128xbf16>
    %11 = vector.shape_cast %10 : vector<8x8x128xbf16> to vector<64x128xbf16>
    %12 = vector.extract_strided_slice %2 {offsets = [0, 1, 0, 0], sizes = [1, 1, 128, 128], strides = [1, 1, 1, 1]} : vector<3x3x128x128xbf16> to vector<1x1x128x128xbf16>
    %13 = vector.shape_cast %12 : vector<1x1x128x128xbf16> to vector<128x128xbf16>
    %cst_8 = arith.constant dense<0.000000e+00> : vector<64x128xf32>
    %14 = tpu.matmul %11, %13, %cst_8 {dimension_numbers = #tpu.dot_dimension_numbers<[1], [0], [0], [1], [0, 0, 1, 1], [], []>} : vector<64x128xbf16>, vector<128x128xbf16>, vector<64x128xf32> -> vector<64x128xf32>
    %15 = arith.addf %9, %14 : vector<64x128xf32>
    %16 = vector.extract_strided_slice %1 {offsets = [0, 2, 0], sizes = [8, 8, 128], strides = [1, 1, 1]} : vector<10x10x128xbf16> to vector<8x8x128xbf16>
    %17 = vector.shape_cast %16 : vector<8x8x128xbf16> to vector<64x128xbf16>
    %18 = vector.extract_strided_slice %2 {offsets = [0, 2, 0, 0], sizes = [1, 1, 128, 128], strides = [1, 1, 1, 1]} : vector<3x3x128x128xbf16> to vector<1x1x128x128xbf16>
    %19 = vector.shape_cast %18 : vector<1x1x128x128xbf16> to vector<128x128xbf16>
    %cst_9 = arith.constant dense<0.000000e+00> : vector<64x128xf32>
    %20 = tpu.matmul %17, %19, %cst_9 {dimension_numbers = #tpu.dot_dimension_numbers<[1], [0], [0], [1], [0, 0, 1, 1], [], []>} : vector<64x128xbf16>, vector<128x128xbf16>, vector<64x128xf32> -> vector<64x128xf32>
    %21 = arith.addf %15, %20 : vector<64x128xf32>
    %22 = vector.extract_strided_slice %1 {offsets = [1, 0, 0], sizes = [8, 8, 128], strides = [1, 1, 1]} : vector<10x10x128xbf16> to vector<8x8x128xbf16>
    %23 = vector.shape_cast %22 : vector<8x8x128xbf16> to vector<64x128xbf16>
    %24 = vector.extract_strided_slice %2 {offsets = [1, 0, 0, 0], sizes = [1, 1, 128, 128], strides = [1, 1, 1, 1]} : vector<3x3x128x128xbf16> to vector<1x1x128x128xbf16>
    %25 = vector.shape_cast %24 : vector<1x1x128x128xbf16> to vector<128x128xbf16>
    %cst_10 = arith.constant dense<0.000000e+00> : vector<64x128xf32>
    %26 = tpu.matmul %23, %25, %cst_10 {dimension_numbers = #tpu.dot_dimension_numbers<[1], [0], [0], [1], [0, 0, 1, 1], [], []>} : vector<64x128xbf16>, vector<128x128xbf16>, vector<64x128xf32> -> vector<64x128xf32>
    %27 = arith.addf %21, %26 : vector<64x128xf32>
    %28 = vector.extract_strided_slice %1 {offsets = [1, 1, 0], sizes = [8, 8, 128], strides = [1, 1, 1]} : vector<10x10x128xbf16> to vector<8x8x128xbf16>
    %29 = vector.shape_cast %28 : vector<8x8x128xbf16> to vector<64x128xbf16>
    %30 = vector.extract_strided_slice %2 {offsets = [1, 1, 0, 0], sizes = [1, 1, 128, 128], strides = [1, 1, 1, 1]} : vector<3x3x128x128xbf16> to vector<1x1x128x128xbf16>
    %31 = vector.shape_cast %30 : vector<1x1x128x128xbf16> to vector<128x128xbf16>
    %cst_11 = arith.constant dense<0.000000e+00> : vector<64x128xf32>
    %32 = tpu.matmul %29, %31, %cst_11 {dimension_numbers = #tpu.dot_dimension_numbers<[1], [0], [0], [1], [0, 0, 1, 1], [], []>} : vector<64x128xbf16>, vector<128x128xbf16>, vector<64x128xf32> -> vector<64x128xf32>
    %33 = arith.addf %27, %32 : vector<64x128xf32>
    %34 = vector.extract_strided_slice %1 {offsets = [1, 2, 0], sizes = [8, 8, 128], strides = [1, 1, 1]} : vector<10x10x128xbf16> to vector<8x8x128xbf16>
    %35 = vector.shape_cast %34 : vector<8x8x128xbf16> to vector<64x128xbf16>
    %36 = vector.extract_strided_slice %2 {offsets = [1, 2, 0, 0], sizes = [1, 1, 128, 128], strides = [1, 1, 1, 1]} : vector<3x3x128x128xbf16> to vector<1x1x128x128xbf16>
    %37 = vector.shape_cast %36 : vector<1x1x128x128xbf16> to vector<128x128xbf16>
    %cst_12 = arith.constant dense<0.000000e+00> : vector<64x128xf32>
    %38 = tpu.matmul %35, %37, %cst_12 {dimension_numbers = #tpu.dot_dimension_numbers<[1], [0], [0], [1], [0, 0, 1, 1], [], []>} : vector<64x128xbf16>, vector<128x128xbf16>, vector<64x128xf32> -> vector<64x128xf32>
    %39 = arith.addf %33, %38 : vector<64x128xf32>
    %40 = vector.extract_strided_slice %1 {offsets = [2, 0, 0], sizes = [8, 8, 128], strides = [1, 1, 1]} : vector<10x10x128xbf16> to vector<8x8x128xbf16>
    %41 = vector.shape_cast %40 : vector<8x8x128xbf16> to vector<64x128xbf16>
    %42 = vector.extract_strided_slice %2 {offsets = [2, 0, 0, 0], sizes = [1, 1, 128, 128], strides = [1, 1, 1, 1]} : vector<3x3x128x128xbf16> to vector<1x1x128x128xbf16>
    %43 = vector.shape_cast %42 : vector<1x1x128x128xbf16> to vector<128x128xbf16>
    %cst_13 = arith.constant dense<0.000000e+00> : vector<64x128xf32>
    %44 = tpu.matmul %41, %43, %cst_13 {dimension_numbers = #tpu.dot_dimension_numbers<[1], [0], [0], [1], [0, 0, 1, 1], [], []>} : vector<64x128xbf16>, vector<128x128xbf16>, vector<64x128xf32> -> vector<64x128xf32>
    %45 = arith.addf %39, %44 : vector<64x128xf32>
    %46 = vector.extract_strided_slice %1 {offsets = [2, 1, 0], sizes = [8, 8, 128], strides = [1, 1, 1]} : vector<10x10x128xbf16> to vector<8x8x128xbf16>
    %47 = vector.shape_cast %46 : vector<8x8x128xbf16> to vector<64x128xbf16>
    %48 = vector.extract_strided_slice %2 {offsets = [2, 1, 0, 0], sizes = [1, 1, 128, 128], strides = [1, 1, 1, 1]} : vector<3x3x128x128xbf16> to vector<1x1x128x128xbf16>
    %49 = vector.shape_cast %48 : vector<1x1x128x128xbf16> to vector<128x128xbf16>
    %cst_14 = arith.constant dense<0.000000e+00> : vector<64x128xf32>
    %50 = tpu.matmul %47, %49, %cst_14 {dimension_numbers = #tpu.dot_dimension_numbers<[1], [0], [0], [1], [0, 0, 1, 1], [], []>} : vector<64x128xbf16>, vector<128x128xbf16>, vector<64x128xf32> -> vector<64x128xf32>
    %51 = arith.addf %45, %50 : vector<64x128xf32>
    %52 = vector.extract_strided_slice %1 {offsets = [2, 2, 0], sizes = [8, 8, 128], strides = [1, 1, 1]} : vector<10x10x128xbf16> to vector<8x8x128xbf16>
    %53 = vector.shape_cast %52 : vector<8x8x128xbf16> to vector<64x128xbf16>
    %54 = vector.extract_strided_slice %2 {offsets = [2, 2, 0, 0], sizes = [1, 1, 128, 128], strides = [1, 1, 1, 1]} : vector<3x3x128x128xbf16> to vector<1x1x128x128xbf16>
    %55 = vector.shape_cast %54 : vector<1x1x128x128xbf16> to vector<128x128xbf16>
    %cst_15 = arith.constant dense<0.000000e+00> : vector<64x128xf32>
    %56 = tpu.matmul %53, %55, %cst_15 {dimension_numbers = #tpu.dot_dimension_numbers<[1], [0], [0], [1], [0, 0, 1, 1], [], []>} : vector<64x128xbf16>, vector<128x128xbf16>, vector<64x128xf32> -> vector<64x128xf32>
    %57 = arith.addf %51, %56 : vector<64x128xf32>
    %c0_16 = arith.constant 0 : index
    %c0_17 = arith.constant 0 : index
    %58 = vector.load %arg4[%c0_16, %c0_17] : memref<1x128xf32, #tpu.memory_space<vmem>>, vector<1x128xf32>
    %59 = vector.broadcast %58 : vector<1x128xf32> to vector<64x128xf32>
    %60 = arith.mulf %57, %59 : vector<64x128xf32>
    %c0_18 = arith.constant 0 : index
    %c0_19 = arith.constant 0 : index
    %61 = vector.load %arg5[%c0_18, %c0_19] : memref<1x128xf32, #tpu.memory_space<vmem>>, vector<1x128xf32>
    %62 = vector.broadcast %61 : vector<1x128xf32> to vector<64x128xf32>
    %63 = arith.addf %60, %62 : vector<64x128xf32>
    %cst_20 = arith.constant 0.000000e+00 : f32
    %64 = vector.broadcast %cst_20 : f32 to vector<64x128xf32>
    %65 = arith.maximumf %63, %64 : vector<64x128xf32>
    %66 = vector.shape_cast %65 : vector<64x128xf32> to vector<1x8x8x128xf32>
    %67 = arith.truncf %66 : vector<1x8x8x128xf32> to vector<1x8x8x128xbf16>
    %c0_21 = arith.constant 0 : index
    %c0_22 = arith.constant 0 : index
    %c0_23 = arith.constant 0 : index
    %c0_24 = arith.constant 0 : index
    %68 = vector.load %arg6[%c0_21, %c0_22, %c0_23, %c0_24] : memref<1x8x8x128xbf16, #tpu.memory_space<vmem>>, vector<1x8x8x128xbf16>
    tpu.vector_store %arg6[%c0_21, %c0_22, %c0_23, %c0_24], %67 {strides = array<i32>} : memref<1x8x8x128xbf16, #tpu.memory_space<vmem>>, vector<1x8x8x128xbf16>,
    return
  }
  func.func @transform_0(%arg0: i32, %arg1: i32) -> (i32, i32, i32, i32) {
    %c0_i32 = arith.constant 0 : i32
    %c0_i32_0 = arith.constant 0 : i32
    %c0_i32_1 = arith.constant 0 : i32
    %c0_i32_2 = arith.constant 0 : i32
    return %arg0, %c0_i32, %c0_i32_0, %c0_i32_1 : i32, i32, i32, i32
  }
  func.func @transform_1(%arg0: i32, %arg1: i32) -> (i32, i32, i32, i32) {
    %c0_i32 = arith.constant 0 : i32
    %c0_i32_0 = arith.constant 0 : i32
    %c0_i32_1 = arith.constant 0 : i32
    %c0_i32_2 = arith.constant 0 : i32
    return %c0_i32, %c0_i32_0, %c0_i32_1, %arg1 : i32, i32, i32, i32
  }
  func.func @transform_2(%arg0: i32, %arg1: i32) -> (i32, i32) {
    %c0_i32 = arith.constant 0 : i32
    %c0_i32_0 = arith.constant 0 : i32
    return %c0_i32, %arg1 : i32, i32
  }
  func.func @transform_3(%arg0: i32, %arg1: i32) -> (i32, i32) {
    %c0_i32 = arith.constant 0 : i32
    %c0_i32_0 = arith.constant 0 : i32
    return %c0_i32, %arg1 : i32, i32
  }
  func.func @transform_4(%arg0: i32, %arg1: i32) -> (i32, i32, i32, i32) {
    %c0_i32 = arith.constant 0 : i32
    %c0_i32_0 = arith.constant 0 : i32
    %c0_i32_1 = arith.constant 0 : i32
    return %arg0, %c0_i32, %c0_i32_0, %arg1 : i32, i32, i32, i32
  }
}

module attributes {stable_mosaic.version = 11 : i64} {
  func.func @_fused_mm_kernel(%arg0: i32, %arg1: i32, %arg2: i32, %arg3: memref<128x128xbf16, #tpu.memory_space<vmem>>, %arg4: memref<128x128xbf16, #tpu.memory_space<vmem>>, %arg5: memref<1x128xf32, #tpu.memory_space<vmem>>, %arg6: memref<1x128xf32, #tpu.memory_space<vmem>>, %arg7: memref<128x128xbf16, #tpu.memory_space<vmem>>, %arg8: memref<128x128xf32, #tpu.memory_space<vmem>>) attributes {dimension_semantics = [#tpu.dimension_semantics<parallel>, #tpu.dimension_semantics<parallel>, #tpu.dimension_semantics<arbitrary>], iteration_bounds = array<i64: 1, 1, 1>, scalar_prefetch = 0 : i64, scratch_operands = 1 : i64, tpu.core_type = #tpu.core_type<tc>, window_params = [{transform_indices = @transform_0, window_bounds = array<i64: 128, 128>}, {transform_indices = @transform_1, window_bounds = array<i64: 128, 128>}, {transform_indices = @transform_2, window_bounds = array<i64: 1, 128>}, {transform_indices = @transform_3, window_bounds = array<i64: 1, 128>}, {transform_indices = @transform_4, window_bounds = array<i64: 128, 128>}]} {
    %c0_i32 = arith.constant 0 : i32
    %0 = arith.cmpi eq, %arg2, %c0_i32 : i32
    %1 = arith.extui %0 : i1 to i32
    %c0_i32_0 = arith.constant 0 : i32
    %2 = arith.cmpi ne, %1, %c0_i32_0 : i32
    scf.if %2 {
      %cst_10 = arith.constant 0.000000e+00 : f32
      %12 = vector.broadcast %cst_10 : f32 to vector<128x128xf32>
      %c0_11 = arith.constant 0 : index
      %c0_12 = arith.constant 0 : index
      %13 = vector.load %arg8[%c0_11, %c0_12] : memref<128x128xf32, #tpu.memory_space<vmem>>, vector<128x128xf32>
      tpu.vector_store %arg8[%c0_11, %c0_12], %12 {strides = array<i32>} : memref<128x128xf32, #tpu.memory_space<vmem>>, vector<128x128xf32>,
    } else {
    }
    %c0 = arith.constant 0 : index
    %c0_1 = arith.constant 0 : index
    %3 = vector.load %arg8[%c0, %c0_1] : memref<128x128xf32, #tpu.memory_space<vmem>>, vector<128x128xf32>
    %c0_2 = arith.constant 0 : index
    %c0_3 = arith.constant 0 : index
    %4 = vector.load %arg3[%c0_2, %c0_3] : memref<128x128xbf16, #tpu.memory_space<vmem>>, vector<128x128xbf16>
    %c0_4 = arith.constant 0 : index
    %c0_5 = arith.constant 0 : index
    %5 = vector.load %arg4[%c0_4, %c0_5] : memref<128x128xbf16, #tpu.memory_space<vmem>>, vector<128x128xbf16>
    %cst = arith.constant dense<0.000000e+00> : vector<128x128xf32>
    %6 = tpu.matmul %4, %5, %cst {dimension_numbers = #tpu.dot_dimension_numbers<[1], [0], [0], [1], [0, 0, 1, 1], [], []>} : vector<128x128xbf16>, vector<128x128xbf16>, vector<128x128xf32> -> vector<128x128xf32>
    %7 = arith.addf %3, %6 : vector<128x128xf32>
    %c0_6 = arith.constant 0 : index
    %c0_7 = arith.constant 0 : index
    %8 = vector.load %arg8[%c0_6, %c0_7] : memref<128x128xf32, #tpu.memory_space<vmem>>, vector<128x128xf32>
    tpu.vector_store %arg8[%c0_6, %c0_7], %7 {strides = array<i32>} : memref<128x128xf32, #tpu.memory_space<vmem>>, vector<128x128xf32>,
    %c0_i32_8 = arith.constant 0 : i32
    %9 = arith.cmpi eq, %arg2, %c0_i32_8 : i32
    %10 = arith.extui %9 : i1 to i32
    %c0_i32_9 = arith.constant 0 : i32
    %11 = arith.cmpi ne, %10, %c0_i32_9 : i32
    scf.if %11 {
      %c0_10 = arith.constant 0 : index
      %c0_11 = arith.constant 0 : index
      %12 = vector.load %arg8[%c0_10, %c0_11] : memref<128x128xf32, #tpu.memory_space<vmem>>, vector<128x128xf32>
      %c0_12 = arith.constant 0 : index
      %c0_13 = arith.constant 0 : index
      %13 = vector.load %arg5[%c0_12, %c0_13] : memref<1x128xf32, #tpu.memory_space<vmem>>, vector<1x128xf32>
      %14 = vector.broadcast %13 : vector<1x128xf32> to vector<128x128xf32>
      %15 = arith.mulf %12, %14 : vector<128x128xf32>
      %c0_14 = arith.constant 0 : index
      %c0_15 = arith.constant 0 : index
      %16 = vector.load %arg6[%c0_14, %c0_15] : memref<1x128xf32, #tpu.memory_space<vmem>>, vector<1x128xf32>
      %17 = vector.broadcast %16 : vector<1x128xf32> to vector<128x128xf32>
      %18 = arith.addf %15, %17 : vector<128x128xf32>
      %19 = arith.truncf %18 : vector<128x128xf32> to vector<128x128xbf16>
      %c0_16 = arith.constant 0 : index
      %c0_17 = arith.constant 0 : index
      %20 = vector.load %arg7[%c0_16, %c0_17] : memref<128x128xbf16, #tpu.memory_space<vmem>>, vector<128x128xbf16>
      tpu.vector_store %arg7[%c0_16, %c0_17], %19 {strides = array<i32>} : memref<128x128xbf16, #tpu.memory_space<vmem>>, vector<128x128xbf16>,
    } else {
    }
    return
  }
  func.func @transform_0(%arg0: i32, %arg1: i32, %arg2: i32) -> (i32, i32) {
    %c0_i32 = arith.constant 0 : i32
    return %arg0, %arg2 : i32, i32
  }
  func.func @transform_1(%arg0: i32, %arg1: i32, %arg2: i32) -> (i32, i32) {
    %c0_i32 = arith.constant 0 : i32
    return %arg2, %arg1 : i32, i32
  }
  func.func @transform_2(%arg0: i32, %arg1: i32, %arg2: i32) -> (i32, i32) {
    %c0_i32 = arith.constant 0 : i32
    %c0_i32_0 = arith.constant 0 : i32
    return %c0_i32, %arg1 : i32, i32
  }
  func.func @transform_3(%arg0: i32, %arg1: i32, %arg2: i32) -> (i32, i32) {
    %c0_i32 = arith.constant 0 : i32
    %c0_i32_0 = arith.constant 0 : i32
    return %c0_i32, %arg1 : i32, i32
  }
  func.func @transform_4(%arg0: i32, %arg1: i32, %arg2: i32) -> (i32, i32) {
    %c0_i32 = arith.constant 0 : i32
    return %arg0, %arg1 : i32, i32
  }
}

module attributes {stable_mosaic.version = 11 : i64} {
  func.func @_fused_mm_kernel(%arg0: i32, %arg1: i32, %arg2: i32, %arg3: memref<128x128xbf16, #tpu.memory_space<vmem>>, %arg4: memref<128x128xbf16, #tpu.memory_space<vmem>>, %arg5: memref<1x128xf32, #tpu.memory_space<vmem>>, %arg6: memref<1x128xf32, #tpu.memory_space<vmem>>, %arg7: memref<128x128xbf16, #tpu.memory_space<vmem>>, %arg8: memref<128x128xbf16, #tpu.memory_space<vmem>>, %arg9: memref<128x128xf32, #tpu.memory_space<vmem>>) attributes {dimension_semantics = [#tpu.dimension_semantics<parallel>, #tpu.dimension_semantics<parallel>, #tpu.dimension_semantics<arbitrary>], iteration_bounds = array<i64: 1, 1, 1>, scalar_prefetch = 0 : i64, scratch_operands = 1 : i64, tpu.core_type = #tpu.core_type<tc>, window_params = [{transform_indices = @transform_0, window_bounds = array<i64: 128, 128>}, {transform_indices = @transform_1, window_bounds = array<i64: 128, 128>}, {transform_indices = @transform_2, window_bounds = array<i64: 1, 128>}, {transform_indices = @transform_3, window_bounds = array<i64: 1, 128>}, {transform_indices = @transform_4, window_bounds = array<i64: 128, 128>}, {transform_indices = @transform_5, window_bounds = array<i64: 128, 128>}]} {
    %c0_i32 = arith.constant 0 : i32
    %0 = arith.cmpi eq, %arg2, %c0_i32 : i32
    %1 = arith.extui %0 : i1 to i32
    %c0_i32_0 = arith.constant 0 : i32
    %2 = arith.cmpi ne, %1, %c0_i32_0 : i32
    scf.if %2 {
      %cst_10 = arith.constant 0.000000e+00 : f32
      %12 = vector.broadcast %cst_10 : f32 to vector<128x128xf32>
      %c0_11 = arith.constant 0 : index
      %c0_12 = arith.constant 0 : index
      %13 = vector.load %arg9[%c0_11, %c0_12] : memref<128x128xf32, #tpu.memory_space<vmem>>, vector<128x128xf32>
      tpu.vector_store %arg9[%c0_11, %c0_12], %12 {strides = array<i32>} : memref<128x128xf32, #tpu.memory_space<vmem>>, vector<128x128xf32>,
    } else {
    }
    %c0 = arith.constant 0 : index
    %c0_1 = arith.constant 0 : index
    %3 = vector.load %arg9[%c0, %c0_1] : memref<128x128xf32, #tpu.memory_space<vmem>>, vector<128x128xf32>
    %c0_2 = arith.constant 0 : index
    %c0_3 = arith.constant 0 : index
    %4 = vector.load %arg3[%c0_2, %c0_3] : memref<128x128xbf16, #tpu.memory_space<vmem>>, vector<128x128xbf16>
    %c0_4 = arith.constant 0 : index
    %c0_5 = arith.constant 0 : index
    %5 = vector.load %arg4[%c0_4, %c0_5] : memref<128x128xbf16, #tpu.memory_space<vmem>>, vector<128x128xbf16>
    %cst = arith.constant dense<0.000000e+00> : vector<128x128xf32>
    %6 = tpu.matmul %4, %5, %cst {dimension_numbers = #tpu.dot_dimension_numbers<[1], [0], [0], [1], [0, 0, 1, 1], [], []>} : vector<128x128xbf16>, vector<128x128xbf16>, vector<128x128xf32> -> vector<128x128xf32>
    %7 = arith.addf %3, %6 : vector<128x128xf32>
    %c0_6 = arith.constant 0 : index
    %c0_7 = arith.constant 0 : index
    %8 = vector.load %arg9[%c0_6, %c0_7] : memref<128x128xf32, #tpu.memory_space<vmem>>, vector<128x128xf32>
    tpu.vector_store %arg9[%c0_6, %c0_7], %7 {strides = array<i32>} : memref<128x128xf32, #tpu.memory_space<vmem>>, vector<128x128xf32>,
    %c0_i32_8 = arith.constant 0 : i32
    %9 = arith.cmpi eq, %arg2, %c0_i32_8 : i32
    %10 = arith.extui %9 : i1 to i32
    %c0_i32_9 = arith.constant 0 : i32
    %11 = arith.cmpi ne, %10, %c0_i32_9 : i32
    scf.if %11 {
      %c0_10 = arith.constant 0 : index
      %c0_11 = arith.constant 0 : index
      %12 = vector.load %arg9[%c0_10, %c0_11] : memref<128x128xf32, #tpu.memory_space<vmem>>, vector<128x128xf32>
      %c0_12 = arith.constant 0 : index
      %c0_13 = arith.constant 0 : index
      %13 = vector.load %arg5[%c0_12, %c0_13] : memref<1x128xf32, #tpu.memory_space<vmem>>, vector<1x128xf32>
      %14 = vector.broadcast %13 : vector<1x128xf32> to vector<128x128xf32>
      %15 = arith.mulf %12, %14 : vector<128x128xf32>
      %c0_14 = arith.constant 0 : index
      %c0_15 = arith.constant 0 : index
      %16 = vector.load %arg6[%c0_14, %c0_15] : memref<1x128xf32, #tpu.memory_space<vmem>>, vector<1x128xf32>
      %17 = vector.broadcast %16 : vector<1x128xf32> to vector<128x128xf32>
      %18 = arith.addf %15, %17 : vector<128x128xf32>
      %c0_16 = arith.constant 0 : index
      %c0_17 = arith.constant 0 : index
      %19 = vector.load %arg7[%c0_16, %c0_17] : memref<128x128xbf16, #tpu.memory_space<vmem>>, vector<128x128xbf16>
      %20 = arith.extf %19 : vector<128x128xbf16> to vector<128x128xf32>
      %21 = arith.addf %18, %20 : vector<128x128xf32>
      %cst_18 = arith.constant 0.000000e+00 : f32
      %22 = vector.broadcast %cst_18 : f32 to vector<128x128xf32>
      %23 = arith.maximumf %21, %22 : vector<128x128xf32>
      %24 = arith.truncf %23 : vector<128x128xf32> to vector<128x128xbf16>
      %c0_19 = arith.constant 0 : index
      %c0_20 = arith.constant 0 : index
      %25 = vector.load %arg8[%c0_19, %c0_20] : memref<128x128xbf16, #tpu.memory_space<vmem>>, vector<128x128xbf16>
      tpu.vector_store %arg8[%c0_19, %c0_20], %24 {strides = array<i32>} : memref<128x128xbf16, #tpu.memory_space<vmem>>, vector<128x128xbf16>,
    } else {
    }
    return
  }
  func.func @transform_0(%arg0: i32, %arg1: i32, %arg2: i32) -> (i32, i32) {
    %c0_i32 = arith.constant 0 : i32
    return %arg0, %arg2 : i32, i32
  }
  func.func @transform_1(%arg0: i32, %arg1: i32, %arg2: i32) -> (i32, i32) {
    %c0_i32 = arith.constant 0 : i32
    return %arg2, %arg1 : i32, i32
  }
  func.func @transform_2(%arg0: i32, %arg1: i32, %arg2: i32) -> (i32, i32) {
    %c0_i32 = arith.constant 0 : i32
    %c0_i32_0 = arith.constant 0 : i32
    return %c0_i32, %arg1 : i32, i32
  }
  func.func @transform_3(%arg0: i32, %arg1: i32, %arg2: i32) -> (i32, i32) {
    %c0_i32 = arith.constant 0 : i32
    %c0_i32_0 = arith.constant 0 : i32
    return %c0_i32, %arg1 : i32, i32
  }
  func.func @transform_4(%arg0: i32, %arg1: i32, %arg2: i32) -> (i32, i32) {
    %c0_i32 = arith.constant 0 : i32
    return %arg0, %arg1 : i32, i32
  }
  func.func @transform_5(%arg0: i32, %arg1: i32, %arg2: i32) -> (i32, i32) {
    %c0_i32 = arith.constant 0 : i32
    return %arg0, %arg1 : i32, i32
  }
}

module attributes {stable_mosaic.version = 11 : i64} {
  func.func @_avgpool2_kernel(%arg0: i32, %arg1: memref<4x2x4x256xbf16, #tpu.memory_space<vmem>>, %arg2: memref<4x4x128xbf16, #tpu.memory_space<vmem>>) attributes {dimension_semantics = [#tpu.dimension_semantics<parallel>], iteration_bounds = array<i64: 2>, scalar_prefetch = 0 : i64, scratch_operands = 0 : i64, tpu.core_type = #tpu.core_type<tc>, window_params = [{transform_indices = @transform_0, window_bounds = array<i64: 4, 2, 4, 256>}, {transform_indices = @transform_1, window_bounds = array<i64: 4, 4, 128>}]} {
    %c0 = arith.constant 0 : index
    %c0_0 = arith.constant 0 : index
    %c0_1 = arith.constant 0 : index
    %c0_2 = arith.constant 0 : index
    %0 = vector.load %arg1[%c0, %c0_0, %c0_1, %c0_2] : memref<4x2x4x256xbf16, #tpu.memory_space<vmem>>, vector<4x2x4x256xbf16>
    %1 = arith.extf %0 : vector<4x2x4x256xbf16> to vector<4x2x4x256xf32>
    %2 = vector.extract_strided_slice %1 {offsets = [0, 0, 0, 0], sizes = [4, 1, 4, 256], strides = [1, 1, 1, 1]} : vector<4x2x4x256xf32> to vector<4x1x4x256xf32>
    %3 = vector.shape_cast %2 : vector<4x1x4x256xf32> to vector<4x4x256xf32>
    %4 = vector.extract_strided_slice %1 {offsets = [0, 1, 0, 0], sizes = [4, 1, 4, 256], strides = [1, 1, 1, 1]} : vector<4x2x4x256xf32> to vector<4x1x4x256xf32>
    %5 = vector.shape_cast %4 : vector<4x1x4x256xf32> to vector<4x4x256xf32>
    %6 = arith.addf %3, %5 : vector<4x4x256xf32>
    %7 = vector.extract_strided_slice %6 {offsets = [0, 0, 0], sizes = [4, 4, 128], strides = [1, 1, 1]} : vector<4x4x256xf32> to vector<4x4x128xf32>
    %8 = vector.extract_strided_slice %6 {offsets = [0, 0, 128], sizes = [4, 4, 128], strides = [1, 1, 1]} : vector<4x4x256xf32> to vector<4x4x128xf32>
    %9 = arith.addf %7, %8 : vector<4x4x128xf32>
    %cst = arith.constant 2.500000e-01 : f32
    %10 = vector.broadcast %cst : f32 to vector<4x4x128xf32>
    %11 = arith.mulf %9, %10 : vector<4x4x128xf32>
    %12 = arith.truncf %11 : vector<4x4x128xf32> to vector<4x4x128xbf16>
    %c0_3 = arith.constant 0 : index
    %c0_4 = arith.constant 0 : index
    %c0_5 = arith.constant 0 : index
    %13 = vector.load %arg2[%c0_3, %c0_4, %c0_5] : memref<4x4x128xbf16, #tpu.memory_space<vmem>>, vector<4x4x128xbf16>
    tpu.vector_store %arg2[%c0_3, %c0_4, %c0_5], %12 {strides = array<i32>} : memref<4x4x128xbf16, #tpu.memory_space<vmem>>, vector<4x4x128xbf16>,
    return
  }
  func.func @transform_0(%arg0: i32) -> (i32, i32, i32, i32) {
    %c0_i32 = arith.constant 0 : i32
    %c0_i32_0 = arith.constant 0 : i32
    %c0_i32_1 = arith.constant 0 : i32
    %c0_i32_2 = arith.constant 0 : i32
    return %arg0, %c0_i32, %c0_i32_0, %c0_i32_1 : i32, i32, i32, i32
  }
  func.func @transform_1(%arg0: i32) -> (i32, i32, i32) {
    %c0_i32 = arith.constant 0 : i32
    %c0_i32_0 = arith.constant 0 : i32
    %c0_i32_1 = arith.constant 0 : i32
    return %arg0, %c0_i32, %c0_i32_0 : i32, i32, i32
  }
}

module attributes {stable_mosaic.version = 11 : i64} {
  func.func @_fused_mm_kernel(%arg0: i32, %arg1: i32, %arg2: i32, %arg3: memref<32x128xbf16, #tpu.memory_space<vmem>>, %arg4: memref<128x128xbf16, #tpu.memory_space<vmem>>, %arg5: memref<1x128xf32, #tpu.memory_space<vmem>>, %arg6: memref<1x128xf32, #tpu.memory_space<vmem>>, %arg7: memref<32x128xbf16, #tpu.memory_space<vmem>>, %arg8: memref<32x128xf32, #tpu.memory_space<vmem>>) attributes {dimension_semantics = [#tpu.dimension_semantics<parallel>, #tpu.dimension_semantics<parallel>, #tpu.dimension_semantics<arbitrary>], iteration_bounds = array<i64: 1, 1, 1>, scalar_prefetch = 0 : i64, scratch_operands = 1 : i64, tpu.core_type = #tpu.core_type<tc>, window_params = [{transform_indices = @transform_0, window_bounds = array<i64: 32, 128>}, {transform_indices = @transform_1, window_bounds = array<i64: 128, 128>}, {transform_indices = @transform_2, window_bounds = array<i64: 1, 128>}, {transform_indices = @transform_3, window_bounds = array<i64: 1, 128>}, {transform_indices = @transform_4, window_bounds = array<i64: 32, 128>}]} {
    %c0_i32 = arith.constant 0 : i32
    %0 = arith.cmpi eq, %arg2, %c0_i32 : i32
    %1 = arith.extui %0 : i1 to i32
    %c0_i32_0 = arith.constant 0 : i32
    %2 = arith.cmpi ne, %1, %c0_i32_0 : i32
    scf.if %2 {
      %cst_10 = arith.constant 0.000000e+00 : f32
      %12 = vector.broadcast %cst_10 : f32 to vector<32x128xf32>
      %c0_11 = arith.constant 0 : index
      %c0_12 = arith.constant 0 : index
      %13 = vector.load %arg8[%c0_11, %c0_12] : memref<32x128xf32, #tpu.memory_space<vmem>>, vector<32x128xf32>
      tpu.vector_store %arg8[%c0_11, %c0_12], %12 {strides = array<i32>} : memref<32x128xf32, #tpu.memory_space<vmem>>, vector<32x128xf32>,
    } else {
    }
    %c0 = arith.constant 0 : index
    %c0_1 = arith.constant 0 : index
    %3 = vector.load %arg8[%c0, %c0_1] : memref<32x128xf32, #tpu.memory_space<vmem>>, vector<32x128xf32>
    %c0_2 = arith.constant 0 : index
    %c0_3 = arith.constant 0 : index
    %4 = vector.load %arg3[%c0_2, %c0_3] : memref<32x128xbf16, #tpu.memory_space<vmem>>, vector<32x128xbf16>
    %c0_4 = arith.constant 0 : index
    %c0_5 = arith.constant 0 : index
    %5 = vector.load %arg4[%c0_4, %c0_5] : memref<128x128xbf16, #tpu.memory_space<vmem>>, vector<128x128xbf16>
    %cst = arith.constant dense<0.000000e+00> : vector<32x128xf32>
    %6 = tpu.matmul %4, %5, %cst {dimension_numbers = #tpu.dot_dimension_numbers<[1], [0], [0], [1], [0, 0, 1, 1], [], []>} : vector<32x128xbf16>, vector<128x128xbf16>, vector<32x128xf32> -> vector<32x128xf32>
    %7 = arith.addf %3, %6 : vector<32x128xf32>
    %c0_6 = arith.constant 0 : index
    %c0_7 = arith.constant 0 : index
    %8 = vector.load %arg8[%c0_6, %c0_7] : memref<32x128xf32, #tpu.memory_space<vmem>>, vector<32x128xf32>
    tpu.vector_store %arg8[%c0_6, %c0_7], %7 {strides = array<i32>} : memref<32x128xf32, #tpu.memory_space<vmem>>, vector<32x128xf32>,
    %c0_i32_8 = arith.constant 0 : i32
    %9 = arith.cmpi eq, %arg2, %c0_i32_8 : i32
    %10 = arith.extui %9 : i1 to i32
    %c0_i32_9 = arith.constant 0 : i32
    %11 = arith.cmpi ne, %10, %c0_i32_9 : i32
    scf.if %11 {
      %c0_10 = arith.constant 0 : index
      %c0_11 = arith.constant 0 : index
      %12 = vector.load %arg8[%c0_10, %c0_11] : memref<32x128xf32, #tpu.memory_space<vmem>>, vector<32x128xf32>
      %c0_12 = arith.constant 0 : index
      %c0_13 = arith.constant 0 : index
      %13 = vector.load %arg5[%c0_12, %c0_13] : memref<1x128xf32, #tpu.memory_space<vmem>>, vector<1x128xf32>
      %14 = vector.broadcast %13 : vector<1x128xf32> to vector<32x128xf32>
      %15 = arith.mulf %12, %14 : vector<32x128xf32>
      %c0_14 = arith.constant 0 : index
      %c0_15 = arith.constant 0 : index
      %16 = vector.load %arg6[%c0_14, %c0_15] : memref<1x128xf32, #tpu.memory_space<vmem>>, vector<1x128xf32>
      %17 = vector.broadcast %16 : vector<1x128xf32> to vector<32x128xf32>
      %18 = arith.addf %15, %17 : vector<32x128xf32>
      %19 = arith.truncf %18 : vector<32x128xf32> to vector<32x128xbf16>
      %c0_16 = arith.constant 0 : index
      %c0_17 = arith.constant 0 : index
      %20 = vector.load %arg7[%c0_16, %c0_17] : memref<32x128xbf16, #tpu.memory_space<vmem>>, vector<32x128xbf16>
      tpu.vector_store %arg7[%c0_16, %c0_17], %19 {strides = array<i32>} : memref<32x128xbf16, #tpu.memory_space<vmem>>, vector<32x128xbf16>,
    } else {
    }
    return
  }
  func.func @transform_0(%arg0: i32, %arg1: i32, %arg2: i32) -> (i32, i32) {
    %c0_i32 = arith.constant 0 : i32
    return %arg0, %arg2 : i32, i32
  }
  func.func @transform_1(%arg0: i32, %arg1: i32, %arg2: i32) -> (i32, i32) {
    %c0_i32 = arith.constant 0 : i32
    return %arg2, %arg1 : i32, i32
  }
  func.func @transform_2(%arg0: i32, %arg1: i32, %arg2: i32) -> (i32, i32) {
    %c0_i32 = arith.constant 0 : i32
    %c0_i32_0 = arith.constant 0 : i32
    return %c0_i32, %arg1 : i32, i32
  }
  func.func @transform_3(%arg0: i32, %arg1: i32, %arg2: i32) -> (i32, i32) {
    %c0_i32 = arith.constant 0 : i32
    %c0_i32_0 = arith.constant 0 : i32
    return %c0_i32, %arg1 : i32, i32
  }
  func.func @transform_4(%arg0: i32, %arg1: i32, %arg2: i32) -> (i32, i32) {
    %c0_i32 = arith.constant 0 : i32
    return %arg0, %arg1 : i32, i32
  }
}

module attributes {stable_mosaic.version = 11 : i64} {
  func.func @_fused_mm_kernel(%arg0: i32, %arg1: i32, %arg2: i32, %arg3: memref<32x128xbf16, #tpu.memory_space<vmem>>, %arg4: memref<128x128xbf16, #tpu.memory_space<vmem>>, %arg5: memref<1x128xf32, #tpu.memory_space<vmem>>, %arg6: memref<1x128xf32, #tpu.memory_space<vmem>>, %arg7: memref<32x128xbf16, #tpu.memory_space<vmem>>, %arg8: memref<32x128xbf16, #tpu.memory_space<vmem>>, %arg9: memref<32x128xf32, #tpu.memory_space<vmem>>) attributes {dimension_semantics = [#tpu.dimension_semantics<parallel>, #tpu.dimension_semantics<parallel>, #tpu.dimension_semantics<arbitrary>], iteration_bounds = array<i64: 1, 1, 1>, scalar_prefetch = 0 : i64, scratch_operands = 1 : i64, tpu.core_type = #tpu.core_type<tc>, window_params = [{transform_indices = @transform_0, window_bounds = array<i64: 32, 128>}, {transform_indices = @transform_1, window_bounds = array<i64: 128, 128>}, {transform_indices = @transform_2, window_bounds = array<i64: 1, 128>}, {transform_indices = @transform_3, window_bounds = array<i64: 1, 128>}, {transform_indices = @transform_4, window_bounds = array<i64: 32, 128>}, {transform_indices = @transform_5, window_bounds = array<i64: 32, 128>}]} {
    %c0_i32 = arith.constant 0 : i32
    %0 = arith.cmpi eq, %arg2, %c0_i32 : i32
    %1 = arith.extui %0 : i1 to i32
    %c0_i32_0 = arith.constant 0 : i32
    %2 = arith.cmpi ne, %1, %c0_i32_0 : i32
    scf.if %2 {
      %cst_10 = arith.constant 0.000000e+00 : f32
      %12 = vector.broadcast %cst_10 : f32 to vector<32x128xf32>
      %c0_11 = arith.constant 0 : index
      %c0_12 = arith.constant 0 : index
      %13 = vector.load %arg9[%c0_11, %c0_12] : memref<32x128xf32, #tpu.memory_space<vmem>>, vector<32x128xf32>
      tpu.vector_store %arg9[%c0_11, %c0_12], %12 {strides = array<i32>} : memref<32x128xf32, #tpu.memory_space<vmem>>, vector<32x128xf32>,
    } else {
    }
    %c0 = arith.constant 0 : index
    %c0_1 = arith.constant 0 : index
    %3 = vector.load %arg9[%c0, %c0_1] : memref<32x128xf32, #tpu.memory_space<vmem>>, vector<32x128xf32>
    %c0_2 = arith.constant 0 : index
    %c0_3 = arith.constant 0 : index
    %4 = vector.load %arg3[%c0_2, %c0_3] : memref<32x128xbf16, #tpu.memory_space<vmem>>, vector<32x128xbf16>
    %c0_4 = arith.constant 0 : index
    %c0_5 = arith.constant 0 : index
    %5 = vector.load %arg4[%c0_4, %c0_5] : memref<128x128xbf16, #tpu.memory_space<vmem>>, vector<128x128xbf16>
    %cst = arith.constant dense<0.000000e+00> : vector<32x128xf32>
    %6 = tpu.matmul %4, %5, %cst {dimension_numbers = #tpu.dot_dimension_numbers<[1], [0], [0], [1], [0, 0, 1, 1], [], []>} : vector<32x128xbf16>, vector<128x128xbf16>, vector<32x128xf32> -> vector<32x128xf32>
    %7 = arith.addf %3, %6 : vector<32x128xf32>
    %c0_6 = arith.constant 0 : index
    %c0_7 = arith.constant 0 : index
    %8 = vector.load %arg9[%c0_6, %c0_7] : memref<32x128xf32, #tpu.memory_space<vmem>>, vector<32x128xf32>
    tpu.vector_store %arg9[%c0_6, %c0_7], %7 {strides = array<i32>} : memref<32x128xf32, #tpu.memory_space<vmem>>, vector<32x128xf32>,
    %c0_i32_8 = arith.constant 0 : i32
    %9 = arith.cmpi eq, %arg2, %c0_i32_8 : i32
    %10 = arith.extui %9 : i1 to i32
    %c0_i32_9 = arith.constant 0 : i32
    %11 = arith.cmpi ne, %10, %c0_i32_9 : i32
    scf.if %11 {
      %c0_10 = arith.constant 0 : index
      %c0_11 = arith.constant 0 : index
      %12 = vector.load %arg9[%c0_10, %c0_11] : memref<32x128xf32, #tpu.memory_space<vmem>>, vector<32x128xf32>
      %c0_12 = arith.constant 0 : index
      %c0_13 = arith.constant 0 : index
      %13 = vector.load %arg5[%c0_12, %c0_13] : memref<1x128xf32, #tpu.memory_space<vmem>>, vector<1x128xf32>
      %14 = vector.broadcast %13 : vector<1x128xf32> to vector<32x128xf32>
      %15 = arith.mulf %12, %14 : vector<32x128xf32>
      %c0_14 = arith.constant 0 : index
      %c0_15 = arith.constant 0 : index
      %16 = vector.load %arg6[%c0_14, %c0_15] : memref<1x128xf32, #tpu.memory_space<vmem>>, vector<1x128xf32>
      %17 = vector.broadcast %16 : vector<1x128xf32> to vector<32x128xf32>
      %18 = arith.addf %15, %17 : vector<32x128xf32>
      %c0_16 = arith.constant 0 : index
      %c0_17 = arith.constant 0 : index
      %19 = vector.load %arg7[%c0_16, %c0_17] : memref<32x128xbf16, #tpu.memory_space<vmem>>, vector<32x128xbf16>
      %20 = arith.extf %19 : vector<32x128xbf16> to vector<32x128xf32>
      %21 = arith.addf %18, %20 : vector<32x128xf32>
      %cst_18 = arith.constant 0.000000e+00 : f32
      %22 = vector.broadcast %cst_18 : f32 to vector<32x128xf32>
      %23 = arith.maximumf %21, %22 : vector<32x128xf32>
      %24 = arith.truncf %23 : vector<32x128xf32> to vector<32x128xbf16>
      %c0_19 = arith.constant 0 : index
      %c0_20 = arith.constant 0 : index
      %25 = vector.load %arg8[%c0_19, %c0_20] : memref<32x128xbf16, #tpu.memory_space<vmem>>, vector<32x128xbf16>
      tpu.vector_store %arg8[%c0_19, %c0_20], %24 {strides = array<i32>} : memref<32x128xbf16, #tpu.memory_space<vmem>>, vector<32x128xbf16>,
    } else {
    }
    return
  }
  func.func @transform_0(%arg0: i32, %arg1: i32, %arg2: i32) -> (i32, i32) {
    %c0_i32 = arith.constant 0 : i32
    return %arg0, %arg2 : i32, i32
  }
  func.func @transform_1(%arg0: i32, %arg1: i32, %arg2: i32) -> (i32, i32) {
    %c0_i32 = arith.constant 0 : i32
    return %arg2, %arg1 : i32, i32
  }
  func.func @transform_2(%arg0: i32, %arg1: i32, %arg2: i32) -> (i32, i32) {
    %c0_i32 = arith.constant 0 : i32
    %c0_i32_0 = arith.constant 0 : i32
    return %c0_i32, %arg1 : i32, i32
  }
  func.func @transform_3(%arg0: i32, %arg1: i32, %arg2: i32) -> (i32, i32) {
    %c0_i32 = arith.constant 0 : i32
    %c0_i32_0 = arith.constant 0 : i32
    return %c0_i32, %arg1 : i32, i32
  }
  func.func @transform_4(%arg0: i32, %arg1: i32, %arg2: i32) -> (i32, i32) {
    %c0_i32 = arith.constant 0 : i32
    return %arg0, %arg1 : i32, i32
  }
  func.func @transform_5(%arg0: i32, %arg1: i32, %arg2: i32) -> (i32, i32) {
    %c0_i32 = arith.constant 0 : i32
    return %arg0, %arg1 : i32, i32
  }
}

module attributes {stable_mosaic.version = 11 : i64} {
  func.func @_fused_mm_kernel(%arg0: i32, %arg1: i32, %arg2: i32, %arg3: memref<32x128xbf16, #tpu.memory_space<vmem>>, %arg4: memref<128x128xbf16, #tpu.memory_space<vmem>>, %arg5: memref<1x128xf32, #tpu.memory_space<vmem>>, %arg6: memref<1x128xf32, #tpu.memory_space<vmem>>, %arg7: memref<32x128xbf16, #tpu.memory_space<vmem>>, %arg8: memref<32x128xf32, #tpu.memory_space<vmem>>) attributes {dimension_semantics = [#tpu.dimension_semantics<parallel>, #tpu.dimension_semantics<parallel>, #tpu.dimension_semantics<arbitrary>], iteration_bounds = array<i64: 1, 1, 1>, scalar_prefetch = 0 : i64, scratch_operands = 1 : i64, tpu.core_type = #tpu.core_type<tc>, window_params = [{transform_indices = @transform_0, window_bounds = array<i64: 32, 128>}, {transform_indices = @transform_1, window_bounds = array<i64: 128, 128>}, {transform_indices = @transform_2, window_bounds = array<i64: 1, 128>}, {transform_indices = @transform_3, window_bounds = array<i64: 1, 128>}, {transform_indices = @transform_4, window_bounds = array<i64: 32, 128>}]} {
    %c0_i32 = arith.constant 0 : i32
    %0 = arith.cmpi eq, %arg2, %c0_i32 : i32
    %1 = arith.extui %0 : i1 to i32
    %c0_i32_0 = arith.constant 0 : i32
    %2 = arith.cmpi ne, %1, %c0_i32_0 : i32
    scf.if %2 {
      %cst_10 = arith.constant 0.000000e+00 : f32
      %12 = vector.broadcast %cst_10 : f32 to vector<32x128xf32>
      %c0_11 = arith.constant 0 : index
      %c0_12 = arith.constant 0 : index
      %13 = vector.load %arg8[%c0_11, %c0_12] : memref<32x128xf32, #tpu.memory_space<vmem>>, vector<32x128xf32>
      tpu.vector_store %arg8[%c0_11, %c0_12], %12 {strides = array<i32>} : memref<32x128xf32, #tpu.memory_space<vmem>>, vector<32x128xf32>,
    } else {
    }
    %c0 = arith.constant 0 : index
    %c0_1 = arith.constant 0 : index
    %3 = vector.load %arg8[%c0, %c0_1] : memref<32x128xf32, #tpu.memory_space<vmem>>, vector<32x128xf32>
    %c0_2 = arith.constant 0 : index
    %c0_3 = arith.constant 0 : index
    %4 = vector.load %arg3[%c0_2, %c0_3] : memref<32x128xbf16, #tpu.memory_space<vmem>>, vector<32x128xbf16>
    %c0_4 = arith.constant 0 : index
    %c0_5 = arith.constant 0 : index
    %5 = vector.load %arg4[%c0_4, %c0_5] : memref<128x128xbf16, #tpu.memory_space<vmem>>, vector<128x128xbf16>
    %cst = arith.constant dense<0.000000e+00> : vector<32x128xf32>
    %6 = tpu.matmul %4, %5, %cst {dimension_numbers = #tpu.dot_dimension_numbers<[1], [0], [0], [1], [0, 0, 1, 1], [], []>} : vector<32x128xbf16>, vector<128x128xbf16>, vector<32x128xf32> -> vector<32x128xf32>
    %7 = arith.addf %3, %6 : vector<32x128xf32>
    %c0_6 = arith.constant 0 : index
    %c0_7 = arith.constant 0 : index
    %8 = vector.load %arg8[%c0_6, %c0_7] : memref<32x128xf32, #tpu.memory_space<vmem>>, vector<32x128xf32>
    tpu.vector_store %arg8[%c0_6, %c0_7], %7 {strides = array<i32>} : memref<32x128xf32, #tpu.memory_space<vmem>>, vector<32x128xf32>,
    %c0_i32_8 = arith.constant 0 : i32
    %9 = arith.cmpi eq, %arg2, %c0_i32_8 : i32
    %10 = arith.extui %9 : i1 to i32
    %c0_i32_9 = arith.constant 0 : i32
    %11 = arith.cmpi ne, %10, %c0_i32_9 : i32
    scf.if %11 {
      %c0_10 = arith.constant 0 : index
      %c0_11 = arith.constant 0 : index
      %12 = vector.load %arg8[%c0_10, %c0_11] : memref<32x128xf32, #tpu.memory_space<vmem>>, vector<32x128xf32>
      %c0_12 = arith.constant 0 : index
      %c0_13 = arith.constant 0 : index
      %13 = vector.load %arg5[%c0_12, %c0_13] : memref<1x128xf32, #tpu.memory_space<vmem>>, vector<1x128xf32>
      %14 = vector.broadcast %13 : vector<1x128xf32> to vector<32x128xf32>
      %15 = arith.mulf %12, %14 : vector<32x128xf32>
      %c0_14 = arith.constant 0 : index
      %c0_15 = arith.constant 0 : index
      %16 = vector.load %arg6[%c0_14, %c0_15] : memref<1x128xf32, #tpu.memory_space<vmem>>, vector<1x128xf32>
      %17 = vector.broadcast %16 : vector<1x128xf32> to vector<32x128xf32>
      %18 = arith.addf %15, %17 : vector<32x128xf32>
      %cst_16 = arith.constant 0.000000e+00 : f32
      %19 = vector.broadcast %cst_16 : f32 to vector<32x128xf32>
      %20 = arith.maximumf %18, %19 : vector<32x128xf32>
      %21 = arith.truncf %20 : vector<32x128xf32> to vector<32x128xbf16>
      %c0_17 = arith.constant 0 : index
      %c0_18 = arith.constant 0 : index
      %22 = vector.load %arg7[%c0_17, %c0_18] : memref<32x128xbf16, #tpu.memory_space<vmem>>, vector<32x128xbf16>
      tpu.vector_store %arg7[%c0_17, %c0_18], %21 {strides = array<i32>} : memref<32x128xbf16, #tpu.memory_space<vmem>>, vector<32x128xbf16>,
    } else {
    }
    return
  }
  func.func @transform_0(%arg0: i32, %arg1: i32, %arg2: i32) -> (i32, i32) {
    %c0_i32 = arith.constant 0 : i32
    return %arg0, %arg2 : i32, i32
  }
  func.func @transform_1(%arg0: i32, %arg1: i32, %arg2: i32) -> (i32, i32) {
    %c0_i32 = arith.constant 0 : i32
    return %arg2, %arg1 : i32, i32
  }
  func.func @transform_2(%arg0: i32, %arg1: i32, %arg2: i32) -> (i32, i32) {
    %c0_i32 = arith.constant 0 : i32
    %c0_i32_0 = arith.constant 0 : i32
    return %c0_i32, %arg1 : i32, i32
  }
  func.func @transform_3(%arg0: i32, %arg1: i32, %arg2: i32) -> (i32, i32) {
    %c0_i32 = arith.constant 0 : i32
    %c0_i32_0 = arith.constant 0 : i32
    return %c0_i32, %arg1 : i32, i32
  }
  func.func @transform_4(%arg0: i32, %arg1: i32, %arg2: i32) -> (i32, i32) {
    %c0_i32 = arith.constant 0 : i32
    return %arg0, %arg1 : i32, i32
  }
}

module attributes {stable_mosaic.version = 11 : i64} {
  func.func @_conv3x3_kernel(%arg0: i32, %arg1: i32, %arg2: memref<1x6x6x128xbf16, #tpu.memory_space<vmem>>, %arg3: memref<3x3x128x128xbf16, #tpu.memory_space<vmem>>, %arg4: memref<1x128xf32, #tpu.memory_space<vmem>>, %arg5: memref<1x128xf32, #tpu.memory_space<vmem>>, %arg6: memref<1x4x4x128xbf16, #tpu.memory_space<vmem>>) attributes {dimension_semantics = [#tpu.dimension_semantics<parallel>, #tpu.dimension_semantics<parallel>], iteration_bounds = array<i64: 2, 1>, scalar_prefetch = 0 : i64, scratch_operands = 0 : i64, tpu.core_type = #tpu.core_type<tc>, window_params = [{transform_indices = @transform_0, window_bounds = array<i64: 1, 6, 6, 128>}, {transform_indices = @transform_1, window_bounds = array<i64: 3, 3, 128, 128>}, {transform_indices = @transform_2, window_bounds = array<i64: 1, 128>}, {transform_indices = @transform_3, window_bounds = array<i64: 1, 128>}, {transform_indices = @transform_4, window_bounds = array<i64: 1, 4, 4, 128>}]} {
    %c0 = arith.constant 0 : index
    %c0_0 = arith.constant 0 : index
    %c0_1 = arith.constant 0 : index
    %c0_2 = arith.constant 0 : index
    %0 = vector.load %arg2[%c0, %c0_0, %c0_1, %c0_2] : memref<1x6x6x128xbf16, #tpu.memory_space<vmem>>, vector<1x6x6x128xbf16>
    %1 = vector.shape_cast %0 : vector<1x6x6x128xbf16> to vector<6x6x128xbf16>
    %c0_3 = arith.constant 0 : index
    %c0_4 = arith.constant 0 : index
    %c0_5 = arith.constant 0 : index
    %c0_6 = arith.constant 0 : index
    %2 = vector.load %arg3[%c0_3, %c0_4, %c0_5, %c0_6] : memref<3x3x128x128xbf16, #tpu.memory_space<vmem>>, vector<3x3x128x128xbf16>
    %cst = arith.constant 0.000000e+00 : f32
    %3 = vector.broadcast %cst : f32 to vector<16x128xf32>
    %4 = vector.extract_strided_slice %1 {offsets = [0, 0, 0], sizes = [4, 4, 128], strides = [1, 1, 1]} : vector<6x6x128xbf16> to vector<4x4x128xbf16>
    %5 = vector.shape_cast %4 : vector<4x4x128xbf16> to vector<16x128xbf16>
    %6 = vector.extract_strided_slice %2 {offsets = [0, 0, 0, 0], sizes = [1, 1, 128, 128], strides = [1, 1, 1, 1]} : vector<3x3x128x128xbf16> to vector<1x1x128x128xbf16>
    %7 = vector.shape_cast %6 : vector<1x1x128x128xbf16> to vector<128x128xbf16>
    %cst_7 = arith.constant dense<0.000000e+00> : vector<16x128xf32>
    %8 = tpu.matmul %5, %7, %cst_7 {dimension_numbers = #tpu.dot_dimension_numbers<[1], [0], [0], [1], [0, 0, 1, 1], [], []>} : vector<16x128xbf16>, vector<128x128xbf16>, vector<16x128xf32> -> vector<16x128xf32>
    %9 = arith.addf %3, %8 : vector<16x128xf32>
    %10 = vector.extract_strided_slice %1 {offsets = [0, 1, 0], sizes = [4, 4, 128], strides = [1, 1, 1]} : vector<6x6x128xbf16> to vector<4x4x128xbf16>
    %11 = vector.shape_cast %10 : vector<4x4x128xbf16> to vector<16x128xbf16>
    %12 = vector.extract_strided_slice %2 {offsets = [0, 1, 0, 0], sizes = [1, 1, 128, 128], strides = [1, 1, 1, 1]} : vector<3x3x128x128xbf16> to vector<1x1x128x128xbf16>
    %13 = vector.shape_cast %12 : vector<1x1x128x128xbf16> to vector<128x128xbf16>
    %cst_8 = arith.constant dense<0.000000e+00> : vector<16x128xf32>
    %14 = tpu.matmul %11, %13, %cst_8 {dimension_numbers = #tpu.dot_dimension_numbers<[1], [0], [0], [1], [0, 0, 1, 1], [], []>} : vector<16x128xbf16>, vector<128x128xbf16>, vector<16x128xf32> -> vector<16x128xf32>
    %15 = arith.addf %9, %14 : vector<16x128xf32>
    %16 = vector.extract_strided_slice %1 {offsets = [0, 2, 0], sizes = [4, 4, 128], strides = [1, 1, 1]} : vector<6x6x128xbf16> to vector<4x4x128xbf16>
    %17 = vector.shape_cast %16 : vector<4x4x128xbf16> to vector<16x128xbf16>
    %18 = vector.extract_strided_slice %2 {offsets = [0, 2, 0, 0], sizes = [1, 1, 128, 128], strides = [1, 1, 1, 1]} : vector<3x3x128x128xbf16> to vector<1x1x128x128xbf16>
    %19 = vector.shape_cast %18 : vector<1x1x128x128xbf16> to vector<128x128xbf16>
    %cst_9 = arith.constant dense<0.000000e+00> : vector<16x128xf32>
    %20 = tpu.matmul %17, %19, %cst_9 {dimension_numbers = #tpu.dot_dimension_numbers<[1], [0], [0], [1], [0, 0, 1, 1], [], []>} : vector<16x128xbf16>, vector<128x128xbf16>, vector<16x128xf32> -> vector<16x128xf32>
    %21 = arith.addf %15, %20 : vector<16x128xf32>
    %22 = vector.extract_strided_slice %1 {offsets = [1, 0, 0], sizes = [4, 4, 128], strides = [1, 1, 1]} : vector<6x6x128xbf16> to vector<4x4x128xbf16>
    %23 = vector.shape_cast %22 : vector<4x4x128xbf16> to vector<16x128xbf16>
    %24 = vector.extract_strided_slice %2 {offsets = [1, 0, 0, 0], sizes = [1, 1, 128, 128], strides = [1, 1, 1, 1]} : vector<3x3x128x128xbf16> to vector<1x1x128x128xbf16>
    %25 = vector.shape_cast %24 : vector<1x1x128x128xbf16> to vector<128x128xbf16>
    %cst_10 = arith.constant dense<0.000000e+00> : vector<16x128xf32>
    %26 = tpu.matmul %23, %25, %cst_10 {dimension_numbers = #tpu.dot_dimension_numbers<[1], [0], [0], [1], [0, 0, 1, 1], [], []>} : vector<16x128xbf16>, vector<128x128xbf16>, vector<16x128xf32> -> vector<16x128xf32>
    %27 = arith.addf %21, %26 : vector<16x128xf32>
    %28 = vector.extract_strided_slice %1 {offsets = [1, 1, 0], sizes = [4, 4, 128], strides = [1, 1, 1]} : vector<6x6x128xbf16> to vector<4x4x128xbf16>
    %29 = vector.shape_cast %28 : vector<4x4x128xbf16> to vector<16x128xbf16>
    %30 = vector.extract_strided_slice %2 {offsets = [1, 1, 0, 0], sizes = [1, 1, 128, 128], strides = [1, 1, 1, 1]} : vector<3x3x128x128xbf16> to vector<1x1x128x128xbf16>
    %31 = vector.shape_cast %30 : vector<1x1x128x128xbf16> to vector<128x128xbf16>
    %cst_11 = arith.constant dense<0.000000e+00> : vector<16x128xf32>
    %32 = tpu.matmul %29, %31, %cst_11 {dimension_numbers = #tpu.dot_dimension_numbers<[1], [0], [0], [1], [0, 0, 1, 1], [], []>} : vector<16x128xbf16>, vector<128x128xbf16>, vector<16x128xf32> -> vector<16x128xf32>
    %33 = arith.addf %27, %32 : vector<16x128xf32>
    %34 = vector.extract_strided_slice %1 {offsets = [1, 2, 0], sizes = [4, 4, 128], strides = [1, 1, 1]} : vector<6x6x128xbf16> to vector<4x4x128xbf16>
    %35 = vector.shape_cast %34 : vector<4x4x128xbf16> to vector<16x128xbf16>
    %36 = vector.extract_strided_slice %2 {offsets = [1, 2, 0, 0], sizes = [1, 1, 128, 128], strides = [1, 1, 1, 1]} : vector<3x3x128x128xbf16> to vector<1x1x128x128xbf16>
    %37 = vector.shape_cast %36 : vector<1x1x128x128xbf16> to vector<128x128xbf16>
    %cst_12 = arith.constant dense<0.000000e+00> : vector<16x128xf32>
    %38 = tpu.matmul %35, %37, %cst_12 {dimension_numbers = #tpu.dot_dimension_numbers<[1], [0], [0], [1], [0, 0, 1, 1], [], []>} : vector<16x128xbf16>, vector<128x128xbf16>, vector<16x128xf32> -> vector<16x128xf32>
    %39 = arith.addf %33, %38 : vector<16x128xf32>
    %40 = vector.extract_strided_slice %1 {offsets = [2, 0, 0], sizes = [4, 4, 128], strides = [1, 1, 1]} : vector<6x6x128xbf16> to vector<4x4x128xbf16>
    %41 = vector.shape_cast %40 : vector<4x4x128xbf16> to vector<16x128xbf16>
    %42 = vector.extract_strided_slice %2 {offsets = [2, 0, 0, 0], sizes = [1, 1, 128, 128], strides = [1, 1, 1, 1]} : vector<3x3x128x128xbf16> to vector<1x1x128x128xbf16>
    %43 = vector.shape_cast %42 : vector<1x1x128x128xbf16> to vector<128x128xbf16>
    %cst_13 = arith.constant dense<0.000000e+00> : vector<16x128xf32>
    %44 = tpu.matmul %41, %43, %cst_13 {dimension_numbers = #tpu.dot_dimension_numbers<[1], [0], [0], [1], [0, 0, 1, 1], [], []>} : vector<16x128xbf16>, vector<128x128xbf16>, vector<16x128xf32> -> vector<16x128xf32>
    %45 = arith.addf %39, %44 : vector<16x128xf32>
    %46 = vector.extract_strided_slice %1 {offsets = [2, 1, 0], sizes = [4, 4, 128], strides = [1, 1, 1]} : vector<6x6x128xbf16> to vector<4x4x128xbf16>
    %47 = vector.shape_cast %46 : vector<4x4x128xbf16> to vector<16x128xbf16>
    %48 = vector.extract_strided_slice %2 {offsets = [2, 1, 0, 0], sizes = [1, 1, 128, 128], strides = [1, 1, 1, 1]} : vector<3x3x128x128xbf16> to vector<1x1x128x128xbf16>
    %49 = vector.shape_cast %48 : vector<1x1x128x128xbf16> to vector<128x128xbf16>
    %cst_14 = arith.constant dense<0.000000e+00> : vector<16x128xf32>
    %50 = tpu.matmul %47, %49, %cst_14 {dimension_numbers = #tpu.dot_dimension_numbers<[1], [0], [0], [1], [0, 0, 1, 1], [], []>} : vector<16x128xbf16>, vector<128x128xbf16>, vector<16x128xf32> -> vector<16x128xf32>
    %51 = arith.addf %45, %50 : vector<16x128xf32>
    %52 = vector.extract_strided_slice %1 {offsets = [2, 2, 0], sizes = [4, 4, 128], strides = [1, 1, 1]} : vector<6x6x128xbf16> to vector<4x4x128xbf16>
    %53 = vector.shape_cast %52 : vector<4x4x128xbf16> to vector<16x128xbf16>
    %54 = vector.extract_strided_slice %2 {offsets = [2, 2, 0, 0], sizes = [1, 1, 128, 128], strides = [1, 1, 1, 1]} : vector<3x3x128x128xbf16> to vector<1x1x128x128xbf16>
    %55 = vector.shape_cast %54 : vector<1x1x128x128xbf16> to vector<128x128xbf16>
    %cst_15 = arith.constant dense<0.000000e+00> : vector<16x128xf32>
    %56 = tpu.matmul %53, %55, %cst_15 {dimension_numbers = #tpu.dot_dimension_numbers<[1], [0], [0], [1], [0, 0, 1, 1], [], []>} : vector<16x128xbf16>, vector<128x128xbf16>, vector<16x128xf32> -> vector<16x128xf32>
    %57 = arith.addf %51, %56 : vector<16x128xf32>
    %c0_16 = arith.constant 0 : index
    %c0_17 = arith.constant 0 : index
    %58 = vector.load %arg4[%c0_16, %c0_17] : memref<1x128xf32, #tpu.memory_space<vmem>>, vector<1x128xf32>
    %59 = vector.broadcast %58 : vector<1x128xf32> to vector<16x128xf32>
    %60 = arith.mulf %57, %59 : vector<16x128xf32>
    %c0_18 = arith.constant 0 : index
    %c0_19 = arith.constant 0 : index
    %61 = vector.load %arg5[%c0_18, %c0_19] : memref<1x128xf32, #tpu.memory_space<vmem>>, vector<1x128xf32>
    %62 = vector.broadcast %61 : vector<1x128xf32> to vector<16x128xf32>
    %63 = arith.addf %60, %62 : vector<16x128xf32>
    %cst_20 = arith.constant 0.000000e+00 : f32
    %64 = vector.broadcast %cst_20 : f32 to vector<16x128xf32>
    %65 = arith.maximumf %63, %64 : vector<16x128xf32>
    %66 = vector.shape_cast %65 : vector<16x128xf32> to vector<1x4x4x128xf32>
    %67 = arith.truncf %66 : vector<1x4x4x128xf32> to vector<1x4x4x128xbf16>
    %c0_21 = arith.constant 0 : index
    %c0_22 = arith.constant 0 : index
    %c0_23 = arith.constant 0 : index
    %c0_24 = arith.constant 0 : index
    %68 = vector.load %arg6[%c0_21, %c0_22, %c0_23, %c0_24] : memref<1x4x4x128xbf16, #tpu.memory_space<vmem>>, vector<1x4x4x128xbf16>
    tpu.vector_store %arg6[%c0_21, %c0_22, %c0_23, %c0_24], %67 {strides = array<i32>} : memref<1x4x4x128xbf16, #tpu.memory_space<vmem>>, vector<1x4x4x128xbf16>,
    return
  }
  func.func @transform_0(%arg0: i32, %arg1: i32) -> (i32, i32, i32, i32) {
    %c0_i32 = arith.constant 0 : i32
    %c0_i32_0 = arith.constant 0 : i32
    %c0_i32_1 = arith.constant 0 : i32
    %c0_i32_2 = arith.constant 0 : i32
    return %arg0, %c0_i32, %c0_i32_0, %c0_i32_1 : i32, i32, i32, i32
  }
  func.func @transform_1(%arg0: i32, %arg1: i32) -> (i32, i32, i32, i32) {
    %c0_i32 = arith.constant 0 : i32
    %c0_i32_0 = arith.constant 0 : i32
    %c0_i32_1 = arith.constant 0 : i32
    %c0_i32_2 = arith.constant 0 : i32
    return %c0_i32, %c0_i32_0, %c0_i32_1, %arg1 : i32, i32, i32, i32
  }
  func.func @transform_2(%arg0: i32, %arg1: i32) -> (i32, i32) {
    %c0_i32 = arith.constant 0 : i32
    %c0_i32_0 = arith.constant 0 : i32
    return %c0_i32, %arg1 : i32, i32
  }
  func.func @transform_3(%arg0: i32, %arg1: i32) -> (i32, i32) {
    %c0_i32 = arith.constant 0 : i32
    %c0_i32_0 = arith.constant 0 : i32
    return %c0_i32, %arg1 : i32, i32
  }
  func.func @transform_4(%arg0: i32, %arg1: i32) -> (i32, i32, i32, i32) {
    %c0_i32 = arith.constant 0 : i32
    %c0_i32_0 = arith.constant 0 : i32
    %c0_i32_1 = arith.constant 0 : i32
    return %arg0, %c0_i32, %c0_i32_0, %arg1 : i32, i32, i32, i32
  }
}

module attributes {stable_mosaic.version = 11 : i64} {
  func.func @_avgpool2_kernel(%arg0: i32, %arg1: memref<2x2x2x256xbf16, #tpu.memory_space<vmem>>, %arg2: memref<2x2x128xbf16, #tpu.memory_space<vmem>>) attributes {dimension_semantics = [#tpu.dimension_semantics<parallel>], iteration_bounds = array<i64: 2>, scalar_prefetch = 0 : i64, scratch_operands = 0 : i64, tpu.core_type = #tpu.core_type<tc>, window_params = [{transform_indices = @transform_0, window_bounds = array<i64: 2, 2, 2, 256>}, {transform_indices = @transform_1, window_bounds = array<i64: 2, 2, 128>}]} {
    %c0 = arith.constant 0 : index
    %c0_0 = arith.constant 0 : index
    %c0_1 = arith.constant 0 : index
    %c0_2 = arith.constant 0 : index
    %0 = vector.load %arg1[%c0, %c0_0, %c0_1, %c0_2] : memref<2x2x2x256xbf16, #tpu.memory_space<vmem>>, vector<2x2x2x256xbf16>
    %1 = arith.extf %0 : vector<2x2x2x256xbf16> to vector<2x2x2x256xf32>
    %2 = vector.extract_strided_slice %1 {offsets = [0, 0, 0, 0], sizes = [2, 1, 2, 256], strides = [1, 1, 1, 1]} : vector<2x2x2x256xf32> to vector<2x1x2x256xf32>
    %3 = vector.shape_cast %2 : vector<2x1x2x256xf32> to vector<2x2x256xf32>
    %4 = vector.extract_strided_slice %1 {offsets = [0, 1, 0, 0], sizes = [2, 1, 2, 256], strides = [1, 1, 1, 1]} : vector<2x2x2x256xf32> to vector<2x1x2x256xf32>
    %5 = vector.shape_cast %4 : vector<2x1x2x256xf32> to vector<2x2x256xf32>
    %6 = arith.addf %3, %5 : vector<2x2x256xf32>
    %7 = vector.extract_strided_slice %6 {offsets = [0, 0, 0], sizes = [2, 2, 128], strides = [1, 1, 1]} : vector<2x2x256xf32> to vector<2x2x128xf32>
    %8 = vector.extract_strided_slice %6 {offsets = [0, 0, 128], sizes = [2, 2, 128], strides = [1, 1, 1]} : vector<2x2x256xf32> to vector<2x2x128xf32>
    %9 = arith.addf %7, %8 : vector<2x2x128xf32>
    %cst = arith.constant 2.500000e-01 : f32
    %10 = vector.broadcast %cst : f32 to vector<2x2x128xf32>
    %11 = arith.mulf %9, %10 : vector<2x2x128xf32>
    %12 = arith.truncf %11 : vector<2x2x128xf32> to vector<2x2x128xbf16>
    %c0_3 = arith.constant 0 : index
    %c0_4 = arith.constant 0 : index
    %c0_5 = arith.constant 0 : index
    %13 = vector.load %arg2[%c0_3, %c0_4, %c0_5] : memref<2x2x128xbf16, #tpu.memory_space<vmem>>, vector<2x2x128xbf16>
    tpu.vector_store %arg2[%c0_3, %c0_4, %c0_5], %12 {strides = array<i32>} : memref<2x2x128xbf16, #tpu.memory_space<vmem>>, vector<2x2x128xbf16>,
    return
  }
  func.func @transform_0(%arg0: i32) -> (i32, i32, i32, i32) {
    %c0_i32 = arith.constant 0 : i32
    %c0_i32_0 = arith.constant 0 : i32
    %c0_i32_1 = arith.constant 0 : i32
    %c0_i32_2 = arith.constant 0 : i32
    return %arg0, %c0_i32, %c0_i32_0, %c0_i32_1 : i32, i32, i32, i32
  }
  func.func @transform_1(%arg0: i32) -> (i32, i32, i32) {
    %c0_i32 = arith.constant 0 : i32
    %c0_i32_0 = arith.constant 0 : i32
    %c0_i32_1 = arith.constant 0 : i32
    return %arg0, %c0_i32, %c0_i32_0 : i32, i32, i32
  }
}

module attributes {stable_mosaic.version = 11 : i64} {
  func.func @_fused_mm_kernel(%arg0: i32, %arg1: i32, %arg2: i32, %arg3: memref<16x128xbf16, #tpu.memory_space<vmem>>, %arg4: memref<128x128xbf16, #tpu.memory_space<vmem>>, %arg5: memref<1x128xf32, #tpu.memory_space<vmem>>, %arg6: memref<1x128xf32, #tpu.memory_space<vmem>>, %arg7: memref<16x128xbf16, #tpu.memory_space<vmem>>, %arg8: memref<16x128xf32, #tpu.memory_space<vmem>>) attributes {dimension_semantics = [#tpu.dimension_semantics<parallel>, #tpu.dimension_semantics<parallel>, #tpu.dimension_semantics<arbitrary>], iteration_bounds = array<i64: 1, 1, 1>, scalar_prefetch = 0 : i64, scratch_operands = 1 : i64, tpu.core_type = #tpu.core_type<tc>, window_params = [{transform_indices = @transform_0, window_bounds = array<i64: 16, 128>}, {transform_indices = @transform_1, window_bounds = array<i64: 128, 128>}, {transform_indices = @transform_2, window_bounds = array<i64: 1, 128>}, {transform_indices = @transform_3, window_bounds = array<i64: 1, 128>}, {transform_indices = @transform_4, window_bounds = array<i64: 16, 128>}]} {
    %c0_i32 = arith.constant 0 : i32
    %0 = arith.cmpi eq, %arg2, %c0_i32 : i32
    %1 = arith.extui %0 : i1 to i32
    %c0_i32_0 = arith.constant 0 : i32
    %2 = arith.cmpi ne, %1, %c0_i32_0 : i32
    scf.if %2 {
      %cst_10 = arith.constant 0.000000e+00 : f32
      %12 = vector.broadcast %cst_10 : f32 to vector<16x128xf32>
      %c0_11 = arith.constant 0 : index
      %c0_12 = arith.constant 0 : index
      %13 = vector.load %arg8[%c0_11, %c0_12] : memref<16x128xf32, #tpu.memory_space<vmem>>, vector<16x128xf32>
      tpu.vector_store %arg8[%c0_11, %c0_12], %12 {strides = array<i32>} : memref<16x128xf32, #tpu.memory_space<vmem>>, vector<16x128xf32>,
    } else {
    }
    %c0 = arith.constant 0 : index
    %c0_1 = arith.constant 0 : index
    %3 = vector.load %arg8[%c0, %c0_1] : memref<16x128xf32, #tpu.memory_space<vmem>>, vector<16x128xf32>
    %c0_2 = arith.constant 0 : index
    %c0_3 = arith.constant 0 : index
    %4 = vector.load %arg3[%c0_2, %c0_3] : memref<16x128xbf16, #tpu.memory_space<vmem>>, vector<16x128xbf16>
    %c0_4 = arith.constant 0 : index
    %c0_5 = arith.constant 0 : index
    %5 = vector.load %arg4[%c0_4, %c0_5] : memref<128x128xbf16, #tpu.memory_space<vmem>>, vector<128x128xbf16>
    %cst = arith.constant dense<0.000000e+00> : vector<16x128xf32>
    %6 = tpu.matmul %4, %5, %cst {dimension_numbers = #tpu.dot_dimension_numbers<[1], [0], [0], [1], [0, 0, 1, 1], [], []>} : vector<16x128xbf16>, vector<128x128xbf16>, vector<16x128xf32> -> vector<16x128xf32>
    %7 = arith.addf %3, %6 : vector<16x128xf32>
    %c0_6 = arith.constant 0 : index
    %c0_7 = arith.constant 0 : index
    %8 = vector.load %arg8[%c0_6, %c0_7] : memref<16x128xf32, #tpu.memory_space<vmem>>, vector<16x128xf32>
    tpu.vector_store %arg8[%c0_6, %c0_7], %7 {strides = array<i32>} : memref<16x128xf32, #tpu.memory_space<vmem>>, vector<16x128xf32>,
    %c0_i32_8 = arith.constant 0 : i32
    %9 = arith.cmpi eq, %arg2, %c0_i32_8 : i32
    %10 = arith.extui %9 : i1 to i32
    %c0_i32_9 = arith.constant 0 : i32
    %11 = arith.cmpi ne, %10, %c0_i32_9 : i32
    scf.if %11 {
      %c0_10 = arith.constant 0 : index
      %c0_11 = arith.constant 0 : index
      %12 = vector.load %arg8[%c0_10, %c0_11] : memref<16x128xf32, #tpu.memory_space<vmem>>, vector<16x128xf32>
      %c0_12 = arith.constant 0 : index
      %c0_13 = arith.constant 0 : index
      %13 = vector.load %arg5[%c0_12, %c0_13] : memref<1x128xf32, #tpu.memory_space<vmem>>, vector<1x128xf32>
      %14 = vector.broadcast %13 : vector<1x128xf32> to vector<16x128xf32>
      %15 = arith.mulf %12, %14 : vector<16x128xf32>
      %c0_14 = arith.constant 0 : index
      %c0_15 = arith.constant 0 : index
      %16 = vector.load %arg6[%c0_14, %c0_15] : memref<1x128xf32, #tpu.memory_space<vmem>>, vector<1x128xf32>
      %17 = vector.broadcast %16 : vector<1x128xf32> to vector<16x128xf32>
      %18 = arith.addf %15, %17 : vector<16x128xf32>
      %19 = arith.truncf %18 : vector<16x128xf32> to vector<16x128xbf16>
      %c0_16 = arith.constant 0 : index
      %c0_17 = arith.constant 0 : index
      %20 = vector.load %arg7[%c0_16, %c0_17] : memref<16x128xbf16, #tpu.memory_space<vmem>>, vector<16x128xbf16>
      tpu.vector_store %arg7[%c0_16, %c0_17], %19 {strides = array<i32>} : memref<16x128xbf16, #tpu.memory_space<vmem>>, vector<16x128xbf16>,
    } else {
    }
    return
  }
  func.func @transform_0(%arg0: i32, %arg1: i32, %arg2: i32) -> (i32, i32) {
    %c0_i32 = arith.constant 0 : i32
    return %arg0, %arg2 : i32, i32
  }
  func.func @transform_1(%arg0: i32, %arg1: i32, %arg2: i32) -> (i32, i32) {
    %c0_i32 = arith.constant 0 : i32
    return %arg2, %arg1 : i32, i32
  }
  func.func @transform_2(%arg0: i32, %arg1: i32, %arg2: i32) -> (i32, i32) {
    %c0_i32 = arith.constant 0 : i32
    %c0_i32_0 = arith.constant 0 : i32
    return %c0_i32, %arg1 : i32, i32
  }
  func.func @transform_3(%arg0: i32, %arg1: i32, %arg2: i32) -> (i32, i32) {
    %c0_i32 = arith.constant 0 : i32
    %c0_i32_0 = arith.constant 0 : i32
    return %c0_i32, %arg1 : i32, i32
  }
  func.func @transform_4(%arg0: i32, %arg1: i32, %arg2: i32) -> (i32, i32) {
    %c0_i32 = arith.constant 0 : i32
    return %arg0, %arg1 : i32, i32
  }
}

module attributes {stable_mosaic.version = 11 : i64} {
  func.func @_fused_mm_kernel(%arg0: i32, %arg1: i32, %arg2: i32, %arg3: memref<16x128xbf16, #tpu.memory_space<vmem>>, %arg4: memref<128x128xbf16, #tpu.memory_space<vmem>>, %arg5: memref<1x128xf32, #tpu.memory_space<vmem>>, %arg6: memref<1x128xf32, #tpu.memory_space<vmem>>, %arg7: memref<16x128xbf16, #tpu.memory_space<vmem>>, %arg8: memref<16x128xbf16, #tpu.memory_space<vmem>>, %arg9: memref<16x128xf32, #tpu.memory_space<vmem>>) attributes {dimension_semantics = [#tpu.dimension_semantics<parallel>, #tpu.dimension_semantics<parallel>, #tpu.dimension_semantics<arbitrary>], iteration_bounds = array<i64: 1, 1, 1>, scalar_prefetch = 0 : i64, scratch_operands = 1 : i64, tpu.core_type = #tpu.core_type<tc>, window_params = [{transform_indices = @transform_0, window_bounds = array<i64: 16, 128>}, {transform_indices = @transform_1, window_bounds = array<i64: 128, 128>}, {transform_indices = @transform_2, window_bounds = array<i64: 1, 128>}, {transform_indices = @transform_3, window_bounds = array<i64: 1, 128>}, {transform_indices = @transform_4, window_bounds = array<i64: 16, 128>}, {transform_indices = @transform_5, window_bounds = array<i64: 16, 128>}]} {
    %c0_i32 = arith.constant 0 : i32
    %0 = arith.cmpi eq, %arg2, %c0_i32 : i32
    %1 = arith.extui %0 : i1 to i32
    %c0_i32_0 = arith.constant 0 : i32
    %2 = arith.cmpi ne, %1, %c0_i32_0 : i32
    scf.if %2 {
      %cst_10 = arith.constant 0.000000e+00 : f32
      %12 = vector.broadcast %cst_10 : f32 to vector<16x128xf32>
      %c0_11 = arith.constant 0 : index
      %c0_12 = arith.constant 0 : index
      %13 = vector.load %arg9[%c0_11, %c0_12] : memref<16x128xf32, #tpu.memory_space<vmem>>, vector<16x128xf32>
      tpu.vector_store %arg9[%c0_11, %c0_12], %12 {strides = array<i32>} : memref<16x128xf32, #tpu.memory_space<vmem>>, vector<16x128xf32>,
    } else {
    }
    %c0 = arith.constant 0 : index
    %c0_1 = arith.constant 0 : index
    %3 = vector.load %arg9[%c0, %c0_1] : memref<16x128xf32, #tpu.memory_space<vmem>>, vector<16x128xf32>
    %c0_2 = arith.constant 0 : index
    %c0_3 = arith.constant 0 : index
    %4 = vector.load %arg3[%c0_2, %c0_3] : memref<16x128xbf16, #tpu.memory_space<vmem>>, vector<16x128xbf16>
    %c0_4 = arith.constant 0 : index
    %c0_5 = arith.constant 0 : index
    %5 = vector.load %arg4[%c0_4, %c0_5] : memref<128x128xbf16, #tpu.memory_space<vmem>>, vector<128x128xbf16>
    %cst = arith.constant dense<0.000000e+00> : vector<16x128xf32>
    %6 = tpu.matmul %4, %5, %cst {dimension_numbers = #tpu.dot_dimension_numbers<[1], [0], [0], [1], [0, 0, 1, 1], [], []>} : vector<16x128xbf16>, vector<128x128xbf16>, vector<16x128xf32> -> vector<16x128xf32>
    %7 = arith.addf %3, %6 : vector<16x128xf32>
    %c0_6 = arith.constant 0 : index
    %c0_7 = arith.constant 0 : index
    %8 = vector.load %arg9[%c0_6, %c0_7] : memref<16x128xf32, #tpu.memory_space<vmem>>, vector<16x128xf32>
    tpu.vector_store %arg9[%c0_6, %c0_7], %7 {strides = array<i32>} : memref<16x128xf32, #tpu.memory_space<vmem>>, vector<16x128xf32>,
    %c0_i32_8 = arith.constant 0 : i32
    %9 = arith.cmpi eq, %arg2, %c0_i32_8 : i32
    %10 = arith.extui %9 : i1 to i32
    %c0_i32_9 = arith.constant 0 : i32
    %11 = arith.cmpi ne, %10, %c0_i32_9 : i32
    scf.if %11 {
      %c0_10 = arith.constant 0 : index
      %c0_11 = arith.constant 0 : index
      %12 = vector.load %arg9[%c0_10, %c0_11] : memref<16x128xf32, #tpu.memory_space<vmem>>, vector<16x128xf32>
      %c0_12 = arith.constant 0 : index
      %c0_13 = arith.constant 0 : index
      %13 = vector.load %arg5[%c0_12, %c0_13] : memref<1x128xf32, #tpu.memory_space<vmem>>, vector<1x128xf32>
      %14 = vector.broadcast %13 : vector<1x128xf32> to vector<16x128xf32>
      %15 = arith.mulf %12, %14 : vector<16x128xf32>
      %c0_14 = arith.constant 0 : index
      %c0_15 = arith.constant 0 : index
      %16 = vector.load %arg6[%c0_14, %c0_15] : memref<1x128xf32, #tpu.memory_space<vmem>>, vector<1x128xf32>
      %17 = vector.broadcast %16 : vector<1x128xf32> to vector<16x128xf32>
      %18 = arith.addf %15, %17 : vector<16x128xf32>
      %c0_16 = arith.constant 0 : index
      %c0_17 = arith.constant 0 : index
      %19 = vector.load %arg7[%c0_16, %c0_17] : memref<16x128xbf16, #tpu.memory_space<vmem>>, vector<16x128xbf16>
      %20 = arith.extf %19 : vector<16x128xbf16> to vector<16x128xf32>
      %21 = arith.addf %18, %20 : vector<16x128xf32>
      %cst_18 = arith.constant 0.000000e+00 : f32
      %22 = vector.broadcast %cst_18 : f32 to vector<16x128xf32>
      %23 = arith.maximumf %21, %22 : vector<16x128xf32>
      %24 = arith.truncf %23 : vector<16x128xf32> to vector<16x128xbf16>
      %c0_19 = arith.constant 0 : index
      %c0_20 = arith.constant 0 : index
      %25 = vector.load %arg8[%c0_19, %c0_20] : memref<16x128xbf16, #tpu.memory_space<vmem>>, vector<16x128xbf16>
      tpu.vector_store %arg8[%c0_19, %c0_20], %24 {strides = array<i32>} : memref<16x128xbf16, #tpu.memory_space<vmem>>, vector<16x128xbf16>,
    } else {
    }
    return
  }
  func.func @transform_0(%arg0: i32, %arg1: i32, %arg2: i32) -> (i32, i32) {
    %c0_i32 = arith.constant 0 : i32
    return %arg0, %arg2 : i32, i32
  }
  func.func @transform_1(%arg0: i32, %arg1: i32, %arg2: i32) -> (i32, i32) {
    %c0_i32 = arith.constant 0 : i32
    return %arg2, %arg1 : i32, i32
  }
  func.func @transform_2(%arg0: i32, %arg1: i32, %arg2: i32) -> (i32, i32) {
    %c0_i32 = arith.constant 0 : i32
    %c0_i32_0 = arith.constant 0 : i32
    return %c0_i32, %arg1 : i32, i32
  }
  func.func @transform_3(%arg0: i32, %arg1: i32, %arg2: i32) -> (i32, i32) {
    %c0_i32 = arith.constant 0 : i32
    %c0_i32_0 = arith.constant 0 : i32
    return %c0_i32, %arg1 : i32, i32
  }
  func.func @transform_4(%arg0: i32, %arg1: i32, %arg2: i32) -> (i32, i32) {
    %c0_i32 = arith.constant 0 : i32
    return %arg0, %arg1 : i32, i32
  }
  func.func @transform_5(%arg0: i32, %arg1: i32, %arg2: i32) -> (i32, i32) {
    %c0_i32 = arith.constant 0 : i32
    return %arg0, %arg1 : i32, i32
  }
}

module attributes {stable_mosaic.version = 11 : i64} {
  func.func @_fused_mm_kernel(%arg0: i32, %arg1: i32, %arg2: i32, %arg3: memref<16x128xbf16, #tpu.memory_space<vmem>>, %arg4: memref<128x128xbf16, #tpu.memory_space<vmem>>, %arg5: memref<1x128xf32, #tpu.memory_space<vmem>>, %arg6: memref<1x128xf32, #tpu.memory_space<vmem>>, %arg7: memref<16x128xbf16, #tpu.memory_space<vmem>>, %arg8: memref<16x128xf32, #tpu.memory_space<vmem>>) attributes {dimension_semantics = [#tpu.dimension_semantics<parallel>, #tpu.dimension_semantics<parallel>, #tpu.dimension_semantics<arbitrary>], iteration_bounds = array<i64: 1, 1, 1>, scalar_prefetch = 0 : i64, scratch_operands = 1 : i64, tpu.core_type = #tpu.core_type<tc>, window_params = [{transform_indices = @transform_0, window_bounds = array<i64: 16, 128>}, {transform_indices = @transform_1, window_bounds = array<i64: 128, 128>}, {transform_indices = @transform_2, window_bounds = array<i64: 1, 128>}, {transform_indices = @transform_3, window_bounds = array<i64: 1, 128>}, {transform_indices = @transform_4, window_bounds = array<i64: 16, 128>}]} {
    %c0_i32 = arith.constant 0 : i32
    %0 = arith.cmpi eq, %arg2, %c0_i32 : i32
    %1 = arith.extui %0 : i1 to i32
    %c0_i32_0 = arith.constant 0 : i32
    %2 = arith.cmpi ne, %1, %c0_i32_0 : i32
    scf.if %2 {
      %cst_10 = arith.constant 0.000000e+00 : f32
      %12 = vector.broadcast %cst_10 : f32 to vector<16x128xf32>
      %c0_11 = arith.constant 0 : index
      %c0_12 = arith.constant 0 : index
      %13 = vector.load %arg8[%c0_11, %c0_12] : memref<16x128xf32, #tpu.memory_space<vmem>>, vector<16x128xf32>
      tpu.vector_store %arg8[%c0_11, %c0_12], %12 {strides = array<i32>} : memref<16x128xf32, #tpu.memory_space<vmem>>, vector<16x128xf32>,
    } else {
    }
    %c0 = arith.constant 0 : index
    %c0_1 = arith.constant 0 : index
    %3 = vector.load %arg8[%c0, %c0_1] : memref<16x128xf32, #tpu.memory_space<vmem>>, vector<16x128xf32>
    %c0_2 = arith.constant 0 : index
    %c0_3 = arith.constant 0 : index
    %4 = vector.load %arg3[%c0_2, %c0_3] : memref<16x128xbf16, #tpu.memory_space<vmem>>, vector<16x128xbf16>
    %c0_4 = arith.constant 0 : index
    %c0_5 = arith.constant 0 : index
    %5 = vector.load %arg4[%c0_4, %c0_5] : memref<128x128xbf16, #tpu.memory_space<vmem>>, vector<128x128xbf16>
    %cst = arith.constant dense<0.000000e+00> : vector<16x128xf32>
    %6 = tpu.matmul %4, %5, %cst {dimension_numbers = #tpu.dot_dimension_numbers<[1], [0], [0], [1], [0, 0, 1, 1], [], []>} : vector<16x128xbf16>, vector<128x128xbf16>, vector<16x128xf32> -> vector<16x128xf32>
    %7 = arith.addf %3, %6 : vector<16x128xf32>
    %c0_6 = arith.constant 0 : index
    %c0_7 = arith.constant 0 : index
    %8 = vector.load %arg8[%c0_6, %c0_7] : memref<16x128xf32, #tpu.memory_space<vmem>>, vector<16x128xf32>
    tpu.vector_store %arg8[%c0_6, %c0_7], %7 {strides = array<i32>} : memref<16x128xf32, #tpu.memory_space<vmem>>, vector<16x128xf32>,
    %c0_i32_8 = arith.constant 0 : i32
    %9 = arith.cmpi eq, %arg2, %c0_i32_8 : i32
    %10 = arith.extui %9 : i1 to i32
    %c0_i32_9 = arith.constant 0 : i32
    %11 = arith.cmpi ne, %10, %c0_i32_9 : i32
    scf.if %11 {
      %c0_10 = arith.constant 0 : index
      %c0_11 = arith.constant 0 : index
      %12 = vector.load %arg8[%c0_10, %c0_11] : memref<16x128xf32, #tpu.memory_space<vmem>>, vector<16x128xf32>
      %c0_12 = arith.constant 0 : index
      %c0_13 = arith.constant 0 : index
      %13 = vector.load %arg5[%c0_12, %c0_13] : memref<1x128xf32, #tpu.memory_space<vmem>>, vector<1x128xf32>
      %14 = vector.broadcast %13 : vector<1x128xf32> to vector<16x128xf32>
      %15 = arith.mulf %12, %14 : vector<16x128xf32>
      %c0_14 = arith.constant 0 : index
      %c0_15 = arith.constant 0 : index
      %16 = vector.load %arg6[%c0_14, %c0_15] : memref<1x128xf32, #tpu.memory_space<vmem>>, vector<1x128xf32>
      %17 = vector.broadcast %16 : vector<1x128xf32> to vector<16x128xf32>
      %18 = arith.addf %15, %17 : vector<16x128xf32>
      %cst_16 = arith.constant 0.000000e+00 : f32
      %19 = vector.broadcast %cst_16 : f32 to vector<16x128xf32>
      %20 = arith.maximumf %18, %19 : vector<16x128xf32>
      %21 = arith.truncf %20 : vector<16x128xf32> to vector<16x128xbf16>
      %c0_17 = arith.constant 0 : index
      %c0_18 = arith.constant 0 : index
      %22 = vector.load %arg7[%c0_17, %c0_18] : memref<16x128xbf16, #tpu.memory_space<vmem>>, vector<16x128xbf16>
      tpu.vector_store %arg7[%c0_17, %c0_18], %21 {strides = array<i32>} : memref<16x128xbf16, #tpu.memory_space<vmem>>, vector<16x128xbf16>,
    } else {
    }
    return
  }
  func.func @transform_0(%arg0: i32, %arg1: i32, %arg2: i32) -> (i32, i32) {
    %c0_i32 = arith.constant 0 : i32
    return %arg0, %arg2 : i32, i32
  }
  func.func @transform_1(%arg0: i32, %arg1: i32, %arg2: i32) -> (i32, i32) {
    %c0_i32 = arith.constant 0 : i32
    return %arg2, %arg1 : i32, i32
  }
  func.func @transform_2(%arg0: i32, %arg1: i32, %arg2: i32) -> (i32, i32) {
    %c0_i32 = arith.constant 0 : i32
    %c0_i32_0 = arith.constant 0 : i32
    return %c0_i32, %arg1 : i32, i32
  }
  func.func @transform_3(%arg0: i32, %arg1: i32, %arg2: i32) -> (i32, i32) {
    %c0_i32 = arith.constant 0 : i32
    %c0_i32_0 = arith.constant 0 : i32
    return %c0_i32, %arg1 : i32, i32
  }
  func.func @transform_4(%arg0: i32, %arg1: i32, %arg2: i32) -> (i32, i32) {
    %c0_i32 = arith.constant 0 : i32
    return %arg0, %arg1 : i32, i32
  }
}

module attributes {stable_mosaic.version = 11 : i64} {
  func.func @_conv3x3_kernel(%arg0: i32, %arg1: i32, %arg2: memref<1x4x4x128xbf16, #tpu.memory_space<vmem>>, %arg3: memref<3x3x128x128xbf16, #tpu.memory_space<vmem>>, %arg4: memref<1x128xf32, #tpu.memory_space<vmem>>, %arg5: memref<1x128xf32, #tpu.memory_space<vmem>>, %arg6: memref<1x2x2x128xbf16, #tpu.memory_space<vmem>>) attributes {dimension_semantics = [#tpu.dimension_semantics<parallel>, #tpu.dimension_semantics<parallel>], iteration_bounds = array<i64: 2, 1>, scalar_prefetch = 0 : i64, scratch_operands = 0 : i64, tpu.core_type = #tpu.core_type<tc>, window_params = [{transform_indices = @transform_0, window_bounds = array<i64: 1, 4, 4, 128>}, {transform_indices = @transform_1, window_bounds = array<i64: 3, 3, 128, 128>}, {transform_indices = @transform_2, window_bounds = array<i64: 1, 128>}, {transform_indices = @transform_3, window_bounds = array<i64: 1, 128>}, {transform_indices = @transform_4, window_bounds = array<i64: 1, 2, 2, 128>}]} {
    %c0 = arith.constant 0 : index
    %c0_0 = arith.constant 0 : index
    %c0_1 = arith.constant 0 : index
    %c0_2 = arith.constant 0 : index
    %0 = vector.load %arg2[%c0, %c0_0, %c0_1, %c0_2] : memref<1x4x4x128xbf16, #tpu.memory_space<vmem>>, vector<1x4x4x128xbf16>
    %1 = vector.shape_cast %0 : vector<1x4x4x128xbf16> to vector<4x4x128xbf16>
    %c0_3 = arith.constant 0 : index
    %c0_4 = arith.constant 0 : index
    %c0_5 = arith.constant 0 : index
    %c0_6 = arith.constant 0 : index
    %2 = vector.load %arg3[%c0_3, %c0_4, %c0_5, %c0_6] : memref<3x3x128x128xbf16, #tpu.memory_space<vmem>>, vector<3x3x128x128xbf16>
    %cst = arith.constant 0.000000e+00 : f32
    %3 = vector.broadcast %cst : f32 to vector<4x128xf32>
    %4 = vector.extract_strided_slice %1 {offsets = [0, 0, 0], sizes = [2, 2, 128], strides = [1, 1, 1]} : vector<4x4x128xbf16> to vector<2x2x128xbf16>
    %5 = vector.shape_cast %4 : vector<2x2x128xbf16> to vector<4x128xbf16>
    %6 = vector.extract_strided_slice %2 {offsets = [0, 0, 0, 0], sizes = [1, 1, 128, 128], strides = [1, 1, 1, 1]} : vector<3x3x128x128xbf16> to vector<1x1x128x128xbf16>
    %7 = vector.shape_cast %6 : vector<1x1x128x128xbf16> to vector<128x128xbf16>
    %cst_7 = arith.constant dense<0.000000e+00> : vector<4x128xf32>
    %8 = tpu.matmul %5, %7, %cst_7 {dimension_numbers = #tpu.dot_dimension_numbers<[1], [0], [0], [1], [0, 0, 1, 1], [], []>} : vector<4x128xbf16>, vector<128x128xbf16>, vector<4x128xf32> -> vector<4x128xf32>
    %9 = arith.addf %3, %8 : vector<4x128xf32>
    %10 = vector.extract_strided_slice %1 {offsets = [0, 1, 0], sizes = [2, 2, 128], strides = [1, 1, 1]} : vector<4x4x128xbf16> to vector<2x2x128xbf16>
    %11 = vector.shape_cast %10 : vector<2x2x128xbf16> to vector<4x128xbf16>
    %12 = vector.extract_strided_slice %2 {offsets = [0, 1, 0, 0], sizes = [1, 1, 128, 128], strides = [1, 1, 1, 1]} : vector<3x3x128x128xbf16> to vector<1x1x128x128xbf16>
    %13 = vector.shape_cast %12 : vector<1x1x128x128xbf16> to vector<128x128xbf16>
    %cst_8 = arith.constant dense<0.000000e+00> : vector<4x128xf32>
    %14 = tpu.matmul %11, %13, %cst_8 {dimension_numbers = #tpu.dot_dimension_numbers<[1], [0], [0], [1], [0, 0, 1, 1], [], []>} : vector<4x128xbf16>, vector<128x128xbf16>, vector<4x128xf32> -> vector<4x128xf32>
    %15 = arith.addf %9, %14 : vector<4x128xf32>
    %16 = vector.extract_strided_slice %1 {offsets = [0, 2, 0], sizes = [2, 2, 128], strides = [1, 1, 1]} : vector<4x4x128xbf16> to vector<2x2x128xbf16>
    %17 = vector.shape_cast %16 : vector<2x2x128xbf16> to vector<4x128xbf16>
    %18 = vector.extract_strided_slice %2 {offsets = [0, 2, 0, 0], sizes = [1, 1, 128, 128], strides = [1, 1, 1, 1]} : vector<3x3x128x128xbf16> to vector<1x1x128x128xbf16>
    %19 = vector.shape_cast %18 : vector<1x1x128x128xbf16> to vector<128x128xbf16>
    %cst_9 = arith.constant dense<0.000000e+00> : vector<4x128xf32>
    %20 = tpu.matmul %17, %19, %cst_9 {dimension_numbers = #tpu.dot_dimension_numbers<[1], [0], [0], [1], [0, 0, 1, 1], [], []>} : vector<4x128xbf16>, vector<128x128xbf16>, vector<4x128xf32> -> vector<4x128xf32>
    %21 = arith.addf %15, %20 : vector<4x128xf32>
    %22 = vector.extract_strided_slice %1 {offsets = [1, 0, 0], sizes = [2, 2, 128], strides = [1, 1, 1]} : vector<4x4x128xbf16> to vector<2x2x128xbf16>
    %23 = vector.shape_cast %22 : vector<2x2x128xbf16> to vector<4x128xbf16>
    %24 = vector.extract_strided_slice %2 {offsets = [1, 0, 0, 0], sizes = [1, 1, 128, 128], strides = [1, 1, 1, 1]} : vector<3x3x128x128xbf16> to vector<1x1x128x128xbf16>
    %25 = vector.shape_cast %24 : vector<1x1x128x128xbf16> to vector<128x128xbf16>
    %cst_10 = arith.constant dense<0.000000e+00> : vector<4x128xf32>
    %26 = tpu.matmul %23, %25, %cst_10 {dimension_numbers = #tpu.dot_dimension_numbers<[1], [0], [0], [1], [0, 0, 1, 1], [], []>} : vector<4x128xbf16>, vector<128x128xbf16>, vector<4x128xf32> -> vector<4x128xf32>
    %27 = arith.addf %21, %26 : vector<4x128xf32>
    %28 = vector.extract_strided_slice %1 {offsets = [1, 1, 0], sizes = [2, 2, 128], strides = [1, 1, 1]} : vector<4x4x128xbf16> to vector<2x2x128xbf16>
    %29 = vector.shape_cast %28 : vector<2x2x128xbf16> to vector<4x128xbf16>
    %30 = vector.extract_strided_slice %2 {offsets = [1, 1, 0, 0], sizes = [1, 1, 128, 128], strides = [1, 1, 1, 1]} : vector<3x3x128x128xbf16> to vector<1x1x128x128xbf16>
    %31 = vector.shape_cast %30 : vector<1x1x128x128xbf16> to vector<128x128xbf16>
    %cst_11 = arith.constant dense<0.000000e+00> : vector<4x128xf32>
    %32 = tpu.matmul %29, %31, %cst_11 {dimension_numbers = #tpu.dot_dimension_numbers<[1], [0], [0], [1], [0, 0, 1, 1], [], []>} : vector<4x128xbf16>, vector<128x128xbf16>, vector<4x128xf32> -> vector<4x128xf32>
    %33 = arith.addf %27, %32 : vector<4x128xf32>
    %34 = vector.extract_strided_slice %1 {offsets = [1, 2, 0], sizes = [2, 2, 128], strides = [1, 1, 1]} : vector<4x4x128xbf16> to vector<2x2x128xbf16>
    %35 = vector.shape_cast %34 : vector<2x2x128xbf16> to vector<4x128xbf16>
    %36 = vector.extract_strided_slice %2 {offsets = [1, 2, 0, 0], sizes = [1, 1, 128, 128], strides = [1, 1, 1, 1]} : vector<3x3x128x128xbf16> to vector<1x1x128x128xbf16>
    %37 = vector.shape_cast %36 : vector<1x1x128x128xbf16> to vector<128x128xbf16>
    %cst_12 = arith.constant dense<0.000000e+00> : vector<4x128xf32>
    %38 = tpu.matmul %35, %37, %cst_12 {dimension_numbers = #tpu.dot_dimension_numbers<[1], [0], [0], [1], [0, 0, 1, 1], [], []>} : vector<4x128xbf16>, vector<128x128xbf16>, vector<4x128xf32> -> vector<4x128xf32>
    %39 = arith.addf %33, %38 : vector<4x128xf32>
    %40 = vector.extract_strided_slice %1 {offsets = [2, 0, 0], sizes = [2, 2, 128], strides = [1, 1, 1]} : vector<4x4x128xbf16> to vector<2x2x128xbf16>
    %41 = vector.shape_cast %40 : vector<2x2x128xbf16> to vector<4x128xbf16>
    %42 = vector.extract_strided_slice %2 {offsets = [2, 0, 0, 0], sizes = [1, 1, 128, 128], strides = [1, 1, 1, 1]} : vector<3x3x128x128xbf16> to vector<1x1x128x128xbf16>
    %43 = vector.shape_cast %42 : vector<1x1x128x128xbf16> to vector<128x128xbf16>
    %cst_13 = arith.constant dense<0.000000e+00> : vector<4x128xf32>
    %44 = tpu.matmul %41, %43, %cst_13 {dimension_numbers = #tpu.dot_dimension_numbers<[1], [0], [0], [1], [0, 0, 1, 1], [], []>} : vector<4x128xbf16>, vector<128x128xbf16>, vector<4x128xf32> -> vector<4x128xf32>
    %45 = arith.addf %39, %44 : vector<4x128xf32>
    %46 = vector.extract_strided_slice %1 {offsets = [2, 1, 0], sizes = [2, 2, 128], strides = [1, 1, 1]} : vector<4x4x128xbf16> to vector<2x2x128xbf16>
    %47 = vector.shape_cast %46 : vector<2x2x128xbf16> to vector<4x128xbf16>
    %48 = vector.extract_strided_slice %2 {offsets = [2, 1, 0, 0], sizes = [1, 1, 128, 128], strides = [1, 1, 1, 1]} : vector<3x3x128x128xbf16> to vector<1x1x128x128xbf16>
    %49 = vector.shape_cast %48 : vector<1x1x128x128xbf16> to vector<128x128xbf16>
    %cst_14 = arith.constant dense<0.000000e+00> : vector<4x128xf32>
    %50 = tpu.matmul %47, %49, %cst_14 {dimension_numbers = #tpu.dot_dimension_numbers<[1], [0], [0], [1], [0, 0, 1, 1], [], []>} : vector<4x128xbf16>, vector<128x128xbf16>, vector<4x128xf32> -> vector<4x128xf32>
    %51 = arith.addf %45, %50 : vector<4x128xf32>
    %52 = vector.extract_strided_slice %1 {offsets = [2, 2, 0], sizes = [2, 2, 128], strides = [1, 1, 1]} : vector<4x4x128xbf16> to vector<2x2x128xbf16>
    %53 = vector.shape_cast %52 : vector<2x2x128xbf16> to vector<4x128xbf16>
    %54 = vector.extract_strided_slice %2 {offsets = [2, 2, 0, 0], sizes = [1, 1, 128, 128], strides = [1, 1, 1, 1]} : vector<3x3x128x128xbf16> to vector<1x1x128x128xbf16>
    %55 = vector.shape_cast %54 : vector<1x1x128x128xbf16> to vector<128x128xbf16>
    %cst_15 = arith.constant dense<0.000000e+00> : vector<4x128xf32>
    %56 = tpu.matmul %53, %55, %cst_15 {dimension_numbers = #tpu.dot_dimension_numbers<[1], [0], [0], [1], [0, 0, 1, 1], [], []>} : vector<4x128xbf16>, vector<128x128xbf16>, vector<4x128xf32> -> vector<4x128xf32>
    %57 = arith.addf %51, %56 : vector<4x128xf32>
    %c0_16 = arith.constant 0 : index
    %c0_17 = arith.constant 0 : index
    %58 = vector.load %arg4[%c0_16, %c0_17] : memref<1x128xf32, #tpu.memory_space<vmem>>, vector<1x128xf32>
    %59 = vector.broadcast %58 : vector<1x128xf32> to vector<4x128xf32>
    %60 = arith.mulf %57, %59 : vector<4x128xf32>
    %c0_18 = arith.constant 0 : index
    %c0_19 = arith.constant 0 : index
    %61 = vector.load %arg5[%c0_18, %c0_19] : memref<1x128xf32, #tpu.memory_space<vmem>>, vector<1x128xf32>
    %62 = vector.broadcast %61 : vector<1x128xf32> to vector<4x128xf32>
    %63 = arith.addf %60, %62 : vector<4x128xf32>
    %cst_20 = arith.constant 0.000000e+00 : f32
    %64 = vector.broadcast %cst_20 : f32 to vector<4x128xf32>
    %65 = arith.maximumf %63, %64 : vector<4x128xf32>
    %66 = vector.shape_cast %65 : vector<4x128xf32> to vector<1x2x2x128xf32>
    %67 = arith.truncf %66 : vector<1x2x2x128xf32> to vector<1x2x2x128xbf16>
    %c0_21 = arith.constant 0 : index
    %c0_22 = arith.constant 0 : index
    %c0_23 = arith.constant 0 : index
    %c0_24 = arith.constant 0 : index
    %68 = vector.load %arg6[%c0_21, %c0_22, %c0_23, %c0_24] : memref<1x2x2x128xbf16, #tpu.memory_space<vmem>>, vector<1x2x2x128xbf16>
    tpu.vector_store %arg6[%c0_21, %c0_22, %c0_23, %c0_24], %67 {strides = array<i32>} : memref<1x2x2x128xbf16, #tpu.memory_space<vmem>>, vector<1x2x2x128xbf16>,
    return
  }
  func.func @transform_0(%arg0: i32, %arg1: i32) -> (i32, i32, i32, i32) {
    %c0_i32 = arith.constant 0 : i32
    %c0_i32_0 = arith.constant 0 : i32
    %c0_i32_1 = arith.constant 0 : i32
    %c0_i32_2 = arith.constant 0 : i32
    return %arg0, %c0_i32, %c0_i32_0, %c0_i32_1 : i32, i32, i32, i32
  }
  func.func @transform_1(%arg0: i32, %arg1: i32) -> (i32, i32, i32, i32) {
    %c0_i32 = arith.constant 0 : i32
    %c0_i32_0 = arith.constant 0 : i32
    %c0_i32_1 = arith.constant 0 : i32
    %c0_i32_2 = arith.constant 0 : i32
    return %c0_i32, %c0_i32_0, %c0_i32_1, %arg1 : i32, i32, i32, i32
  }
  func.func @transform_2(%arg0: i32, %arg1: i32) -> (i32, i32) {
    %c0_i32 = arith.constant 0 : i32
    %c0_i32_0 = arith.constant 0 : i32
    return %c0_i32, %arg1 : i32, i32
  }
  func.func @transform_3(%arg0: i32, %arg1: i32) -> (i32, i32) {
    %c0_i32 = arith.constant 0 : i32
    %c0_i32_0 = arith.constant 0 : i32
    return %c0_i32, %arg1 : i32, i32
  }
  func.func @transform_4(%arg0: i32, %arg1: i32) -> (i32, i32, i32, i32) {
    %c0_i32 = arith.constant 0 : i32
    %c0_i32_0 = arith.constant 0 : i32
    %c0_i32_1 = arith.constant 0 : i32
    return %arg0, %c0_i32, %c0_i32_0, %arg1 : i32, i32, i32, i32
  }
}

module attributes {stable_mosaic.version = 11 : i64} {
  func.func @_avgpool2_kernel(%arg0: i32, %arg1: memref<1x2x1x256xbf16, #tpu.memory_space<vmem>>, %arg2: memref<1x1x128xbf16, #tpu.memory_space<vmem>>) attributes {dimension_semantics = [#tpu.dimension_semantics<parallel>], iteration_bounds = array<i64: 2>, scalar_prefetch = 0 : i64, scratch_operands = 0 : i64, tpu.core_type = #tpu.core_type<tc>, window_params = [{transform_indices = @transform_0, window_bounds = array<i64: 1, 2, 1, 256>}, {transform_indices = @transform_1, window_bounds = array<i64: 1, 1, 128>}]} {
    %c0 = arith.constant 0 : index
    %c0_0 = arith.constant 0 : index
    %c0_1 = arith.constant 0 : index
    %c0_2 = arith.constant 0 : index
    %0 = vector.load %arg1[%c0, %c0_0, %c0_1, %c0_2] : memref<1x2x1x256xbf16, #tpu.memory_space<vmem>>, vector<1x2x1x256xbf16>
    %1 = arith.extf %0 : vector<1x2x1x256xbf16> to vector<1x2x1x256xf32>
    %2 = vector.extract_strided_slice %1 {offsets = [0, 0, 0, 0], sizes = [1, 1, 1, 256], strides = [1, 1, 1, 1]} : vector<1x2x1x256xf32> to vector<1x1x1x256xf32>
    %3 = vector.shape_cast %2 : vector<1x1x1x256xf32> to vector<1x1x256xf32>
    %4 = vector.extract_strided_slice %1 {offsets = [0, 1, 0, 0], sizes = [1, 1, 1, 256], strides = [1, 1, 1, 1]} : vector<1x2x1x256xf32> to vector<1x1x1x256xf32>
    %5 = vector.shape_cast %4 : vector<1x1x1x256xf32> to vector<1x1x256xf32>
    %6 = arith.addf %3, %5 : vector<1x1x256xf32>
    %7 = vector.extract_strided_slice %6 {offsets = [0, 0, 0], sizes = [1, 1, 128], strides = [1, 1, 1]} : vector<1x1x256xf32> to vector<1x1x128xf32>
    %8 = vector.extract_strided_slice %6 {offsets = [0, 0, 128], sizes = [1, 1, 128], strides = [1, 1, 1]} : vector<1x1x256xf32> to vector<1x1x128xf32>
    %9 = arith.addf %7, %8 : vector<1x1x128xf32>
    %cst = arith.constant 2.500000e-01 : f32
    %10 = vector.broadcast %cst : f32 to vector<1x1x128xf32>
    %11 = arith.mulf %9, %10 : vector<1x1x128xf32>
    %12 = arith.truncf %11 : vector<1x1x128xf32> to vector<1x1x128xbf16>
    %c0_3 = arith.constant 0 : index
    %c0_4 = arith.constant 0 : index
    %c0_5 = arith.constant 0 : index
    %13 = vector.load %arg2[%c0_3, %c0_4, %c0_5] : memref<1x1x128xbf16, #tpu.memory_space<vmem>>, vector<1x1x128xbf16>
    tpu.vector_store %arg2[%c0_3, %c0_4, %c0_5], %12 {strides = array<i32>} : memref<1x1x128xbf16, #tpu.memory_space<vmem>>, vector<1x1x128xbf16>,
    return
  }
  func.func @transform_0(%arg0: i32) -> (i32, i32, i32, i32) {
    %c0_i32 = arith.constant 0 : i32
    %c0_i32_0 = arith.constant 0 : i32
    %c0_i32_1 = arith.constant 0 : i32
    %c0_i32_2 = arith.constant 0 : i32
    return %arg0, %c0_i32, %c0_i32_0, %c0_i32_1 : i32, i32, i32, i32
  }
  func.func @transform_1(%arg0: i32) -> (i32, i32, i32) {
    %c0_i32 = arith.constant 0 : i32
    %c0_i32_0 = arith.constant 0 : i32
    %c0_i32_1 = arith.constant 0 : i32
    return %arg0, %c0_i32, %c0_i32_0 : i32, i32, i32
  }
}

module attributes {stable_mosaic.version = 11 : i64} {
  func.func @_fused_mm_kernel(%arg0: i32, %arg1: i32, %arg2: i32, %arg3: memref<16x128xbf16, #tpu.memory_space<vmem>>, %arg4: memref<128x384xbf16, #tpu.memory_space<vmem>>, %arg5: memref<1x384xf32, #tpu.memory_space<vmem>>, %arg6: memref<16x384xbf16, #tpu.memory_space<vmem>>, %arg7: memref<16x384xf32, #tpu.memory_space<vmem>>) attributes {dimension_semantics = [#tpu.dimension_semantics<parallel>, #tpu.dimension_semantics<parallel>, #tpu.dimension_semantics<arbitrary>], iteration_bounds = array<i64: 1, 1, 1>, scalar_prefetch = 0 : i64, scratch_operands = 1 : i64, tpu.core_type = #tpu.core_type<tc>, window_params = [{transform_indices = @transform_0, window_bounds = array<i64: 16, 128>}, {transform_indices = @transform_1, window_bounds = array<i64: 128, 384>}, {transform_indices = @transform_2, window_bounds = array<i64: 1, 384>}, {transform_indices = @transform_3, window_bounds = array<i64: 16, 384>}]} {
    %c0_i32 = arith.constant 0 : i32
    %0 = arith.cmpi eq, %arg2, %c0_i32 : i32
    %1 = arith.extui %0 : i1 to i32
    %c0_i32_0 = arith.constant 0 : i32
    %2 = arith.cmpi ne, %1, %c0_i32_0 : i32
    scf.if %2 {
      %cst_10 = arith.constant 0.000000e+00 : f32
      %12 = vector.broadcast %cst_10 : f32 to vector<16x384xf32>
      %c0_11 = arith.constant 0 : index
      %c0_12 = arith.constant 0 : index
      %13 = vector.load %arg7[%c0_11, %c0_12] : memref<16x384xf32, #tpu.memory_space<vmem>>, vector<16x384xf32>
      tpu.vector_store %arg7[%c0_11, %c0_12], %12 {strides = array<i32>} : memref<16x384xf32, #tpu.memory_space<vmem>>, vector<16x384xf32>,
    } else {
    }
    %c0 = arith.constant 0 : index
    %c0_1 = arith.constant 0 : index
    %3 = vector.load %arg7[%c0, %c0_1] : memref<16x384xf32, #tpu.memory_space<vmem>>, vector<16x384xf32>
    %c0_2 = arith.constant 0 : index
    %c0_3 = arith.constant 0 : index
    %4 = vector.load %arg3[%c0_2, %c0_3] : memref<16x128xbf16, #tpu.memory_space<vmem>>, vector<16x128xbf16>
    %c0_4 = arith.constant 0 : index
    %c0_5 = arith.constant 0 : index
    %5 = vector.load %arg4[%c0_4, %c0_5] : memref<128x384xbf16, #tpu.memory_space<vmem>>, vector<128x384xbf16>
    %cst = arith.constant dense<0.000000e+00> : vector<16x384xf32>
    %6 = tpu.matmul %4, %5, %cst {dimension_numbers = #tpu.dot_dimension_numbers<[1], [0], [0], [1], [0, 0, 1, 1], [], []>} : vector<16x128xbf16>, vector<128x384xbf16>, vector<16x384xf32> -> vector<16x384xf32>
    %7 = arith.addf %3, %6 : vector<16x384xf32>
    %c0_6 = arith.constant 0 : index
    %c0_7 = arith.constant 0 : index
    %8 = vector.load %arg7[%c0_6, %c0_7] : memref<16x384xf32, #tpu.memory_space<vmem>>, vector<16x384xf32>
    tpu.vector_store %arg7[%c0_6, %c0_7], %7 {strides = array<i32>} : memref<16x384xf32, #tpu.memory_space<vmem>>, vector<16x384xf32>,
    %c0_i32_8 = arith.constant 0 : i32
    %9 = arith.cmpi eq, %arg2, %c0_i32_8 : i32
    %10 = arith.extui %9 : i1 to i32
    %c0_i32_9 = arith.constant 0 : i32
    %11 = arith.cmpi ne, %10, %c0_i32_9 : i32
    scf.if %11 {
      %c0_10 = arith.constant 0 : index
      %c0_11 = arith.constant 0 : index
      %12 = vector.load %arg7[%c0_10, %c0_11] : memref<16x384xf32, #tpu.memory_space<vmem>>, vector<16x384xf32>
      %c0_12 = arith.constant 0 : index
      %c0_13 = arith.constant 0 : index
      %13 = vector.load %arg5[%c0_12, %c0_13] : memref<1x384xf32, #tpu.memory_space<vmem>>, vector<1x384xf32>
      %14 = vector.broadcast %13 : vector<1x384xf32> to vector<16x384xf32>
      %15 = arith.addf %12, %14 : vector<16x384xf32>
      %16 = arith.truncf %15 : vector<16x384xf32> to vector<16x384xbf16>
      %c0_14 = arith.constant 0 : index
      %c0_15 = arith.constant 0 : index
      %17 = vector.load %arg6[%c0_14, %c0_15] : memref<16x384xbf16, #tpu.memory_space<vmem>>, vector<16x384xbf16>
      tpu.vector_store %arg6[%c0_14, %c0_15], %16 {strides = array<i32>} : memref<16x384xbf16, #tpu.memory_space<vmem>>, vector<16x384xbf16>,
    } else {
    }
    return
  }
  func.func @transform_0(%arg0: i32, %arg1: i32, %arg2: i32) -> (i32, i32) {
    %c0_i32 = arith.constant 0 : i32
    return %arg0, %arg2 : i32, i32
  }
  func.func @transform_1(%arg0: i32, %arg1: i32, %arg2: i32) -> (i32, i32) {
    %c0_i32 = arith.constant 0 : i32
    return %arg2, %arg1 : i32, i32
  }
  func.func @transform_2(%arg0: i32, %arg1: i32, %arg2: i32) -> (i32, i32) {
    %c0_i32 = arith.constant 0 : i32
    %c0_i32_0 = arith.constant 0 : i32
    return %c0_i32, %arg1 : i32, i32
  }
  func.func @transform_3(%arg0: i32, %arg1: i32, %arg2: i32) -> (i32, i32) {
    %c0_i32 = arith.constant 0 : i32
    return %arg0, %arg1 : i32, i32
  }
}

module attributes {stable_mosaic.version = 11 : i64} {
  func.func @_attn_kernel(%arg0: memref<8x1x32xbf16, #tpu.memory_space<vmem>>, %arg1: memref<8x2x32xbf16, #tpu.memory_space<vmem>>, %arg2: memref<8x2x32xbf16, #tpu.memory_space<vmem>>, %arg3: memref<8x1x32xf32, #tpu.memory_space<vmem>>) attributes {dimension_semantics = [], scalar_prefetch = 0 : i64, scratch_operands = 0 : i64, tpu.core_type = #tpu.core_type<tc>} {
    %c0 = arith.constant 0 : index
    %c0_0 = arith.constant 0 : index
    %c0_1 = arith.constant 0 : index
    %0 = vector.load %arg0[%c0, %c0_0, %c0_1] : memref<8x1x32xbf16, #tpu.memory_space<vmem>>, vector<8x1x32xbf16>
    %c0_2 = arith.constant 0 : index
    %c0_3 = arith.constant 0 : index
    %c0_4 = arith.constant 0 : index
    %1 = vector.load %arg1[%c0_2, %c0_3, %c0_4] : memref<8x2x32xbf16, #tpu.memory_space<vmem>>, vector<8x2x32xbf16>
    "tpu.trace_start"() <{level = 10 : i32, message = "bqd,bsd->bqs"}> : () -> ()
    %cst = arith.constant dense<0.000000e+00> : vector<8x1x2xf32>
    %2 = tpu.matmul %0, %1, %cst {dimension_numbers = #tpu.dot_dimension_numbers<[2], [2], [1], [1], [0, 0, 0, 1, 1, 1], [0], [0]>} : vector<8x1x32xbf16>, vector<8x2x32xbf16>, vector<8x1x2xf32> -> vector<8x1x2xf32>
    "tpu.trace_stop"() : () -> ()
    %cst_5 = arith.constant dense<0xFF800000> : vector<8x1xf32>
    %3 = vector.multi_reduction <maximumf>, %2, %cst_5 [2] : vector<8x1x2xf32> to vector<8x1xf32>
    %4 = vector.shape_cast %3 : vector<8x1xf32> to vector<8x1x1xf32>
    %5 = vector.broadcast %4 : vector<8x1x1xf32> to vector<8x1x2xf32>
    %6 = arith.subf %2, %5 : vector<8x1x2xf32>
    %7 = math.exp %6 : vector<8x1x2xf32>
    %cst_6 = arith.constant dense<0.000000e+00> : vector<8x1xf32>
    %8 = vector.multi_reduction <add>, %7, %cst_6 [2] : vector<8x1x2xf32> to vector<8x1xf32>
    %9 = vector.shape_cast %8 : vector<8x1xf32> to vector<8x1x1xf32>
    %10 = tpu.reciprocal %9 {approx = true} : vector<8x1x1xf32> -> vector<8x1x1xf32>
    %11 = vector.broadcast %10 : vector<8x1x1xf32> to vector<8x1x2xf32>
    %12 = arith.mulf %7, %11 : vector<8x1x2xf32>
    %13 = arith.truncf %12 : vector<8x1x2xf32> to vector<8x1x2xbf16>
    %c0_7 = arith.constant 0 : index
    %c0_8 = arith.constant 0 : index
    %c0_9 = arith.constant 0 : index
    %14 = vector.load %arg2[%c0_7, %c0_8, %c0_9] : memref<8x2x32xbf16, #tpu.memory_space<vmem>>, vector<8x2x32xbf16>
    "tpu.trace_start"() <{level = 10 : i32, message = "bqs,bsd->bqd"}> : () -> ()
    %cst_10 = arith.constant dense<0.000000e+00> : vector<8x1x32xf32>
    %15 = tpu.matmul %13, %14, %cst_10 {dimension_numbers = #tpu.dot_dimension_numbers<[2], [1], [1], [2], [0, 0, 0, 1, 1, 2], [0], [0]>} : vector<8x1x2xbf16>, vector<8x2x32xbf16>, vector<8x1x32xf32> -> vector<8x1x32xf32>
    "tpu.trace_stop"() : () -> ()
    %c0_11 = arith.constant 0 : index
    %c0_12 = arith.constant 0 : index
    %c0_13 = arith.constant 0 : index
    %16 = vector.load %arg3[%c0_11, %c0_12, %c0_13] : memref<8x1x32xf32, #tpu.memory_space<vmem>>, vector<8x1x32xf32>
    tpu.vector_store %arg3[%c0_11, %c0_12, %c0_13], %15 {strides = array<i32>} : memref<8x1x32xf32, #tpu.memory_space<vmem>>, vector<8x1x32xf32>,
    return
  }
}

module attributes {stable_mosaic.version = 11 : i64} {
  func.func @_fused_mm_kernel(%arg0: i32, %arg1: i32, %arg2: i32, %arg3: memref<16x128xbf16, #tpu.memory_space<vmem>>, %arg4: memref<128x128xbf16, #tpu.memory_space<vmem>>, %arg5: memref<1x128xf32, #tpu.memory_space<vmem>>, %arg6: memref<16x128xf32, #tpu.memory_space<vmem>>, %arg7: memref<16x128xf32, #tpu.memory_space<vmem>>) attributes {dimension_semantics = [#tpu.dimension_semantics<parallel>, #tpu.dimension_semantics<parallel>, #tpu.dimension_semantics<arbitrary>], iteration_bounds = array<i64: 1, 1, 1>, scalar_prefetch = 0 : i64, scratch_operands = 1 : i64, tpu.core_type = #tpu.core_type<tc>, window_params = [{transform_indices = @transform_0, window_bounds = array<i64: 16, 128>}, {transform_indices = @transform_1, window_bounds = array<i64: 128, 128>}, {transform_indices = @transform_2, window_bounds = array<i64: 1, 128>}, {transform_indices = @transform_3, window_bounds = array<i64: 16, 128>}]} {
    %c0_i32 = arith.constant 0 : i32
    %0 = arith.cmpi eq, %arg2, %c0_i32 : i32
    %1 = arith.extui %0 : i1 to i32
    %c0_i32_0 = arith.constant 0 : i32
    %2 = arith.cmpi ne, %1, %c0_i32_0 : i32
    scf.if %2 {
      %cst_10 = arith.constant 0.000000e+00 : f32
      %12 = vector.broadcast %cst_10 : f32 to vector<16x128xf32>
      %c0_11 = arith.constant 0 : index
      %c0_12 = arith.constant 0 : index
      %13 = vector.load %arg7[%c0_11, %c0_12] : memref<16x128xf32, #tpu.memory_space<vmem>>, vector<16x128xf32>
      tpu.vector_store %arg7[%c0_11, %c0_12], %12 {strides = array<i32>} : memref<16x128xf32, #tpu.memory_space<vmem>>, vector<16x128xf32>,
    } else {
    }
    %c0 = arith.constant 0 : index
    %c0_1 = arith.constant 0 : index
    %3 = vector.load %arg7[%c0, %c0_1] : memref<16x128xf32, #tpu.memory_space<vmem>>, vector<16x128xf32>
    %c0_2 = arith.constant 0 : index
    %c0_3 = arith.constant 0 : index
    %4 = vector.load %arg3[%c0_2, %c0_3] : memref<16x128xbf16, #tpu.memory_space<vmem>>, vector<16x128xbf16>
    %c0_4 = arith.constant 0 : index
    %c0_5 = arith.constant 0 : index
    %5 = vector.load %arg4[%c0_4, %c0_5] : memref<128x128xbf16, #tpu.memory_space<vmem>>, vector<128x128xbf16>
    %cst = arith.constant dense<0.000000e+00> : vector<16x128xf32>
    %6 = tpu.matmul %4, %5, %cst {dimension_numbers = #tpu.dot_dimension_numbers<[1], [0], [0], [1], [0, 0, 1, 1], [], []>} : vector<16x128xbf16>, vector<128x128xbf16>, vector<16x128xf32> -> vector<16x128xf32>
    %7 = arith.addf %3, %6 : vector<16x128xf32>
    %c0_6 = arith.constant 0 : index
    %c0_7 = arith.constant 0 : index
    %8 = vector.load %arg7[%c0_6, %c0_7] : memref<16x128xf32, #tpu.memory_space<vmem>>, vector<16x128xf32>
    tpu.vector_store %arg7[%c0_6, %c0_7], %7 {strides = array<i32>} : memref<16x128xf32, #tpu.memory_space<vmem>>, vector<16x128xf32>,
    %c0_i32_8 = arith.constant 0 : i32
    %9 = arith.cmpi eq, %arg2, %c0_i32_8 : i32
    %10 = arith.extui %9 : i1 to i32
    %c0_i32_9 = arith.constant 0 : i32
    %11 = arith.cmpi ne, %10, %c0_i32_9 : i32
    scf.if %11 {
      %c0_10 = arith.constant 0 : index
      %c0_11 = arith.constant 0 : index
      %12 = vector.load %arg7[%c0_10, %c0_11] : memref<16x128xf32, #tpu.memory_space<vmem>>, vector<16x128xf32>
      %c0_12 = arith.constant 0 : index
      %c0_13 = arith.constant 0 : index
      %13 = vector.load %arg5[%c0_12, %c0_13] : memref<1x128xf32, #tpu.memory_space<vmem>>, vector<1x128xf32>
      %14 = vector.broadcast %13 : vector<1x128xf32> to vector<16x128xf32>
      %15 = arith.addf %12, %14 : vector<16x128xf32>
      %c0_14 = arith.constant 0 : index
      %c0_15 = arith.constant 0 : index
      %16 = vector.load %arg6[%c0_14, %c0_15] : memref<16x128xf32, #tpu.memory_space<vmem>>, vector<16x128xf32>
      tpu.vector_store %arg6[%c0_14, %c0_15], %15 {strides = array<i32>} : memref<16x128xf32, #tpu.memory_space<vmem>>, vector<16x128xf32>,
    } else {
    }
    return
  }
  func.func @transform_0(%arg0: i32, %arg1: i32, %arg2: i32) -> (i32, i32) {
    %c0_i32 = arith.constant 0 : i32
    return %arg0, %arg2 : i32, i32
  }
  func.func @transform_1(%arg0: i32, %arg1: i32, %arg2: i32) -> (i32, i32) {
    %c0_i32 = arith.constant 0 : i32
    return %arg2, %arg1 : i32, i32
  }
  func.func @transform_2(%arg0: i32, %arg1: i32, %arg2: i32) -> (i32, i32) {
    %c0_i32 = arith.constant 0 : i32
    %c0_i32_0 = arith.constant 0 : i32
    return %c0_i32, %arg1 : i32, i32
  }
  func.func @transform_3(%arg0: i32, %arg1: i32, %arg2: i32) -> (i32, i32) {
    %c0_i32 = arith.constant 0 : i32
    return %arg0, %arg1 : i32, i32
  }
}

</mosaic_0001>

<bundles_post_ra>
// kernel: _lambda_.32
= control target key start
LH: loop header
LB: loop body
LE: loop exit
PB: predicated region body
PF: predicated region fallthrough
CT: control target
= control target key end

     0   :  { %s337_s6 = smov 0   ;;  %s382_s0 = inlined_call_operand.vmem [shape: bf16[16,2,8,256], index: 0, kind: input, shape index: {}]   ;;  %s383_s1 = inlined_call_operand.vmem [shape: bf16[16,8,128], index: 1, kind: output, shape index: {}]  }
   0x1 LB: > { %s275_s7 = sadd.s32 4294967295, %s325_s6   ;;  %p279_p0 = scmp.ge.s32.totalorder %s325_s6, 1  ;;  %s325_s6 = sphi %s337_s6, %s11_s6  }
   0x2   : > { %p89_p1 = scmp.lt.s32.totalorder %s325_s6, 3 }
   0x4   : > { %p90_p2 = pnand %p279_p0, %p89_p1 }
   0x5   : > { %s280_s8 = sshll.u32 (!%p90_p2), %s275_s7, 3 }
   0x6   : > { %93 = sbr.rel (%p90_p2) target bundleno = 39 (0x27), region = 24  ;;  %p111_p3 = scmp.lt.s32.totalorder (!%p90_p2), %s280_s8, 15 }
   0xb   : > { %s385_s8 = smov (!%p111_p3, %s280_s8), 15 }
   0xc   : > { %s287_s9 = sshll.u32 %s385_s8, 4  ;;  %s284_s13 = sshll.u32 %s385_s8, 2 }
   0xd   : > { %s351_s12 = scalar_lea.vmem %s382_s0, %s287_s9  ;;  %s370_s16 = scalar_lea.vmem %s383_s1, %s284_s13 }
   0xe   : > { %v123_v0 = vld [vmem:[%s351_s12] sm:$0xff]  ;;  %v124_v1 = vld [vmem:[%s351_s12 + $0x8] sm:$0xff]  ;;  %v125_v2 = vld [vmem:[%s351_s12 + $0x10] sm:$0xff] }
   0xf   : > { %v126_v3 = vld [vmem:[%s351_s12 + $0x18] sm:$0xff]  ;;  %v139_v4 = vunpack.c.l.bf16 %v123_v0  ;;  %v140_v5 = vunpack.c.h.bf16 %v123_v0  ;;  %v141_v6 = vunpack.c.l.bf16 %v124_v1  ;;  %v142_v7 = vunpack.c.h.bf16 %v124_v1  ;;  %v127_v8 = vld [vmem:[%s351_s12 + $0x20] sm:$0xff]  ;;  %v128_v9 = vld [vmem:[%s351_s12 + $0x28] sm:$0xff] }
  0x10   : > { %v143_v10 = vunpack.c.l.bf16 %v125_v2  ;;  %v144_v11 = vunpack.c.h.bf16 %v125_v2  ;;  %v145_v12 = vunpack.c.l.bf16 %v126_v3  ;;  %v146_v13 = vunpack.c.h.bf16 %v126_v3  ;;  %v129_v14 = vld [vmem:[%s351_s12 + $0x30] sm:$0xff]  ;;  %v130_v15 = vld [vmem:[%s351_s12 + $0x38] sm:$0xff]  ;;  %v131_v24 = vld [vmem:[%s351_s12 + $0x40] sm:$0xff] }
  0x11   : > { %v171_v16 = vadd.f32 %v141_v6, %v139_v4  ;;  %v172_v17 = vadd.f32 %v142_v7, %v140_v5  ;;  %v147_v18 = vunpack.c.l.bf16 %v127_v8  ;;  %v148_v19 = vunpack.c.h.bf16 %v127_v8  ;;  %v132_v29 = vld [vmem:[%s351_s12 + $0x48] sm:$0xff]  ;;  %v133_v34 = vld [vmem:[%s351_s12 + $0x50] sm:$0xff]  ;;  %v134_v35 = vld [vmem:[%s351_s12 + $0x58] sm:$0xff] }
  0x12   : > { %v173_v20 = vadd.f32 %v145_v12, %v143_v10  ;;  %v174_v21 = vadd.f32 %v146_v13, %v144_v11  ;;  %v149_v22 = vunpack.c.l.bf16 %v128_v9  ;;  %v150_v23 = vunpack.c.h.bf16 %v128_v9  ;;  %v135_v44 = vld [vmem:[%s351_s12 + $0x60] sm:$0xff]  ;;  %v136_v49 = vld [vmem:[%s351_s12 + $0x68] sm:$0xff]  ;;  %v137_v54 = vld [vmem:[%s351_s12 + $0x70] sm:$0xff] }
  0x13   : > { %v187_v25 = vadd.f32 %v172_v17, %v171_v16  ;;  %v151_v26 = vunpack.c.l.bf16 %v129_v14  ;;  %v152_v27 = vunpack.c.h.bf16 %v129_v14  ;;  %v153_v28 = vunpack.c.l.bf16 %v130_v15  ;;  %v138_v58 = vld [vmem:[%s351_s12 + $0x78] sm:$0xff] }
  0x14   : > { %v188_v30 = vadd.f32 %v174_v21, %v173_v20  ;;  %v154_v31 = vunpack.c.h.bf16 %v130_v15  ;;  %v175_v32 = vadd.f32 %v149_v22, %v147_v18  ;;  %v176_v33 = vadd.f32 %v150_v23, %v148_v19 }
  0x15   : > { %v195_v36 = vmul.f32 0.25, %v187_v25  ;;  %v177_v37 = vadd.f32 %v153_v28, %v151_v26  ;;  %v155_v38 = vunpack.c.l.bf16 %v131_v24  ;;  %v156_v39 = vunpack.c.h.bf16 %v131_v24 }
  0x16   : > { %v196_v40 = vmul.f32 0.25, %v188_v30  ;;  %v178_v41 = vadd.f32 %v154_v31, %v152_v27  ;;  %v189_v42 = vadd.f32 %v176_v33, %v175_v32  ;;  %v157_v43 = vunpack.c.l.bf16 %v132_v29 }
  0x17   : > { %v158_v45 = vunpack.c.h.bf16 %v132_v29  ;;  %v159_v46 = vunpack.c.l.bf16 %v133_v34  ;;  %v160_v47 = vunpack.c.h.bf16 %v133_v34  ;;  %v161_v48 = vunpack.c.l.bf16 %v134_v35 }
  0x18   : > { %v291_v50 = vpack.c.bf16 %v196_v40, %v195_v36  ;;  %v190_v51 = vadd.f32 %v178_v41, %v177_v37  ;;  %v197_v52 = vmul.f32 0.25, %v189_v42  ;;  %v162_v53 = vunpack.c.h.bf16 %v134_v35 }
  0x19   : > { %v179_v55 = vadd.f32 %v157_v43, %v155_v38  ;;  %v180_v56 = vadd.f32 %v158_v45, %v156_v39  ;;  %v181_v57 = vadd.f32 %v161_v48, %v159_v46  ;;  %v163_v59 = vunpack.c.l.bf16 %v135_v44 }
  0x1a   : > { %292 = vst [vmem:[%s370_s16] sm:$0xff] %v291_v50   ;;  %v198_v60 = vmul.f32 0.25, %v190_v51  ;;  %v182_v61 = vadd.f32 %v162_v53, %v160_v47  ;;  %v164_v62 = vunpack.c.h.bf16 %v135_v44  ;;  %v165_v63 = vunpack.c.l.bf16 %v136_v49 }
  0x1b   : > { %v191_v0 = vadd.f32 %v180_v56, %v179_v55  ;;  %v166_v1 = vunpack.c.h.bf16 %v136_v49  ;;  %v167_v2 = vunpack.c.l.bf16 %v137_v54  ;;  %v168_v3 = vunpack.c.h.bf16 %v137_v54 }
  0x1c   : > { %v296_v4 = vpack.c.bf16 %v198_v60, %v197_v52  ;;  %v192_v5 = vadd.f32 %v182_v61, %v181_v57  ;;  %v169_v6 = vunpack.c.l.bf16 %v138_v58  ;;  %v170_v7 = vunpack.c.h.bf16 %v138_v58 }
  0x1d   : > { %v199_v8 = vmul.f32 0.25, %v191_v0  ;;  %v183_v9 = vadd.f32 %v165_v63, %v163_v59  ;;  %v184_v10 = vadd.f32 %v166_v1, %v164_v62 }
  0x1e   : > { %308 = vst [vmem:[%s370_s16 + $0x8] sm:$0xff] %v296_v4   ;;  %v200_v11 = vmul.f32 0.25, %v192_v5  ;;  %v185_v12 = vadd.f32 %v169_v6, %v167_v2  ;;  %v186_v13 = vadd.f32 %v170_v7, %v168_v3 }
  0x1f   : > { %v193_v14 = vadd.f32 %v184_v10, %v183_v9 }
  0x20   : > { %v301_v15 = vpack.c.bf16 %v200_v11, %v199_v8  ;;  %v194_v16 = vadd.f32 %v186_v13, %v185_v12 }
  0x21   : > { %v201_v17 = vmul.f32 0.25, %v193_v14 }
  0x22   : > { %309 = vst [vmem:[%s370_s16 + $0x10] sm:$0xff] %v301_v15   ;;  %v202_v18 = vmul.f32 0.25, %v194_v16 }
  0x24   : > { %v306_v19 = vpack.c.bf16 %v202_v18, %v201_v17 }
  0x26   : > { %310 = vst [vmem:[%s370_s16 + $0x18] sm:$0xff] %v306_v19  }
  0x27 PF: > { %s11_s6 = sadd.s32 1, %s325_s6  }
  0x28   : > { %p8_p4 = scmp.ge.s32.totalorder %s11_s6, 4  }
  0x2a   :  { %10 = sbr.rel (!%p8_p4) target bundleno = 1 (0x1), region = 54 }

// kernel: _lambda_.29
= control target key start
LH: loop header
LB: loop body
LE: loop exit
PB: predicated region body
PF: predicated region fallthrough
CT: control target
= control target key end

     0   :  { %s1961_s1 = inlined_call_operand.vmem [shape: bf16[128,128], index: 1, kind: input, shape index: {}]   ;;  %s1962_s2 = inlined_call_operand.vmem [shape: f32[1,128], index: 2, kind: input, shape index: {}]   ;;  %s1963_s3 = inlined_call_operand.vmem [shape: f32[1,128], index: 3, kind: input, shape index: {}]   ;;  %s1964_s0 = inlined_call_operand.vmem [shape: bf16[512,128], index: 0, kind: input, shape index: {}]   ;;  %s1965_s4 = inlined_call_operand.vmem [shape: bf16[512,128], index: 4, kind: output, shape index: {}]  }
   0x1   :  { %v1364_v0 = vld [vmem:[%s1961_s1 + $0x38] sm:$0xff]  ;;  %v1363_v1 = vld [vmem:[%s1961_s1 + $0x30] sm:$0xff]  ;;  %v1362_v2 = vld [vmem:[%s1961_s1 + $0x28] sm:$0xff] }
   0x2   :  { %469 = vmatpush.bf16.msra.mxu0 %v1364_v0  ;;  %1556 = vmatpush.bf16.msra.mxu1 %v1364_v0  ;;  %v1361_v3 = vld [vmem:[%s1961_s1 + $0x20] sm:$0xff]  ;;  %v1360_v4 = vld [vmem:[%s1961_s1 + $0x18] sm:$0xff]  ;;  %v1359_v5 = vld [vmem:[%s1961_s1 + $0x10] sm:$0xff] }
   0x3   :  { %1557 = vmatpush.bf16.msra.mxu2 %v1364_v0  ;;  %1558 = vmatpush.bf16.msra.mxu3 %v1364_v0  ;;  %v1358_v6 = vld [vmem:[%s1961_s1 + $0x8] sm:$0xff]  ;;  %v1357_v7 = vld [vmem:[%s1961_s1] sm:$0xff]  ;;  %v1327_v16 = vld [vmem:[%s1964_s0 + $0x10] sm:$0xff] }
   0x4   :  { %v1325_v8 = vld [vmem:[%s1964_s0] sm:$0xff]  ;;  %v1326_v12 = vld [vmem:[%s1964_s0 + $0x8] sm:$0xff]  ;;  %v1335_v17 = vld [vmem:[%s1964_s0 + $0x50] sm:$0xff] }
   0x5   :  { %v1333_v9 = vld [vmem:[%s1964_s0 + $0x40] sm:$0xff]  ;;  %v1334_v13 = vld [vmem:[%s1964_s0 + $0x48] sm:$0xff]  ;;  %v1343_v18 = vld [vmem:[%s1964_s0 + $0x90] sm:$0xff] }
   0x6   :  { %470 = vmatpush.bf16.msra.mxu0 %v1363_v1  ;;  %1559 = vmatpush.bf16.msra.mxu1 %v1363_v1  ;;  %v1341_v10 = vld [vmem:[%s1964_s0 + $0x80] sm:$0xff]  ;;  %v1342_v14 = vld [vmem:[%s1964_s0 + $0x88] sm:$0xff]  ;;  %v1351_v19 = vld [vmem:[%s1964_s0 + $0xd0] sm:$0xff] }
   0x7   :  { %1560 = vmatpush.bf16.msra.mxu2 %v1363_v1  ;;  %1561 = vmatpush.bf16.msra.mxu3 %v1363_v1  ;;  %v1349_v11 = vld [vmem:[%s1964_s0 + $0xc0] sm:$0xff]  ;;  %v1350_v15 = vld [vmem:[%s1964_s0 + $0xc8] sm:$0xff]  ;;  %v1328_v20 = vld [vmem:[%s1964_s0 + $0x18] sm:$0xff] }
   0x8   :  { %v1336_v21 = vld [vmem:[%s1964_s0 + $0x58] sm:$0xff]  ;;  %v1329_v24 = vld [vmem:[%s1964_s0 + $0x20] sm:$0xff]  ;;  %v1330_v28 = vld [vmem:[%s1964_s0 + $0x28] sm:$0xff] }
   0x9   :  { %v1344_v22 = vld [vmem:[%s1964_s0 + $0x98] sm:$0xff]  ;;  %v1337_v25 = vld [vmem:[%s1964_s0 + $0x60] sm:$0xff]  ;;  %v1338_v29 = vld [vmem:[%s1964_s0 + $0x68] sm:$0xff] }
   0xa   :  { %471 = vmatpush.bf16.msra.mxu0 %v1362_v2  ;;  %1562 = vmatpush.bf16.msra.mxu1 %v1362_v2  ;;  %v1352_v23 = vld [vmem:[%s1964_s0 + $0xd8] sm:$0xff]  ;;  %v1345_v26 = vld [vmem:[%s1964_s0 + $0xa0] sm:$0xff]  ;;  %v1346_v30 = vld [vmem:[%s1964_s0 + $0xa8] sm:$0xff] }
   0xb   :  { %1563 = vmatpush.bf16.msra.mxu2 %v1362_v2  ;;  %1564 = vmatpush.bf16.msra.mxu3 %v1362_v2  ;;  %v1353_v27 = vld [vmem:[%s1964_s0 + $0xe0] sm:$0xff]  ;;  %v1354_v31 = vld [vmem:[%s1964_s0 + $0xe8] sm:$0xff]  ;;  %v1331_v32 = vld [vmem:[%s1964_s0 + $0x30] sm:$0xff] }
   0xc   :  { %v1339_v33 = vld [vmem:[%s1964_s0 + $0x70] sm:$0xff]  ;;  %v1332_v36 = vld [vmem:[%s1964_s0 + $0x38] sm:$0xff]  ;;  %v1730_v42 = vld [vmem:[%s1962_s2] ss:$0 sm:$0xff] }
   0xd   :  { %v1347_v34 = vld [vmem:[%s1964_s0 + $0xb0] sm:$0xff]  ;;  %v1340_v37 = vld [vmem:[%s1964_s0 + $0x78] sm:$0xff]  ;;  %v1736_v44 = vld [vmem:[%s1963_s3] ss:$0 sm:$0xff] }
   0xe   :  { %472 = vmatpush.bf16.msra.mxu0 %v1361_v3  ;;  %1565 = vmatpush.bf16.msra.mxu1 %v1361_v3  ;;  %v1355_v35 = vld [vmem:[%s1964_s0 + $0xf0] sm:$0xff]  ;;  %v1348_v38 = vld [vmem:[%s1964_s0 + $0xb8] sm:$0xff] }
   0xf   :  { %1566 = vmatpush.bf16.msra.mxu2 %v1361_v3  ;;  %1567 = vmatpush.bf16.msra.mxu3 %v1361_v3  ;;  %v1356_v39 = vld [vmem:[%s1964_s0 + $0xf8] sm:$0xff] }
  0x12   :  { %473 = vmatpush.bf16.msra.mxu0 %v1360_v4  ;;  %1568 = vmatpush.bf16.msra.mxu1 %v1360_v4 }
  0x13   :  { %1569 = vmatpush.bf16.msra.mxu2 %v1360_v4  ;;  %1570 = vmatpush.bf16.msra.mxu3 %v1360_v4 }
  0x16   :  { %474 = vmatpush.bf16.msra.mxu0 %v1359_v5  ;;  %1571 = vmatpush.bf16.msra.mxu1 %v1359_v5 }
  0x17   :  { %1572 = vmatpush.bf16.msra.mxu2 %v1359_v5  ;;  %1573 = vmatpush.bf16.msra.mxu3 %v1359_v5 }
  0x1a   :  { %475 = vmatpush.bf16.msra.mxu0 %v1358_v6  ;;  %1574 = vmatpush.bf16.msra.mxu1 %v1358_v6 }
  0x1b   :  { %1575 = vmatpush.bf16.msra.mxu2 %v1358_v6  ;;  %1576 = vmatpush.bf16.msra.mxu3 %v1358_v6 }
  0x1e   :  { %476 = vmatpush.bf16.msra.mxu0 %v1357_v7  ;;  %1577 = vmatpush.bf16.msra.mxu1 %v1357_v7 }
  0x1f   :  { %1578 = vmatpush.bf16.msra.mxu2 %v1357_v7  ;;  %1579 = vmatpush.bf16.msra.mxu3 %v1357_v7 }
  0x21   :  { %477 = vmatmul.bf16.vlgmr.msra.gmra.mxu0 %v1325_v8  ;;  %517 = vmatmul.bf16.vlgmr.msra.gmra.mxu1 %v1333_v9 }
  0x22   :  { %557 = vmatmul.bf16.vlgmr.msra.gmra.mxu2 %v1341_v10  ;;  %597 = vmatmul.bf16.vlgmr.msra.gmra.mxu3 %v1349_v11 }
  0x31   :  { %482 = vmatmul.bf16.gmra.mxu0 %v1326_v12  ;;  %522 = vmatmul.bf16.gmra.mxu1 %v1334_v13 }
  0x32   :  { %562 = vmatmul.bf16.gmra.mxu2 %v1342_v14  ;;  %602 = vmatmul.bf16.gmra.mxu3 %v1350_v15 }
  0x41   :  { %487 = vmatmul.bf16.gmra.mxu0 %v1327_v16  ;;  %527 = vmatmul.bf16.gmra.mxu1 %v1335_v17 }
  0x42   :  { %567 = vmatmul.bf16.gmra.mxu2 %v1343_v18  ;;  %607 = vmatmul.bf16.gmra.mxu3 %v1351_v19 }
  0x51   :  { %492 = vmatmul.bf16.gmra.mxu0 %v1328_v20  ;;  %532 = vmatmul.bf16.gmra.mxu1 %v1336_v21 }
  0x52   :  { %572 = vmatmul.bf16.gmra.mxu2 %v1344_v22  ;;  %612 = vmatmul.bf16.gmra.mxu3 %v1352_v23 }
  0x61   :  { %497 = vmatmul.bf16.gmra.mxu0 %v1329_v24  ;;  %537 = vmatmul.bf16.gmra.mxu1 %v1337_v25 }
  0x62   :  { %577 = vmatmul.bf16.gmra.mxu2 %v1345_v26  ;;  %617 = vmatmul.bf16.gmra.mxu3 %v1353_v27 }
  0x71   :  { %502 = vmatmul.bf16.gmra.mxu0 %v1330_v28  ;;  %542 = vmatmul.bf16.gmra.mxu1 %v1338_v29 }
  0x72   :  { %582 = vmatmul.bf16.gmra.mxu2 %v1346_v30  ;;  %622 = vmatmul.bf16.gmra.mxu3 %v1354_v31 }
  0x81   :  { %507 = vmatmul.bf16.gmra.mxu0 %v1331_v32  ;;  %547 = vmatmul.bf16.gmra.mxu1 %v1339_v33 }
  0x82   :  { %587 = vmatmul.bf16.gmra.mxu2 %v1347_v34  ;;  %627 = vmatmul.bf16.gmra.mxu3 %v1355_v35 }
  0x91   :  { %512 = vmatmul.bf16.gmra.mxu0 %v1332_v36  ;;  %552 = vmatmul.bf16.gmra.mxu1 %v1340_v37 }
  0x92   :  { %592 = vmatmul.bf16.gmra.mxu2 %v1348_v38  ;;  %632 = vmatmul.bf16.gmra.mxu3 %v1356_v39 }
  0x9e   :  { %v478_v40 = vpop.f32.mrf.mxu0  ;;  %v518_v41 = vpop.f32.mrf.mxu1 }
  0x9f   :  { %v837_v43 = vmul.f32 %v1730_v42, %v478_v40  ;;  %v853_v45 = vmul.f32 %v1730_v42, %v518_v41 }
  0xa1   :  { %v905_v50 = vadd.f32 %v1736_v44, %v837_v43  ;;  %v921_v51 = vadd.f32 %v1736_v44, %v853_v45 }
  0xa3   :  { %v969_v58 = vmax.f32 %v905_v50, 0.0  ;;  %v985_v59 = vmax.f32 %v921_v51, 0.0 }
  0xa5   :  { %v558_v46 = vpop.f32.mrf.mxu2  ;;  %v598_v47 = vpop.f32.mrf.mxu3 }
  0xa6   :  { %v480_v48 = vpop.f32.mrf.mxu0  ;;  %v520_v49 = vpop.f32.mrf.mxu1  ;;  %v869_v56 = vmul.f32 %v1730_v42, %v558_v46  ;;  %v885_v57 = vmul.f32 %v1730_v42, %v598_v47 }
  0xa7   :  { %v838_v52 = vmul.f32 %v1730_v42, %v480_v48  ;;  %v854_v53 = vmul.f32 %v1730_v42, %v520_v49 }
  0xa8   :  { %v937_v2 = vadd.f32 %v1736_v44, %v869_v56  ;;  %v953_v3 = vadd.f32 %v1736_v44, %v885_v57 }
  0xa9   :  { %v906_v54 = vadd.f32 %v1736_v44, %v838_v52  ;;  %v922_v55 = vadd.f32 %v1736_v44, %v854_v53 }
  0xaa   :  { %v1001_v10 = vmax.f32 %v937_v2, 0.0  ;;  %v1017_v11 = vmax.f32 %v953_v3, 0.0 }
  0xab   :  { %v970_v60 = vmax.f32 %v906_v54, 0.0  ;;  %v986_v61 = vmax.f32 %v922_v55, 0.0 }
  0xad   :  { %v1368_v62 = vpack.c.bf16 %v970_v60, %v969_v58  ;;  %v1408_v63 = vpack.c.bf16 %v986_v61, %v985_v59  ;;  %v560_v0 = vpop.f32.mrf.mxu2  ;;  %v600_v1 = vpop.f32.mrf.mxu3 }
  0xae   :  { %v870_v4 = vmul.f32 %v1730_v42, %v560_v0  ;;  %v886_v5 = vmul.f32 %v1730_v42, %v600_v1  ;;  %v483_v6 = vpop.f32.mrf.mxu0  ;;  %v523_v7 = vpop.f32.mrf.mxu1 }
  0xaf   :  { %1369 = vst [vmem:[%s1965_s4] sm:$0xff] %v1368_v62   ;;  %v839_v14 = vmul.f32 %v1730_v42, %v483_v6  ;;  %v855_v15 = vmul.f32 %v1730_v42, %v523_v7 }
  0xb0   :  { %1532 = vst [vmem:[%s1965_s4 + $0x40] sm:$0xff] %v1408_v63   ;;  %v938_v8 = vadd.f32 %v1736_v44, %v870_v4  ;;  %v954_v9 = vadd.f32 %v1736_v44, %v886_v5 }
  0xb1   :  { %v907_v22 = vadd.f32 %v1736_v44, %v839_v14  ;;  %v923_v23 = vadd.f32 %v1736_v44, %v855_v15 }
  0xb2   :  { %v1002_v12 = vmax.f32 %v938_v8, 0.0  ;;  %v1018_v13 = vmax.f32 %v954_v9, 0.0 }
  0xb3   :  { %v971_v30 = vmax.f32 %v907_v22, 0.0  ;;  %v987_v31 = vmax.f32 %v923_v23, 0.0 }
  0xb4   :  { %v1448_v16 = vpack.c.bf16 %v1002_v12, %v1001_v10  ;;  %v1488_v17 = vpack.c.bf16 %v1018_v13, %v1017_v11 }
  0xb5   :  { %v563_v18 = vpop.f32.mrf.mxu2  ;;  %v603_v19 = vpop.f32.mrf.mxu3 }
  0xb6   :  { %1540 = vst [vmem:[%s1965_s4 + $0x80] sm:$0xff] %v1448_v16   ;;  %v485_v20 = vpop.f32.mrf.mxu0  ;;  %v525_v21 = vpop.f32.mrf.mxu1  ;;  %v871_v28 = vmul.f32 %v1730_v42, %v563_v18  ;;  %v887_v29 = vmul.f32 %v1730_v42, %v603_v19 }
  0xb7   :  { %1548 = vst [vmem:[%s1965_s4 + $0xc0] sm:$0xff] %v1488_v17   ;;  %v840_v24 = vmul.f32 %v1730_v42, %v485_v20  ;;  %v856_v25 = vmul.f32 %v1730_v42, %v525_v21 }
  0xb8   :  { %v939_v38 = vadd.f32 %v1736_v44, %v871_v28  ;;  %v955_v39 = vadd.f32 %v1736_v44, %v887_v29 }
  0xb9   :  { %v908_v26 = vadd.f32 %v1736_v44, %v840_v24  ;;  %v924_v27 = vadd.f32 %v1736_v44, %v856_v25 }
  0xba   :  { %v1003_v48 = vmax.f32 %v939_v38, 0.0  ;;  %v1019_v49 = vmax.f32 %v955_v39, 0.0 }
  0xbb   :  { %v972_v32 = vmax.f32 %v908_v26, 0.0  ;;  %v988_v33 = vmax.f32 %v924_v27, 0.0 }
  0xbd   :  { %v1373_v34 = vpack.c.bf16 %v972_v32, %v971_v30  ;;  %v1413_v35 = vpack.c.bf16 %v988_v33, %v987_v31  ;;  %v565_v36 = vpop.f32.mrf.mxu2  ;;  %v605_v37 = vpop.f32.mrf.mxu3 }
  0xbe   :  { %v872_v40 = vmul.f32 %v1730_v42, %v565_v36  ;;  %v888_v41 = vmul.f32 %v1730_v42, %v605_v37  ;;  %v488_v43 = vpop.f32.mrf.mxu0  ;;  %v528_v45 = vpop.f32.mrf.mxu1 }
  0xbf   :  { %1525 = vst [vmem:[%s1965_s4 + $0x8] sm:$0xff] %v1373_v34   ;;  %v841_v52 = vmul.f32 %v1730_v42, %v488_v43  ;;  %v857_v53 = vmul.f32 %v1730_v42, %v528_v45 }
  0xc0   :  { %1533 = vst [vmem:[%s1965_s4 + $0x48] sm:$0xff] %v1413_v35   ;;  %v940_v46 = vadd.f32 %v1736_v44, %v872_v40  ;;  %v956_v47 = vadd.f32 %v1736_v44, %v888_v41 }
  0xc1   :  { %v909_v60 = vadd.f32 %v1736_v44, %v841_v52  ;;  %v925_v61 = vadd.f32 %v1736_v44, %v857_v53 }
  0xc2   :  { %v1004_v50 = vmax.f32 %v940_v46, 0.0  ;;  %v1020_v51 = vmax.f32 %v956_v47, 0.0 }
  0xc3   :  { %v973_v4 = vmax.f32 %v909_v60, 0.0  ;;  %v989_v5 = vmax.f32 %v925_v61, 0.0 }
  0xc4   :  { %v1453_v54 = vpack.c.bf16 %v1004_v50, %v1003_v48  ;;  %v1493_v55 = vpack.c.bf16 %v1020_v51, %v1019_v49 }
  0xc5   :  { %v568_v56 = vpop.f32.mrf.mxu2  ;;  %v608_v57 = vpop.f32.mrf.mxu3 }
  0xc6   :  { %1541 = vst [vmem:[%s1965_s4 + $0x88] sm:$0xff] %v1453_v54   ;;  %v490_v58 = vpop.f32.mrf.mxu0  ;;  %v530_v59 = vpop.f32.mrf.mxu1  ;;  %v873_v2 = vmul.f32 %v1730_v42, %v568_v56  ;;  %v889_v3 = vmul.f32 %v1730_v42, %v608_v57 }
  0xc7   :  { %1549 = vst [vmem:[%s1965_s4 + $0xc8] sm:$0xff] %v1493_v55   ;;  %v842_v62 = vmul.f32 %v1730_v42, %v490_v58  ;;  %v858_v63 = vmul.f32 %v1730_v42, %v530_v59 }
  0xc8   :  { %v941_v12 = vadd.f32 %v1736_v44, %v873_v2  ;;  %v957_v13 = vadd.f32 %v1736_v44, %v889_v3 }
  0xc9   :  { %v910_v0 = vadd.f32 %v1736_v44, %v842_v62  ;;  %v926_v1 = vadd.f32 %v1736_v44, %v858_v63 }
  0xca   :  { %v1005_v20 = vmax.f32 %v941_v12, 0.0  ;;  %v1021_v21 = vmax.f32 %v957_v13, 0.0 }
  0xcb   :  { %v974_v6 = vmax.f32 %v910_v0, 0.0  ;;  %v990_v7 = vmax.f32 %v926_v1, 0.0 }
  0xcd   :  { %v1378_v8 = vpack.c.bf16 %v974_v6, %v973_v4  ;;  %v1418_v9 = vpack.c.bf16 %v990_v7, %v989_v5  ;;  %v570_v10 = vpop.f32.mrf.mxu2  ;;  %v610_v11 = vpop.f32.mrf.mxu3 }
  0xce   :  { %v874_v14 = vmul.f32 %v1730_v42, %v570_v10  ;;  %v890_v15 = vmul.f32 %v1730_v42, %v610_v11  ;;  %v493_v16 = vpop.f32.mrf.mxu0  ;;  %v533_v17 = vpop.f32.mrf.mxu1 }
  0xcf   :  { %1526 = vst [vmem:[%s1965_s4 + $0x10] sm:$0xff] %v1378_v8   ;;  %v843_v24 = vmul.f32 %v1730_v42, %v493_v16  ;;  %v859_v25 = vmul.f32 %v1730_v42, %v533_v17 }
  0xd0   :  { %1534 = vst [vmem:[%s1965_s4 + $0x50] sm:$0xff] %v1418_v9   ;;  %v942_v18 = vadd.f32 %v1736_v44, %v874_v14  ;;  %v958_v19 = vadd.f32 %v1736_v44, %v890_v15 }
  0xd1   :  { %v911_v32 = vadd.f32 %v1736_v44, %v843_v24  ;;  %v927_v33 = vadd.f32 %v1736_v44, %v859_v25 }
  0xd2   :  { %v1006_v22 = vmax.f32 %v942_v18, 0.0  ;;  %v1022_v23 = vmax.f32 %v958_v19, 0.0 }
  0xd3   :  { %v975_v40 = vmax.f32 %v911_v32, 0.0  ;;  %v991_v41 = vmax.f32 %v927_v33, 0.0 }
  0xd4   :  { %v1458_v26 = vpack.c.bf16 %v1006_v22, %v1005_v20  ;;  %v1498_v27 = vpack.c.bf16 %v1022_v23, %v1021_v21 }
  0xd5   :  { %v573_v28 = vpop.f32.mrf.mxu2  ;;  %v613_v29 = vpop.f32.mrf.mxu3 }
  0xd6   :  { %1542 = vst [vmem:[%s1965_s4 + $0x90] sm:$0xff] %v1458_v26   ;;  %v495_v30 = vpop.f32.mrf.mxu0  ;;  %v535_v31 = vpop.f32.mrf.mxu1  ;;  %v875_v38 = vmul.f32 %v1730_v42, %v573_v28  ;;  %v891_v39 = vmul.f32 %v1730_v42, %v613_v29 }
  0xd7   :  { %1550 = vst [vmem:[%s1965_s4 + $0xd0] sm:$0xff] %v1498_v27   ;;  %v844_v34 = vmul.f32 %v1730_v42, %v495_v30  ;;  %v860_v35 = vmul.f32 %v1730_v42, %v535_v31 }
  0xd8   :  { %v943_v50 = vadd.f32 %v1736_v44, %v875_v38  ;;  %v959_v51 = vadd.f32 %v1736_v44, %v891_v39 }
  0xd9   :  { %v912_v36 = vadd.f32 %v1736_v44, %v844_v34  ;;  %v928_v37 = vadd.f32 %v1736_v44, %v860_v35 }
  0xda   :  { %v1007_v58 = vmax.f32 %v943_v50, 0.0  ;;  %v1023_v59 = vmax.f32 %v959_v51, 0.0 }
  0xdb   :  { %v976_v43 = vmax.f32 %v912_v36, 0.0  ;;  %v992_v45 = vmax.f32 %v928_v37, 0.0 }
  0xdd   :  { %v1383_v46 = vpack.c.bf16 %v976_v43, %v975_v40  ;;  %v1423_v47 = vpack.c.bf16 %v992_v45, %v991_v41  ;;  %v575_v48 = vpop.f32.mrf.mxu2  ;;  %v615_v49 = vpop.f32.mrf.mxu3 }
  0xde   :  { %v876_v52 = vmul.f32 %v1730_v42, %v575_v48  ;;  %v892_v53 = vmul.f32 %v1730_v42, %v615_v49  ;;  %v498_v54 = vpop.f32.mrf.mxu0  ;;  %v538_v55 = vpop.f32.mrf.mxu1 }
  0xdf   :  { %1527 = vst [vmem:[%s1965_s4 + $0x18] sm:$0xff] %v1383_v46   ;;  %v845_v62 = vmul.f32 %v1730_v42, %v498_v54  ;;  %v861_v63 = vmul.f32 %v1730_v42, %v538_v55 }
  0xe0   :  { %1535 = vst [vmem:[%s1965_s4 + $0x58] sm:$0xff] %v1423_v47   ;;  %v944_v56 = vadd.f32 %v1736_v44, %v876_v52  ;;  %v960_v57 = vadd.f32 %v1736_v44, %v892_v53 }
  0xe1   :  { %v913_v6 = vadd.f32 %v1736_v44, %v845_v62  ;;  %v929_v7 = vadd.f32 %v1736_v44, %v861_v63 }
  0xe2   :  { %v1008_v60 = vmax.f32 %v944_v56, 0.0  ;;  %v1024_v61 = vmax.f32 %v960_v57, 0.0 }
  0xe3   :  { %v977_v14 = vmax.f32 %v913_v6, 0.0  ;;  %v993_v15 = vmax.f32 %v929_v7, 0.0 }
  0xe4   :  { %v1463_v0 = vpack.c.bf16 %v1008_v60, %v1007_v58  ;;  %v1503_v1 = vpack.c.bf16 %v1024_v61, %v1023_v59 }
  0xe5   :  { %v578_v2 = vpop.f32.mrf.mxu2  ;;  %v618_v3 = vpop.f32.mrf.mxu3 }
  0xe6   :  { %1543 = vst [vmem:[%s1965_s4 + $0x98] sm:$0xff] %v1463_v0   ;;  %v500_v4 = vpop.f32.mrf.mxu0  ;;  %v540_v5 = vpop.f32.mrf.mxu1  ;;  %v877_v12 = vmul.f32 %v1730_v42, %v578_v2  ;;  %v893_v13 = vmul.f32 %v1730_v42, %v618_v3 }
  0xe7   :  { %1551 = vst [vmem:[%s1965_s4 + $0xd8] sm:$0xff] %v1503_v1   ;;  %v846_v8 = vmul.f32 %v1730_v42, %v500_v4  ;;  %v862_v9 = vmul.f32 %v1730_v42, %v540_v5 }
  0xe8   :  { %v945_v22 = vadd.f32 %v1736_v44, %v877_v12  ;;  %v961_v23 = vadd.f32 %v1736_v44, %v893_v13 }
  0xe9   :  { %v914_v10 = vadd.f32 %v1736_v44, %v846_v8  ;;  %v930_v11 = vadd.f32 %v1736_v44, %v862_v9 }
  0xea   :  { %v1009_v30 = vmax.f32 %v945_v22, 0.0  ;;  %v1025_v31 = vmax.f32 %v961_v23, 0.0 }
  0xeb   :  { %v978_v16 = vmax.f32 %v914_v10, 0.0  ;;  %v994_v17 = vmax.f32 %v930_v11, 0.0 }
  0xed   :  { %v1388_v18 = vpack.c.bf16 %v978_v16, %v977_v14  ;;  %v1428_v19 = vpack.c.bf16 %v994_v17, %v993_v15  ;;  %v580_v20 = vpop.f32.mrf.mxu2  ;;  %v620_v21 = vpop.f32.mrf.mxu3 }
  0xee   :  { %v878_v24 = vmul.f32 %v1730_v42, %v580_v20  ;;  %v894_v25 = vmul.f32 %v1730_v42, %v620_v21  ;;  %v503_v26 = vpop.f32.mrf.mxu0  ;;  %v543_v27 = vpop.f32.mrf.mxu1 }
  0xef   :  { %1528 = vst [vmem:[%s1965_s4 + $0x20] sm:$0xff] %v1388_v18   ;;  %v847_v34 = vmul.f32 %v1730_v42, %v503_v26  ;;  %v863_v35 = vmul.f32 %v1730_v42, %v543_v27 }
  0xf0   :  { %1536 = vst [vmem:[%s1965_s4 + $0x60] sm:$0xff] %v1428_v19   ;;  %v946_v28 = vadd.f32 %v1736_v44, %v878_v24  ;;  %v962_v29 = vadd.f32 %v1736_v44, %v894_v25 }
  0xf1   :  { %v915_v43 = vadd.f32 %v1736_v44, %v847_v34  ;;  %v931_v45 = vadd.f32 %v1736_v44, %v863_v35 }
  0xf2   :  { %v1010_v32 = vmax.f32 %v946_v28, 0.0  ;;  %v1026_v33 = vmax.f32 %v962_v29, 0.0 }
  0xf3   :  { %v979_v52 = vmax.f32 %v915_v43, 0.0  ;;  %v995_v53 = vmax.f32 %v931_v45, 0.0 }
  0xf4   :  { %v1468_v36 = vpack.c.bf16 %v1010_v32, %v1009_v30  ;;  %v1508_v37 = vpack.c.bf16 %v1026_v33, %v1025_v31 }
  0xf5   :  { %v583_v38 = vpop.f32.mrf.mxu2  ;;  %v623_v39 = vpop.f32.mrf.mxu3 }
  0xf6   :  { %1544 = vst [vmem:[%s1965_s4 + $0xa0] sm:$0xff] %v1468_v36   ;;  %v505_v40 = vpop.f32.mrf.mxu0  ;;  %v545_v41 = vpop.f32.mrf.mxu1  ;;  %v879_v50 = vmul.f32 %v1730_v42, %v583_v38  ;;  %v895_v51 = vmul.f32 %v1730_v42, %v623_v39 }
  0xf7   :  { %1552 = vst [vmem:[%s1965_s4 + $0xe0] sm:$0xff] %v1508_v37   ;;  %v848_v46 = vmul.f32 %v1730_v42, %v505_v40  ;;  %v864_v47 = vmul.f32 %v1730_v42, %v545_v41 }
  0xf8   :  { %v947_v60 = vadd.f32 %v1736_v44, %v879_v50  ;;  %v963_v61 = vadd.f32 %v1736_v44, %v895_v51 }
  0xf9   :  { %v916_v48 = vadd.f32 %v1736_v44, %v848_v46  ;;  %v932_v49 = vadd.f32 %v1736_v44, %v864_v47 }
  0xfa   :  { %v1011_v4 = vmax.f32 %v947_v60, 0.0  ;;  %v1027_v5 = vmax.f32 %v963_v61, 0.0 }
  0xfb   :  { %v980_v54 = vmax.f32 %v916_v48, 0.0  ;;  %v996_v55 = vmax.f32 %v932_v49, 0.0 }
  0xfd   :  { %v1393_v56 = vpack.c.bf16 %v980_v54, %v979_v52  ;;  %v1433_v57 = vpack.c.bf16 %v996_v55, %v995_v53  ;;  %v585_v58 = vpop.f32.mrf.mxu2  ;;  %v625_v59 = vpop.f32.mrf.mxu3 }
  0xfe   :  { %v880_v62 = vmul.f32 %v1730_v42, %v585_v58  ;;  %v896_v63 = vmul.f32 %v1730_v42, %v625_v59  ;;  %v508_v0 = vpop.f32.mrf.mxu0  ;;  %v548_v1 = vpop.f32.mrf.mxu1 }
  0xff   :  { %1529 = vst [vmem:[%s1965_s4 + $0x28] sm:$0xff] %v1393_v56   ;;  %v849_v8 = vmul.f32 %v1730_v42, %v508_v0  ;;  %v865_v9 = vmul.f32 %v1730_v42, %v548_v1 }
 0x100   :  { %1537 = vst [vmem:[%s1965_s4 + $0x68] sm:$0xff] %v1433_v57   ;;  %v948_v2 = vadd.f32 %v1736_v44, %v880_v62  ;;  %v964_v3 = vadd.f32 %v1736_v44, %v896_v63 }
 0x101   :  { %v917_v16 = vadd.f32 %v1736_v44, %v849_v8  ;;  %v933_v17 = vadd.f32 %v1736_v44, %v865_v9 }
 0x102   :  { %v1012_v6 = vmax.f32 %v948_v2, 0.0  ;;  %v1028_v7 = vmax.f32 %v964_v3, 0.0 }
 0x103   :  { %v981_v24 = vmax.f32 %v917_v16, 0.0  ;;  %v997_v25 = vmax.f32 %v933_v17, 0.0 }
 0x104   :  { %v1473_v10 = vpack.c.bf16 %v1012_v6, %v1011_v4  ;;  %v1513_v11 = vpack.c.bf16 %v1028_v7, %v1027_v5 }
 0x105   :  { %v588_v12 = vpop.f32.mrf.mxu2  ;;  %v628_v13 = vpop.f32.mrf.mxu3 }
 0x106   :  { %1545 = vst [vmem:[%s1965_s4 + $0xa8] sm:$0xff] %v1473_v10   ;;  %v510_v14 = vpop.f32.mrf.mxu0  ;;  %v550_v15 = vpop.f32.mrf.mxu1  ;;  %v881_v22 = vmul.f32 %v1730_v42, %v588_v12  ;;  %v897_v23 = vmul.f32 %v1730_v42, %v628_v13 }
 0x107   :  { %1553 = vst [vmem:[%s1965_s4 + $0xe8] sm:$0xff] %v1513_v11   ;;  %v850_v18 = vmul.f32 %v1730_v42, %v510_v14  ;;  %v866_v19 = vmul.f32 %v1730_v42, %v550_v15 }
 0x108   :  { %v949_v32 = vadd.f32 %v1736_v44, %v881_v22  ;;  %v965_v33 = vadd.f32 %v1736_v44, %v897_v23 }
 0x109   :  { %v918_v20 = vadd.f32 %v1736_v44, %v850_v18  ;;  %v934_v21 = vadd.f32 %v1736_v44, %v866_v19 }
 0x10a   :  { %v1013_v40 = vmax.f32 %v949_v32, 0.0  ;;  %v1029_v41 = vmax.f32 %v965_v33, 0.0 }
 0x10b   :  { %v982_v26 = vmax.f32 %v918_v20, 0.0  ;;  %v998_v27 = vmax.f32 %v934_v21, 0.0 }
 0x10d   :  { %v1398_v28 = vpack.c.bf16 %v982_v26, %v981_v24  ;;  %v1438_v29 = vpack.c.bf16 %v998_v27, %v997_v25  ;;  %v590_v30 = vpop.f32.mrf.mxu2  ;;  %v630_v31 = vpop.f32.mrf.mxu3 }
 0x10e   :  { %v882_v34 = vmul.f32 %v1730_v42, %v590_v30  ;;  %v898_v35 = vmul.f32 %v1730_v42, %v630_v31  ;;  %v513_v36 = vpop.f32.mrf.mxu0  ;;  %v553_v37 = vpop.f32.mrf.mxu1 }
 0x10f   :  { %1530 = vst [vmem:[%s1965_s4 + $0x30] sm:$0xff] %v1398_v28   ;;  %v851_v46 = vmul.f32 %v1730_v42, %v513_v36  ;;  %v867_v47 = vmul.f32 %v1730_v42, %v553_v37 }
 0x110   :  { %1538 = vst [vmem:[%s1965_s4 + $0x70] sm:$0xff] %v1438_v29   ;;  %v950_v38 = vadd.f32 %v1736_v44, %v882_v34  ;;  %v966_v39 = vadd.f32 %v1736_v44, %v898_v35 }
 0x111   :  { %v919_v54 = vadd.f32 %v1736_v44, %v851_v46  ;;  %v935_v55 = vadd.f32 %v1736_v44, %v867_v47 }
 0x112   :  { %v1014_v43 = vmax.f32 %v950_v38, 0.0  ;;  %v1030_v45 = vmax.f32 %v966_v39, 0.0 }
 0x113   :  { %v983_v62 = vmax.f32 %v919_v54, 0.0  ;;  %v999_v63 = vmax.f32 %v935_v55, 0.0 }
 0x114   :  { %v1478_v48 = vpack.c.bf16 %v1014_v43, %v1013_v40  ;;  %v1518_v49 = vpack.c.bf16 %v1030_v45, %v1029_v41 }
 0x115   :  { %v593_v50 = vpop.f32.mrf.mxu2  ;;  %v633_v51 = vpop.f32.mrf.mxu3 }
 0x116   :  { %1546 = vst [vmem:[%s1965_s4 + $0xb0] sm:$0xff] %v1478_v48   ;;  %v515_v52 = vpop.f32.mrf.mxu0  ;;  %v555_v53 = vpop.f32.mrf.mxu1  ;;  %v883_v60 = vmul.f32 %v1730_v42, %v593_v50  ;;  %v899_v61 = vmul.f32 %v1730_v42, %v633_v51 }
 0x117   :  { %1554 = vst [vmem:[%s1965_s4 + $0xf0] sm:$0xff] %v1518_v49   ;;  %v852_v56 = vmul.f32 %v1730_v42, %v515_v52  ;;  %v868_v57 = vmul.f32 %v1730_v42, %v555_v53 }
 0x118   :  { %v951_v6 = vadd.f32 %v1736_v44, %v883_v60  ;;  %v967_v7 = vadd.f32 %v1736_v44, %v899_v61 }
 0x119   :  { %v920_v58 = vadd.f32 %v1736_v44, %v852_v56  ;;  %v936_v59 = vadd.f32 %v1736_v44, %v868_v57 }
 0x11a   :  { %v1015_v12 = vmax.f32 %v951_v6, 0.0  ;;  %v1031_v13 = vmax.f32 %v967_v7, 0.0 }
 0x11b   :  { %v984_v0 = vmax.f32 %v920_v58, 0.0  ;;  %v1000_v1 = vmax.f32 %v936_v59, 0.0 }
 0x11d   :  { %v1403_v2 = vpack.c.bf16 %v984_v0, %v983_v62  ;;  %v1443_v3 = vpack.c.bf16 %v1000_v1, %v999_v63  ;;  %v595_v4 = vpop.f32.mrf.mxu2  ;;  %v635_v5 = vpop.f32.mrf.mxu3 }
 0x11e   :  { %v884_v8 = vmul.f32 %v1730_v42, %v595_v4  ;;  %v900_v9 = vmul.f32 %v1730_v42, %v635_v5 }
 0x11f   :  { %1531 = vst [vmem:[%s1965_s4 + $0x38] sm:$0xff] %v1403_v2  }
 0x120   :  { %1539 = vst [vmem:[%s1965_s4 + $0x78] sm:$0xff] %v1443_v3   ;;  %v952_v10 = vadd.f32 %v1736_v44, %v884_v8  ;;  %v968_v11 = vadd.f32 %v1736_v44, %v900_v9 }
 0x122   :  { %v1016_v14 = vmax.f32 %v952_v10, 0.0  ;;  %v1032_v15 = vmax.f32 %v968_v11, 0.0 }
 0x124   :  { %v1483_v16 = vpack.c.bf16 %v1016_v14, %v1015_v12  ;;  %v1523_v17 = vpack.c.bf16 %v1032_v15, %v1031_v13 }
 0x126   :  { %1547 = vst [vmem:[%s1965_s4 + $0xb8] sm:$0xff] %v1483_v16  }
 0x127   :  { %1555 = vst [vmem:[%s1965_s4 + $0xf8] sm:$0xff] %v1523_v17  }

// kernel: _lambda_.33
= control target key start
LH: loop header
LB: loop body
LE: loop exit
PB: predicated region body
PF: predicated region fallthrough
CT: control target
= control target key end

     0   :  { %s665_s1 = inlined_call_operand.vmem [shape: bf16[128,128], index: 1, kind: input, shape index: {}]   ;;  %s666_s2 = inlined_call_operand.vmem [shape: f32[1,128], index: 2, kind: input, shape index: {}]   ;;  %s667_s3 = inlined_call_operand.vmem [shape: f32[1,128], index: 3, kind: input, shape index: {}]   ;;  %s668_s0 = inlined_call_operand.vmem [shape: bf16[128,128], index: 0, kind: input, shape index: {}]   ;;  %s669_s4 = inlined_call_operand.vmem [shape: bf16[128,128], index: 4, kind: output, shape index: {}]  }
   0x1   :  { %v452_v0 = vld [vmem:[%s665_s1 + $0x38] sm:$0xff]  ;;  %v451_v1 = vld [vmem:[%s665_s1 + $0x30] sm:$0xff]  ;;  %v450_v2 = vld [vmem:[%s665_s1 + $0x28] sm:$0xff] }
   0x2   :  { %181 = vmatpush.bf16.msra.mxu0 %v452_v0  ;;  %500 = vmatpush.bf16.msra.mxu1 %v452_v0  ;;  %v449_v3 = vld [vmem:[%s665_s1 + $0x20] sm:$0xff]  ;;  %v448_v4 = vld [vmem:[%s665_s1 + $0x18] sm:$0xff]  ;;  %v447_v5 = vld [vmem:[%s665_s1 + $0x10] sm:$0xff] }
   0x3   :  { %501 = vmatpush.bf16.msra.mxu2 %v452_v0  ;;  %502 = vmatpush.bf16.msra.mxu3 %v452_v0  ;;  %v446_v6 = vld [vmem:[%s665_s1 + $0x8] sm:$0xff]  ;;  %v445_v7 = vld [vmem:[%s665_s1] sm:$0xff]  ;;  %v439_v9 = vld [vmem:[%s668_s0 + $0x10] sm:$0xff] }
   0x4   :  { %v437_v8 = vld [vmem:[%s668_s0] sm:$0xff]  ;;  %v443_v11 = vld [vmem:[%s668_s0 + $0x30] sm:$0xff]  ;;  %v438_v12 = vld [vmem:[%s668_s0 + $0x8] sm:$0xff] }
   0x5   :  { %v441_v10 = vld [vmem:[%s668_s0 + $0x20] sm:$0xff]  ;;  %v440_v13 = vld [vmem:[%s668_s0 + $0x18] sm:$0xff]  ;;  %v442_v14 = vld [vmem:[%s668_s0 + $0x28] sm:$0xff] }
   0x6   :  { %182 = vmatpush.bf16.msra.mxu0 %v451_v1  ;;  %503 = vmatpush.bf16.msra.mxu1 %v451_v1  ;;  %v444_v15 = vld [vmem:[%s668_s0 + $0x38] sm:$0xff]  ;;  %v602_v18 = vld [vmem:[%s666_s2] ss:$0 sm:$0xff] }
   0x7   :  { %504 = vmatpush.bf16.msra.mxu2 %v451_v1  ;;  %505 = vmatpush.bf16.msra.mxu3 %v451_v1  ;;  %v608_v20 = vld [vmem:[%s667_s3] ss:$0 sm:$0xff] }
   0xa   :  { %183 = vmatpush.bf16.msra.mxu0 %v450_v2  ;;  %506 = vmatpush.bf16.msra.mxu1 %v450_v2 }
   0xb   :  { %507 = vmatpush.bf16.msra.mxu2 %v450_v2  ;;  %508 = vmatpush.bf16.msra.mxu3 %v450_v2 }
   0xe   :  { %184 = vmatpush.bf16.msra.mxu0 %v449_v3  ;;  %509 = vmatpush.bf16.msra.mxu1 %v449_v3 }
   0xf   :  { %510 = vmatpush.bf16.msra.mxu2 %v449_v3  ;;  %511 = vmatpush.bf16.msra.mxu3 %v449_v3 }
  0x12   :  { %185 = vmatpush.bf16.msra.mxu0 %v448_v4  ;;  %512 = vmatpush.bf16.msra.mxu1 %v448_v4 }
  0x13   :  { %513 = vmatpush.bf16.msra.mxu2 %v448_v4  ;;  %514 = vmatpush.bf16.msra.mxu3 %v448_v4 }
  0x16   :  { %186 = vmatpush.bf16.msra.mxu0 %v447_v5  ;;  %515 = vmatpush.bf16.msra.mxu1 %v447_v5 }
  0x17   :  { %516 = vmatpush.bf16.msra.mxu2 %v447_v5  ;;  %517 = vmatpush.bf16.msra.mxu3 %v447_v5 }
  0x1a   :  { %187 = vmatpush.bf16.msra.mxu0 %v446_v6  ;;  %518 = vmatpush.bf16.msra.mxu1 %v446_v6 }
  0x1b   :  { %519 = vmatpush.bf16.msra.mxu2 %v446_v6  ;;  %520 = vmatpush.bf16.msra.mxu3 %v446_v6 }
  0x1e   :  { %188 = vmatpush.bf16.msra.mxu0 %v445_v7  ;;  %521 = vmatpush.bf16.msra.mxu1 %v445_v7 }
  0x1f   :  { %522 = vmatpush.bf16.msra.mxu2 %v445_v7  ;;  %523 = vmatpush.bf16.msra.mxu3 %v445_v7 }
  0x21   :  { %189 = vmatmul.bf16.vlgmr.msra.gmra.mxu0 %v437_v8  ;;  %199 = vmatmul.bf16.vlgmr.msra.gmra.mxu1 %v439_v9 }
  0x22   :  { %209 = vmatmul.bf16.vlgmr.msra.gmra.mxu2 %v441_v10  ;;  %219 = vmatmul.bf16.vlgmr.msra.gmra.mxu3 %v443_v11 }
  0x31   :  { %194 = vmatmul.bf16.gmra.mxu0 %v438_v12  ;;  %204 = vmatmul.bf16.gmra.mxu1 %v440_v13 }
  0x32   :  { %214 = vmatmul.bf16.gmra.mxu2 %v442_v14  ;;  %224 = vmatmul.bf16.gmra.mxu3 %v444_v15 }
  0x9e   :  { %v190_v16 = vpop.f32.mrf.mxu0  ;;  %v200_v17 = vpop.f32.mrf.mxu1 }
  0x9f   :  { %v285_v19 = vmul.f32 %v602_v18, %v190_v16  ;;  %v289_v21 = vmul.f32 %v602_v18, %v200_v17 }
  0xa1   :  { %v305_v26 = vadd.f32 %v608_v20, %v285_v19  ;;  %v309_v27 = vadd.f32 %v608_v20, %v289_v21 }
  0xa3   :  { %v321_v34 = vmax.f32 %v305_v26, 0.0  ;;  %v325_v35 = vmax.f32 %v309_v27, 0.0 }
  0xa5   :  { %v210_v22 = vpop.f32.mrf.mxu2  ;;  %v220_v23 = vpop.f32.mrf.mxu3 }
  0xa6   :  { %v192_v24 = vpop.f32.mrf.mxu0  ;;  %v202_v25 = vpop.f32.mrf.mxu1  ;;  %v293_v32 = vmul.f32 %v602_v18, %v210_v22  ;;  %v297_v33 = vmul.f32 %v602_v18, %v220_v23 }
  0xa7   :  { %v286_v28 = vmul.f32 %v602_v18, %v192_v24  ;;  %v290_v29 = vmul.f32 %v602_v18, %v202_v25 }
  0xa8   :  { %v313_v42 = vadd.f32 %v608_v20, %v293_v32  ;;  %v317_v43 = vadd.f32 %v608_v20, %v297_v33 }
  0xa9   :  { %v306_v30 = vadd.f32 %v608_v20, %v286_v28  ;;  %v310_v31 = vadd.f32 %v608_v20, %v290_v29 }
  0xaa   :  { %v329_v50 = vmax.f32 %v313_v42, 0.0  ;;  %v333_v51 = vmax.f32 %v317_v43, 0.0 }
  0xab   :  { %v322_v36 = vmax.f32 %v306_v30, 0.0  ;;  %v326_v37 = vmax.f32 %v310_v31, 0.0 }
  0xad   :  { %v456_v38 = vpack.c.bf16 %v322_v36, %v321_v34  ;;  %v466_v39 = vpack.c.bf16 %v326_v37, %v325_v35  ;;  %v212_v40 = vpop.f32.mrf.mxu2  ;;  %v222_v41 = vpop.f32.mrf.mxu3 }
  0xae   :  { %v294_v44 = vmul.f32 %v602_v18, %v212_v40  ;;  %v298_v45 = vmul.f32 %v602_v18, %v222_v41  ;;  %v195_v46 = vpop.f32.mrf.mxu0  ;;  %v205_v47 = vpop.f32.mrf.mxu1 }
  0xaf   :  { %457 = vst [vmem:[%s669_s4] sm:$0xff] %v456_v38   ;;  %v287_v54 = vmul.f32 %v602_v18, %v195_v46  ;;  %v291_v55 = vmul.f32 %v602_v18, %v205_v47 }
  0xb0   :  { %494 = vst [vmem:[%s669_s4 + $0x10] sm:$0xff] %v466_v39   ;;  %v314_v48 = vadd.f32 %v608_v20, %v294_v44  ;;  %v318_v49 = vadd.f32 %v608_v20, %v298_v45 }
  0xb1   :  { %v307_v62 = vadd.f32 %v608_v20, %v287_v54  ;;  %v311_v63 = vadd.f32 %v608_v20, %v291_v55 }
  0xb2   :  { %v330_v52 = vmax.f32 %v314_v48, 0.0  ;;  %v334_v53 = vmax.f32 %v318_v49, 0.0 }
  0xb3   :  { %v323_v6 = vmax.f32 %v307_v62, 0.0  ;;  %v327_v7 = vmax.f32 %v311_v63, 0.0 }
  0xb4   :  { %v476_v56 = vpack.c.bf16 %v330_v52, %v329_v50  ;;  %v486_v57 = vpack.c.bf16 %v334_v53, %v333_v51 }
  0xb5   :  { %v215_v58 = vpop.f32.mrf.mxu2  ;;  %v225_v59 = vpop.f32.mrf.mxu3 }
  0xb6   :  { %496 = vst [vmem:[%s669_s4 + $0x20] sm:$0xff] %v476_v56   ;;  %v197_v60 = vpop.f32.mrf.mxu0  ;;  %v207_v61 = vpop.f32.mrf.mxu1  ;;  %v295_v4 = vmul.f32 %v602_v18, %v215_v58  ;;  %v299_v5 = vmul.f32 %v602_v18, %v225_v59 }
  0xb7   :  { %498 = vst [vmem:[%s669_s4 + $0x30] sm:$0xff] %v486_v57   ;;  %v288_v0 = vmul.f32 %v602_v18, %v197_v60  ;;  %v292_v1 = vmul.f32 %v602_v18, %v207_v61 }
  0xb8   :  { %v315_v14 = vadd.f32 %v608_v20, %v295_v4  ;;  %v319_v15 = vadd.f32 %v608_v20, %v299_v5 }
  0xb9   :  { %v308_v2 = vadd.f32 %v608_v20, %v288_v0  ;;  %v312_v3 = vadd.f32 %v608_v20, %v292_v1 }
  0xba   :  { %v331_v22 = vmax.f32 %v315_v14, 0.0  ;;  %v335_v23 = vmax.f32 %v319_v15, 0.0 }
  0xbb   :  { %v324_v8 = vmax.f32 %v308_v2, 0.0  ;;  %v328_v9 = vmax.f32 %v312_v3, 0.0 }
  0xbd   :  { %v461_v10 = vpack.c.bf16 %v324_v8, %v323_v6  ;;  %v471_v11 = vpack.c.bf16 %v328_v9, %v327_v7  ;;  %v217_v12 = vpop.f32.mrf.mxu2  ;;  %v227_v13 = vpop.f32.mrf.mxu3 }
  0xbe   :  { %v296_v16 = vmul.f32 %v602_v18, %v217_v12  ;;  %v300_v17 = vmul.f32 %v602_v18, %v227_v13 }
  0xbf   :  { %493 = vst [vmem:[%s669_s4 + $0x8] sm:$0xff] %v461_v10  }
  0xc0   :  { %495 = vst [vmem:[%s669_s4 + $0x18] sm:$0xff] %v471_v11   ;;  %v316_v19 = vadd.f32 %v608_v20, %v296_v16  ;;  %v320_v21 = vadd.f32 %v608_v20, %v300_v17 }
  0xc2   :  { %v332_v24 = vmax.f32 %v316_v19, 0.0  ;;  %v336_v25 = vmax.f32 %v320_v21, 0.0 }
  0xc4   :  { %v481_v26 = vpack.c.bf16 %v332_v24, %v331_v22  ;;  %v491_v27 = vpack.c.bf16 %v336_v25, %v335_v23 }
  0xc6   :  { %497 = vst [vmem:[%s669_s4 + $0x28] sm:$0xff] %v481_v26  }
  0xc7   :  { %499 = vst [vmem:[%s669_s4 + $0x38] sm:$0xff] %v491_v27  }

// kernel: _lambda_.35
= control target key start
LH: loop header
LB: loop body
LE: loop exit
PB: predicated region body
PF: predicated region fallthrough
CT: control target
= control target key end

     0   :  { %s613_s1 = inlined_call_operand.vmem [shape: bf16[128,128], index: 1, kind: input, shape index: {}]   ;;  %s614_s2 = inlined_call_operand.vmem [shape: f32[1,128], index: 2, kind: input, shape index: {}]   ;;  %s615_s3 = inlined_call_operand.vmem [shape: f32[1,128], index: 3, kind: input, shape index: {}]   ;;  %s616_s0 = inlined_call_operand.vmem [shape: bf16[128,128], index: 0, kind: input, shape index: {}]   ;;  %s617_s4 = inlined_call_operand.vmem [shape: bf16[128,128], index: 4, kind: output, shape index: {}]  }
   0x1   :  { %v436_v0 = vld [vmem:[%s613_s1 + $0x38] sm:$0xff]  ;;  %v435_v1 = vld [vmem:[%s613_s1 + $0x30] sm:$0xff]  ;;  %v434_v2 = vld [vmem:[%s613_s1 + $0x28] sm:$0xff] }
   0x2   :  { %181 = vmatpush.bf16.msra.mxu0 %v436_v0  ;;  %484 = vmatpush.bf16.msra.mxu1 %v436_v0  ;;  %v433_v3 = vld [vmem:[%s613_s1 + $0x20] sm:$0xff]  ;;  %v432_v4 = vld [vmem:[%s613_s1 + $0x18] sm:$0xff]  ;;  %v431_v5 = vld [vmem:[%s613_s1 + $0x10] sm:$0xff] }
   0x3   :  { %485 = vmatpush.bf16.msra.mxu2 %v436_v0  ;;  %486 = vmatpush.bf16.msra.mxu3 %v436_v0  ;;  %v430_v6 = vld [vmem:[%s613_s1 + $0x8] sm:$0xff]  ;;  %v429_v7 = vld [vmem:[%s613_s1] sm:$0xff]  ;;  %v423_v9 = vld [vmem:[%s616_s0 + $0x10] sm:$0xff] }
   0x4   :  { %v421_v8 = vld [vmem:[%s616_s0] sm:$0xff]  ;;  %v427_v11 = vld [vmem:[%s616_s0 + $0x30] sm:$0xff]  ;;  %v422_v12 = vld [vmem:[%s616_s0 + $0x8] sm:$0xff] }
   0x5   :  { %v425_v10 = vld [vmem:[%s616_s0 + $0x20] sm:$0xff]  ;;  %v424_v13 = vld [vmem:[%s616_s0 + $0x18] sm:$0xff]  ;;  %v426_v14 = vld [vmem:[%s616_s0 + $0x28] sm:$0xff] }
   0x6   :  { %182 = vmatpush.bf16.msra.mxu0 %v435_v1  ;;  %487 = vmatpush.bf16.msra.mxu1 %v435_v1  ;;  %v428_v15 = vld [vmem:[%s616_s0 + $0x38] sm:$0xff]  ;;  %v508_v18 = vld [vmem:[%s614_s2] ss:$0 sm:$0xff] }
   0x7   :  { %488 = vmatpush.bf16.msra.mxu2 %v435_v1  ;;  %489 = vmatpush.bf16.msra.mxu3 %v435_v1  ;;  %v509_v20 = vld [vmem:[%s615_s3] ss:$0 sm:$0xff] }
   0xa   :  { %183 = vmatpush.bf16.msra.mxu0 %v434_v2  ;;  %490 = vmatpush.bf16.msra.mxu1 %v434_v2 }
   0xb   :  { %491 = vmatpush.bf16.msra.mxu2 %v434_v2  ;;  %492 = vmatpush.bf16.msra.mxu3 %v434_v2 }
   0xe   :  { %184 = vmatpush.bf16.msra.mxu0 %v433_v3  ;;  %493 = vmatpush.bf16.msra.mxu1 %v433_v3 }
   0xf   :  { %494 = vmatpush.bf16.msra.mxu2 %v433_v3  ;;  %495 = vmatpush.bf16.msra.mxu3 %v433_v3 }
  0x12   :  { %185 = vmatpush.bf16.msra.mxu0 %v432_v4  ;;  %496 = vmatpush.bf16.msra.mxu1 %v432_v4 }
  0x13   :  { %497 = vmatpush.bf16.msra.mxu2 %v432_v4  ;;  %498 = vmatpush.bf16.msra.mxu3 %v432_v4 }
  0x16   :  { %186 = vmatpush.bf16.msra.mxu0 %v431_v5  ;;  %499 = vmatpush.bf16.msra.mxu1 %v431_v5 }
  0x17   :  { %500 = vmatpush.bf16.msra.mxu2 %v431_v5  ;;  %501 = vmatpush.bf16.msra.mxu3 %v431_v5 }
  0x1a   :  { %187 = vmatpush.bf16.msra.mxu0 %v430_v6  ;;  %502 = vmatpush.bf16.msra.mxu1 %v430_v6 }
  0x1b   :  { %503 = vmatpush.bf16.msra.mxu2 %v430_v6  ;;  %504 = vmatpush.bf16.msra.mxu3 %v430_v6 }
  0x1e   :  { %188 = vmatpush.bf16.msra.mxu0 %v429_v7  ;;  %505 = vmatpush.bf16.msra.mxu1 %v429_v7 }
  0x1f   :  { %506 = vmatpush.bf16.msra.mxu2 %v429_v7  ;;  %507 = vmatpush.bf16.msra.mxu3 %v429_v7 }
  0x21   :  { %189 = vmatmul.bf16.vlgmr.msra.gmra.mxu0 %v421_v8  ;;  %199 = vmatmul.bf16.vlgmr.msra.gmra.mxu1 %v423_v9 }
  0x22   :  { %209 = vmatmul.bf16.vlgmr.msra.gmra.mxu2 %v425_v10  ;;  %219 = vmatmul.bf16.vlgmr.msra.gmra.mxu3 %v427_v11 }
  0x31   :  { %194 = vmatmul.bf16.gmra.mxu0 %v422_v12  ;;  %204 = vmatmul.bf16.gmra.mxu1 %v424_v13 }
  0x32   :  { %214 = vmatmul.bf16.gmra.mxu2 %v426_v14  ;;  %224 = vmatmul.bf16.gmra.mxu3 %v428_v15 }
  0x9e   :  { %v190_v16 = vpop.f32.mrf.mxu0  ;;  %v200_v17 = vpop.f32.mrf.mxu1 }
  0x9f   :  { %v285_v19 = vmul.f32 %v508_v18, %v190_v16  ;;  %v289_v21 = vmul.f32 %v508_v18, %v200_v17 }
  0xa1   :  { %v305_v28 = vadd.f32 %v509_v20, %v285_v19  ;;  %v309_v29 = vadd.f32 %v509_v20, %v289_v21 }
  0xa5   :  { %v210_v22 = vpop.f32.mrf.mxu2  ;;  %v220_v23 = vpop.f32.mrf.mxu3 }
  0xa6   :  { %v192_v24 = vpop.f32.mrf.mxu0  ;;  %v202_v25 = vpop.f32.mrf.mxu1  ;;  %v293_v34 = vmul.f32 %v508_v18, %v210_v22  ;;  %v297_v35 = vmul.f32 %v508_v18, %v220_v23 }
  0xa7   :  { %v286_v26 = vmul.f32 %v508_v18, %v192_v24  ;;  %v290_v27 = vmul.f32 %v508_v18, %v202_v25 }
  0xa8   :  { %v313_v42 = vadd.f32 %v509_v20, %v293_v34  ;;  %v317_v43 = vadd.f32 %v509_v20, %v297_v35 }
  0xa9   :  { %v306_v30 = vadd.f32 %v509_v20, %v286_v26  ;;  %v310_v31 = vadd.f32 %v509_v20, %v290_v27 }
  0xab   :  { %v440_v32 = vpack.c.bf16 %v306_v30, %v305_v28  ;;  %v450_v33 = vpack.c.bf16 %v310_v31, %v309_v29 }
  0xad   :  { %441 = vst [vmem:[%s617_s4] sm:$0xff] %v440_v32   ;;  %v212_v36 = vpop.f32.mrf.mxu2  ;;  %v222_v37 = vpop.f32.mrf.mxu3 }
  0xae   :  { %478 = vst [vmem:[%s617_s4 + $0x10] sm:$0xff] %v450_v33   ;;  %v294_v38 = vmul.f32 %v508_v18, %v212_v36  ;;  %v298_v39 = vmul.f32 %v508_v18, %v222_v37  ;;  %v195_v40 = vpop.f32.mrf.mxu0  ;;  %v205_v41 = vpop.f32.mrf.mxu1 }
  0xaf   :  { %v287_v48 = vmul.f32 %v508_v18, %v195_v40  ;;  %v291_v49 = vmul.f32 %v508_v18, %v205_v41 }
  0xb0   :  { %v314_v44 = vadd.f32 %v509_v20, %v294_v38  ;;  %v318_v45 = vadd.f32 %v509_v20, %v298_v39 }
  0xb1   :  { %v307_v56 = vadd.f32 %v509_v20, %v287_v48  ;;  %v311_v57 = vadd.f32 %v509_v20, %v291_v49 }
  0xb2   :  { %v460_v46 = vpack.c.bf16 %v314_v44, %v313_v42  ;;  %v470_v47 = vpack.c.bf16 %v318_v45, %v317_v43 }
  0xb4   :  { %480 = vst [vmem:[%s617_s4 + $0x20] sm:$0xff] %v460_v46  }
  0xb5   :  { %482 = vst [vmem:[%s617_s4 + $0x30] sm:$0xff] %v470_v47   ;;  %v215_v50 = vpop.f32.mrf.mxu2  ;;  %v225_v51 = vpop.f32.mrf.mxu3 }
  0xb6   :  { %v197_v52 = vpop.f32.mrf.mxu0  ;;  %v207_v53 = vpop.f32.mrf.mxu1  ;;  %v295_v62 = vmul.f32 %v508_v18, %v215_v50  ;;  %v299_v63 = vmul.f32 %v508_v18, %v225_v51 }
  0xb7   :  { %v288_v54 = vmul.f32 %v508_v18, %v197_v52  ;;  %v292_v55 = vmul.f32 %v508_v18, %v207_v53 }
  0xb8   :  { %v315_v4 = vadd.f32 %v509_v20, %v295_v62  ;;  %v319_v5 = vadd.f32 %v509_v20, %v299_v63 }
  0xb9   :  { %v308_v58 = vadd.f32 %v509_v20, %v288_v54  ;;  %v312_v59 = vadd.f32 %v509_v20, %v292_v55 }
  0xbb   :  { %v445_v60 = vpack.c.bf16 %v308_v58, %v307_v56  ;;  %v455_v61 = vpack.c.bf16 %v312_v59, %v311_v57 }
  0xbd   :  { %477 = vst [vmem:[%s617_s4 + $0x8] sm:$0xff] %v445_v60   ;;  %v217_v0 = vpop.f32.mrf.mxu2  ;;  %v227_v1 = vpop.f32.mrf.mxu3 }
  0xbe   :  { %479 = vst [vmem:[%s617_s4 + $0x18] sm:$0xff] %v455_v61   ;;  %v296_v2 = vmul.f32 %v508_v18, %v217_v0  ;;  %v300_v3 = vmul.f32 %v508_v18, %v227_v1 }
  0xc0   :  { %v316_v6 = vadd.f32 %v509_v20, %v296_v2  ;;  %v320_v7 = vadd.f32 %v509_v20, %v300_v3 }
  0xc2   :  { %v465_v8 = vpack.c.bf16 %v316_v6, %v315_v4  ;;  %v475_v9 = vpack.c.bf16 %v320_v7, %v319_v5 }
  0xc4   :  { %481 = vst [vmem:[%s617_s4 + $0x28] sm:$0xff] %v465_v8  }
  0xc5   :  { %483 = vst [vmem:[%s617_s4 + $0x38] sm:$0xff] %v475_v9  }

// kernel: _lambda_.30
= control target key start
LH: loop header
LB: loop body
LE: loop exit
PB: predicated region body
PF: predicated region fallthrough
CT: control target
= control target key end

     0   :  { %s3732_s15 = smov 0   ;;  %s3734_s16 = smov 0   ;;  %s4905_s0 = inlined_call_operand.vmem [shape: bf16[2,18,18,128], index: 0, kind: input, shape index: {}]   ;;  %s4906_s1 = inlined_call_operand.vmem [shape: bf16[3,3,128,128], index: 1, kind: input, shape index: {}]   ;;  %s4907_s2 = inlined_call_operand.vmem [shape: f32[1,128], index: 2, kind: input, shape index: {}]   ;;  %s4908_s3 = inlined_call_operand.vmem [shape: f32[1,128], index: 3, kind: input, shape index: {}]   ;;  %s4909_s4 = inlined_call_operand.vmem [shape: bf16[2,16,16,128], index: 4, kind: output, shape index: {}]  }
   0x1   :  { %s3736_s17 = smov 0  }
   0x2 LB: > { %s26_s18 = sadd.s32 1, %s3701_s16  ;;  %p3044_p0 = scmp.ge.s32.totalorder %s3705_s17, 1  ;;  %s3705_s17 = sphi %s3736_s17, %s14_s17   ;;  %s3701_s16 = sphi %s3734_s16, %s5029_s16   ;;  %s3697_s15 = sphi %s3732_s15, %s5028_s15  }
   0x3   : > { %p28_p1 = scmp.ge.s32.totalorder %s26_s18, 2  ;;  %p201_p2 = scmp.lt.s32.totalorder %s3705_s17, 3 }
   0x5   : > { %s5031_s18 = smov (%p28_p1, %s26_s18), 0  ;;  %p202_p3 = pnand %p3044_p0, %p201_p2 }
   0x7   : > { %205 = sbr.rel (%p202_p3) target bundleno = 763 (0x2fb), region = 36 }
   0xc   : > { %v3462_v0 = vld [vmem:[%s4906_s1 + $0x78] sm:$0xff]  ;;  %p240_p4 = scmp.lt.s32.totalorder %s3697_s15, 1  ;;  %v3461_v1 = vld [vmem:[%s4906_s1 + $0x70] sm:$0xff]  ;;  %v3460_v2 = vld [vmem:[%s4906_s1 + $0x68] sm:$0xff]  ;;  %vm461_vm0 = vsmask.f32 3328 }
   0xd   : > { %3614 = vmatpush.bf16.msra.mxu1 %v3462_v0  ;;  %3615 = vmatpush.bf16.msra.mxu2 %v3462_v0  ;;  %vm462_vm1 = vsmask.f32 7440  ;;  %v3459_v6 = vld [vmem:[%s4906_s1 + $0x60] sm:$0xff]  ;;  %v3458_v35 = vld [vmem:[%s4906_s1 + $0x58] sm:$0xff]  ;;  %v3457_v54 = vld [vmem:[%s4906_s1 + $0x50] sm:$0xff]  ;;  %vm1298_vm3 = vcmask 1042432  }
   0xe   : > { %s5033_s15 = smov (!%p240_p4, %s3697_s15), 1  ;;  %3616 = vmatpush.bf16.msra.mxu3 %v3462_v0  ;;  %960 = vmatpush.bf16.msra.mxu0 %v3462_v0  ;;  %vm3780_vm2 = vmor %vm461_vm0, %vm462_vm1  ;;  %vm1299_vm4 = vcmask 1046532  }
   0xf   : > { %s3638_s23 = smul.u32 216, %s5033_s15  ;;  %vm4153_vm5 = vmor %vm1298_vm3, %vm1299_vm4 }
  0x11   : > { %3617 = vmatpush.bf16.msra.mxu1 %v3461_v1  ;;  %3618 = vmatpush.bf16.msra.mxu2 %v3461_v1  ;;  %s3765_s28 = scalar_lea.vmem %s4905_s0, %s3638_s23  ;;  %s3428_s23 = sshll.u32 %s5033_s15, 7 }
  0x12   : > { %3619 = vmatpush.bf16.msra.mxu3 %v3461_v1  ;;  %961 = vmatpush.bf16.msra.mxu0 %v3461_v1  ;;  %v275_v3 = vld [vmem:[%s3765_s28 + $0x30] sm:$0xf]  ;;  %v276_v4 = vld [vmem:[%s3765_s28 + $0x34] sm:$0xf]  ;;  %v277_v5 = vld [vmem:[%s3765_s28 + $0x38] sm:$0x1]  ;;  %s4741_s26 = scalar_lea.vmem %s4909_s4, %s3428_s23 }
  0x13   : > { %v561_v7 = vshrl.u32 %v275_v3, 16  ;;  %v564_v8 = vshll.u32 %v275_v3, 16  ;;  %v570_v9 = vshll.u32 %v276_v4, 16  ;;  %v574_v10 = vshrl.u32 %v276_v4, 16  ;;  %v287_v11 = vld [vmem:[%s3765_s28 + $0x60] sm:$0xf] }
  0x14   : > { %v580_v12 = vshll.u32 %v277_v5, 16  ;;  %v288_v13 = vld [vmem:[%s3765_s28 + $0x64] sm:$0xf]  ;;  %v289_v14 = vld [vmem:[%s3765_s28 + $0x68] sm:$0x1]  ;;  %v657_v15 = vshrl.u32 %v287_v11, 16 }
  0x15   : > { %3620 = vmatpush.bf16.msra.mxu1 %v3460_v2  ;;  %3621 = vmatpush.bf16.msra.mxu2 %v3460_v2  ;;  %v563_v16 = vrot.slane %v561_v7, 4  ;;  %v566_v17 = vrot.slane %v564_v8, 5  ;;  %v572_v18 = vrot.slane %v570_v9, 5  ;;  %v576_v19 = vrot.slane %v574_v10, 4  ;;  %v299_v20 = vld [vmem:[%s3765_s28 + $0x90] sm:$0xf] }
  0x16   : > { %3622 = vmatpush.bf16.msra.mxu3 %v3460_v2  ;;  %962 = vmatpush.bf16.msra.mxu0 %v3460_v2  ;;  %v582_v21 = vrot.slane %v580_v12, 5  ;;  %v659_v22 = vrot.slane %v657_v15, 4  ;;  %v660_v23 = vshll.u32 %v287_v11, 16  ;;  %v666_v24 = vshll.u32 %v288_v13, 16  ;;  %v300_v29 = vld [vmem:[%s3765_s28 + $0x94] sm:$0xf] }
  0x17   : > { %v567_v25 = vor.u32 %v566_v17, %v563_v16  ;;  %v577_v26 = vor.u32 %v576_v19, %v572_v18  ;;  %v670_v27 = vshrl.u32 %v288_v13, 16  ;;  %v676_v28 = vshll.u32 %v289_v14, 16  ;;  %v301_v41 = vld [vmem:[%s3765_s28 + $0x98] sm:$0x1]  ;;  %v3793_v49 = vld [vmem:[%s3765_s28] sm:$0xf] }
  0x18   : > { %v662_v31 = vrot.slane %v660_v23, 5  ;;  %v668_v32 = vrot.slane %v666_v24, 5  ;;  %v753_v33 = vshrl.u32 %v299_v20, 16  ;;  %v756_v34 = vshll.u32 %v299_v20, 16  ;;  %v3803_v62 = vld [vmem:[%s3765_s28 + $0x4] sm:$0xf] }
  0x19   : > { %3623 = vmatpush.bf16.msra.mxu1 %v3459_v6  ;;  %3624 = vmatpush.bf16.msra.mxu2 %v3459_v6  ;;  %v568_v36 = vrot.slane %v567_v25, 4  ;;  %v578_v37 = vrot.slane %v577_v26, 4  ;;  %v672_v38 = vrot.slane %v670_v27, 4  ;;  %v678_v39 = vrot.slane %v676_v28, 5  ;;  %v3809_v4 = vld [vmem:[%s3765_s28 + $0x8] sm:$0x1] }
  0x1a   : > { %3625 = vmatpush.bf16.msra.mxu3 %v3459_v6  ;;  %963 = vmatpush.bf16.msra.mxu0 %v3459_v6  ;;  %v663_v40 = vor.u32 %v662_v31, %v659_v22  ;;  %v755_v42 = vrot.slane %v753_v33, 4  ;;  %v758_v43 = vrot.slane %v756_v34, 5  ;;  %v762_v44 = vshll.u32 %v300_v29, 16  ;;  %v3812_v5 = vld [vmem:[%s3765_s28 + $0x3c] sm:$0xf]  ;;  %v3456_v10 = vld [vmem:[%s4906_s1 + $0x48] sm:$0xff] }
  0x1b   : > { %v573_v45 = vsel %vm3780_vm2, %v568_v36, %v572_v18  ;;  %v583_v46 = vsel %vm3780_vm2, %v578_v37, %v582_v21  ;;  %v673_v47 = vor.u32 %v672_v38, %v668_v32  ;;  %v766_v48 = vshrl.u32 %v300_v29, 16  ;;  %v3823_v15 = vld [vmem:[%s3765_s28 + $0x40] sm:$0xf]  ;;  %v3829_v19 = vld [vmem:[%s3765_s28 + $0x44] sm:$0x1]  ;;  %v3470_v37 = vld [vmem:[%s4906_s1 + $0xb8] sm:$0xff] }
  0x1c   : > { %v856_v50 = vunpack.c.l.b16 %v573_v45  ;;  %v857_v51 = vunpack.c.l.b16 %v583_v46  ;;  %v664_v52 = vrot.slane %v663_v40, 4  ;;  %v759_v53 = vor.u32 %v758_v43, %v755_v42  ;;  %v290_v25 = vld [vmem:[%s3765_s28 + $0x6c] sm:$0xf]  ;;  %v3455_v31 = vld [vmem:[%s4906_s1 + $0x40] sm:$0xff]  ;;  %v291_v40 = vld [vmem:[%s3765_s28 + $0x70] sm:$0xf] }
  0x1d   : > { %3626 = vmatpush.bf16.msra.mxu1 %v3458_v35  ;;  %3627 = vmatpush.bf16.msra.mxu2 %v3458_v35  ;;  %v674_v55 = vrot.slane %v673_v47, 4  ;;  %v764_v56 = vrot.slane %v762_v44, 5  ;;  %v768_v57 = vrot.slane %v766_v48, 4  ;;  %v772_v58 = vshll.u32 %v301_v41, 16  ;;  %v3478_v43 = vld [vmem:[%s4906_s1 + $0xf8] sm:$0xff] }
  0x1e   : > { %3628 = vmatpush.bf16.msra.mxu3 %v3458_v35  ;;  %964 = vmatpush.bf16.msra.mxu0 %v3458_v35  ;;  %v3798_v59 = vpack.c.b16 %v857_v51, %v856_v50  ;;  %v669_v60 = vsel %vm3780_vm2, %v664_v52, %v668_v32  ;;  %v760_v61 = vrot.slane %v759_v53, 4  ;;  %v465_v63 = vshrl.u32 %v3793_v49, 16  ;;  %v292_v47 = vld [vmem:[%s3765_s28 + $0x74] sm:$0x1]  ;;  %v302_v53 = vld [vmem:[%s3765_s28 + $0x9c] sm:$0xf] }
  0x1f   : > { %v679_v0 = vsel %vm3780_vm2, %v674_v55, %v678_v39  ;;  %v864_v1 = vunpack.c.l.b16 %v669_v60  ;;  %v769_v2 = vor.u32 %v768_v57, %v764_v56  ;;  %v774_v3 = vrot.slane %v772_v58, 5 }
  0x20   : > { %v865_v6 = vunpack.c.l.b16 %v679_v0  ;;  %v765_v7 = vsel %vm3780_vm2, %v760_v61, %v764_v56  ;;  %v467_v8 = vrot.slane %v465_v63, 4  ;;  %v468_v9 = vshll.u32 %v3793_v49, 16  ;;  %v3454_v56 = vld [vmem:[%s4906_s1 + $0x38] sm:$0xff]  ;;  %v3469_v61 = vld [vmem:[%s4906_s1 + $0xb0] sm:$0xff] }
  0x21   : > { %3629 = vmatpush.bf16.msra.mxu1 %v3457_v54  ;;  %3630 = vmatpush.bf16.msra.mxu2 %v3457_v54  ;;  %v770_v11 = vrot.slane %v769_v2, 4  ;;  %v872_v12 = vunpack.c.l.b16 %v765_v7  ;;  %v474_v13 = vshll.u32 %v3803_v62, 16  ;;  %v478_v14 = vshrl.u32 %v3803_v62, 16  ;;  %v3477_v2 = vld [vmem:[%s4906_s1 + $0xf0] sm:$0xff] }
  0x22   : > { %3631 = vmatpush.bf16.msra.mxu3 %v3457_v54  ;;  %965 = vmatpush.bf16.msra.mxu0 %v3457_v54  ;;  %v3825_v16 = vpack.c.b16 %v865_v6, %v864_v1  ;;  %v470_v17 = vrot.slane %v468_v9, 5  ;;  %v484_v18 = vshll.u32 %v3809_v4, 16  ;;  %v585_v20 = vshrl.u32 %v3812_v5, 16 }
  0x23   : > { %v775_v21 = vsel %vm3780_vm2, %v770_v11, %v774_v3  ;;  %v476_v22 = vrot.slane %v474_v13, 5  ;;  %v480_v23 = vrot.slane %v478_v14, 4  ;;  %v588_v24 = vshll.u32 %v3812_v5, 16  ;;  %v3486_v11 = vld [vmem:[%s4906_s1 + $0x138] sm:$0xff] }
  0x24   : > { %4944 = vst [vmem:[#allocation2_spill] sm:$0xff] %v3825_v16  ;;  %v873_v26 = vunpack.c.l.b16 %v775_v21  ;;  %v471_v27 = vor.u32 %v470_v17, %v467_v8  ;;  %v486_v28 = vrot.slane %v484_v18, 5  ;;  %v587_v29 = vrot.slane %v585_v20, 4  ;;  %v303_v8 = vld [vmem:[%s3765_s28 + $0xa0] sm:$0xf]  ;;  %v3453_v20 = vld [vmem:[%s4906_s1 + $0x30] sm:$0xff] }
  0x25   : > { %3632 = vmatpush.bf16.msra.mxu1 %v3456_v10  ;;  %3633 = vmatpush.bf16.msra.mxu2 %v3456_v10  ;;  %v481_v32 = vor.u32 %v480_v23, %v476_v22  ;;  %v590_v33 = vrot.slane %v588_v24, 5  ;;  %v594_v34 = vshll.u32 %v3823_v15, 16  ;;  %v598_v35 = vshrl.u32 %v3823_v15, 16  ;;  %v304_v17 = vld [vmem:[%s3765_s28 + $0xa4] sm:$0x1] }
  0x26   : > { %3634 = vmatpush.bf16.msra.mxu3 %v3456_v10  ;;  %966 = vmatpush.bf16.msra.mxu0 %v3456_v10  ;;  %v3841_v36 = vpack.c.b16 %v873_v26, %v872_v12  ;;  %v472_v38 = vrot.slane %v471_v27, 4  ;;  %v604_v39 = vshll.u32 %v3829_v19, 16  ;;  %v681_v41 = vshrl.u32 %v290_v25, 16  ;;  %v3876_v18 = vld [vmem:[%s3765_s28 + $0xc] sm:$0xf] }
  0x27   : > { %v482_v42 = vrot.slane %v481_v32, 4  ;;  %v591_v44 = vor.u32 %v590_v33, %v587_v29  ;;  %v596_v45 = vrot.slane %v594_v34, 5  ;;  %v600_v46 = vrot.slane %v598_v35, 4  ;;  %v3468_v29 = vld [vmem:[%s4906_s1 + $0xa8] sm:$0xff]  ;;  %v3888_v34 = vld [vmem:[%s3765_s28 + $0x10] sm:$0xf] }
  0x28   : > { %v477_v48 = vsel %vm3780_vm2, %v472_v38, %v476_v22  ;;  %v606_v50 = vrot.slane %v604_v39, 5  ;;  %v683_v51 = vrot.slane %v681_v41, 4  ;;  %v684_v52 = vshll.u32 %v290_v25, 16 }
  0x29   : > { %3635 = vmatpush.bf16.msra.mxu1 %v3455_v31  ;;  %3636 = vmatpush.bf16.msra.mxu2 %v3455_v31  ;;  %v487_v54 = vsel %vm3780_vm2, %v482_v42, %v486_v28  ;;  %v848_v55 = vunpack.c.l.b16 %v477_v48  ;;  %v592_v57 = vrot.slane %v591_v44, 4  ;;  %v601_v58 = vor.u32 %v600_v46, %v596_v45  ;;  %v3899_v42 = vld [vmem:[%s3765_s28 + $0x14] sm:$0x1]  ;;  %v3452_v48 = vld [vmem:[%s4906_s1 + $0x28] sm:$0xff] }
  0x2a   : > { %3637 = vmatpush.bf16.msra.mxu3 %v3455_v31  ;;  %967 = vmatpush.bf16.msra.mxu0 %v3455_v31  ;;  %v849_v60 = vunpack.c.l.b16 %v487_v54  ;;  %v686_v63 = vrot.slane %v684_v52, 5  ;;  %v690_v0 = vshll.u32 %v291_v40, 16  ;;  %v694_v1 = vshrl.u32 %v291_v40, 16  ;;  %v3910_v54 = vld [vmem:[%s3765_s28 + $0x48] sm:$0xf] }
  0x2b   : > { %v597_v3 = vsel %vm3780_vm2, %v592_v57, %v596_v45  ;;  %v602_v6 = vrot.slane %v601_v58, 4  ;;  %v700_v7 = vshll.u32 %v292_v47, 16  ;;  %v777_v9 = vshrl.u32 %v302_v53, 16 }
  0x2c   : > { %988 = vmatmul.bf16.vlgmr.msra.gmra.mxu1 %v3798_v59  ;;  %1008 = vmatmul.bf16.vlgmr.msra.gmra.mxu2 %v3825_v16  ;;  %v880_v10 = vpack.c.b16 %v849_v60, %v848_v55  ;;  %v858_v12 = vunpack.c.l.b16 %v597_v3  ;;  %v687_v13 = vor.u32 %v686_v63, %v683_v51  ;;  %v692_v14 = vrot.slane %v690_v0, 5  ;;  %v3467_v60 = vld [vmem:[%s4906_s1 + $0xa0] sm:$0xff]  ;;  %v3484_v3 = vld [vmem:[%s4906_s1 + $0x128] sm:$0xff] }
  0x2d   : > { %1525 = vmatpush.bf16.msrb.mxu2 %v3470_v37  ;;  %1028 = vmatmul.bf16.vlgmr.msra.gmra.mxu3 %v3841_v36  ;;  %v607_v21 = vsel %vm3780_vm2, %v602_v6, %v606_v50  ;;  %v696_v22 = vrot.slane %v694_v1, 4  ;;  %v702_v23 = vrot.slane %v700_v7, 5  ;;  %v779_v24 = vrot.slane %v777_v9, 4  ;;  %v3476_v37 = vld [vmem:[%s4906_s1 + $0xe8] sm:$0xff]  ;;  %v3451_v6 = vld [vmem:[%s4906_s1 + $0x20] sm:$0xff] }
  0x2e   : > { %1700 = vmatpush.bf16.msrb.mxu3 %v3478_v43  ;;  %1193 = vmatpush.bf16.msrb.mxu1 %v3454_v56  ;;  %v859_v25 = vunpack.c.l.b16 %v607_v21  ;;  %v688_v26 = vrot.slane %v687_v13, 4  ;;  %v780_v27 = vshll.u32 %v302_v53, 16  ;;  %v786_v28 = vshll.u32 %v303_v8, 16  ;;  %v3485_v43 = vld [vmem:[%s4906_s1 + $0x130] sm:$0xff]  ;;  %v3941_v21 = vld [vmem:[%s3765_s28 + $0x78] sm:$0xf] }
  0x2f   : > { %968 = vmatmul.bf16.vlgmr.msra.gmra.mxu0 %v880_v10  ;;  %v697_v31 = vor.u32 %v696_v22, %v692_v14  ;;  %v790_v32 = vshrl.u32 %v303_v8, 16  ;;  %v796_v33 = vshll.u32 %v304_v17, 16  ;;  %v489_v35 = vshrl.u32 %v3876_v18, 16  ;;  %v3929_v10 = vld [vmem:[%s3765_s28 + $0x4c] sm:$0xf] }
  0x30   : > { %1897 = vmatpush.bf16.msrb.mxu0 %v3486_v11  ;;  %v3894_v38 = vpack.c.b16 %v859_v25, %v858_v12  ;;  %v693_v39 = vsel %vm3780_vm2, %v688_v26, %v692_v14  ;;  %v782_v40 = vrot.slane %v780_v27, 5  ;;  %v788_v41 = vrot.slane %v786_v28, 5  ;;  %v3937_v17 = vld [vmem:[%s3765_s28 + $0x50] sm:$0x1]  ;;  %v3466_v26 = vld [vmem:[%s4906_s1 + $0x98] sm:$0xff] }
  0x31   : > { %1526 = vmatpush.bf16.msrb.mxu2 %v3469_v61  ;;  %v698_v44 = vrot.slane %v697_v31, 4  ;;  %v866_v45 = vunpack.c.l.b16 %v693_v39  ;;  %v792_v46 = vrot.slane %v790_v32, 4  ;;  %v798_v47 = vrot.slane %v796_v33, 5  ;;  %v3475_v61 = vld [vmem:[%s4906_s1 + $0xe0] sm:$0xff]  ;;  %v3474_v27 = vld [vmem:[%s4906_s1 + $0xd8] sm:$0xff] }
  0x32   : > { %1701 = vmatpush.bf16.msrb.mxu3 %v3477_v2  ;;  %4945 = vst [vmem:[#allocation3_spill] sm:$0xff] %v3894_v38  ;;  %1194 = vmatpush.bf16.msrb.mxu1 %v3453_v20  ;;  %v783_v50 = vor.u32 %v782_v40, %v779_v24  ;;  %v491_v51 = vrot.slane %v489_v35, 4  ;;  %v492_v52 = vshll.u32 %v3876_v18, 16  ;;  %v498_v53 = vshll.u32 %v3888_v34, 16  ;;  %v3483_v40 = vld [vmem:[%s4906_s1 + $0x120] sm:$0xff] }
  0x33   : > { %v703_v55 = vsel %vm3780_vm2, %v698_v44, %v702_v23  ;;  %v793_v56 = vor.u32 %v792_v46, %v788_v41  ;;  %v502_v57 = vshrl.u32 %v3888_v34, 16  ;;  %v508_v58 = vshll.u32 %v3899_v42, 16  ;;  %v3963_v46 = vld [vmem:[%s3765_s28 + $0x7c] sm:$0xf] }
  0x34   : > { %v867_v63 = vunpack.c.l.b16 %v703_v55  ;;  %v784_v0 = vrot.slane %v783_v50, 4  ;;  %v494_v1 = vrot.slane %v492_v52, 5  ;;  %v500_v2 = vrot.slane %v498_v53, 5  ;;  %1898 = vmatpush.bf16.msrb.mxu0 %v3485_v43  ;;  %v305_v55 = vld [vmem:[%s3765_s28 + $0xa8] sm:$0xf] }
  0x35   : > { %1527 = vmatpush.bf16.msrb.mxu2 %v3468_v29  ;;  %v794_v7 = vrot.slane %v793_v56, 4  ;;  %v504_v8 = vrot.slane %v502_v57, 4  ;;  %v510_v9 = vrot.slane %v508_v58, 5  ;;  %v609_v11 = vshrl.u32 %v3910_v54, 16  ;;  %v3465_v56 = vld [vmem:[%s4906_s1 + $0x90] sm:$0xff] }
  0x36   : > { %1702 = vmatpush.bf16.msrb.mxu3 %v3476_v37  ;;  %1195 = vmatpush.bf16.msrb.mxu1 %v3452_v48  ;;  %v3932_v12 = vpack.c.b16 %v867_v63, %v866_v45  ;;  %v789_v13 = vsel %vm3780_vm2, %v784_v0, %v788_v41  ;;  %v495_v14 = vor.u32 %v494_v1, %v491_v51  ;;  %v612_v20 = vshll.u32 %v3910_v54, 16  ;;  %v3450_v48 = vld [vmem:[%s4906_s1 + $0x18] sm:$0xff]  ;;  %v3473_v57 = vld [vmem:[%s4906_s1 + $0xd0] sm:$0xff] }
  0x37   : > { %v799_v22 = vsel %vm3780_vm2, %v794_v7, %v798_v47  ;;  %v874_v23 = vunpack.c.l.b16 %v789_v13  ;;  %v505_v24 = vor.u32 %v504_v8, %v500_v2  ;;  %v611_v25 = vrot.slane %v609_v11, 4  ;;  %v3966_v47 = vld [vmem:[%s3765_s28 + $0x80] sm:$0x1]  ;;  %v306_v11 = vld [vmem:[%s3765_s28 + $0xac] sm:$0xf] }
  0x38   : > { %v875_v28 = vunpack.c.l.b16 %v799_v22  ;;  %v496_v29 = vrot.slane %v495_v14, 4  ;;  %1899 = vmatpush.bf16.msrb.mxu0 %v3484_v3  ;;  %v614_v31 = vrot.slane %v612_v20, 5  ;;  %v618_v32 = vshll.u32 %v3929_v10, 16  ;;  %v3449_v14 = vld [vmem:[%s4906_s1 + $0x10] sm:$0xff] }
  0x39   : > { %1528 = vmatpush.bf16.msrb.mxu2 %v3467_v60  ;;  %v506_v33 = vrot.slane %v505_v24, 4  ;;  %v622_v35 = vshrl.u32 %v3929_v10, 16  ;;  %v628_v37 = vshll.u32 %v3937_v17, 16  ;;  %v705_v39 = vshrl.u32 %v3941_v21, 16 }
  0x3a   : > { %1703 = vmatpush.bf16.msrb.mxu3 %v3475_v61  ;;  %1196 = vmatpush.bf16.msrb.mxu1 %v3451_v6  ;;  %v3958_v41 = vpack.c.b16 %v875_v28, %v874_v23  ;;  %v501_v43 = vsel %vm3780_vm2, %v496_v29, %v500_v2  ;;  %v615_v44 = vor.u32 %v614_v31, %v611_v25  ;;  %v620_v45 = vrot.slane %v618_v32, 5  ;;  %v3482_v6 = vld [vmem:[%s4906_s1 + $0x118] sm:$0xff]  ;;  %v307_v25 = vld [vmem:[%s3765_s28 + $0xb0] sm:$0x1] }
  0x3b   : > { %v511_v50 = vsel %vm3780_vm2, %v506_v33, %v510_v9  ;;  %v850_v51 = vunpack.c.l.b16 %v501_v43  ;;  %v624_v52 = vrot.slane %v622_v35, 4  ;;  %v630_v53 = vrot.slane %v628_v37, 5  ;;  %v4001_v31 = vld [vmem:[%s3765_s28 + $0x18] sm:$0xf] }
  0x3c   : > { %4946 = vst [vmem:[#allocation4_spill] sm:$0xff] %v3958_v41  ;;  %993 = vmatmul.bf16.gmra.mxu1 %v3894_v38  ;;  %1013 = vmatmul.bf16.gmra.mxu2 %v3932_v12  ;;  %v851_v58 = vunpack.c.l.b16 %v511_v50  ;;  %v616_v60 = vrot.slane %v615_v44, 4  ;;  %v707_v61 = vrot.slane %v705_v39, 4  ;;  %v708_v63 = vshll.u32 %v3941_v21, 16 }
  0x3d   : > { %1529 = vmatpush.bf16.msrb.mxu2 %v3466_v26  ;;  %1033 = vmatmul.bf16.gmra.mxu3 %v3958_v41  ;;  %v625_v0 = vor.u32 %v624_v52, %v620_v45  ;;  %v714_v1 = vshll.u32 %v3963_v46, 16  ;;  %v718_v2 = vshrl.u32 %v3963_v46, 16  ;;  %v724_v3 = vshll.u32 %v3966_v47, 16  ;;  %v4009_v52 = vld [vmem:[%s3765_s28 + $0x1c] sm:$0xf] }
  0x3e   : > { %1704 = vmatpush.bf16.msrb.mxu3 %v3474_v27  ;;  %1900 = vmatpush.bf16.msrb.mxu0 %v3483_v40  ;;  %v3990_v7 = vpack.c.b16 %v851_v58, %v850_v51  ;;  %v621_v8 = vsel %vm3780_vm2, %v616_v60, %v620_v45  ;;  %v710_v9 = vrot.slane %v708_v63, 5  ;;  %v801_v13 = vshrl.u32 %v305_v55, 16  ;;  %v3464_v45 = vld [vmem:[%s4906_s1 + $0x88] sm:$0xff]  ;;  %v4017_v60 = vld [vmem:[%s3765_s28 + $0x20] sm:$0x1] }
  0x3f   : > { %1197 = vmatpush.bf16.msrb.mxu1 %v3450_v48  ;;  %v626_v20 = vrot.slane %v625_v0, 4  ;;  %v860_v22 = vunpack.c.l.b16 %v621_v8  ;;  %v716_v23 = vrot.slane %v714_v1, 5  ;;  %v720_v24 = vrot.slane %v718_v2, 4 }
  0x40   : > { %973 = vmatmul.bf16.gmra.mxu0 %v3990_v7  ;;  %v711_v26 = vor.u32 %v710_v9, %v707_v61  ;;  %v726_v27 = vrot.slane %v724_v3, 5  ;;  %v803_v28 = vrot.slane %v801_v13, 4  ;;  %v804_v29 = vshll.u32 %v305_v55, 16  ;;  %v4020_v61 = vld [vmem:[%s3765_s28 + $0x54] sm:$0xf] }
  0x41   : > { %1530 = vmatpush.bf16.msrb.mxu2 %v3465_v56  ;;  %v631_v32 = vsel %vm3780_vm2, %v626_v20, %v630_v53  ;;  %v721_v33 = vor.u32 %v720_v24, %v716_v23  ;;  %v810_v35 = vshll.u32 %v306_v11, 16  ;;  %v814_v37 = vshrl.u32 %v306_v11, 16  ;;  %v3472_v11 = vld [vmem:[%s4906_s1 + $0xc8] sm:$0xff]  ;;  %v3481_v13 = vld [vmem:[%s4906_s1 + $0x110] sm:$0xff] }
  0x42   : > { %1705 = vmatpush.bf16.msrb.mxu3 %v3473_v57  ;;  %1901 = vmatpush.bf16.msrb.mxu0 %v3482_v6  ;;  %v861_v39 = vunpack.c.l.b16 %v631_v32  ;;  %v712_v40 = vrot.slane %v711_v26, 4  ;;  %v806_v43 = vrot.slane %v804_v29, 5  ;;  %v820_v44 = vshll.u32 %v307_v25, 16  ;;  %v3463_v25 = vld [vmem:[%s4906_s1 + $0x80] sm:$0xff]  ;;  %v4046_v32 = vld [vmem:[%s3765_s28 + $0x58] sm:$0xf] }
  0x43   : > { %1198 = vmatpush.bf16.msrb.mxu1 %v3449_v14  ;;  %v722_v48 = vrot.slane %v721_v33, 4  ;;  %v812_v50 = vrot.slane %v810_v35, 5  ;;  %v816_v51 = vrot.slane %v814_v37, 4  ;;  %v513_v53 = vshrl.u32 %v4001_v31, 16  ;;  %v3448_v14 = vld [vmem:[%s4906_s1 + $0x8] sm:$0xff] }
  0x44   : > { %v4012_v55 = vpack.c.b16 %v861_v39, %v860_v22  ;;  %v717_v56 = vsel %vm3780_vm2, %v712_v40, %v716_v23  ;;  %v807_v57 = vor.u32 %v806_v43, %v803_v28  ;;  %v822_v58 = vrot.slane %v820_v44, 5  ;;  %v4049_v33 = vld [vmem:[%s3765_s28 + $0x5c] sm:$0x1]  ;;  %v4054_v43 = vld [vmem:[%s3765_s28 + $0x84] sm:$0xf] }
  0x45   : > { %1531 = vmatpush.bf16.msrb.mxu2 %v3464_v45  ;;  %v727_v63 = vsel %vm3780_vm2, %v722_v48, %v726_v27  ;;  %v868_v0 = vunpack.c.l.b16 %v717_v56  ;;  %v817_v1 = vor.u32 %v816_v51, %v812_v50  ;;  %v515_v2 = vrot.slane %v513_v53, 4  ;;  %v3471_v44 = vld [vmem:[%s4906_s1 + $0xc0] sm:$0xff]  ;;  %v3480_v45 = vld [vmem:[%s4906_s1 + $0x108] sm:$0xff] }
  0x46   : > { %4947 = vst [vmem:[#allocation5_spill] sm:$0xff] %v4012_v55  ;;  %v869_v3 = vunpack.c.l.b16 %v727_v63  ;;  %v808_v6 = vrot.slane %v807_v57, 4  ;;  %v516_v8 = vshll.u32 %v4001_v31, 16  ;;  %v522_v9 = vshll.u32 %v4009_v52, 16  ;;  %1706 = vmatpush.bf16.msrb.mxu3 %v3472_v11  ;;  %1902 = vmatpush.bf16.msrb.mxu0 %v3481_v13  ;;  %v3447_v56 = vld [vmem:[%s4906_s1] sm:$0xff] }
  0x47   : > { %v818_v20 = vrot.slane %v817_v1, 4  ;;  %v526_v22 = vshrl.u32 %v4009_v52, 16  ;;  %v532_v23 = vshll.u32 %v4017_v60, 16  ;;  %v633_v24 = vshrl.u32 %v4020_v61, 16  ;;  %1199 = vmatpush.bf16.msrb.mxu1 %v3448_v14 }
  0x48   : > { %v4041_v26 = vpack.c.b16 %v869_v3, %v868_v0  ;;  %v813_v27 = vsel %vm3780_vm2, %v808_v6, %v812_v50  ;;  %v518_v28 = vrot.slane %v516_v8, 5  ;;  %v524_v29 = vrot.slane %v522_v9, 5  ;;  %v4074_v6 = vld [vmem:[%s3765_s28 + $0x88] sm:$0xf] }
  0x49   : > { %v823_v35 = vsel %vm3780_vm2, %v818_v20, %v822_v58  ;;  %v876_v37 = vunpack.c.l.b16 %v813_v27  ;;  %v528_v39 = vrot.slane %v526_v22, 4  ;;  %v534_v40 = vrot.slane %v532_v23, 5  ;;  %1532 = vmatpush.bf16.msrb.mxu2 %v3463_v25  ;;  %v3479_v20 = vld [vmem:[%s4906_s1 + $0x100] sm:$0xff] }
  0x4a   : > { %v877_v48 = vunpack.c.l.b16 %v823_v35  ;;  %v519_v50 = vor.u32 %v518_v28, %v515_v2  ;;  %v635_v51 = vrot.slane %v633_v24, 4  ;;  %v636_v53 = vshll.u32 %v4020_v61, 16  ;;  %1707 = vmatpush.bf16.msrb.mxu3 %v3471_v44  ;;  %1903 = vmatpush.bf16.msrb.mxu0 %v3480_v45  ;;  %v4084_v24 = vld [vmem:[%s3765_s28 + $0x8c] sm:$0x1]  ;;  %v4088_v28 = vld [vmem:[%s3765_s28 + $0xb4] sm:$0xf] }
  0x4b   : > { %v529_v57 = vor.u32 %v528_v39, %v524_v29  ;;  %v642_v58 = vshll.u32 %v4046_v32, 16  ;;  %v646_v63 = vshrl.u32 %v4046_v32, 16  ;;  %v652_v0 = vshll.u32 %v4049_v33, 16  ;;  %4949 = vst [vmem:[#allocation7_spill] sm:$0xff] %v4088_v28  ;;  %1200 = vmatpush.bf16.msrb.mxu1 %v3447_v56 }
  0x4c   : > { %998 = vmatmul.bf16.gmra.mxu1 %v4012_v55  ;;  %1018 = vmatmul.bf16.gmra.mxu2 %v4041_v26  ;;  %v4071_v1 = vpack.c.b16 %v877_v48, %v876_v37  ;;  %v520_v2 = vrot.slane %v519_v50, 4  ;;  %v638_v3 = vrot.slane %v636_v53, 5  ;;  %v729_v8 = vshrl.u32 %v4054_v43, 16 }
  0x4d   : > { %v530_v9 = vrot.slane %v529_v57, 4  ;;  %v644_v11 = vrot.slane %v642_v58, 5  ;;  %v648_v13 = vrot.slane %v646_v63, 4  ;;  %v654_v14 = vrot.slane %v652_v0, 5  ;;  %v4096_v58 = vld [vmem:[%s3765_s28 + $0xb8] sm:$0xf] }
  0x4e   : > { %4948 = vst [vmem:[#allocation6_spill] sm:$0xff] %v4071_v1  ;;  %1038 = vmatmul.bf16.gmra.mxu3 %v4071_v1  ;;  %v525_v22 = vsel %vm3780_vm2, %v520_v2, %v524_v29  ;;  %v639_v23 = vor.u32 %v638_v3, %v635_v51  ;;  %v731_v25 = vrot.slane %v729_v8, 4  ;;  %v732_v27 = vshll.u32 %v4054_v43, 16  ;;  %1904 = vmatpush.bf16.msrb.mxu0 %v3479_v20  ;;  %v4104_v3 = vld [vmem:[%s3765_s28 + $0xbc] sm:$0x1] }
  0x4f   : > { %v535_v35 = vsel %vm3780_vm2, %v530_v9, %v534_v40  ;;  %v852_v37 = vunpack.c.l.b16 %v525_v22  ;;  %v649_v39 = vor.u32 %v648_v13, %v644_v11  ;;  %v738_v44 = vshll.u32 %v4074_v6, 16  ;;  %4950 = vst [vmem:[#allocation8_spill] sm:$0xff] %v4096_v58  ;;  %v4107_v8 = vld [vmem:[%s3765_s28 + $0x24] sm:$0xf]  ;;  %v3502_v9 = vld [vmem:[%s4906_s1 + $0x1b8] sm:$0xff] }
  0x50   : > { %v853_v29 = vunpack.c.l.b16 %v535_v35  ;;  %v640_v45 = vrot.slane %v639_v23, 4  ;;  %v734_v48 = vrot.slane %v732_v27, 5  ;;  %v742_v50 = vshrl.u32 %v4074_v6, 16  ;;  %4951 = vst [vmem:[#allocation9_spill] sm:$0xff] %v4104_v3  ;;  %2253 = vmatpush.bf16.msra.mxu2 %v3502_v9 }
  0x51   : > { %v650_v51 = vrot.slane %v649_v39, 4  ;;  %v740_v53 = vrot.slane %v738_v44, 5  ;;  %v748_v57 = vshll.u32 %v4084_v24, 16  ;;  %v825_v56 = vshrl.u32 %v4088_v28, 16 }
  0x52   : > { %v4099_v40 = vpack.c.b16 %v853_v29, %v852_v37  ;;  %v645_v63 = vsel %vm3780_vm2, %v640_v45, %v644_v11  ;;  %v735_v0 = vor.u32 %v734_v48, %v731_v25  ;;  %v744_v2 = vrot.slane %v742_v50, 4  ;;  %v4120_v29 = vld [vmem:[%s3765_s28 + $0x28] sm:$0xf] }
  0x53   : > { %v655_v13 = vsel %vm3780_vm2, %v650_v51, %v654_v14  ;;  %v862_v20 = vunpack.c.l.b16 %v645_v63  ;;  %v750_v22 = vrot.slane %v748_v57, 5  ;;  %v827_v23 = vrot.slane %v825_v56, 4  ;;  %v3510_v57 = vld [vmem:[%s4906_s1 + $0x1f8] sm:$0xff] }
  0x54   : > { %978 = vmatmul.bf16.gmra.mxu0 %v4099_v40  ;;  %v863_v11 = vunpack.c.l.b16 %v655_v13  ;;  %v736_v25 = vrot.slane %v735_v0, 4  ;;  %v745_v27 = vor.u32 %v744_v2, %v740_v53  ;;  %v828_v35 = vshll.u32 %v4088_v28, 16  ;;  %v3494_v56 = vld [vmem:[%s4906_s1 + $0x178] sm:$0xff]  ;;  %2450 = vmatpush.bf16.msra.mxu3 %v3510_v57 }
  0x55   : > { %v834_v37 = vshll.u32 %v4096_v58, 16  ;;  %v838_v39 = vshrl.u32 %v4096_v58, 16  ;;  %v844_v44 = vshll.u32 %v4104_v3, 16  ;;  %v537_v14 = vshrl.u32 %v4107_v8, 16  ;;  %v3518_v63 = vld [vmem:[%s4906_s1 + $0x238] sm:$0xff]  ;;  %2078 = vmatpush.bf16.msra.mxu1 %v3494_v56 }
  0x56   : > { %v4123_v45 = vpack.c.b16 %v863_v11, %v862_v20  ;;  %v741_v48 = vsel %vm3780_vm2, %v736_v25, %v740_v53  ;;  %v746_v50 = vrot.slane %v745_v27, 4  ;;  %v830_v51 = vrot.slane %v828_v35, 5  ;;  %v4137_v20 = vld [vmem:[%s3765_s28 + $0x2c] sm:$0x1]  ;;  %2631 = vmatpush.bf16.msra.mxu0 %v3518_v63 }
  0x57   : > { %v870_v0 = vunpack.c.l.b16 %v741_v48  ;;  %v836_v2 = vrot.slane %v834_v37, 5  ;;  %v840_v9 = vrot.slane %v838_v39, 4  ;;  %v846_v13 = vrot.slane %v844_v44, 5 }
  0x58   : > { %4952 = vst [vmem:[#allocation10_spill] sm:$0xff] %v4123_v45  ;;  %v751_v53 = vsel %vm3780_vm2, %v746_v50, %v750_v22  ;;  %v831_v11 = vor.u32 %v830_v51, %v827_v23  ;;  %v539_v25 = vrot.slane %v537_v14, 4  ;;  %v540_v27 = vshll.u32 %v4107_v8, 16 }
  0x59   : > { %v871_v35 = vunpack.c.l.b16 %v751_v53  ;;  %v841_v3 = vor.u32 %v840_v9, %v836_v2  ;;  %v546_v28 = vshll.u32 %v4120_v29, 16  ;;  %v550_v48 = vshrl.u32 %v4120_v29, 16 }
  0x5a   : > { %v832_v37 = vrot.slane %v831_v11, 4  ;;  %v542_v39 = vrot.slane %v540_v27, 5  ;;  %v556_v44 = vshll.u32 %v4137_v20, 16  ;;  %v1306_v11 = vrot.slane %v3809_v4, 5 }
  0x5b   : > { %v4145_v58 = vpack.c.b16 %v871_v35, %v870_v0  ;;  %v842_v22 = vrot.slane %v841_v3, 4  ;;  %v548_v23 = vrot.slane %v546_v28, 5  ;;  %v552_v14 = vrot.slane %v550_v48, 4 }
  0x5c   : > { %1003 = vmatmul.bf16.gmra.mxu1 %v4123_v45  ;;  %v837_v50 = vsel %vm3780_vm2, %v832_v37, %v836_v2  ;;  %v543_v51 = vor.u32 %v542_v39, %v539_v25  ;;  %v558_v57 = vrot.slane %v556_v44, 5  ;;  %v4953_v0 = vmov 0 }
  0x5d   : > { %1023 = vmatmul.bf16.gmra.mxu2 %v4145_v58  ;;  %v847_v56 = vsel %vm3780_vm2, %v842_v22, %v846_v13  ;;  %v878_v63 = vunpack.c.l.b16 %v837_v50  ;;  %v553_v9 = vor.u32 %v552_v14, %v548_v23  ;;  %v4954_v0 = vsel %vm4153_vm5, 4294967295, %v4953_v0 }
  0x5e   : > { %4955 = vst [vmem:[#allocation11_spill] sm:$0xff] %v4954_v0  ;;  %v3176_v28 = vrot.slane %v3793_v49, 9  ;;  %v879_v3 = vunpack.c.l.b16 %v847_v56  ;;  %v544_v53 = vrot.slane %v543_v51, 4  ;;  %v1303_v2 = vrot.slane %v3803_v62, 5 }
  0x5f   : > { %v554_v25 = vrot.slane %v553_v9, 4  ;;  %v3177_v27 = vrot.slane %v3876_v18, 9  ;;  %v1310_v35 = vrot.slane %v3888_v34, 5  ;;  %v1313_v13 = vrot.slane %v3899_v42, 5  ;;  %v3429_v9 = vld [vmem:[%s3765_s28] sm:$0xff] }
  0x60   : > { %v4163_v48 = vpack.c.b16 %v879_v3, %v878_v63  ;;  %v549_v37 = vsel %vm3780_vm2, %v544_v53, %v548_v23  ;;  %v1304_v49 = vsel %vm4153_vm5, %v3176_v28, %v1303_v2  ;;  %v1305_v39 = vrot.slane %v1303_v2, 4  ;;  %v3430_v28 = vld [vmem:[%s3765_s28 + $0xc] sm:$0xff] }
  0x61   : > { %v559_v62 = vsel %vm3780_vm2, %v554_v25, %v558_v57  ;;  %v854_v4 = vunpack.c.l.b16 %v549_v37  ;;  %v1413_v44 = vunpack.c.l.b16 %v1304_v49  ;;  %v1311_v18 = vsel %vm4153_vm5, %v3177_v27, %v1310_v35  ;;  %v3501_v3 = vld [vmem:[%s4906_s1 + $0x1b0] sm:$0xff] }
  0x62   : > { %1043 = vmatmul.bf16.gmra.mxu3 %v4163_v48  ;;  %v855_v34 = vunpack.c.l.b16 %v559_v62  ;;  %v1307_v42 = vsel %vm4153_vm5, %v1305_v39, %v1306_v11  ;;  %v1312_v22 = vrot.slane %v1310_v35, 4  ;;  %v1415_v14 = vunpack.c.l.b16 %v1311_v18  ;;  %2254 = vmatpush.bf16.msra.mxu2 %v3501_v3  ;;  %v3509_v53 = vld [vmem:[%s4906_s1 + $0x1f0] sm:$0xff] }
  0x63   : > { %v1414_v23 = vunpack.c.l.b16 %v1307_v42  ;;  %v3493_v2 = vld [vmem:[%s4906_s1 + $0x170] sm:$0xff]  ;;  %2451 = vmatpush.bf16.msra.mxu3 %v3509_v53  ;;  %v1317_v25 = vrot.slane %v4009_v52, 5  ;;  %v3178_v27 = vrot.slane %v4001_v31, 9  ;;  %v4217_v31 = vld [vmem:[%s3765_s28 + $0x24] sm:$0xff]  ;;  %v1327_v18 = vrot.slane %v4137_v20, 5 }
  0x64   : > { %v4176_v50 = vpack.c.b16 %v855_v34, %v854_v4  ;;  %v1314_v51 = vsel %vm4153_vm5, %v1312_v22, %v1313_v13  ;;  %v3517_v11 = vld [vmem:[%s4906_s1 + $0x230] sm:$0xff]  ;;  %2079 = vmatpush.bf16.msra.mxu1 %v3493_v2  ;;  %v1320_v13 = vrot.slane %v4017_v60, 5  ;;  %v1324_v4 = vrot.slane %v4120_v29, 5  ;;  %v3500_v42 = vld [vmem:[%s4906_s1 + $0x1a8] sm:$0xff]  ;;  %v3667_v2 = vld [vmem:[%s3765_s28 + $0x38] sm:$0x1] }
  0x65   : > { %v1445_v57 = vpack.c.b16 %v1414_v23, %v1413_v44  ;;  %v1416_v56 = vunpack.c.l.b16 %v1314_v51  ;;  %2632 = vmatpush.bf16.msra.mxu0 %v3517_v11  ;;  %v1319_v35 = vrot.slane %v1317_v25, 4  ;;  %v1318_v37 = vsel %vm4153_vm5, %v3178_v27, %v1317_v25  ;;  %v3508_v20 = vld [vmem:[%s4906_s1 + $0x1e8] sm:$0xff] }
  0x66   : > { %983 = vmatmul.bf16.gmra.mxu0 %v4176_v50  ;;  %v1417_v52 = vunpack.c.l.b16 %v1318_v37  ;;  %v3179_v60 = vrot.slane %v4107_v8, 9  ;;  %v1326_v44 = vrot.slane %v1324_v4, 4  ;;  %2255 = vmatpush.bf16.msra.mxu2 %v3500_v42  ;;  %v3492_v23 = vld [vmem:[%s4906_s1 + $0x168] sm:$0xff]  ;;  %v1334_v11 = vrot.slane %v3667_v2, 5 }
  0x67   : > { %v4181_v63 = vpack.c.b16 %v1416_v56, %v1415_v14  ;;  %v1321_v49 = vsel %vm4153_vm5, %v1319_v35, %v1320_v13  ;;  %v3516_v14 = vld [vmem:[%s4906_s1 + $0x228] sm:$0xff]  ;;  %2452 = vmatpush.bf16.msra.mxu3 %v3508_v20  ;;  %v1345_v2 = vrot.slane %v3929_v10, 5 }
  0x68   : > { %v1418_v39 = vunpack.c.l.b16 %v1321_v49  ;;  %v1325_v34 = vsel %vm4153_vm5, %v3179_v60, %v1324_v4  ;;  %v1328_v29 = vsel %vm4153_vm5, %v1326_v44, %v1327_v18  ;;  %2080 = vmatpush.bf16.msra.mxu1 %v3492_v23  ;;  %v4265_v4 = vld [vmem:[%s3765_s28 + $0x3c] sm:$0xff]  ;;  %v3181_v60 = vrot.slane %v3812_v5, 9 }
  0x69   : > { %v1419_v8 = vunpack.c.l.b16 %v1325_v34  ;;  %v1420_v22 = vunpack.c.l.b16 %v1328_v29  ;;  %2633 = vmatpush.bf16.msra.mxu0 %v3516_v14  ;;  %v1341_v18 = vrot.slane %v3829_v19, 5  ;;  %v3499_v5 = vld [vmem:[%s4906_s1 + $0x1a0] sm:$0xff] }
  0x6a   : > { %v4211_v62 = vpack.c.b16 %v1418_v39, %v1417_v52  ;;  %v1338_v52 = vrot.slane %v3823_v15, 5  ;;  %2256 = vmatpush.bf16.msra.mxu2 %v3499_v5  ;;  %v3507_v23 = vld [vmem:[%s4906_s1 + $0x1e0] sm:$0xff] }
  0x6b   : > { %v4239_v51 = vpack.c.b16 %v1420_v22, %v1419_v8  ;;  %v3491_v14 = vld [vmem:[%s4906_s1 + $0x160] sm:$0xff]  ;;  %2453 = vmatpush.bf16.msra.mxu3 %v3507_v23  ;;  %v1352_v23 = vrot.slane %v4046_v32, 5 }
  0x6c   : > { %1201 = vmatmul.bf16.vlgmr.msrb.gmra.mxu1 %v3429_v9  ;;  %v4245_v9 = vld [vmem:[%s3765_s28 + $0x30] sm:$0xff]  ;;  %v1340_v44 = vrot.slane %v1338_v52, 4  ;;  %v1339_v15 = vsel %vm4153_vm5, %v3181_v60, %v1338_v52 }
  0x6d   : > { %1533 = vmatmul.bf16.vlgmr.msrb.gmra.mxu2 %v1445_v57  ;;  %v3665_v57 = vld [vmem:[%s3765_s28 + $0x34] sm:$0xf]  ;;  %v1423_v19 = vunpack.c.l.b16 %v1339_v15  ;;  %2081 = vmatpush.bf16.msra.mxu1 %v3491_v14 }
  0x6e   : > { %v1331_v56 = vrot.slane %v3665_v57, 5  ;;  %v1342_v8 = vsel %vm4153_vm5, %v1340_v44, %v1341_v18  ;;  %v4339_v14 = vld [vmem:[%s3765_s28 + $0x54] sm:$0xff] }
  0x6f   : > { %v1424_v20 = vunpack.c.l.b16 %v1342_v8  ;;  %4963 = vst [vmem:[#allocation19_spill] sm:$0xff] %v4339_v14 }
  0x70   : > { %v1333_v53 = vrot.slane %v1331_v56, 4 }
  0x72   : > { %1708 = vmatmul.bf16.vlgmr.msrb.gmra.mxu3 %v3430_v28  ;;  %v1335_v27 = vsel %vm4153_vm5, %v1333_v53, %v1334_v11  ;;  %v3515_v53 = vld [vmem:[%s4906_s1 + $0x220] sm:$0xff] }
  0x73   : > { %v1422_v13 = vunpack.c.l.b16 %v1335_v27  ;;  %2634 = vmatpush.bf16.msra.mxu0 %v3515_v53  ;;  %v3182_v27 = vrot.slane %v3910_v54, 9  ;;  %v3183_v53 = vrot.slane %v4020_v61, 9 }
  0x75   : > { %v1346_v44 = vsel %vm4153_vm5, %v3182_v27, %v1345_v2  ;;  %v1355_v27 = vrot.slane %v4049_v33, 5  ;;  %v3498_v33 = vld [vmem:[%s4906_s1 + $0x198] sm:$0xff] }
  0x76   : > { %1905 = vmatmul.bf16.vlgmr.msrb.gmra.mxu0 %v3990_v7  ;;  %v4201_v7 = vld [vmem:[%s3765_s28 + $0x18] sm:$0xff]  ;;  %v1425_v15 = vunpack.c.l.b16 %v1346_v44  ;;  %2257 = vmatpush.bf16.msra.mxu2 %v3498_v33 }
  0x7c   : > { %1206 = vmatmul.bf16.gmra.mxu1 %v3430_v28  ;;  %v3666_v28 = vld [vmem:[%s3765_s28 + $0x30] sm:$0xf] }
  0x7d   : > { %1538 = vmatmul.bf16.gmra.mxu2 %v4181_v63  ;;  %v3180_v3 = vrot.slane %v3666_v28, 9 }
  0x7f   : > { %v1332_v25 = vsel %vm4153_vm5, %v3180_v3, %v1331_v56  ;;  %v4298_v3 = vpack.c.b16 %v1424_v20, %v1423_v19 }
  0x80   : > { %v1421_v35 = vunpack.c.l.b16 %v1332_v25  ;;  %v4309_v25 = vld [vmem:[%s3765_s28 + $0x48] sm:$0xff] }
  0x81   : > { %4958 = vst [vmem:[#allocation14_spill] sm:$0xff] %v4298_v3 }
  0x82   : > { %1713 = vmatmul.bf16.gmra.mxu3 %v4201_v7  ;;  %v4257_v49 = vpack.c.b16 %v1422_v13, %v1421_v35  ;;  %4959 = vst [vmem:[#allocation15_spill] sm:$0xff] %v4309_v25  ;;  %v1347_v35 = vrot.slane %v1345_v2, 4  ;;  %v1348_v13 = vrot.slane %v3937_v17, 5  ;;  %v1354_v2 = vrot.slane %v1352_v23, 4 }
  0x84   : > { %v1349_v18 = vsel %vm4153_vm5, %v1347_v35, %v1348_v13  ;;  %v1356_v61 = vsel %vm4153_vm5, %v1354_v2, %v1355_v27 }
  0x85   : > { %v1426_v54 = vunpack.c.l.b16 %v1349_v18  ;;  %v1353_v18 = vsel %vm4153_vm5, %v3183_v53, %v1352_v23  ;;  %v3490_v23 = vld [vmem:[%s4906_s1 + $0x158] sm:$0xff] }
  0x86   : > { %1910 = vmatmul.bf16.gmra.mxu0 %v4099_v40  ;;  %2082 = vmatpush.bf16.msra.mxu1 %v3490_v23  ;;  %v3669_v23 = vld [vmem:[%s3765_s28 + $0x60] sm:$0xf] }
  0x87   : > { %v4333_v20 = vpack.c.b16 %v1426_v54, %v1425_v15  ;;  %v1427_v15 = vunpack.c.l.b16 %v1353_v18  ;;  %v1428_v54 = vunpack.c.l.b16 %v1356_v61  ;;  %v3668_v61 = vld [vmem:[%s3765_s28 + $0x64] sm:$0xf] }
  0x88   : > { %v1359_v33 = vrot.slane %v3668_v61, 5 }
  0x89   : > { %4962 = vst [vmem:[#allocation18_spill] sm:$0xff] %v4333_v20  ;;  %v4370_v27 = vpack.c.b16 %v1428_v54, %v1427_v15  ;;  %v3184_v15 = vrot.slane %v3669_v23, 9 }
  0x8a   : > { %v1361_v54 = vrot.slane %v1359_v33, 4 }
  0x8b   : > { %4965 = vst [vmem:[#allocation21_spill] sm:$0xff] %v4370_v27 }
  0x8c   : > { %1211 = vmatmul.bf16.gmra.mxu1 %v4201_v7 }
  0x8d   : > { %1543 = vmatmul.bf16.gmra.mxu2 %v4211_v62 }
  0x92   : > { %1718 = vmatmul.bf16.gmra.mxu3 %v4217_v31 }
  0x96   : > { %1915 = vmatmul.bf16.gmra.mxu0 %v4176_v50 }
  0x9c   : > { %1216 = vmatmul.bf16.gmra.mxu1 %v4217_v31 }
  0x9d   : > { %1548 = vmatmul.bf16.gmra.mxu2 %v4239_v51 }
  0xa2   : > { %1723 = vmatmul.bf16.gmra.mxu3 %v4245_v9 }
  0xa6   : > { %1920 = vmatmul.bf16.gmra.mxu0 %v3798_v59 }
  0xa9   : > { %v4255_v37 = vpop.f32.mrf.mxu1 }
  0xac   : > { %v4260_v39 = vpop.f32.mrf.mxu0  ;;  %1221 = vmatmul.bf16.gmra.mxu1 %v4245_v9 }
  0xad   : > { %1553 = vmatmul.bf16.gmra.mxu2 %v4257_v49 }
  0xaf   : > { %v4269_v34 = vpop.f32.mrf.mxu2 }
  0xb0   : > { %v4271_v29 = vpop.f32.mrf.mxu3 }
  0xb1   : > { %4956 = vst [vmem:[#allocation12_spill] sm:$0xff] %v4271_v29  ;;  %v4273_v42 = vpop.f32.mrf.mxu1 }
  0xb2   : > { %1728 = vmatmul.bf16.gmra.mxu3 %v4265_v4 }
  0xb4   : > { %v4283_v22 = vpop.f32.mrf.mxu0 }
  0xb6   : > { %1925 = vmatmul.bf16.gmra.mxu0 %v3894_v38 }
  0xb7   : > { %v4292_v57 = vpop.f32.mrf.mxu2 }
  0xb8   : > { %v4294_v56 = vpop.f32.mrf.mxu3 }
  0xb9   : > { %4957 = vst [vmem:[#allocation13_spill] sm:$0xff] %v4294_v56  ;;  %v4296_v28 = vpop.f32.mrf.mxu1 }
  0xbc   : > { %1226 = vmatmul.bf16.gmra.mxu1 %v4265_v4 }
  0xbd   : > { %v4305_v11 = vpop.f32.mrf.mxu0  ;;  %1558 = vmatmul.bf16.gmra.mxu2 %v4298_v3 }
  0xbf   : > { %v4313_v52 = vpop.f32.mrf.mxu2 }
  0xc0   : > { %v4315_v60 = vpop.f32.mrf.mxu3 }
  0xc1   : > { %4960 = vst [vmem:[#allocation16_spill] sm:$0xff] %v4315_v60  ;;  %v4317_v10 = vpop.f32.mrf.mxu1  ;;  %v3670_v60 = vld [vmem:[%s3765_s28 + $0x68] sm:$0x1] }
  0xc2   : > { %1733 = vmatmul.bf16.gmra.mxu3 %v4309_v25  ;;  %v1362_v56 = vrot.slane %v3670_v60, 5 }
  0xc5   : > { %v4325_v17 = vpop.f32.mrf.mxu0 }
  0xc6   : > { %1930 = vmatmul.bf16.gmra.mxu0 %v4012_v55 }
  0xc7   : > { %v4327_v8 = vpop.f32.mrf.mxu2 }
  0xc8   : > { %v4329_v5 = vpop.f32.mrf.mxu3 }
  0xc9   : > { %4961 = vst [vmem:[#allocation17_spill] sm:$0xff] %v4329_v5  ;;  %v4331_v19 = vpop.f32.mrf.mxu1 }
  0xcc   : > { %1231 = vmatmul.bf16.gmra.mxu1 %v4309_v25 }
  0xcd   : > { %1563 = vmatmul.bf16.gmra.mxu2 %v4333_v20 }
  0xcf   : > { %v4343_v35 = vpop.f32.mrf.mxu2 }
  0xd1   : > { %v4345_v13 = vpop.f32.mrf.mxu0  ;;  %v4347_v44 = vpop.f32.mrf.mxu3 }
  0xd2   : > { %4964 = vst [vmem:[#allocation20_spill] sm:$0xff] %v4347_v44  ;;  %1738 = vmatmul.bf16.gmra.mxu3 %v4339_v14  ;;  %v4350_v32 = vpop.f32.mrf.mxu1  ;;  %v3506_v44 = vld [vmem:[%s4906_s1 + $0x1d8] sm:$0xff] }
  0xd3   : > { %2454 = vmatpush.bf16.msra.mxu3 %v3506_v44  ;;  %v4383_v44 = vld [vmem:[%s3765_s28 + $0x60] sm:$0xff] }
  0xd4   : > { %4967 = vst [vmem:[#allocation23_spill] sm:$0xff] %v4383_v44 }
  0xd6   : > { %1935 = vmatmul.bf16.gmra.mxu0 %v4123_v45  ;;  %v3514_v45 = vld [vmem:[%s4906_s1 + $0x218] sm:$0xff] }
  0xd7   : > { %v4366_v53 = vpop.f32.mrf.mxu2  ;;  %2635 = vmatpush.bf16.msra.mxu0 %v3514_v45  ;;  %v1363_v45 = vsel %vm4153_vm5, %v1361_v54, %v1362_v56 }
  0xd8   : > { %v1430_v60 = vunpack.c.l.b16 %v1363_v45  ;;  %v3672_v45 = vld [vmem:[%s3765_s28 + $0x6c] sm:$0xf] }
  0xd9   : > { %v4368_v2 = vpop.f32.mrf.mxu0  ;;  %v4375_v5 = vpop.f32.mrf.mxu3 }
  0xda   : > { %v4372_v18 = vpop.f32.mrf.mxu1  ;;  %4966 = vst [vmem:[#allocation22_spill] sm:$0xff] %v4375_v5 }
  0xdc   : > { %1236 = vmatmul.bf16.gmra.mxu1 %v4339_v14  ;;  %v1360_v14 = vsel %vm4153_vm5, %v3184_v15, %v1359_v33  ;;  %v3671_v33 = vld [vmem:[%s3765_s28 + $0x70] sm:$0xf] }
  0xdd   : > { %1568 = vmatmul.bf16.gmra.mxu2 %v4370_v27  ;;  %v1429_v20 = vunpack.c.l.b16 %v1360_v14  ;;  %v1366_v15 = vrot.slane %v3671_v33, 5  ;;  %v4414_v14 = vld [vmem:[%s3765_s28 + $0x6c] sm:$0xff] }
  0xdf   : > { %v4403_v29 = vpack.c.b16 %v1430_v60, %v1429_v20  ;;  %v3673_v20 = vld [vmem:[%s3765_s28 + $0x74] sm:$0x1] }
  0xe0   : > { %v4387_v61 = vpop.f32.mrf.mxu2  ;;  %v1369_v60 = vrot.slane %v3673_v20, 5 }
  0xe1   : > { %4968 = vst [vmem:[#allocation24_spill] sm:$0xff] %v4387_v61 }
  0xe2   : > { %1743 = vmatmul.bf16.gmra.mxu3 %v4383_v44  ;;  %v4390_v5 = vpop.f32.mrf.mxu1  ;;  %4971 = vst [vmem:[#allocation27_spill] sm:$0xff] %v4403_v29 }
  0xe3   : > { %v4396_v27 = vpop.f32.mrf.mxu0 }
  0xe5   : > { %v4398_v23 = vpop.f32.mrf.mxu3 }
  0xe6   : > { %4969 = vst [vmem:[#allocation25_spill] sm:$0xff] %v4398_v23  ;;  %1940 = vmatmul.bf16.gmra.mxu0 %v3825_v16  ;;  %v3185_v23 = vrot.slane %v3672_v45, 9  ;;  %v1368_v16 = vrot.slane %v1366_v15, 4  ;;  %v3497_v45 = vld [vmem:[%s4906_s1 + $0x190] sm:$0xff] }
  0xe7   : > { %2258 = vmatpush.bf16.msra.mxu2 %v3497_v45 }
  0xe8   : > { %v4401_v55 = vpop.f32.mrf.mxu2 }
  0xe9   : > { %4970 = vst [vmem:[#allocation26_spill] sm:$0xff] %v4401_v55 }
  0xea   : > { %v1202_v25 = vpop.f32.mrf.mxu1 }
  0xeb   : > { %v4406_v3 = vpop.f32.mrf.mxu0  ;;  %v1203_v56 = vadd.f32 %v1202_v25, %v4260_v39  ;;  %v1367_v39 = vsel %vm4153_vm5, %v3185_v23, %v1366_v15  ;;  %v1370_v25 = vsel %vm4153_vm5, %v1368_v16, %v1369_v60  ;;  %v3505_v23 = vld [vmem:[%s4906_s1 + $0x1d0] sm:$0xff] }
  0xec   : > { %1241 = vmatmul.bf16.gmra.mxu1 %v4383_v44  ;;  %v1431_v20 = vunpack.c.l.b16 %v1367_v39  ;;  %v1432_v61 = vunpack.c.l.b16 %v1370_v25  ;;  %v3489_v16 = vld [vmem:[%s4906_s1 + $0x150] sm:$0xff]  ;;  %2455 = vmatpush.bf16.msra.mxu3 %v3505_v23 }
  0xed   : > { %v4410_v54 = vpop.f32.mrf.mxu3  ;;  %1573 = vmatmul.bf16.gmra.mxu2 %v4403_v29  ;;  %2083 = vmatpush.bf16.msra.mxu1 %v3489_v16  ;;  %v3513_v25 = vld [vmem:[%s4906_s1 + $0x210] sm:$0xff] }
  0xee   : > { %4972 = vst [vmem:[#allocation28_spill] sm:$0xff] %v4410_v54  ;;  %v4436_v60 = vpack.c.b16 %v1432_v61, %v1431_v20  ;;  %2636 = vmatpush.bf16.msra.mxu0 %v3513_v25  ;;  %v3186_v61 = vrot.slane %v3941_v21, 9 }
  0xf0   : > { %v1534_v55 = vpop.f32.mrf.mxu2 }
  0xf1   : > { %v1614_v38 = vadd.f32 %v1534_v55, %v1203_v56 }
  0xf2   : > { %1748 = vmatmul.bf16.gmra.mxu3 %v4414_v14  ;;  %v1204_v33 = vpop.f32.mrf.mxu1 }
  0xf3   : > { %v1906_v54 = vpop.f32.mrf.mxu0  ;;  %v1205_v29 = vadd.f32 %v1204_v33, %v4283_v22 }
  0xf5   : > { %v1709_v44 = vpop.f32.mrf.mxu3 }
  0xf6   : > { %1945 = vmatmul.bf16.gmra.mxu0 %v3932_v12  ;;  %v1789_v55 = vadd.f32 %v1709_v44, %v1614_v38  ;;  %v1373_v38 = vrot.slane %v3963_v46, 5  ;;  %v1376_v46 = vrot.slane %v3966_v47, 5 }
  0xf8   : > { %v1536_v22 = vpop.f32.mrf.mxu2  ;;  %v4434_v15 = vadd.f32 %v1906_v54, %v1789_v55  ;;  %v1375_v20 = vrot.slane %v1373_v38, 4 }
  0xf9   : > { %v1615_v56 = vadd.f32 %v1536_v22, %v1205_v29  ;;  %v4446_v29 = vld [vmem:[%s3765_s28 + $0x78] sm:$0xff]  ;;  %v1374_v22 = vsel %vm4153_vm5, %v3186_v61, %v1373_v38  ;;  %v1380_v61 = vrot.slane %v4074_v6, 5 }
  0xfa   : > { %v1207_v33 = vpop.f32.mrf.mxu1 }
  0xfb   : > { %v1908_v44 = vpop.f32.mrf.mxu0  ;;  %v1208_v39 = vadd.f32 %v1207_v33, %v4305_v11 }
  0xfc   : > { %1246 = vmatmul.bf16.gmra.mxu1 %v4414_v14 }
  0xfd   : > { %v1711_v45 = vpop.f32.mrf.mxu3  ;;  %1578 = vmatmul.bf16.gmra.mxu2 %v4436_v60 }
  0xfe   : > { %v1790_v54 = vadd.f32 %v1711_v45, %v1615_v56  ;;  %v1377_v56 = vsel %vm4153_vm5, %v1375_v20, %v1376_v46  ;;  %v1433_v45 = vunpack.c.l.b16 %v1374_v22  ;;  %v4468_v22 = vld [vmem:[%s3765_s28 + $0x84] sm:$0xff] }
  0xff   : > { %v1434_v47 = vunpack.c.l.b16 %v1377_v56  ;;  %v1382_v56 = vrot.slane %v1380_v61, 4 }
 0x100   : > { %v1539_v55 = vpop.f32.mrf.mxu2  ;;  %v4450_v11 = vadd.f32 %v1908_v44, %v1790_v54 }
 0x101   : > { %v1616_v23 = vadd.f32 %v1539_v55, %v1208_v39 }
 0x102   : > { %4973 = vst [vmem:[#allocation29_spill] sm:$0xff] %v4450_v11  ;;  %1753 = vmatmul.bf16.gmra.mxu3 %v4446_v29  ;;  %v1209_v16 = vpop.f32.mrf.mxu1  ;;  %v4461_v11 = vpack.c.b16 %v1434_v47, %v1433_v45 }
 0x103   : > { %v1911_v33 = vpop.f32.mrf.mxu0  ;;  %v1210_v25 = vadd.f32 %v1209_v16, %v4325_v17 }
 0x105   : > { %v1714_v21 = vpop.f32.mrf.mxu3 }
 0x106   : > { %1950 = vmatmul.bf16.gmra.mxu0 %v4041_v26  ;;  %v1791_v44 = vadd.f32 %v1714_v21, %v1616_v23  ;;  %v3187_v23 = vrot.slane %v4054_v43, 9  ;;  %v3496_v43 = vld [vmem:[%s4906_s1 + $0x188] sm:$0xff] }
 0x107   : > { %2259 = vmatpush.bf16.msra.mxu2 %v3496_v43  ;;  %v3675_v43 = vld [vmem:[%s3765_s28 + $0x90] sm:$0xf] }
 0x108   : > { %v1541_v39 = vpop.f32.mrf.mxu2  ;;  %v4459_v54 = vadd.f32 %v1911_v33, %v1791_v44  ;;  %v1383_v33 = vrot.slane %v4084_v24, 5  ;;  %v1381_v45 = vsel %vm4153_vm5, %v3187_v23, %v1380_v61  ;;  %v3504_v61 = vld [vmem:[%s4906_s1 + $0x1c8] sm:$0xff] }
 0x109   : > { %v1617_v55 = vadd.f32 %v1541_v39, %v1210_v25  ;;  %2456 = vmatpush.bf16.msra.mxu3 %v3504_v61 }
 0x10a   : > { %v1212_v38 = vpop.f32.mrf.mxu1  ;;  %v1384_v47 = vsel %vm4153_vm5, %v1382_v56, %v1383_v33  ;;  %v3674_v33 = vld [vmem:[%s3765_s28 + $0x94] sm:$0xf] }
 0x10b   : > { %v1913_v20 = vpop.f32.mrf.mxu0  ;;  %v1213_v46 = vadd.f32 %v1212_v38, %v4345_v13  ;;  %v1436_v38 = vunpack.c.l.b16 %v1384_v47 }
 0x10c   : > { %1251 = vmatmul.bf16.gmra.mxu1 %v4446_v29 }
 0x10d   : > { %v1716_v17 = vpop.f32.mrf.mxu3  ;;  %1583 = vmatmul.bf16.gmra.mxu2 %v4461_v11 }
 0x10e   : > { %v1792_v16 = vadd.f32 %v1716_v17, %v1617_v55  ;;  %v1435_v55 = vunpack.c.l.b16 %v1381_v45  ;;  %v3512_v45 = vld [vmem:[%s4906_s1 + $0x208] sm:$0xff] }
 0x10f   : > { %2637 = vmatpush.bf16.msra.mxu0 %v3512_v45 }
 0x110   : > { %v1544_v25 = vpop.f32.mrf.mxu2  ;;  %v4472_v21 = vadd.f32 %v1913_v20, %v1792_v16  ;;  %v4492_v23 = vpack.c.b16 %v1436_v38, %v1435_v55  ;;  %v3676_v38 = vld [vmem:[%s3765_s28 + $0x98] sm:$0x1] }
 0x111   : > { %v1618_v6 = vadd.f32 %v1544_v25, %v1213_v46  ;;  %v1387_v25 = vrot.slane %v3674_v33, 5 }
 0x112   : > { %1758 = vmatmul.bf16.gmra.mxu3 %v4468_v22  ;;  %v1214_v13 = vpop.f32.mrf.mxu1 }
 0x113   : > { %v1916_v44 = vpop.f32.mrf.mxu0  ;;  %v1215_v39 = vadd.f32 %v1214_v13, %v4368_v2  ;;  %v3488_v2 = vld [vmem:[%s4906_s1 + $0x148] sm:$0xff]  ;;  %v1389_v55 = vrot.slane %v1387_v25, 4 }
 0x114   : > { %2084 = vmatpush.bf16.msra.mxu1 %v3488_v2 }
 0x115   : > { %v1719_v24 = vpop.f32.mrf.mxu3 }
 0x116   : > { %1955 = vmatmul.bf16.gmra.mxu0 %v4145_v58  ;;  %v1793_v20 = vadd.f32 %v1719_v24, %v1618_v6  ;;  %v3188_v24 = vrot.slane %v3675_v43, 9 }
 0x118   : > { %v1546_v46 = vpop.f32.mrf.mxu2  ;;  %v4490_v17 = vadd.f32 %v1916_v44, %v1793_v20  ;;  %v1390_v20 = vrot.slane %v3676_v38, 5 }
 0x119   : > { %v1619_v16 = vadd.f32 %v1546_v46, %v1215_v39  ;;  %v4502_v39 = vld [vmem:[%s3765_s28 + $0x90] sm:$0xff] }
 0x11a   : > { %v1217_v56 = vpop.f32.mrf.mxu1 }
 0x11b   : > { %v1918_v6 = vpop.f32.mrf.mxu0  ;;  %v1218_v13 = vadd.f32 %v1217_v56, %v4396_v27  ;;  %v1388_v56 = vsel %vm4153_vm5, %v3188_v24, %v1387_v25 }
 0x11c   : > { %1256 = vmatmul.bf16.gmra.mxu1 %v4468_v22  ;;  %v1437_v43 = vunpack.c.l.b16 %v1388_v56  ;;  %v4523_v56 = vld [vmem:[%s3765_s28 + $0x9c] sm:$0xff] }
 0x11d   : > { %v1721_v47 = vpop.f32.mrf.mxu3  ;;  %1588 = vmatmul.bf16.gmra.mxu2 %v4492_v23  ;;  %4977 = vst [vmem:[#allocation33_spill] sm:$0xff] %v4523_v56 }
 0x11e   : > { %v1794_v44 = vadd.f32 %v1721_v47, %v1619_v16  ;;  %v1391_v16 = vsel %vm4153_vm5, %v1389_v55, %v1390_v20  ;;  %v3677_v55 = vld [vmem:[%s3765_s28 + $0xa0] sm:$0xf] }
 0x11f   : > { %v1438_v38 = vunpack.c.l.b16 %v1391_v16  ;;  %v1394_v20 = vrot.slane %v3677_v55, 5 }
 0x120   : > { %v1549_v61 = vpop.f32.mrf.mxu2  ;;  %v4506_v27 = vadd.f32 %v1918_v6, %v1794_v44 }
 0x121   : > { %v1620_v2 = vadd.f32 %v1549_v61, %v1218_v13  ;;  %v4517_v25 = vpack.c.b16 %v1438_v38, %v1437_v43 }
 0x122   : > { %4974 = vst [vmem:[#allocation30_spill] sm:$0xff] %v4506_v27  ;;  %1763 = vmatmul.bf16.gmra.mxu3 %v4502_v39  ;;  %v1219_v46 = vpop.f32.mrf.mxu1 }
 0x123   : > { %v1921_v33 = vpop.f32.mrf.mxu0  ;;  %v1220_v45 = vadd.f32 %v1219_v46, %v4406_v3  ;;  %4976 = vst [vmem:[#allocation32_spill] sm:$0xff] %v4517_v25 }
 0x125   : > { %v1724_v47 = vpop.f32.mrf.mxu3 }
 0x126   : > { %1960 = vmatmul.bf16.gmra.mxu0 %v3841_v36  ;;  %v1795_v6 = vadd.f32 %v1724_v47, %v1620_v2  ;;  %v3678_v2 = vld [vmem:[%s3765_s28 + $0x9c] sm:$0xf]  ;;  %v1396_v47 = vrot.slane %v1394_v20, 4 }
 0x127   : > { %v3189_v16 = vrot.slane %v3678_v2, 9  ;;  %v3495_v2 = vld [vmem:[%s4906_s1 + $0x180] sm:$0xff] }
 0x128   : > { %v1551_v13 = vpop.f32.mrf.mxu2  ;;  %v4515_v44 = vadd.f32 %v1921_v33, %v1795_v6  ;;  %v3679_v33 = vld [vmem:[%s3765_s28 + $0xa4] sm:$0x1]  ;;  %2260 = vmatpush.bf16.msra.mxu2 %v3495_v2 }
 0x129   : > { %v1621_v61 = vadd.f32 %v1551_v13, %v1220_v45  ;;  %v1397_v6 = vrot.slane %v3679_v33, 5 }
 0x12a   : > { %4975 = vst [vmem:[#allocation31_spill] sm:$0xff] %v4515_v44  ;;  %v1222_v24 = vpop.f32.mrf.mxu1  ;;  %v1395_v44 = vsel %vm4153_vm5, %v3189_v16, %v1394_v20  ;;  %v3503_v20 = vld [vmem:[%s4906_s1 + $0x1c0] sm:$0xff] }
 0x12b   : > { %v1923_v27 = vpop.f32.mrf.mxu0  ;;  %v1223_v45 = vadd.f32 %v1222_v24, %v4255_v37  ;;  %v1439_v37 = vunpack.c.l.b16 %v1395_v44  ;;  %2457 = vmatpush.bf16.msra.mxu3 %v3503_v20  ;;  %v3682_v20 = vld [vmem:[%s3765_s28 + $0xb0] sm:$0x1] }
 0x12c   : > { %1261 = vmatmul.bf16.gmra.mxu1 %v4502_v39 }
 0x12d   : > { %v1726_v3 = vpop.f32.mrf.mxu3  ;;  %1593 = vmatmul.bf16.gmra.mxu2 %v4517_v25  ;;  %v4595_v25 = vld [vmem:[%s3765_s28 + $0xc8] sm:$0x1] }
 0x12e   : > { %v1796_v46 = vadd.f32 %v1726_v3, %v1621_v61  ;;  %v1398_v61 = vsel %vm4153_vm5, %v1396_v47, %v1397_v6 }
 0x130   : > { %v1554_v43 = vpop.f32.mrf.mxu2  ;;  %v4528_v38 = vadd.f32 %v1923_v27, %v1796_v46  ;;  %v1440_v27 = vunpack.c.l.b16 %v1398_v61  ;;  %v3487_v46 = vld [vmem:[%s4906_s1 + $0x140] sm:$0xff] }
 0x131   : > { %v1622_v13 = vadd.f32 %v1554_v43, %v1223_v45  ;;  %2085 = vmatpush.bf16.msra.mxu1 %v3487_v46  ;;  %v1404_v46 = vrot.slane %v3682_v20, 5 }
 0x132   : > { %4978 = vst [vmem:[#allocation34_spill] sm:$0xff] %v4528_v38  ;;  %1768 = vmatmul.bf16.gmra.mxu3 %v4523_v56  ;;  %v1224_v55 = vpop.f32.mrf.mxu1  ;;  %v4548_v45 = vpack.c.b16 %v1440_v27, %v1439_v37 }
 0x133   : > { %v1926_v3 = vpop.f32.mrf.mxu0  ;;  %v1225_v16 = vadd.f32 %v1224_v55, %v4273_v42 }
 0x134   : > { %4980 = vst [vmem:[#allocation36_spill] sm:$0xff] %v4548_v45 }
 0x135   : > { %v1729_v33 = vpop.f32.mrf.mxu3 }
 0x136   : > { %1965 = vmatmul.bf16.gmra.mxu0 %v3958_v41  ;;  %v1797_v24 = vadd.f32 %v1729_v33, %v1622_v13  ;;  %v3680_v13 = vld [vmem:[%s3765_s28 + $0xac] sm:$0xf]  ;;  %v3511_v33 = vld [vmem:[%s4906_s1 + $0x200] sm:$0xff] }
 0x137   : > { %v1401_v61 = vrot.slane %v3680_v13, 5  ;;  %2638 = vmatpush.bf16.msra.mxu0 %v3511_v33 }
 0x138   : > { %v1556_v47 = vpop.f32.mrf.mxu2  ;;  %v4546_v44 = vadd.f32 %v1926_v3, %v1797_v24  ;;  %v4557_v3 = vld [vmem:[%s3765_s28 + $0xa8] sm:$0xff] }
 0x139   : > { %v1623_v6 = vadd.f32 %v1556_v47, %v1225_v16  ;;  %4981 = vst [vmem:[#allocation37_spill] sm:$0xff] %v4557_v3  ;;  %v3681_v24 = vld [vmem:[%s3765_s28 + $0xa8] sm:$0xf]  ;;  %v1403_v27 = vrot.slane %v1401_v61, 4 }
 0x13a   : > { %4979 = vst [vmem:[#allocation35_spill] sm:$0xff] %v4546_v44  ;;  %v1227_v43 = vpop.f32.mrf.mxu1  ;;  %v3190_v37 = vrot.slane %v3681_v24, 9 }
 0x13b   : > { %v1928_v2 = vpop.f32.mrf.mxu0  ;;  %v1228_v16 = vadd.f32 %v1227_v43, %v4296_v28  ;;  %v1405_v33 = vsel %vm4153_vm5, %v1403_v27, %v1404_v46  ;;  %v4571_v43 = vld [vmem:[%s3765_s28 + $0xc0] sm:$0xf] }
 0x13c   : > { %1266 = vmatmul.bf16.gmra.mxu1 %v4523_v56  ;;  %v1442_v20 = vunpack.c.l.b16 %v1405_v33  ;;  %4983 = vst [vmem:[#allocation39_spill] sm:$0xff] %v4571_v43  ;;  %v1822_v27 = vshrl.u32 %v4571_v43, 16 }
 0x13d   : > { %v1731_v42 = vpop.f32.mrf.mxu3  ;;  %1598 = vmatmul.bf16.gmra.mxu2 %v4548_v45 }
 0x13e   : > { %v1798_v55 = vadd.f32 %v1731_v42, %v1623_v6  ;;  %v1402_v6 = vsel %vm4153_vm5, %v3190_v37, %v1401_v61 }
 0x13f   : > { %v1441_v45 = vunpack.c.l.b16 %v1402_v6  ;;  %v4987_v6 = vld [vmem:[#allocation8_spill] sm:$0xff] }
 0x140   : > { %v1559_v47 = vpop.f32.mrf.mxu2  ;;  %v4562_v44 = vadd.f32 %v1928_v2, %v1798_v55  ;;  %v1408_v33 = vrot.slane %v4987_v6, 5  ;;  %v4989_v6 = vld [vmem:[#allocation9_spill] sm:$0xff] }
 0x141   : > { %v1624_v13 = vadd.f32 %v1559_v47, %v1228_v16  ;;  %v4575_v16 = vld [vmem:[%s3765_s28 + $0xc4] sm:$0xf]  ;;  %v4579_v37 = vpack.c.b16 %v1442_v20, %v1441_v45  ;;  %v1824_v45 = vrot.slane %v1822_v27, 4  ;;  %v4589_v20 = vld [vmem:[%s3765_s28 + $0xb4] sm:$0xff] }
 0x142   : > { %4982 = vst [vmem:[#allocation38_spill] sm:$0xff] %v4562_v44  ;;  %1773 = vmatmul.bf16.gmra.mxu3 %v4557_v3  ;;  %v1229_v38 = vpop.f32.mrf.mxu1 }
 0x143   : > { %v1931_v42 = vpop.f32.mrf.mxu0  ;;  %v1230_v2 = vadd.f32 %v1229_v38, %v4317_v10  ;;  %4984 = vst [vmem:[#allocation40_spill] sm:$0xff] %v4575_v16  ;;  %v1835_v10 = vshrl.u32 %v4575_v16, 16 }
 0x144   : > { %4986 = vst [vmem:[#allocation42_spill] sm:$0xff] %v4579_v37 }
 0x145   : > { %v1734_v24 = vpop.f32.mrf.mxu3  ;;  %v1837_v56 = vrot.slane %v1835_v10, 4 }
 0x146   : > { %1970 = vmatmul.bf16.gmra.mxu0 %v4071_v1  ;;  %v1799_v28 = vadd.f32 %v1734_v24, %v1624_v13  ;;  %v1825_v13 = vshll.u32 %v4571_v43, 16  ;;  %v1831_v24 = vshll.u32 %v4575_v16, 16 }
 0x148   : > { %v1561_v55 = vpop.f32.mrf.mxu2  ;;  %v4577_v47 = vadd.f32 %v1931_v42, %v1799_v28  ;;  %v4988_v28 = vld [vmem:[#allocation7_spill] sm:$0xff]  ;;  %v1827_v1 = vrot.slane %v1825_v13, 5  ;;  %v1833_v41 = vrot.slane %v1831_v24, 5  ;;  %v1841_v13 = vshll.u32 %v4595_v25, 16 }
 0x149   : > { %v1625_v61 = vadd.f32 %v1561_v55, %v1230_v2  ;;  %v3191_v2 = vrot.slane %v4988_v28, 9  ;;  %v1410_v55 = vrot.slane %v1408_v33, 4 }
 0x14a   : > { %4985 = vst [vmem:[#allocation41_spill] sm:$0xff] %v4577_v47  ;;  %v1232_v46 = vpop.f32.mrf.mxu1  ;;  %v1411_v47 = vrot.slane %v4989_v6, 5 }
 0x14b   : > { %v1933_v44 = vpop.f32.mrf.mxu0  ;;  %v1233_v43 = vadd.f32 %v1232_v46, %v4331_v19  ;;  %v1409_v27 = vsel %vm4153_vm5, %v3191_v2, %v1408_v33  ;;  %v1828_v19 = vor.u32 %v1827_v1, %v1824_v45  ;;  %v1838_v46 = vor.u32 %v1837_v56, %v1833_v41 }
 0x14c   : > { %1271 = vmatmul.bf16.gmra.mxu1 %v4557_v3  ;;  %v1443_v10 = vunpack.c.l.b16 %v1409_v27  ;;  %v1843_v33 = vrot.slane %v1841_v13, 5  ;;  %v4618_v27 = vld [vmem:[%s3765_s28 + $0xc0] sm:$0xff] }
 0x14d   : > { %v1736_v38 = vpop.f32.mrf.mxu3  ;;  %1603 = vmatmul.bf16.gmra.mxu2 %v4579_v37 }
 0x14e   : > { %v1800_v42 = vadd.f32 %v1736_v38, %v1625_v61  ;;  %v1412_v38 = vsel %vm4153_vm5, %v1410_v55, %v1411_v47 }
 0x14f   : > { %v1444_v6 = vunpack.c.l.b16 %v1412_v38 }
 0x150   : > { %v1564_v16 = vpop.f32.mrf.mxu2  ;;  %v4597_v3 = vadd.f32 %v1933_v44, %v1800_v42  ;;  %v1839_v42 = vrot.slane %v1838_v46, 4 }
 0x151   : > { %v1626_v37 = vadd.f32 %v1564_v16, %v1233_v43  ;;  %v1829_v16 = vrot.slane %v1828_v19, 4  ;;  %v4609_v1 = vpack.c.b16 %v1444_v6, %v1443_v10 }
 0x152   : > { %1778 = vmatmul.bf16.gmra.mxu3 %v4589_v20  ;;  %v1234_v61 = vpop.f32.mrf.mxu1 }
 0x153   : > { %v1936_v28 = vpop.f32.mrf.mxu0  ;;  %v1235_v43 = vadd.f32 %v1234_v61, %v4350_v32  ;;  %v1834_v55 = vsel %vm3780_vm2, %v1829_v16, %v1833_v41 }
 0x154   : > { %v1845_v38 = vunpack.c.l.b16 %v1834_v55 }
 0x155   : > { %v1739_v24 = vpop.f32.mrf.mxu3 }
 0x156   : > { %1975 = vmatmul.bf16.gmra.mxu0 %v4163_v48  ;;  %v1801_v44 = vadd.f32 %v1739_v24, %v1626_v37  ;;  %v1844_v37 = vsel %vm3780_vm2, %v1839_v42, %v1843_v33 }
 0x158   : > { %v1566_v2 = vpop.f32.mrf.mxu2  ;;  %v4607_v0 = vadd.f32 %v1936_v28, %v1801_v44  ;;  %v1846_v28 = vunpack.c.l.b16 %v1844_v37 }
 0x159   : > { %v1627_v47 = vadd.f32 %v1566_v2, %v1235_v43 }
 0x15a   : > { %v1237_v56 = vpop.f32.mrf.mxu1  ;;  %v4624_v41 = vpack.c.b16 %v1846_v28, %v1845_v38 }
 0x15b   : > { %v1938_v45 = vpop.f32.mrf.mxu0  ;;  %v1238_v19 = vadd.f32 %v1237_v56, %v4372_v18 }
 0x15c   : > { %1276 = vmatmul.bf16.gmra.mxu1 %v4589_v20 }
 0x15d   : > { %v1741_v32 = vpop.f32.mrf.mxu3  ;;  %1608 = vmatmul.bf16.gmra.mxu2 %v4609_v1 }
 0x15e   : > { %v1802_v61 = vadd.f32 %v1741_v32, %v1627_v47 }
 0x160   : > { %v1569_v46 = vpop.f32.mrf.mxu2  ;;  %v4621_v13 = vadd.f32 %v1938_v45, %v1802_v61 }
 0x161   : > { %v1628_v24 = vadd.f32 %v1569_v46, %v1238_v19 }
 0x162   : > { %1783 = vmatmul.bf16.gmra.mxu3 %v4618_v27  ;;  %v1239_v10 = vpop.f32.mrf.mxu1 }
 0x163   : > { %v1941_v6 = vpop.f32.mrf.mxu0  ;;  %v1240_v16 = vadd.f32 %v1239_v10, %v4390_v5 }
 0x165   : > { %v1744_v44 = vpop.f32.mrf.mxu3 }
 0x166   : > { %1980 = vmatmul.bf16.gmra.mxu0 %v4624_v41  ;;  %v1803_v43 = vadd.f32 %v1744_v44, %v1628_v24 }
 0x168   : > { %v1571_v42 = vpop.f32.mrf.mxu2  ;;  %v4628_v33 = vadd.f32 %v1941_v6, %v1803_v43 }
 0x169   : > { %v1629_v18 = vadd.f32 %v1571_v42, %v1240_v16 }
 0x16a   : > { %v1242_v2 = vpop.f32.mrf.mxu1 }
 0x16b   : > { %v1943_v47 = vpop.f32.mrf.mxu0  ;;  %v1243_v55 = vadd.f32 %v1242_v2, %v4269_v34 }
 0x16c   : > { %2086 = vmatmul.bf16.vlgmr.msra.gmra.mxu1 %v4181_v63 }
 0x16d   : > { %v1746_v56 = vpop.f32.mrf.mxu3  ;;  %2261 = vmatmul.bf16.vlgmr.msra.gmra.mxu2 %v4201_v7 }
 0x16e   : > { %v1804_v45 = vadd.f32 %v1746_v56, %v1629_v18 }
 0x170   : > { %v1574_v37 = vpop.f32.mrf.mxu2  ;;  %v4633_v32 = vadd.f32 %v1943_v47, %v1804_v45 }
 0x171   : > { %v1630_v61 = vadd.f32 %v1574_v37, %v1243_v55 }
 0x172   : > { %2458 = vmatmul.bf16.vlgmr.msra.gmra.mxu3 %v4099_v40  ;;  %v1244_v5 = vpop.f32.mrf.mxu1 }
 0x173   : > { %v1946_v38 = vpop.f32.mrf.mxu0  ;;  %v1245_v63 = vadd.f32 %v1244_v5, %v4292_v57 }
 0x175   : > { %v1749_v28 = vpop.f32.mrf.mxu3 }
 0x176   : > { %2639 = vmatmul.bf16.vlgmr.msra.gmra.mxu0 %v4211_v62  ;;  %v1805_v19 = vadd.f32 %v1749_v28, %v1630_v61 }
 0x178   : > { %v1576_v46 = vpop.f32.mrf.mxu2  ;;  %v4638_v24 = vadd.f32 %v1946_v38, %v1805_v19 }
 0x179   : > { %v1631_v7 = vadd.f32 %v1576_v46, %v1245_v63 }
 0x17a   : > { %v1247_v10 = vpop.f32.mrf.mxu1 }
 0x17b   : > { %v1948_v34 = vpop.f32.mrf.mxu0  ;;  %v1248_v44 = vadd.f32 %v1247_v10, %v4313_v52 }
 0x17c   : > { %2091 = vmatmul.bf16.gmra.mxu1 %v4211_v62 }
 0x17d   : > { %v1751_v6 = vpop.f32.mrf.mxu3  ;;  %2266 = vmatmul.bf16.gmra.mxu2 %v4217_v31 }
 0x17e   : > { %v1806_v40 = vadd.f32 %v1751_v6, %v1631_v7 }
 0x180   : > { %v1579_v43 = vpop.f32.mrf.mxu2  ;;  %v4643_v16 = vadd.f32 %v1948_v34, %v1806_v40  ;;  %v4990_v40 = vld [vmem:[#allocation24_spill] sm:$0xff] }
 0x181   : > { %v1632_v42 = vadd.f32 %v1579_v43, %v1248_v44 }
 0x182   : > { %2463 = vmatmul.bf16.gmra.mxu3 %v4176_v50  ;;  %v1249_v57 = vpop.f32.mrf.mxu1 }
 0x183   : > { %v1951_v18 = vpop.f32.mrf.mxu0  ;;  %v1250_v62 = vadd.f32 %v1249_v57, %v4327_v8 }
 0x185   : > { %v1754_v2 = vpop.f32.mrf.mxu3 }
 0x186   : > { %2644 = vmatmul.bf16.gmra.mxu0 %v4239_v51  ;;  %v1807_v47 = vadd.f32 %v1754_v2, %v1632_v42 }
 0x188   : > { %v1581_v56 = vpop.f32.mrf.mxu2  ;;  %v4648_v45 = vadd.f32 %v1951_v18, %v1807_v47  ;;  %v4991_v18 = vld [vmem:[#allocation3_spill] sm:$0xff] }
 0x189   : > { %v1633_v31 = vadd.f32 %v1581_v56, %v1250_v62  ;;  %v4992_v62 = vld [vmem:[#allocation14_spill] sm:$0xff] }
 0x18a   : > { %v1252_v55 = vpop.f32.mrf.mxu1 }
 0x18b   : > { %v1953_v52 = vpop.f32.mrf.mxu0  ;;  %v1253_v61 = vadd.f32 %v1252_v55, %v4343_v35 }
 0x18c   : > { %2096 = vmatmul.bf16.gmra.mxu1 %v4239_v51 }
 0x18d   : > { %v1756_v37 = vpop.f32.mrf.mxu3  ;;  %2271 = vmatmul.bf16.gmra.mxu2 %v4245_v9 }
 0x18e   : > { %v1808_v50 = vadd.f32 %v1756_v37, %v1633_v31  ;;  %v4993_v31 = vld [vmem:[#allocation26_spill] sm:$0xff] }
 0x190   : > { %v1584_v5 = vpop.f32.mrf.mxu2  ;;  %v4653_v38 = vadd.f32 %v1953_v52, %v1808_v50 }
 0x191   : > { %v1634_v28 = vadd.f32 %v1584_v5, %v1253_v61  ;;  %v4994_v5 = vld [vmem:[#allocation15_spill] sm:$0xff] }
 0x192   : > { %2468 = vmatmul.bf16.gmra.mxu3 %v3798_v59  ;;  %v1254_v8 = vpop.f32.mrf.mxu1 }
 0x193   : > { %v1956_v19 = vpop.f32.mrf.mxu0  ;;  %v1255_v51 = vadd.f32 %v1254_v8, %v4366_v53  ;;  %v4995_v8 = vld [vmem:[#allocation12_spill] sm:$0xff] }
 0x195   : > { %v1759_v63 = vpop.f32.mrf.mxu3 }
 0x196   : > { %2649 = vmatmul.bf16.gmra.mxu0 %v4257_v49  ;;  %v1809_v46 = vadd.f32 %v1759_v63, %v1634_v28 }
 0x198   : > { %v1586_v7 = vpop.f32.mrf.mxu2  ;;  %v4658_v10 = vadd.f32 %v1956_v19, %v1809_v46 }
 0x199   : > { %v1635_v9 = vadd.f32 %v1586_v7, %v1255_v51  ;;  %v4996_v7 = vld [vmem:[#allocation5_spill] sm:$0xff] }
 0x19a   : > { %v1257_v34 = vpop.f32.mrf.mxu1 }
 0x19b   : > { %v1958_v35 = vpop.f32.mrf.mxu0  ;;  %v1258_v44 = vadd.f32 %v1257_v34, %v4990_v40  ;;  %v4998_v40 = vld [vmem:[#allocation13_spill] sm:$0xff] }
 0x19c   : > { %2101 = vmatmul.bf16.gmra.mxu1 %v4257_v49 }
 0x19d   : > { %v1761_v6 = vpop.f32.mrf.mxu3  ;;  %2276 = vmatmul.bf16.gmra.mxu2 %v4265_v4 }
 0x19e   : > { %v1810_v59 = vadd.f32 %v1761_v6, %v1635_v9  ;;  %v4997_v6 = vld [vmem:[#allocation18_spill] sm:$0xff] }
 0x1a0   : > { %v1589_v43 = vpop.f32.mrf.mxu2  ;;  %v4663_v42 = vadd.f32 %v1958_v35, %v1810_v59 }
 0x1a1   : > { %v1636_v57 = vadd.f32 %v1589_v43, %v1258_v44 }
 0x1a2   : > { %2473 = vmatmul.bf16.gmra.mxu3 %v4991_v18  ;;  %v1259_v53 = vpop.f32.mrf.mxu1 }
 0x1a3   : > { %v1961_v2 = vpop.f32.mrf.mxu0  ;;  %v1260_v49 = vadd.f32 %v1259_v53, %v4993_v31  ;;  %v5000_v31 = vld [vmem:[#allocation16_spill] sm:$0xff] }
 0x1a5   : > { %v1764_v47 = vpop.f32.mrf.mxu3 }
 0x1a6   : > { %2654 = vmatmul.bf16.gmra.mxu0 %v4992_v62  ;;  %v1811_v56 = vadd.f32 %v1764_v47, %v1636_v57 }
 0x1a8   : > { %v1591_v55 = vpop.f32.mrf.mxu2  ;;  %v4668_v52 = vadd.f32 %v1961_v2, %v1811_v56 }
 0x1a9   : > { %v1637_v4 = vadd.f32 %v1591_v55, %v1260_v49 }
 0x1aa   : > { %v1262_v37 = vpop.f32.mrf.mxu1 }
 0x1ab   : > { %v1963_v50 = vpop.f32.mrf.mxu0  ;;  %v1263_v19 = vadd.f32 %v1262_v37, %v4995_v8  ;;  %v5002_v8 = vld [vmem:[#allocation21_spill] sm:$0xff] }
 0x1ac   : > { %2106 = vmatmul.bf16.gmra.mxu1 %v4992_v62  ;;  %v4999_v62 = vld [vmem:[#allocation19_spill] sm:$0xff] }
 0x1ad   : > { %v1766_v61 = vpop.f32.mrf.mxu3  ;;  %2281 = vmatmul.bf16.gmra.mxu2 %v4994_v5 }
 0x1ae   : > { %v1812_v28 = vadd.f32 %v1766_v61, %v1637_v4 }
 0x1b0   : > { %v1594_v63 = vpop.f32.mrf.mxu2  ;;  %v4673_v46 = vadd.f32 %v1963_v50, %v1812_v28  ;;  %v5001_v50 = vld [vmem:[#allocation10_spill] sm:$0xff] }
 0x1b1   : > { %v1638_v51 = vadd.f32 %v1594_v63, %v1263_v19  ;;  %v5003_v63 = vld [vmem:[#allocation17_spill] sm:$0xff] }
 0x1b2   : > { %2478 = vmatmul.bf16.gmra.mxu3 %v4996_v7  ;;  %v1264_v9 = vpop.f32.mrf.mxu1 }
 0x1b3   : > { %v1966_v34 = vpop.f32.mrf.mxu0  ;;  %v1265_v44 = vadd.f32 %v1264_v9, %v4998_v40  ;;  %v5004_v40 = vld [vmem:[#allocation23_spill] sm:$0xff] }
 0x1b5   : > { %v1769_v35 = vpop.f32.mrf.mxu3 }
 0x1b6   : > { %2659 = vmatmul.bf16.gmra.mxu0 %v4997_v6  ;;  %v1813_v59 = vadd.f32 %v1769_v35, %v1638_v51 }
 0x1b8   : > { %v1596_v43 = vpop.f32.mrf.mxu2  ;;  %v4678_v57 = vadd.f32 %v1966_v34, %v1813_v59 }
 0x1b9   : > { %v1639_v18 = vadd.f32 %v1596_v43, %v1265_v44  ;;  %v5005_v43 = vld [vmem:[#allocation20_spill] sm:$0xff] }
 0x1ba   : > { %v1267_v53 = vpop.f32.mrf.mxu1 }
 0x1bb   : > { %v1968_v2 = vpop.f32.mrf.mxu0  ;;  %v1268_v49 = vadd.f32 %v1267_v53, %v5000_v31 }
 0x1bc   : > { %2111 = vmatmul.bf16.gmra.mxu1 %v4997_v6 }
 0x1bd   : > { %v1771_v47 = vpop.f32.mrf.mxu3  ;;  %2286 = vmatmul.bf16.gmra.mxu2 %v4999_v62  ;;  %v5006_v62 = vld [vmem:[#allocation2_spill] sm:$0xff] }
 0x1be   : > { %v1814_v56 = vadd.f32 %v1771_v47, %v1639_v18 }
 0x1c0   : > { %v1599_v55 = vpop.f32.mrf.mxu2  ;;  %v4683_v4 = vadd.f32 %v1968_v2, %v1814_v56 }
 0x1c1   : > { %v1640_v37 = vadd.f32 %v1599_v55, %v1268_v49  ;;  %v5007_v55 = vld [vmem:[#allocation27_spill] sm:$0xff] }
 0x1c2   : > { %2483 = vmatmul.bf16.gmra.mxu3 %v5001_v50  ;;  %v1269_v61 = vpop.f32.mrf.mxu1  ;;  %v5008_v50 = vld [vmem:[#allocation22_spill] sm:$0xff] }
 0x1c3   : > { %v1971_v5 = vpop.f32.mrf.mxu0  ;;  %v1270_v51 = vadd.f32 %v1269_v61, %v5003_v63 }
 0x1c5   : > { %v1774_v28 = vpop.f32.mrf.mxu3 }
 0x1c6   : > { %2664 = vmatmul.bf16.gmra.mxu0 %v5002_v8  ;;  %v1815_v19 = vadd.f32 %v1774_v28, %v1640_v37 }
 0x1c8   : > { %v1601_v7 = vpop.f32.mrf.mxu2  ;;  %v4688_v9 = vadd.f32 %v1971_v5, %v1815_v19 }
 0x1c9   : > { %v1641_v34 = vadd.f32 %v1601_v7, %v1270_v51 }
 0x1ca   : > { %v1272_v35 = vpop.f32.mrf.mxu1 }
 0x1cb   : > { %v1973_v6 = vpop.f32.mrf.mxu0  ;;  %v1273_v18 = vadd.f32 %v1272_v35, %v5005_v43 }
 0x1cc   : > { %2116 = vmatmul.bf16.gmra.mxu1 %v5002_v8 }
 0x1cd   : > { %v1776_v59 = vpop.f32.mrf.mxu3  ;;  %2291 = vmatmul.bf16.gmra.mxu2 %v5004_v40 }
 0x1ce   : > { %v1816_v44 = vadd.f32 %v1776_v59, %v1641_v34  ;;  %v5009_v34 = vld [vmem:[#allocation25_spill] sm:$0xff] }
 0x1d0   : > { %v1604_v53 = vpop.f32.mrf.mxu2  ;;  %v4693_v2 = vadd.f32 %v1973_v6, %v1816_v44 }
 0x1d1   : > { %v1642_v47 = vadd.f32 %v1604_v53, %v1273_v18 }
 0x1d2   : > { %2488 = vmatmul.bf16.gmra.mxu3 %v5006_v62  ;;  %v1274_v56 = vpop.f32.mrf.mxu1 }
 0x1d3   : > { %v1976_v31 = vpop.f32.mrf.mxu0  ;;  %v1275_v61 = vadd.f32 %v1274_v56, %v5008_v50 }
 0x1d5   : > { %v1779_v49 = vpop.f32.mrf.mxu3 }
 0x1d6   : > { %2669 = vmatmul.bf16.gmra.mxu0 %v5007_v55  ;;  %v1817_v37 = vadd.f32 %v1779_v49, %v1642_v47  ;;  %v5010_v47 = vld [vmem:[#allocation28_spill] sm:$0xff] }
 0x1d8   : > { %v1606_v5 = vpop.f32.mrf.mxu2  ;;  %v4698_v28 = vadd.f32 %v1976_v31, %v1817_v37 }
 0x1d9   : > { %v1643_v8 = vadd.f32 %v1606_v5, %v1275_v61 }
 0x1da   : > { %v1277_v19 = vpop.f32.mrf.mxu1 }
 0x1db   : > { %v1978_v63 = vpop.f32.mrf.mxu0  ;;  %v1278_v35 = vadd.f32 %v1277_v19, %v5009_v34  ;;  %v5011_v34 = vld [vmem:[#allocation29_spill] sm:$0xff] }
 0x1dc   : > { %2121 = vmatmul.bf16.gmra.mxu1 %v5007_v55 }
 0x1dd   : > { %v1781_v51 = vpop.f32.mrf.mxu3  ;;  %2296 = vmatmul.bf16.gmra.mxu2 %v4414_v14 }
 0x1de   : > { %v1818_v7 = vadd.f32 %v1781_v51, %v1643_v8 }
 0x1e0   : > { %v1609_v6 = vpop.f32.mrf.mxu2  ;;  %v4703_v59 = vadd.f32 %v1978_v63, %v1818_v7 }
 0x1e1   : > { %v1644_v40 = vadd.f32 %v1609_v6, %v1278_v35 }
 0x1e2   : > { %2493 = vmatmul.bf16.gmra.mxu3 %v3932_v12  ;;  %v1279_v44 = vpop.f32.mrf.mxu1 }
 0x1e3   : > { %v1981_v43 = vpop.f32.mrf.mxu0  ;;  %v1280_v62 = vadd.f32 %v1279_v44, %v5010_v47 }
 0x1e5   : > { %v1784_v18 = vpop.f32.mrf.mxu3 }
 0x1e6   : > { %2674 = vmatmul.bf16.gmra.mxu0 %v4436_v60  ;;  %v1819_v53 = vadd.f32 %v1784_v18, %v1644_v40  ;;  %v4729_v18 = vld [vmem:[%s4908_s3] ss:$0 sm:$0xff] }
 0x1e8   : > { %v1611_v56 = vpop.f32.mrf.mxu2  ;;  %v4708_v31 = vadd.f32 %v1981_v43, %v1819_v53 }
 0x1e9   : > { %v1645_v14 = vadd.f32 %v1611_v56, %v1280_v62 }
 0x1ea   : > { %v2087_v49 = vpop.f32.mrf.mxu1 }
 0x1eb   : > { %v1983_v55 = vpop.f32.mrf.mxu0  ;;  %v2167_v50 = vadd.f32 %v2087_v49, %v4434_v15  ;;  %v4721_v15 = vld [vmem:[%s4907_s2] ss:$0 sm:$0xff] }
 0x1ec   : > { %2126 = vmatmul.bf16.gmra.mxu1 %v4436_v60 }
 0x1ed   : > { %v1786_v37 = vpop.f32.mrf.mxu3  ;;  %2301 = vmatmul.bf16.gmra.mxu2 %v4446_v29 }
 0x1ee   : > { %v1820_v12 = vadd.f32 %v1786_v37, %v1645_v14 }
 0x1f0   : > { %v2262_v61 = vpop.f32.mrf.mxu2  ;;  %v4713_v5 = vadd.f32 %v1983_v55, %v1820_v12 }
 0x1f1   : > { %v2342_v8 = vadd.f32 %v2262_v61, %v2167_v50 }
 0x1f2   : > { %2498 = vmatmul.bf16.gmra.mxu3 %v4041_v26  ;;  %v2089_v19 = vpop.f32.mrf.mxu1 }
 0x1f3   : > { %v2640_v63 = vpop.f32.mrf.mxu0  ;;  %v2168_v60 = vadd.f32 %v2089_v19, %v5011_v34 }
 0x1f5   : > { %v2459_v51 = vpop.f32.mrf.mxu3 }
 0x1f6   : > { %2679 = vmatmul.bf16.gmra.mxu0 %v4461_v11  ;;  %v2539_v7 = vadd.f32 %v2459_v51, %v2342_v8 }
 0x1f8   : > { %v2264_v35 = vpop.f32.mrf.mxu2  ;;  %v2720_v6 = vadd.f32 %v2640_v63, %v2539_v7 }
 0x1f9   : > { %v2343_v29 = vadd.f32 %v2264_v35, %v2168_v60 }
 0x1fa   : > { %v2092_v40 = vpop.f32.mrf.mxu1  ;;  %v2756_v43 = vmul.f32 %v4721_v15, %v2720_v6 }
 0x1fb   : > { %v2642_v44 = vpop.f32.mrf.mxu0  ;;  %v2169_v62 = vadd.f32 %v2092_v40, %v4459_v54 }
 0x1fc   : > { %2131 = vmatmul.bf16.gmra.mxu1 %v4461_v11  ;;  %v2792_v14 = vadd.f32 %v4729_v18, %v2756_v43 }
 0x1fd   : > { %v2461_v26 = vpop.f32.mrf.mxu3  ;;  %2306 = vmatmul.bf16.gmra.mxu2 %v4468_v22 }
 0x1fe   : > { %v2540_v53 = vadd.f32 %v2461_v26, %v2343_v29  ;;  %v2824_v50 = vmax.f32 %v2792_v14, 0.0  ;;  %v5012_v14 = vld [vmem:[#allocation32_spill] sm:$0xff] }
 0x200   : > { %v2721_v47 = vadd.f32 %v2642_v44, %v2540_v53  ;;  %v2267_v56 = vpop.f32.mrf.mxu2 }
 0x201   : > { %v2344_v11 = vadd.f32 %v2267_v56, %v2169_v62 }
 0x202   : > { %v2757_v49 = vmul.f32 %v4721_v15, %v2721_v47  ;;  %2503 = vmatmul.bf16.gmra.mxu3 %v4145_v58  ;;  %v2094_v22 = vpop.f32.mrf.mxu1 }
 0x203   : > { %v2645_v55 = vpop.f32.mrf.mxu0  ;;  %v2170_v58 = vadd.f32 %v2094_v22, %v4472_v21 }
 0x204   : > { %v2793_v37 = vadd.f32 %v4729_v18, %v2757_v49 }
 0x205   : > { %v2464_v12 = vpop.f32.mrf.mxu3 }
 0x206   : > { %v2825_v61 = vmax.f32 %v2793_v37, 0.0  ;;  %2684 = vmatmul.bf16.gmra.mxu0 %v4492_v23  ;;  %v2541_v8 = vadd.f32 %v2464_v12, %v2344_v11  ;;  %v5013_v11 = vld [vmem:[#allocation30_spill] sm:$0xff] }
 0x208   : > { %v3522_v54 = vpack.c.bf16 %v2825_v61, %v2824_v50  ;;  %v2269_v19 = vpop.f32.mrf.mxu2  ;;  %v2722_v63 = vadd.f32 %v2645_v55, %v2541_v8  ;;  %v5014_v8 = vld [vmem:[#allocation33_spill] sm:$0xff] }
 0x209   : > { %v2345_v51 = vadd.f32 %v2269_v19, %v2170_v58 }
 0x20a   : > { %3523 = vst [vmem:[%s4741_s26] sm:$0xff] %v3522_v54   ;;  %v2097_v7 = vpop.f32.mrf.mxu1  ;;  %v2758_v35 = vmul.f32 %v4721_v15, %v2722_v63  ;;  %v5015_v63 = vld [vmem:[#allocation31_spill] sm:$0xff] }
 0x20b   : > { %v2647_v34 = vpop.f32.mrf.mxu0  ;;  %v2171_v40 = vadd.f32 %v2097_v7, %v4490_v17 }
 0x20c   : > { %2136 = vmatmul.bf16.gmra.mxu1 %v4492_v23  ;;  %v2794_v21 = vadd.f32 %v4729_v18, %v2758_v35  ;;  %v5016_v35 = vld [vmem:[#allocation4_spill] sm:$0xff] }
 0x20d   : > { %v2466_v60 = vpop.f32.mrf.mxu3  ;;  %2311 = vmatmul.bf16.gmra.mxu2 %v4502_v39 }
 0x20e   : > { %v2542_v6 = vadd.f32 %v2466_v60, %v2345_v51  ;;  %v2826_v62 = vmax.f32 %v2794_v21, 0.0 }
 0x210   : > { %v2723_v29 = vadd.f32 %v2647_v34, %v2542_v6  ;;  %v2272_v44 = vpop.f32.mrf.mxu2 }
 0x211   : > { %v2346_v43 = vadd.f32 %v2272_v44, %v2171_v40 }
 0x212   : > { %v2759_v26 = vmul.f32 %v4721_v15, %v2723_v29  ;;  %2508 = vmatmul.bf16.gmra.mxu3 %v3841_v36  ;;  %v2099_v53 = vpop.f32.mrf.mxu1 }
 0x213   : > { %v2650_v23 = vpop.f32.mrf.mxu0  ;;  %v2172_v22 = vadd.f32 %v2099_v53, %v5013_v11  ;;  %v5017_v53 = vld [vmem:[#allocation36_spill] sm:$0xff] }
 0x214   : > { %v2795_v47 = vadd.f32 %v4729_v18, %v2759_v26 }
 0x215   : > { %v2469_v39 = vpop.f32.mrf.mxu3 }
 0x216   : > { %v2827_v56 = vmax.f32 %v2795_v47, 0.0  ;;  %2689 = vmatmul.bf16.gmra.mxu0 %v5012_v14  ;;  %v2543_v49 = vadd.f32 %v2469_v39, %v2346_v43  ;;  %v5018_v39 = vld [vmem:[#allocation34_spill] sm:$0xff] }
 0x218   : > { %v3527_v17 = vpack.c.bf16 %v2827_v56, %v2826_v62  ;;  %v2274_v55 = vpop.f32.mrf.mxu2  ;;  %v2724_v37 = vadd.f32 %v2650_v23, %v2543_v49 }
 0x219   : > { %v2347_v12 = vadd.f32 %v2274_v55, %v2172_v22  ;;  %v5019_v55 = vld [vmem:[#allocation37_spill] sm:$0xff] }
 0x21a   : > { %3599 = vst [vmem:[%s4741_s26 + $0x8] sm:$0xff] %v3527_v17   ;;  %v2102_v50 = vpop.f32.mrf.mxu1  ;;  %v2760_v54 = vmul.f32 %v4721_v15, %v2724_v37 }
 0x21b   : > { %v2652_v36 = vpop.f32.mrf.mxu0  ;;  %v2173_v51 = vadd.f32 %v2102_v50, %v5015_v63 }
 0x21c   : > { %2141 = vmatmul.bf16.gmra.mxu1 %v5012_v14  ;;  %v2796_v34 = vadd.f32 %v4729_v18, %v2760_v54 }
 0x21d   : > { %v2471_v61 = vpop.f32.mrf.mxu3  ;;  %2316 = vmatmul.bf16.gmra.mxu2 %v5014_v8 }
 0x21e   : > { %v2544_v58 = vadd.f32 %v2471_v61, %v2347_v12  ;;  %v2828_v26 = vmax.f32 %v2796_v34, 0.0 }
 0x220   : > { %v2725_v19 = vadd.f32 %v2652_v36, %v2544_v58  ;;  %v2277_v7 = vpop.f32.mrf.mxu2  ;;  %v5020_v36 = vld [vmem:[#allocation35_spill] sm:$0xff] }
 0x221   : > { %v2348_v6 = vadd.f32 %v2277_v7, %v2173_v51 }
 0x222   : > { %v2761_v60 = vmul.f32 %v4721_v15, %v2725_v19  ;;  %2513 = vmatmul.bf16.gmra.mxu3 %v5016_v35  ;;  %v2104_v29 = vpop.f32.mrf.mxu1  ;;  %v5021_v19 = vld [vmem:[#allocation6_spill] sm:$0xff] }
 0x223   : > { %v2655_v40 = vpop.f32.mrf.mxu0  ;;  %v2174_v62 = vadd.f32 %v2104_v29, %v5018_v39  ;;  %v5022_v29 = vld [vmem:[#allocation42_spill] sm:$0xff] }
 0x224   : > { %v2797_v44 = vadd.f32 %v4729_v18, %v2761_v60 }
 0x225   : > { %v2474_v21 = vpop.f32.mrf.mxu3 }
 0x226   : > { %v2829_v43 = vmax.f32 %v2797_v44, 0.0  ;;  %2694 = vmatmul.bf16.gmra.mxu0 %v5017_v53  ;;  %v2545_v23 = vadd.f32 %v2474_v21, %v2348_v6  ;;  %v5023_v21 = vld [vmem:[#allocation38_spill] sm:$0xff] }
 0x228   : > { %v3532_v47 = vpack.c.bf16 %v2829_v43, %v2828_v26  ;;  %v2279_v56 = vpop.f32.mrf.mxu2  ;;  %v2726_v14 = vadd.f32 %v2655_v40, %v2545_v23 }
 0x229   : > { %v2349_v49 = vadd.f32 %v2279_v56, %v2174_v62 }
 0x22a   : > { %3600 = vst [vmem:[%s4741_s26 + $0x10] sm:$0xff] %v3532_v47   ;;  %v2107_v17 = vpop.f32.mrf.mxu1  ;;  %v2762_v37 = vmul.f32 %v4721_v15, %v2726_v14 }
 0x22b   : > { %v2657_v11 = vpop.f32.mrf.mxu0  ;;  %v2175_v61 = vadd.f32 %v2107_v17, %v5020_v36  ;;  %v5024_v17 = vld [vmem:[#allocation41_spill] sm:$0xff]  ;;  %v4786_v36 = vld [vmem:[%s3765_s28 + $0xcc] sm:$0xf] }
 0x22c   : > { %2146 = vmatmul.bf16.gmra.mxu1 %v5017_v53  ;;  %v2798_v54 = vadd.f32 %v4729_v18, %v2762_v37 }
 0x22d   : > { %v2476_v22 = vpop.f32.mrf.mxu3  ;;  %2321 = vmatmul.bf16.gmra.mxu2 %v5019_v55 }
 0x22e   : > { %v2546_v12 = vadd.f32 %v2476_v22, %v2349_v49  ;;  %v2830_v35 = vmax.f32 %v2798_v54, 0.0 }
 0x230   : > { %v2727_v50 = vadd.f32 %v2657_v11, %v2546_v12  ;;  %v2282_v8 = vpop.f32.mrf.mxu2 }
 0x231   : > { %v2350_v63 = vadd.f32 %v2282_v8, %v2175_v61  ;;  %v5025_v8 = vld [vmem:[#allocation40_spill] sm:$0xff] }
 0x232   : > { %v2763_v58 = vmul.f32 %v4721_v15, %v2727_v50  ;;  %2518 = vmatmul.bf16.gmra.mxu3 %v5021_v19  ;;  %v2109_v51 = vpop.f32.mrf.mxu1 }
 0x233   : > { %v2660_v7 = vpop.f32.mrf.mxu0  ;;  %v2176_v26 = vadd.f32 %v2109_v51, %v5023_v21  ;;  %v2378_v51 = vshll.u32 %v4786_v36, 16 }
 0x234   : > { %v2799_v34 = vadd.f32 %v4729_v18, %v2763_v58  ;;  %v4791_v58 = vld [vmem:[%s3765_s28 + $0xd0] sm:$0xf] }
 0x235   : > { %v2479_v60 = vpop.f32.mrf.mxu3 }
 0x236   : > { %v2831_v6 = vmax.f32 %v2799_v34, 0.0  ;;  %2699 = vmatmul.bf16.gmra.mxu0 %v5022_v29  ;;  %v2547_v40 = vadd.f32 %v2479_v60, %v2350_v63  ;;  %v2375_v63 = vshrl.u32 %v4786_v36, 16  ;;  %v5026_v60 = vld [vmem:[#allocation39_spill] sm:$0xff] }
 0x238   : > { %v3537_v44 = vpack.c.bf16 %v2831_v6, %v2830_v35  ;;  %v2284_v43 = vpop.f32.mrf.mxu2  ;;  %v2728_v53 = vadd.f32 %v2660_v7, %v2547_v40  ;;  %v3292_v35 = vrot.slane %v5026_v60, 9  ;;  %v2384_v40 = vshll.u32 %v4791_v58, 16 }
 0x239   : > { %v2351_v23 = vadd.f32 %v2284_v43, %v2176_v26 }
 0x23a   : > { %3601 = vst [vmem:[%s4741_s26 + $0x18] sm:$0xff] %v3537_v44   ;;  %v2112_v47 = vpop.f32.mrf.mxu1  ;;  %v2764_v56 = vmul.f32 %v4721_v15, %v2728_v53  ;;  %v2388_v44 = vshrl.u32 %v4791_v58, 16  ;;  %v2377_v53 = vrot.slane %v2375_v63, 4 }
 0x23b   : > { %v2662_v39 = vpop.f32.mrf.mxu0  ;;  %v2177_v11 = vadd.f32 %v2112_v47, %v5024_v17  ;;  %v2386_v17 = vrot.slane %v2384_v40, 5 }
 0x23c   : > { %2151 = vmatmul.bf16.gmra.mxu1 %v5022_v29  ;;  %v2800_v55 = vadd.f32 %v4729_v18, %v2764_v56  ;;  %v2024_v29 = vrot.slane %v4595_v25, 5 }
 0x23d   : > { %v2481_v62 = vpop.f32.mrf.mxu3  ;;  %2326 = vmatmul.bf16.gmra.mxu2 %v4589_v20  ;;  %v2021_v20 = vrot.slane %v5025_v8, 5 }
 0x23e   : > { %v2548_v14 = vadd.f32 %v2481_v62, %v2351_v23  ;;  %v2832_v7 = vmax.f32 %v2800_v55, 0.0  ;;  %v2380_v23 = vrot.slane %v2378_v51, 5 }
 0x23f   : > { %v2023_v6 = vrot.slane %v2021_v20, 4 }
 0x240   : > { %v2729_v49 = vadd.f32 %v2662_v39, %v2548_v14  ;;  %v2287_v22 = vpop.f32.mrf.mxu2  ;;  %v2381_v55 = vor.u32 %v2380_v23, %v2377_v53 }
 0x241   : > { %v2352_v12 = vadd.f32 %v2287_v22, %v2177_v11  ;;  %v2025_v25 = vsel %vm4153_vm5, %v2023_v6, %v2024_v29  ;;  %v2390_v11 = vrot.slane %v2388_v44, 4  ;;  %v316_v22 = vld [vmem:[%s3765_s28 + $0xd4] sm:$0x1]  ;;  %v2574_v29 = vrot.slane %v4791_v58, 5 }
 0x242   : > { %v2765_v37 = vmul.f32 %v4721_v15, %v2729_v49  ;;  %2523 = vmatmul.bf16.gmra.mxu3 %v4163_v48  ;;  %v2114_v50 = vpop.f32.mrf.mxu1  ;;  %v2022_v49 = vsel %vm4153_vm5, %v3292_v35, %v2021_v20  ;;  %v2382_v51 = vrot.slane %v2381_v55, 4 }
 0x243   : > { %v2665_v61 = vpop.f32.mrf.mxu0  ;;  %v2178_v26 = vadd.f32 %v2114_v50, %v4597_v3  ;;  %v2026_v50 = vunpack.c.l.b16 %v2022_v49  ;;  %v2391_v8 = vor.u32 %v2390_v11, %v2386_v17  ;;  %v2576_v23 = vrot.slane %v2574_v29, 4 }
 0x244   : > { %v2801_v54 = vadd.f32 %v4729_v18, %v2765_v37  ;;  %v2387_v44 = vsel %vm3780_vm2, %v2382_v51, %v2386_v17 }
 0x245   : > { %v2484_v19 = vpop.f32.mrf.mxu3  ;;  %v2392_v35 = vrot.slane %v2391_v8, 4  ;;  %v2398_v49 = vunpack.c.l.b16 %v2387_v44 }
 0x246   : > { %v2833_v34 = vmax.f32 %v2801_v54, 0.0  ;;  %2704 = vmatmul.bf16.gmra.mxu0 %v4609_v1  ;;  %v2549_v48 = vadd.f32 %v2484_v19, %v2352_v12  ;;  %v2394_v54 = vshll.u32 %v316_v22, 16 }
 0x248   : > { %v3542_v21 = vpack.c.bf16 %v2833_v34, %v2832_v7  ;;  %v2289_v43 = vpop.f32.mrf.mxu2  ;;  %v2730_v47 = vadd.f32 %v2665_v61, %v2549_v48  ;;  %v2027_v61 = vunpack.c.l.b16 %v2025_v25  ;;  %v2396_v6 = vrot.slane %v2394_v54, 5 }
 0x249   : > { %v2353_v39 = vadd.f32 %v2289_v43, %v2178_v26  ;;  %v3393_v43 = vrot.slane %v4786_v36, 9 }
 0x24a   : > { %3602 = vst [vmem:[%s4741_s26 + $0x20] sm:$0xff] %v3542_v21   ;;  %v2117_v62 = vpop.f32.mrf.mxu1  ;;  %v2766_v37 = vmul.f32 %v4721_v15, %v2730_v47  ;;  %v2397_v53 = vsel %vm3780_vm2, %v2392_v35, %v2396_v6  ;;  %v2577_v47 = vrot.slane %v316_v22, 5 }
 0x24b   : > { %v2667_v56 = vpop.f32.mrf.mxu0  ;;  %v2179_v19 = vadd.f32 %v2117_v62, %v4607_v0  ;;  %v2575_v55 = vsel %vm4153_vm5, %v3393_v43, %v2574_v29 }
 0x24c   : > { %2156 = vmatmul.bf16.gmra.mxu1 %v4609_v1  ;;  %v2802_v7 = vadd.f32 %v4729_v18, %v2766_v37  ;;  %v2578_v30 = vsel %vm4153_vm5, %v2576_v23, %v2577_v47  ;;  %v2579_v37 = vunpack.c.l.b16 %v2575_v55 }
 0x24d   : > { %v2486_v3 = vpop.f32.mrf.mxu3  ;;  %2331 = vmatmul.bf16.gmra.mxu2 %v4618_v27  ;;  %v2028_v27 = vpack.c.b16 %v2027_v61, %v2026_v50  ;;  %v2580_v61 = vunpack.c.l.b16 %v2578_v30 }
 0x24e   : > { %v2550_v12 = vadd.f32 %v2486_v3, %v2353_v39  ;;  %v2834_v21 = vmax.f32 %v2802_v7, 0.0  ;;  %v2399_v3 = vunpack.c.l.b16 %v2397_v53 }
 0x24f   : > { %v2581_v14 = vpack.c.b16 %v2580_v61, %v2579_v37 }
 0x250   : > { %v2731_v20 = vadd.f32 %v2667_v56, %v2550_v12  ;;  %v2292_v63 = vpop.f32.mrf.mxu2  ;;  %v3446_v56 = vld [vmem:[%s3765_s28 + $0xcc] sm:$0xff]  ;;  %v2400_v50 = vpack.c.b16 %v2399_v3, %v2398_v49 }
 0x251   : > { %v2354_v34 = vadd.f32 %v2292_v63, %v2179_v19 }
 0x252   : > { %v2767_v1 = vmul.f32 %v4721_v15, %v2731_v20  ;;  %2528 = vmatmul.bf16.gmra.mxu3 %v4624_v41  ;;  %v2119_v48 = vpop.f32.mrf.mxu1 }
 0x253   : > { %v2670_v60 = vpop.f32.mrf.mxu0  ;;  %v2180_v58 = vadd.f32 %v2119_v48, %v4621_v13 }
 0x254   : > { %v2803_v40 = vadd.f32 %v4729_v18, %v2767_v1 }
 0x255   : > { %v2489_v0 = vpop.f32.mrf.mxu3 }
 0x256   : > { %v2835_v26 = vmax.f32 %v2803_v40, 0.0  ;;  %2709 = vmatmul.bf16.gmra.mxu0 %v2028_v27  ;;  %v2551_v41 = vadd.f32 %v2489_v0, %v2354_v34 }
 0x258   : > { %v3547_v39 = vpack.c.bf16 %v2835_v26, %v2834_v21  ;;  %v2294_v62 = vpop.f32.mrf.mxu2  ;;  %v2732_v25 = vadd.f32 %v2670_v60, %v2551_v41 }
 0x259   : > { %v2355_v17 = vadd.f32 %v2294_v62, %v2180_v58 }
 0x25a   : > { %3603 = vst [vmem:[%s4741_s26 + $0x28] sm:$0xff] %v3547_v39   ;;  %v2122_v11 = vpop.f32.mrf.mxu1  ;;  %v2768_v13 = vmul.f32 %v4721_v15, %v2732_v25 }
 0x25b   : > { %v2672_v36 = vpop.f32.mrf.mxu0  ;;  %v2181_v54 = vadd.f32 %v2122_v11, %v4628_v33 }
 0x25c   : > { %2161 = vmatmul.bf16.gmra.mxu1 %v2028_v27  ;;  %v2804_v19 = vadd.f32 %v4729_v18, %v2768_v13 }
 0x25d   : > { %v2491_v22 = vpop.f32.mrf.mxu3  ;;  %2336 = vmatmul.bf16.gmra.mxu2 %v3446_v56 }
 0x25e   : > { %v2552_v12 = vadd.f32 %v2491_v22, %v2355_v17  ;;  %v2836_v48 = vmax.f32 %v2804_v19, 0.0 }
 0x260   : > { %v2733_v8 = vadd.f32 %v2672_v36, %v2552_v12  ;;  %v2297_v20 = vpop.f32.mrf.mxu2 }
 0x261   : > { %v2356_v51 = vadd.f32 %v2297_v20, %v2181_v54 }
 0x262   : > { %v2769_v63 = vmul.f32 %v4721_v15, %v2733_v8  ;;  %2533 = vmatmul.bf16.gmra.mxu3 %v2400_v50  ;;  %v2124_v7 = vpop.f32.mrf.mxu1 }
 0x263   : > { %v2675_v1 = vpop.f32.mrf.mxu0  ;;  %v2182_v33 = vadd.f32 %v2124_v7, %v4633_v32 }
 0x264   : > { %v2805_v27 = vadd.f32 %v4729_v18, %v2769_v63 }
 0x265   : > { %v2494_v34 = vpop.f32.mrf.mxu3 }
 0x266   : > { %v2837_v60 = vmax.f32 %v2805_v27, 0.0  ;;  %2714 = vmatmul.bf16.gmra.mxu0 %v2581_v14  ;;  %v2553_v35 = vadd.f32 %v2494_v34, %v2356_v51 }
 0x268   : > { %v3552_v6 = vpack.c.bf16 %v2837_v60, %v2836_v48  ;;  %v2299_v29 = vpop.f32.mrf.mxu2  ;;  %v2734_v40 = vadd.f32 %v2675_v1, %v2553_v35 }
 0x269   : > { %v2357_v0 = vadd.f32 %v2299_v29, %v2182_v33 }
 0x26a   : > { %3604 = vst [vmem:[%s4741_s26 + $0x30] sm:$0xff] %v3552_v6   ;;  %v2127_v44 = vpop.f32.mrf.mxu1  ;;  %v2770_v41 = vmul.f32 %v4721_v15, %v2734_v40 }
 0x26b   : > { %v2677_v21 = vpop.f32.mrf.mxu0  ;;  %v2183_v23 = vadd.f32 %v2127_v44, %v4638_v24 }
 0x26c   : > { %v2806_v39 = vadd.f32 %v4729_v18, %v2770_v41 }
 0x26d   : > { %v2496_v26 = vpop.f32.mrf.mxu3 }
 0x26e   : > { %v2554_v43 = vadd.f32 %v2496_v26, %v2357_v0  ;;  %v2838_v17 = vmax.f32 %v2806_v39, 0.0 }
 0x270   : > { %v2735_v53 = vadd.f32 %v2677_v21, %v2554_v43  ;;  %v2302_v47 = vpop.f32.mrf.mxu2 }
 0x271   : > { %v2358_v32 = vadd.f32 %v2302_v47, %v2183_v23 }
 0x272   : > { %v2771_v58 = vmul.f32 %v4721_v15, %v2735_v53  ;;  %v2129_v62 = vpop.f32.mrf.mxu1 }
 0x273   : > { %v2680_v56 = vpop.f32.mrf.mxu0  ;;  %v2184_v36 = vadd.f32 %v2129_v62, %v4643_v16 }
 0x274   : > { %v2807_v49 = vadd.f32 %v4729_v18, %v2771_v58 }
 0x275   : > { %v2499_v25 = vpop.f32.mrf.mxu3 }
 0x276   : > { %v2839_v11 = vmax.f32 %v2807_v49, 0.0  ;;  %v2555_v3 = vadd.f32 %v2499_v25, %v2358_v32 }
 0x278   : > { %v3557_v55 = vpack.c.bf16 %v2839_v11, %v2838_v17  ;;  %v2304_v30 = vpop.f32.mrf.mxu2  ;;  %v2736_v24 = vadd.f32 %v2680_v56, %v2555_v3 }
 0x279   : > { %v2359_v22 = vadd.f32 %v2304_v30, %v2184_v36 }
 0x27a   : > { %3605 = vst [vmem:[%s4741_s26 + $0x38] sm:$0xff] %v3557_v55   ;;  %v2132_v37 = vpop.f32.mrf.mxu1  ;;  %v2772_v50 = vmul.f32 %v4721_v15, %v2736_v24 }
 0x27b   : > { %v2682_v13 = vpop.f32.mrf.mxu0  ;;  %v2185_v54 = vadd.f32 %v2132_v37, %v4648_v45 }
 0x27c   : > { %v2808_v19 = vadd.f32 %v4729_v18, %v2772_v50 }
 0x27d   : > { %v2501_v12 = vpop.f32.mrf.mxu3 }
 0x27e   : > { %v2556_v61 = vadd.f32 %v2501_v12, %v2359_v22  ;;  %v2840_v27 = vmax.f32 %v2808_v19, 0.0 }
 0x280   : > { %v2737_v8 = vadd.f32 %v2682_v13, %v2556_v61  ;;  %v2307_v20 = vpop.f32.mrf.mxu2 }
 0x281   : > { %v2360_v16 = vadd.f32 %v2307_v20, %v2185_v54 }
 0x282   : > { %v2773_v63 = vmul.f32 %v4721_v15, %v2737_v8  ;;  %v2134_v14 = vpop.f32.mrf.mxu1 }
 0x283   : > { %v2685_v51 = vpop.f32.mrf.mxu0  ;;  %v2186_v35 = vadd.f32 %v2134_v14, %v4653_v38 }
 0x284   : > { %v2809_v7 = vadd.f32 %v4729_v18, %v2773_v63 }
 0x285   : > { %v2504_v1 = vpop.f32.mrf.mxu3 }
 0x286   : > { %v2841_v34 = vmax.f32 %v2809_v7, 0.0  ;;  %v2557_v48 = vadd.f32 %v2504_v1, %v2360_v16 }
 0x288   : > { %v3562_v60 = vpack.c.bf16 %v2841_v34, %v2840_v27  ;;  %v2309_v6 = vpop.f32.mrf.mxu2  ;;  %v2738_v45 = vadd.f32 %v2685_v51, %v2557_v48 }
 0x289   : > { %v2361_v33 = vadd.f32 %v2309_v6, %v2186_v35 }
 0x28a   : > { %3606 = vst [vmem:[%s4741_s26 + $0x40] sm:$0xff] %v3562_v60   ;;  %v2137_v29 = vpop.f32.mrf.mxu1  ;;  %v2774_v44 = vmul.f32 %v4721_v15, %v2738_v45 }
 0x28b   : > { %v2687_v40 = vpop.f32.mrf.mxu0  ;;  %v2187_v41 = vadd.f32 %v2137_v29, %v4658_v10 }
 0x28c   : > { %v2810_v53 = vadd.f32 %v4729_v18, %v2774_v44 }
 0x28d   : > { %v2506_v0 = vpop.f32.mrf.mxu3 }
 0x28e   : > { %v2558_v21 = vadd.f32 %v2506_v0, %v2361_v33  ;;  %v2842_v62 = vmax.f32 %v2810_v53, 0.0 }
 0x290   : > { %v2739_v26 = vadd.f32 %v2687_v40, %v2558_v21  ;;  %v2312_v43 = vpop.f32.mrf.mxu2 }
 0x291   : > { %v2362_v38 = vadd.f32 %v2312_v43, %v2187_v41 }
 0x292   : > { %v2775_v23 = vmul.f32 %v4721_v15, %v2739_v26  ;;  %v2139_v47 = vpop.f32.mrf.mxu1 }
 0x293   : > { %v2690_v39 = vpop.f32.mrf.mxu0  ;;  %v2188_v17 = vadd.f32 %v2139_v47, %v4663_v42 }
 0x294   : > { %v2811_v58 = vadd.f32 %v4729_v18, %v2775_v23 }
 0x295   : > { %v2509_v32 = vpop.f32.mrf.mxu3 }
 0x296   : > { %v2843_v56 = vmax.f32 %v2811_v58, 0.0  ;;  %v2559_v49 = vadd.f32 %v2509_v32, %v2362_v38 }
 0x298   : > { %v3567_v25 = vpack.c.bf16 %v2843_v56, %v2842_v62  ;;  %v2314_v11 = vpop.f32.mrf.mxu2  ;;  %v2740_v10 = vadd.f32 %v2690_v39, %v2559_v49 }
 0x299   : > { %v2363_v3 = vadd.f32 %v2314_v11, %v2188_v17 }
 0x29a   : > { %3607 = vst [vmem:[%s4741_s26 + $0x48] sm:$0xff] %v3567_v25   ;;  %v2142_v55 = vpop.f32.mrf.mxu1  ;;  %v2776_v24 = vmul.f32 %v4721_v15, %v2740_v10 }
 0x29b   : > { %v2692_v36 = vpop.f32.mrf.mxu0  ;;  %v2189_v13 = vadd.f32 %v2142_v55, %v4668_v52 }
 0x29c   : > { %v2812_v50 = vadd.f32 %v4729_v18, %v2776_v24 }
 0x29d   : > { %v2511_v30 = vpop.f32.mrf.mxu3 }
 0x29e   : > { %v2560_v22 = vadd.f32 %v2511_v30, %v2363_v3  ;;  %v2844_v63 = vmax.f32 %v2812_v50, 0.0 }
 0x2a0   : > { %v2741_v37 = vadd.f32 %v2692_v36, %v2560_v22  ;;  %v2317_v12 = vpop.f32.mrf.mxu2 }
 0x2a1   : > { %v2364_v42 = vadd.f32 %v2317_v12, %v2189_v13 }
 0x2a2   : > { %v2777_v61 = vmul.f32 %v4721_v15, %v2741_v37  ;;  %v2144_v8 = vpop.f32.mrf.mxu1 }
 0x2a3   : > { %v2695_v54 = vpop.f32.mrf.mxu0  ;;  %v2190_v7 = vadd.f32 %v2144_v8, %v4673_v46 }
 0x2a4   : > { %v2813_v20 = vadd.f32 %v4729_v18, %v2777_v61 }
 0x2a5   : > { %v2514_v19 = vpop.f32.mrf.mxu3 }
 0x2a6   : > { %v2845_v16 = vmax.f32 %v2813_v20, 0.0  ;;  %v2561_v14 = vadd.f32 %v2514_v19, %v2364_v42 }
 0x2a8   : > { %v3572_v51 = vpack.c.bf16 %v2845_v16, %v2844_v63  ;;  %v2319_v1 = vpop.f32.mrf.mxu2  ;;  %v2742_v52 = vadd.f32 %v2695_v54, %v2561_v14 }
 0x2a9   : > { %v2365_v27 = vadd.f32 %v2319_v1, %v2190_v7 }
 0x2aa   : > { %3608 = vst [vmem:[%s4741_s26 + $0x50] sm:$0xff] %v3572_v51   ;;  %v2147_v34 = vpop.f32.mrf.mxu1  ;;  %v2778_v35 = vmul.f32 %v4721_v15, %v2742_v52 }
 0x2ab   : > { %v2697_v48 = vpop.f32.mrf.mxu0  ;;  %v2191_v33 = vadd.f32 %v2147_v34, %v4678_v57 }
 0x2ac   : > { %v2814_v40 = vadd.f32 %v4729_v18, %v2778_v35 }
 0x2ad   : > { %v2516_v60 = vpop.f32.mrf.mxu3 }
 0x2ae   : > { %v2562_v6 = vadd.f32 %v2516_v60, %v2365_v27  ;;  %v2846_v43 = vmax.f32 %v2814_v40, 0.0 }
 0x2b0   : > { %v2743_v45 = vadd.f32 %v2697_v48, %v2562_v6  ;;  %v2322_v29 = vpop.f32.mrf.mxu2 }
 0x2b1   : > { %v2366_v46 = vadd.f32 %v2322_v29, %v2191_v33 }
 0x2b2   : > { %v2779_v0 = vmul.f32 %v4721_v15, %v2743_v45  ;;  %v2149_v44 = vpop.f32.mrf.mxu1 }
 0x2b3   : > { %v2700_v21 = vpop.f32.mrf.mxu0  ;;  %v2192_v47 = vadd.f32 %v2149_v44, %v4683_v4 }
 0x2b4   : > { %v2815_v26 = vadd.f32 %v4729_v18, %v2779_v0 }
 0x2b5   : > { %v2519_v41 = vpop.f32.mrf.mxu3 }
 0x2b6   : > { %v2847_v53 = vmax.f32 %v2815_v26, 0.0  ;;  %v2563_v23 = vadd.f32 %v2519_v41, %v2366_v46 }
 0x2b8   : > { %v3577_v38 = vpack.c.bf16 %v2847_v53, %v2846_v43  ;;  %v2324_v39 = vpop.f32.mrf.mxu2  ;;  %v2744_v57 = vadd.f32 %v2700_v21, %v2563_v23 }
 0x2b9   : > { %v2367_v58 = vadd.f32 %v2324_v39, %v2192_v47 }
 0x2ba   : > { %3609 = vst [vmem:[%s4741_s26 + $0x58] sm:$0xff] %v3577_v38   ;;  %v2152_v32 = vpop.f32.mrf.mxu1  ;;  %v2780_v49 = vmul.f32 %v4721_v15, %v2744_v57 }
 0x2bb   : > { %v2702_v62 = vpop.f32.mrf.mxu0  ;;  %v2193_v11 = vadd.f32 %v2152_v32, %v4688_v9 }
 0x2bc   : > { %v2816_v3 = vadd.f32 %v4729_v18, %v2780_v49 }
 0x2bd   : > { %v2521_v56 = vpop.f32.mrf.mxu3 }
 0x2be   : > { %v2564_v25 = vadd.f32 %v2521_v56, %v2367_v58  ;;  %v2848_v37 = vmax.f32 %v2816_v3, 0.0 }
 0x2c0   : > { %v2745_v17 = vadd.f32 %v2702_v62, %v2564_v25  ;;  %v2327_v10 = vpop.f32.mrf.mxu2 }
 0x2c1   : > { %v2368_v4 = vadd.f32 %v2327_v10, %v2193_v11 }
 0x2c2   : > { %v2781_v55 = vmul.f32 %v4721_v15, %v2745_v17  ;;  %v2154_v36 = vpop.f32.mrf.mxu1 }
 0x2c3   : > { %v2705_v30 = vpop.f32.mrf.mxu0  ;;  %v2194_v61 = vadd.f32 %v2154_v36, %v4693_v2 }
 0x2c4   : > { %v2817_v24 = vadd.f32 %v4729_v18, %v2781_v55 }
 0x2c5   : > { %v2524_v22 = vpop.f32.mrf.mxu3 }
 0x2c6   : > { %v2849_v13 = vmax.f32 %v2817_v24, 0.0  ;;  %v2565_v12 = vadd.f32 %v2524_v22, %v2368_v4 }
 0x2c8   : > { %v3582_v50 = vpack.c.bf16 %v2849_v13, %v2848_v37  ;;  %v2329_v42 = vpop.f32.mrf.mxu2  ;;  %v2746_v9 = vadd.f32 %v2705_v30, %v2565_v12 }
 0x2c9   : > { %v2369_v8 = vadd.f32 %v2329_v42, %v2194_v61 }
 0x2ca   : > { %3610 = vst [vmem:[%s4741_s26 + $0x60] sm:$0xff] %v3582_v50   ;;  %v2157_v54 = vpop.f32.mrf.mxu1  ;;  %v2782_v63 = vmul.f32 %v4721_v15, %v2746_v9 }
 0x2cb   : > { %v2707_v20 = vpop.f32.mrf.mxu0  ;;  %v2195_v51 = vadd.f32 %v2157_v54, %v4698_v28 }
 0x2cc   : > { %v2818_v1 = vadd.f32 %v4729_v18, %v2782_v63 }
 0x2cd   : > { %v2526_v19 = vpop.f32.mrf.mxu3 }
 0x2ce   : > { %v2566_v16 = vadd.f32 %v2526_v19, %v2369_v8  ;;  %v2850_v35 = vmax.f32 %v2818_v1, 0.0 }
 0x2d0   : > { %v2747_v14 = vadd.f32 %v2707_v20, %v2566_v16  ;;  %v2332_v7 = vpop.f32.mrf.mxu2 }
 0x2d1   : > { %v2370_v2 = vadd.f32 %v2332_v7, %v2195_v51 }
 0x2d2   : > { %v2783_v52 = vmul.f32 %v4721_v15, %v2747_v14  ;;  %v2159_v27 = vpop.f32.mrf.mxu1 }
 0x2d3   : > { %v2710_v34 = vpop.f32.mrf.mxu0  ;;  %v2196_v29 = vadd.f32 %v2159_v27, %v4703_v59 }
 0x2d4   : > { %v2819_v48 = vadd.f32 %v4729_v18, %v2783_v52 }
 0x2d5   : > { %v2529_v60 = vpop.f32.mrf.mxu3 }
 0x2d6   : > { %v2851_v6 = vmax.f32 %v2819_v48, 0.0  ;;  %v2567_v45 = vadd.f32 %v2529_v60, %v2370_v2 }
 0x2d8   : > { %v3587_v33 = vpack.c.bf16 %v2851_v6, %v2850_v35  ;;  %v2334_v40 = vpop.f32.mrf.mxu2  ;;  %v2748_v28 = vadd.f32 %v2710_v34, %v2567_v45 }
 0x2d9   : > { %v2371_v0 = vadd.f32 %v2334_v40, %v2196_v29 }
 0x2da   : > { %3611 = vst [vmem:[%s4741_s26 + $0x68] sm:$0xff] %v3587_v33   ;;  %v2162_v46 = vpop.f32.mrf.mxu1  ;;  %v2784_v26 = vmul.f32 %v4721_v15, %v2748_v28 }
 0x2db   : > { %v2712_v44 = vpop.f32.mrf.mxu0  ;;  %v2197_v53 = vadd.f32 %v2162_v46, %v4708_v31 }
 0x2dc   : > { %v2820_v38 = vadd.f32 %v4729_v18, %v2784_v26 }
 0x2dd   : > { %v2531_v21 = vpop.f32.mrf.mxu3 }
 0x2de   : > { %v2568_v41 = vadd.f32 %v2531_v21, %v2371_v0  ;;  %v2852_v62 = vmax.f32 %v2820_v38, 0.0 }
 0x2e0   : > { %v2749_v43 = vadd.f32 %v2712_v44, %v2568_v41  ;;  %v2337_v23 = vpop.f32.mrf.mxu2 }
 0x2e1   : > { %v2372_v59 = vadd.f32 %v2337_v23, %v2197_v53 }
 0x2e2   : > { %v2785_v47 = vmul.f32 %v4721_v15, %v2749_v43  ;;  %v2164_v57 = vpop.f32.mrf.mxu1 }
 0x2e3   : > { %v2715_v58 = vpop.f32.mrf.mxu0  ;;  %v2198_v17 = vadd.f32 %v2164_v57, %v4713_v5 }
 0x2e4   : > { %v2821_v39 = vadd.f32 %v4729_v18, %v2785_v47 }
 0x2e5   : > { %v2534_v32 = vpop.f32.mrf.mxu3 }
 0x2e6   : > { %v2853_v56 = vmax.f32 %v2821_v39, 0.0  ;;  %v2569_v49 = vadd.f32 %v2534_v32, %v2372_v59 }
 0x2e8   : > { %v3592_v25 = vpack.c.bf16 %v2853_v56, %v2852_v62  ;;  %v2339_v11 = vpop.f32.mrf.mxu2  ;;  %v2750_v31 = vadd.f32 %v2715_v58, %v2569_v49 }
 0x2e9   : > { %v2373_v10 = vadd.f32 %v2339_v11, %v2198_v17 }
 0x2ea   : > { %3612 = vst [vmem:[%s4741_s26 + $0x70] sm:$0xff] %v3592_v25   ;;  %v2786_v55 = vmul.f32 %v4721_v15, %v2750_v31 }
 0x2eb   : > { %v2717_v36 = vpop.f32.mrf.mxu0 }
 0x2ec   : > { %v2822_v24 = vadd.f32 %v4729_v18, %v2786_v55 }
 0x2ed   : > { %v2536_v3 = vpop.f32.mrf.mxu3 }
 0x2ee   : > { %v2570_v4 = vadd.f32 %v2536_v3, %v2373_v10  ;;  %v2854_v13 = vmax.f32 %v2822_v24, 0.0 }
 0x2f0   : > { %v2751_v30 = vadd.f32 %v2717_v36, %v2570_v4 }
 0x2f2   : > { %v2787_v22 = vmul.f32 %v4721_v15, %v2751_v30 }
 0x2f4   : > { %v2823_v37 = vadd.f32 %v4729_v18, %v2787_v22 }
 0x2f6   : > { %v2855_v12 = vmax.f32 %v2823_v37, 0.0 }
 0x2f8   : > { %v3597_v5 = vpack.c.bf16 %v2855_v12, %v2854_v13 }
 0x2fa   : > { %3613 = vst [vmem:[%s4741_s26 + $0x78] sm:$0xff] %v3597_v5  }
 0x2fb PF: > { %s14_s17 = sadd.s32 1, %s3705_s17   ;;  %s5028_s15 = smov %s3701_s16 }
 0x2fc   : > { %p11_p5 = scmp.ge.s32.totalorder %s14_s17, 4   ;;  %s5029_s16 = smov %s5031_s18 }
 0x2fe   :  { %13 = sbr.rel (!%p11_p5) target bundleno = 2 (0x2), region = 75 }

// kernel: _lambda_.34
= control target key start
LH: loop header
LB: loop body
LE: loop exit
PB: predicated region body
PF: predicated region fallthrough
CT: control target
= control target key end

     0   :  { %s2130_s15 = smov 0   ;;  %s2132_s16 = smov 0   ;;  %s2724_s0 = inlined_call_operand.vmem [shape: bf16[2,10,10,128], index: 0, kind: input, shape index: {}]   ;;  %s2725_s1 = inlined_call_operand.vmem [shape: bf16[3,3,128,128], index: 1, kind: input, shape index: {}]   ;;  %s2726_s2 = inlined_call_operand.vmem [shape: f32[1,128], index: 2, kind: input, shape index: {}]   ;;  %s2727_s3 = inlined_call_operand.vmem [shape: f32[1,128], index: 3, kind: input, shape index: {}]   ;;  %s2728_s4 = inlined_call_operand.vmem [shape: bf16[2,8,8,128], index: 4, kind: output, shape index: {}]  }
   0x1   :  { %s2134_s17 = smov 0  }
   0x2 LB: > { %s26_s18 = sadd.s32 1, %s2099_s16  ;;  %p1638_p0 = scmp.ge.s32.totalorder %s2103_s17, 1  ;;  %s2103_s17 = sphi %s2134_s17, %s14_s17   ;;  %s2099_s16 = sphi %s2132_s16, %s2734_s16   ;;  %s2095_s15 = sphi %s2130_s15, %s2733_s15  }
   0x3   : > { %p28_p1 = scmp.ge.s32.totalorder %s26_s18, 2  ;;  %p201_p2 = scmp.lt.s32.totalorder %s2103_s17, 3 }
   0x5   : > { %s2736_s18 = smov (%p28_p1, %s26_s18), 0  ;;  %p202_p3 = pnand %p1638_p0, %p201_p2 }
   0x6   : > { %p240_p4 = scmp.lt.s32.totalorder (!%p202_p3), %s2095_s15, 1 }
   0x7   : > { %205 = sbr.rel (%p202_p3) target bundleno = 339 (0x153), region = 36 }
   0xc   : > { %v1958_v0 = vld [vmem:[%s2725_s1 + $0x78] sm:$0xff]  ;;  %v1957_v2 = vld [vmem:[%s2725_s1 + $0x70] sm:$0xff]  ;;  %s2738_s15 = smov (!%p240_p4, %s2095_s15), 1  ;;  %v1956_v5 = vld [vmem:[%s2725_s1 + $0x68] sm:$0xff]  ;;  %vm427_vm0 = vsmask.f32 3328 }
   0xd   : > { %v1966_v1 = vld [vmem:[%s2725_s1 + $0xb8] sm:$0xff]  ;;  %2038 = vmatpush.bf16.msra.mxu1 %v1958_v0  ;;  %606 = vmatpush.bf16.msra.mxu0 %v1958_v0  ;;  %v1965_v3 = vld [vmem:[%s2725_s1 + $0xb0] sm:$0xff]  ;;  %s2054_s29 = smul.u32 80, %s2738_s15  ;;  %v1964_v7 = vld [vmem:[%s2725_s1 + $0xa8] sm:$0xff]  ;;  %vm428_vm1 = vsmask.f32 7440 }
   0xe   : > { %843 = vmatpush.bf16.msra.mxu2 %v1966_v1  ;;  %v1974_v4 = vld [vmem:[%s2725_s1 + $0xf8] sm:$0xff]  ;;  %v1973_v6 = vld [vmem:[%s2725_s1 + $0xf0] sm:$0xff]  ;;  %vm744_vm2 = vcmask 1042432   ;;  %v1955_v11 = vld [vmem:[%s2725_s1 + $0x60] sm:$0xff]  ;;  %vm745_vm3 = vcmask 1046532   ;;  %s1942_s22 = sshll.u32 %s2738_s15, 5 }
   0xf   : > { %938 = vmatpush.bf16.msra.mxu3 %v1974_v4  ;;  %s2178_s12 = scalar_lea.vmem %s2724_s0, %s2054_s29  ;;  %v1963_v17 = vld [vmem:[%s2725_s1 + $0xa0] sm:$0xff]  ;;  %v1972_v18 = vld [vmem:[%s2725_s1 + $0xe8] sm:$0xff]  ;;  %v1954_v39 = vld [vmem:[%s2725_s1 + $0x58] sm:$0xff]  ;;  %s2688_s25 = scalar_lea.vmem %s2728_s4, %s1942_s22 }
  0x10   : > { %v2181_v8 = vld [vmem:[%s2178_s12 + $0x20] sm:$0xf]  ;;  %v2184_v9 = vld [vmem:[%s2178_s12 + $0x24] sm:$0x1]  ;;  %v2187_v10 = vld [vmem:[%s2178_s12 + $0x28] sm:$0xf] }
  0x11   : > { %2039 = vmatpush.bf16.msra.mxu1 %v1957_v2  ;;  %607 = vmatpush.bf16.msra.mxu0 %v1957_v2  ;;  %v2193_v12 = vld [vmem:[%s2178_s12 + $0x2c] sm:$0x1]  ;;  %v487_v13 = vshrl.u32 %v2181_v8, 16  ;;  %v490_v14 = vshll.u32 %v2181_v8, 16  ;;  %v496_v15 = vshll.u32 %v2184_v9, 16  ;;  %v501_v16 = vshrl.u32 %v2187_v10, 16  ;;  %vm2230_vm4 = vmor %vm427_vm0, %vm428_vm1 }
  0x12   : > { %844 = vmatpush.bf16.msra.mxu2 %v1965_v3  ;;  %v504_v19 = vshll.u32 %v2187_v10, 16  ;;  %v2207_v20 = vld [vmem:[%s2178_s12] sm:$0xf]  ;;  %v510_v24 = vshll.u32 %v2193_v12, 16  ;;  %v264_v25 = vld [vmem:[%s2178_s12 + $0x4] sm:$0x1]  ;;  %vm2236_vm5 = vmor %vm744_vm2, %vm745_vm3 }
  0x13   : > { %939 = vmatpush.bf16.msra.mxu3 %v1973_v6  ;;  %v489_v21 = vrot.slane %v487_v13, 4  ;;  %v492_v22 = vrot.slane %v490_v14, 5  ;;  %v503_v23 = vrot.slane %v501_v16, 4  ;;  %v498_v26 = vrot.slane %v496_v15, 5  ;;  %v2212_v28 = vld [vmem:[%s2178_s12 + $0x8] sm:$0xf] }
  0x14   : > { %v506_v27 = vrot.slane %v504_v19, 5  ;;  %v266_v29 = vld [vmem:[%s2178_s12 + $0xc] sm:$0x1]  ;;  %v431_v31 = vshrl.u32 %v2207_v20, 16  ;;  %v434_v32 = vshll.u32 %v2207_v20, 16  ;;  %v440_v33 = vshll.u32 %v264_v25, 16 }
  0x15   : > { %2040 = vmatpush.bf16.msra.mxu1 %v1956_v5  ;;  %608 = vmatpush.bf16.msra.mxu0 %v1956_v5  ;;  %v493_v30 = vor.u32 %v492_v22, %v489_v21  ;;  %v1971_v35 = vld [vmem:[%s2725_s1 + $0xe0] sm:$0xff]  ;;  %v445_v36 = vshrl.u32 %v2212_v28, 16  ;;  %v448_v37 = vshll.u32 %v2212_v28, 16  ;;  %v454_v38 = vshll.u32 %v266_v29, 16  ;;  %v1962_v44 = vld [vmem:[%s2725_s1 + $0x98] sm:$0xff]  ;;  %v1953_v59 = vld [vmem:[%s2725_s1 + $0x50] sm:$0xff] }
  0x16   : > { %845 = vmatpush.bf16.msra.mxu2 %v1964_v7  ;;  %v507_v34 = vor.u32 %v506_v27, %v503_v23  ;;  %v512_v41 = vrot.slane %v510_v24, 5  ;;  %v433_v42 = vrot.slane %v431_v31, 4  ;;  %v436_v43 = vrot.slane %v434_v32, 5  ;;  %v1970_v56 = vld [vmem:[%s2725_s1 + $0xd8] sm:$0xff]  ;;  %v2246_v58 = vld [vmem:[%s2178_s12 + $0x30] sm:$0xf] }
  0x17   : > { %940 = vmatpush.bf16.msra.mxu3 %v1972_v18  ;;  %v494_v40 = vrot.slane %v493_v30, 4  ;;  %v447_v47 = vrot.slane %v445_v36, 4  ;;  %v450_v48 = vrot.slane %v448_v37, 5  ;;  %v442_v50 = vrot.slane %v440_v33, 5  ;;  %v1961_v0 = vld [vmem:[%s2725_s1 + $0x90] sm:$0xff]  ;;  %v1960_v18 = vld [vmem:[%s2725_s1 + $0x88] sm:$0xff] }
  0x18   : > { %v508_v46 = vrot.slane %v507_v34, 4  ;;  %v437_v49 = vor.u32 %v436_v43, %v433_v42  ;;  %v1706_v52 = vrot.slane %v2207_v20, 9  ;;  %v749_v53 = vrot.slane %v264_v25, 5  ;;  %v2261_v3 = vld [vmem:[%s2178_s12 + $0x38] sm:$0xf]  ;;  %v1969_v16 = vld [vmem:[%s2725_s1 + $0xd0] sm:$0xff] }
  0x19   : > { %2041 = vmatpush.bf16.msra.mxu1 %v1955_v11  ;;  %609 = vmatpush.bf16.msra.mxu0 %v1955_v11  ;;  %v451_v54 = vor.u32 %v450_v48, %v447_v47  ;;  %v456_v55 = vrot.slane %v454_v38, 5  ;;  %v1707_v57 = vrot.slane %v2212_v28, 9  ;;  %v499_v60 = vsel %vm2230_vm4, %v494_v40, %v498_v26  ;;  %v2272_v11 = vld [vmem:[%s2178_s12 + $0x10] sm:$0xf]  ;;  %v2296_v25 = vld [vmem:[%s2178_s12 + $0x34] sm:$0x1] }
  0x1a   : > { %846 = vmatpush.bf16.msra.mxu2 %v1963_v17  ;;  %v513_v61 = vsel %vm2230_vm4, %v508_v46, %v512_v41  ;;  %v438_v62 = vrot.slane %v437_v49, 4  ;;  %v753_v63 = vrot.slane %v266_v29, 5  ;;  %v750_v2 = vsel %vm2236_vm5, %v1706_v52, %v749_v53  ;;  %v1952_v17 = vld [vmem:[%s2725_s1 + $0x48] sm:$0xff]  ;;  %v2300_v27 = vld [vmem:[%s2178_s12 + $0x18] sm:$0xf]  ;;  %v1951_v34 = vld [vmem:[%s2725_s1 + $0x40] sm:$0xff] }
  0x1b   : > { %941 = vmatpush.bf16.msra.mxu3 %v1971_v35  ;;  %v452_v1 = vrot.slane %v451_v54, 4  ;;  %v515_v6 = vshrl.u32 %v2246_v58, 16  ;;  %v518_v7 = vshll.u32 %v2246_v58, 16  ;;  %v2274_v13 = vunpack.c.l.b16 %v499_v60  ;;  %v2304_v30 = vld [vmem:[%s2178_s12 + $0x3c] sm:$0x1]  ;;  %v1968_v36 = vld [vmem:[%s2725_s1 + $0xc8] sm:$0xff] }
  0x1c   : > { %v443_v4 = vsel %vm2230_vm4, %v438_v62, %v442_v50  ;;  %v2267_v5 = vsel %vm2236_vm5, %v1707_v57, %v753_v63  ;;  %v2276_v14 = vunpack.c.l.b16 %v513_v61  ;;  %v779_v21 = vunpack.c.l.b16 %v750_v2  ;;  %v2319_v40 = vld [vmem:[%s2178_s12 + $0x1c] sm:$0x1]  ;;  %v1959_v47 = vld [vmem:[%s2725_s1 + $0x80] sm:$0xff] }
  0x1d   : > { %2042 = vmatpush.bf16.msra.mxu1 %v1954_v39  ;;  %610 = vmatpush.bf16.msra.mxu0 %v1954_v39  ;;  %v457_v15 = vsel %vm2230_vm4, %v452_v1, %v456_v55  ;;  %v2289_v19 = vunpack.c.l.b16 %v443_v4  ;;  %v529_v22 = vshrl.u32 %v2261_v3, 16  ;;  %v780_v24 = vunpack.c.l.b16 %v2267_v5  ;;  %v268_v39 = vld [vmem:[%s2178_s12 + $0x14] sm:$0x1]  ;;  %v1950_v46 = vld [vmem:[%s2725_s1 + $0x38] sm:$0xff] }
  0x1e   : > { %847 = vmatpush.bf16.msra.mxu2 %v1962_v44  ;;  %v2292_v23 = vunpack.c.l.b16 %v457_v15  ;;  %v532_v26 = vshll.u32 %v2261_v3, 16  ;;  %v459_v29 = vshrl.u32 %v2272_v11, 16  ;;  %v517_v31 = vrot.slane %v515_v6, 4  ;;  %v1982_v53 = vld [vmem:[%s2725_s1 + $0x138] sm:$0xff] }
  0x1f   : > { %942 = vmatpush.bf16.msra.mxu3 %v1970_v56  ;;  %v520_v32 = vrot.slane %v518_v7, 5  ;;  %v462_v33 = vshll.u32 %v2272_v11, 16  ;;  %v2312_v35 = vpack.c.b16 %v2276_v14, %v2274_v13  ;;  %v531_v37 = vrot.slane %v529_v22, 4  ;;  %v1998_v55 = vld [vmem:[%s2725_s1 + $0x1b8] sm:$0xff]  ;;  %v1949_v7 = vld [vmem:[%s2725_s1 + $0x30] sm:$0xff] }
  0x20   : > { %v534_v38 = vrot.slane %v532_v26, 5  ;;  %v461_v41 = vrot.slane %v459_v29, 4  ;;  %v473_v43 = vshrl.u32 %v2300_v27, 16  ;;  %v476_v44 = vshll.u32 %v2300_v27, 16  ;;  %v2006_v15 = vld [vmem:[%s2725_s1 + $0x1f8] sm:$0xff] }
  0x21   : > { %2043 = vmatpush.bf16.msra.mxu1 %v1953_v59  ;;  %611 = vmatpush.bf16.msra.mxu0 %v1953_v59  ;;  %v464_v42 = vrot.slane %v462_v33, 5  ;;  %v550_v48 = vpack.c.b16 %v2292_v23, %v2289_v19  ;;  %v787_v49 = vpack.c.b16 %v780_v24, %v779_v21  ;;  %v524_v50 = vshll.u32 %v2296_v25, 16  ;;  %v1997_v21 = vld [vmem:[%s2725_s1 + $0x1b0] sm:$0xff] }
  0x22   : > { %848 = vmatpush.bf16.msra.mxu2 %v1961_v0  ;;  %v538_v52 = vshll.u32 %v2304_v30, 16  ;;  %v521_v54 = vor.u32 %v520_v32, %v517_v31  ;;  %v468_v56 = vshll.u32 %v268_v39, 16  ;;  %v475_v57 = vrot.slane %v473_v43, 4  ;;  %v1967_v0 = vld [vmem:[%s2725_s1 + $0xc0] sm:$0xff]  ;;  %v1980_v43 = vld [vmem:[%s2725_s1 + $0x128] sm:$0xff] }
  0x23   : > { %943 = vmatpush.bf16.msra.mxu3 %v1969_v16  ;;  %v478_v59 = vrot.slane %v476_v44, 5  ;;  %v535_v60 = vor.u32 %v534_v38, %v531_v37  ;;  %v482_v61 = vshll.u32 %v2319_v40, 16  ;;  %v644_v62 = vunpack.c.l.b16 %v2212_v28  ;;  %v1981_v16 = vld [vmem:[%s2725_s1 + $0x130] sm:$0xff]  ;;  %v1948_v37 = vld [vmem:[%s2725_s1 + $0x28] sm:$0xff] }
  0x24   : > { %v645_v63 = vunpack.c.l.b16 %v2272_v11  ;;  %v465_v1 = vor.u32 %v464_v42, %v461_v41  ;;  %v1708_v4 = vrot.slane %v2272_v11, 9  ;;  %v757_v6 = vrot.slane %v268_v39, 5  ;;  %v2005_v42 = vld [vmem:[%s2725_s1 + $0x1f0] sm:$0xff]  ;;  %v1996_v44 = vld [vmem:[%s2725_s1 + $0x1a8] sm:$0xff] }
  0x25   : > { %2044 = vmatpush.bf16.msra.mxu1 %v1952_v17  ;;  %612 = vmatpush.bf16.msra.mxu0 %v1952_v17  ;;  %v479_v2 = vor.u32 %v478_v59, %v475_v57  ;;  %v526_v17 = vrot.slane %v524_v50, 5  ;;  %v522_v22 = vrot.slane %v521_v54, 4  ;;  %v470_v26 = vrot.slane %v468_v56, 5  ;;  %v1979_v50 = vld [vmem:[%s2725_s1 + $0x120] sm:$0xff]  ;;  %v1946_v59 = vld [vmem:[%s2725_s1 + $0x18] sm:$0xff]  ;;  %v1988_v28 = vld [vmem:[%s2725_s1 + $0x168] sm:$0xff] }
  0x26   : > { %849 = vmatpush.bf16.msra.mxu2 %v1960_v18  ;;  %v540_v18 = vrot.slane %v538_v52, 5  ;;  %v758_v19 = vsel %vm2236_vm5, %v1708_v4, %v757_v6  ;;  %v882_v29 = vpack.c.b16 %v645_v63, %v644_v62  ;;  %v536_v32 = vrot.slane %v535_v60, 4  ;;  %v1995_v52 = vld [vmem:[%s2725_s1 + $0x1a0] sm:$0xff]  ;;  %v1978_v60 = vld [vmem:[%s2725_s1 + $0x118] sm:$0xff]  ;;  %v1945_v6 = vld [vmem:[%s2725_s1 + $0x10] sm:$0xff] }
  0x27   : > { %944 = vmatpush.bf16.msra.mxu3 %v1968_v36  ;;  %v781_v31 = vunpack.c.l.b16 %v758_v19  ;;  %v466_v33 = vrot.slane %v465_v1, 4  ;;  %v484_v36 = vrot.slane %v482_v61, 5  ;;  %v1709_v38 = vrot.slane %v2300_v27, 9 }
  0x28   : > { %v761_v39 = vrot.slane %v2319_v40, 5  ;;  %v527_v5 = vsel %vm2230_vm4, %v522_v22, %v526_v17  ;;  %v646_v1 = vunpack.c.l.b16 %v2300_v27  ;;  %v2003_v17 = vld [vmem:[%s2725_s1 + $0x1e0] sm:$0xff]  ;;  %v1710_v19 = vrot.slane %v2181_v8, 9  ;;  %v2010_v27 = vld [vmem:[%s2725_s1 + $0x218] sm:$0xff] }
  0x29   : > { %2045 = vmatpush.bf16.msra.mxu1 %v1951_v34  ;;  %613 = vmatpush.bf16.msra.mxu0 %v1951_v34  ;;  %v480_v34 = vrot.slane %v479_v2, 4  ;;  %v2374_v41 = vpack.c.b16 %v781_v31, %v780_v24  ;;  %v541_v24 = vsel %vm2230_vm4, %v536_v32, %v540_v18  ;;  %v471_v40 = vsel %vm2230_vm4, %v466_v33, %v470_v26  ;;  %v1944_v18 = vld [vmem:[%s2725_s1 + $0x8] sm:$0xff]  ;;  %v2002_v32 = vld [vmem:[%s2725_s1 + $0x1d8] sm:$0xff] }
  0x2a   : > { %850 = vmatpush.bf16.msra.mxu2 %v1959_v47  ;;  %v1947_v47 = vld [vmem:[%s2725_s1 + $0x20] sm:$0xff]  ;;  %v2411_v54 = vunpack.c.l.b16 %v541_v24  ;;  %v647_v2 = vunpack.c.l.b16 %v2181_v8  ;;  %v1711_v22 = vrot.slane %v2187_v10, 9  ;;  %v769_v26 = vrot.slane %v2193_v12, 5 }
  0x2b   : > { %945 = vmatpush.bf16.msra.mxu3 %v1967_v0  ;;  %v649_v24 = vunpack.c.l.b16 %v2246_v58 }
  0x2c   : > { %624 = vmatmul.bf16.vlgmr.msra.gmra.mxu1 %v2312_v35  ;;  %614 = vmatmul.bf16.vlgmr.msra.gmra.mxu0 %v550_v48  ;;  %v2398_v48 = vsel %vm2236_vm5, %v1709_v38, %v761_v39  ;;  %v2482_v33 = vsel %vm2236_vm5, %v1711_v22, %v769_v26  ;;  %v2014_v38 = vld [vmem:[%s2725_s1 + $0x238] sm:$0xff]  ;;  %v652_v22 = vpack.c.b16 %v646_v1, %v645_v63  ;;  %v2009_v63 = vld [vmem:[%s2725_s1 + $0x210] sm:$0xff] }
  0x2d   : > { %707 = vmatpush.bf16.msrb.mxu1 %v1950_v46  ;;  %1046 = vmatpush.bf16.msrb.mxu0 %v1982_v53  ;;  %v485_v46 = vsel %vm2230_vm4, %v480_v34, %v484_v36  ;;  %v2409_v53 = vunpack.c.l.b16 %v527_v5  ;;  %v782_v57 = vunpack.c.l.b16 %v2398_v48  ;;  %v1990_v34 = vld [vmem:[%s2725_s1 + $0x178] sm:$0xff]  ;;  %v1975_v36 = vld [vmem:[%s2725_s1 + $0x100] sm:$0xff]  ;;  %v648_v5 = vunpack.c.l.b16 %v2187_v10  ;;  %v281_v48 = vld [vmem:[%s2178_s12 + $0x48] sm:$0xf] }
  0x2e   : > { %1234 = vmatpush.bf16.msrb.mxu2 %v1998_v55  ;;  %946 = vmatmul.bf16.vlgmr.msra.gmra.mxu3 %v882_v29  ;;  %v2413_v55 = vunpack.c.l.b16 %v471_v40  ;;  %v2415_v56 = vunpack.c.l.b16 %v485_v46  ;;  %v1993_v29 = vld [vmem:[%s2725_s1 + $0x190] sm:$0xff] }
  0x2f   : > { %851 = vmatmul.bf16.vlgmr.msra.gmra.mxu2 %v787_v49  ;;  %1336 = vmatpush.bf16.msrb.mxu3 %v2006_v15  ;;  %v2004_v49 = vld [vmem:[%s2725_s1 + $0x1e8] sm:$0xff]  ;;  %v2426_v61 = vpack.c.b16 %v2411_v54, %v2409_v53  ;;  %v2436_v4 = vpack.c.b16 %v782_v57, %v781_v31  ;;  %v883_v15 = vpack.c.b16 %v647_v2, %v646_v1  ;;  %v2013_v46 = vld [vmem:[%s2725_s1 + $0x230] sm:$0xff] }
  0x30   : > { %v2430_v0 = vpack.c.b16 %v2415_v56, %v2413_v55  ;;  %v1976_v31 = vld [vmem:[%s2725_s1 + $0x108] sm:$0xff]  ;;  %v991_v26 = vpack.c.b16 %v2274_v13, %v2415_v56  ;;  %v1983_v56 = vld [vmem:[%s2725_s1 + $0x140] sm:$0xff] }
  0x31   : > { %708 = vmatpush.bf16.msrb.mxu1 %v1949_v7  ;;  %1047 = vmatpush.bf16.msrb.mxu0 %v1981_v16  ;;  %v1977_v7 = vld [vmem:[%s2725_s1 + $0x110] sm:$0xff]  ;;  %v1994_v16 = vld [vmem:[%s2725_s1 + $0x198] sm:$0xff]  ;;  %v1984_v13 = vld [vmem:[%s2725_s1 + $0x148] sm:$0xff] }
  0x32   : > { %1235 = vmatpush.bf16.msrb.mxu2 %v1997_v21  ;;  %v765_v21 = vrot.slane %v2184_v9, 5  ;;  %v1943_v9 = vld [vmem:[%s2725_s1] sm:$0xff] }
  0x33   : > { %1337 = vmatpush.bf16.msrb.mxu3 %v2005_v42  ;;  %v784_v42 = vunpack.c.l.b16 %v2482_v33 }
  0x34   : > { %v2478_v12 = vsel %vm2236_vm5, %v1710_v19, %v765_v21  ;;  %v2561_v19 = vld [vmem:[%s2178_s12 + $0x40] sm:$0xf]  ;;  %v1985_v21 = vld [vmem:[%s2725_s1 + $0x150] sm:$0xff] }
  0x35   : > { %709 = vmatpush.bf16.msrb.mxu1 %v1948_v37  ;;  %1048 = vmatpush.bf16.msrb.mxu0 %v1980_v43  ;;  %v643_v37 = vunpack.c.l.b16 %v2207_v20  ;;  %v783_v39 = vunpack.c.l.b16 %v2478_v12  ;;  %v1989_v43 = vld [vmem:[%s2725_s1 + $0x170] sm:$0xff]  ;;  %v990_v20 = vpack.c.b16 %v2413_v55, %v2292_v23  ;;  %v1992_v23 = vld [vmem:[%s2725_s1 + $0x188] sm:$0xff]  ;;  %v1713_v55 = vrot.slane %v2261_v3, 9 }
  0x36   : > { %1236 = vmatpush.bf16.msrb.mxu2 %v1996_v44  ;;  %v976_v1 = vshrl.u32 %v2561_v19, 16  ;;  %v1275_v12 = vshll.u32 %v281_v48, 16 }
  0x37   : > { %1338 = vmatpush.bf16.msrb.mxu3 %v2004_v49  ;;  %v651_v44 = vpack.c.b16 %v644_v62, %v643_v37  ;;  %v2509_v40 = vpack.c.b16 %v784_v42, %v783_v39  ;;  %v884_v62 = vpack.c.b16 %v649_v24, %v648_v5  ;;  %v2012_v49 = vld [vmem:[%s2725_s1 + $0x228] sm:$0xff]  ;;  %v1090_v8 = vpack.c.b16 %v783_v39, %v782_v57 }
  0x38   : > { %v1272_v57 = vshrl.u32 %v281_v48, 16 }
  0x39   : > { %710 = vmatpush.bf16.msrb.mxu1 %v1947_v47  ;;  %1049 = vmatpush.bf16.msrb.mxu0 %v1979_v50  ;;  %v2001_v47 = vld [vmem:[%s2725_s1 + $0x1d0] sm:$0xff]  ;;  %v1712_v50 = vrot.slane %v2246_v58, 9 }
  0x3a   : > { %1237 = vmatpush.bf16.msrb.mxu2 %v1995_v52  ;;  %v773_v52 = vrot.slane %v2296_v25, 5  ;;  %v2000_v25 = vld [vmem:[%s2725_s1 + $0x1c8] sm:$0xff]  ;;  %v1274_v39 = vrot.slane %v1272_v57, 4 }
  0x3b   : > { %1339 = vmatpush.bf16.msrb.mxu3 %v2003_v17 }
  0x3c   : > { %629 = vmatmul.bf16.gmra.mxu1 %v2426_v61  ;;  %619 = vmatmul.bf16.gmra.mxu0 %v2430_v0 }
  0x3d   : > { %711 = vmatpush.bf16.msrb.mxu1 %v1946_v59  ;;  %1050 = vmatpush.bf16.msrb.mxu0 %v1978_v60  ;;  %v777_v59 = vrot.slane %v2304_v30, 5  ;;  %v1991_v60 = vld [vmem:[%s2725_s1 + $0x180] sm:$0xff] }
  0x3e   : > { %1238 = vmatpush.bf16.msrb.mxu2 %v1994_v16  ;;  %951 = vmatmul.bf16.gmra.mxu3 %v883_v15  ;;  %v2011_v30 = vld [vmem:[%s2725_s1 + $0x220] sm:$0xff]  ;;  %v1986_v16 = vld [vmem:[%s2725_s1 + $0x158] sm:$0xff] }
  0x3f   : > { %856 = vmatmul.bf16.gmra.mxu2 %v2436_v4  ;;  %1340 = vmatpush.bf16.msrb.mxu3 %v2002_v32  ;;  %v2553_v15 = vsel %vm2236_vm5, %v1713_v55, %v777_v59  ;;  %v1907_v59 = vrot.slane %v281_v48, 9 }
  0x41   : > { %712 = vmatpush.bf16.msrb.mxu1 %v1945_v6  ;;  %1051 = vmatpush.bf16.msrb.mxu0 %v1977_v7  ;;  %v1987_v6 = vld [vmem:[%s2725_s1 + $0x160] sm:$0xff]  ;;  %v2549_v7 = vsel %vm2236_vm5, %v1712_v50, %v773_v52 }
  0x42   : > { %1239 = vmatpush.bf16.msrb.mxu2 %v1993_v29  ;;  %v785_v17 = vunpack.c.l.b16 %v2549_v7  ;;  %v650_v29 = vunpack.c.l.b16 %v2261_v3  ;;  %v1999_v3 = vld [vmem:[%s2725_s1 + $0x1c0] sm:$0xff] }
  0x43   : > { %1341 = vmatpush.bf16.msrb.mxu3 %v2001_v47 }
  0x45   : > { %713 = vmatpush.bf16.msrb.mxu1 %v1944_v18  ;;  %1052 = vmatpush.bf16.msrb.mxu0 %v1976_v31  ;;  %v786_v18 = vunpack.c.l.b16 %v2553_v15  ;;  %v881_v31 = vunpack.c.l.b16 %v2561_v19 }
  0x46   : > { %1240 = vmatpush.bf16.msrb.mxu2 %v1992_v23 }
  0x47   : > { %1342 = vmatpush.bf16.msrb.mxu3 %v2000_v25  ;;  %v2578_v32 = vpack.c.b16 %v786_v18, %v785_v17  ;;  %v885_v11 = vpack.c.b16 %v881_v31, %v650_v29 }
  0x49   : > { %714 = vmatpush.bf16.msrb.mxu1 %v1943_v9  ;;  %1053 = vmatpush.bf16.msrb.mxu0 %v1975_v36  ;;  %v979_v9 = vshll.u32 %v2561_v19, 16  ;;  %v978_v36 = vrot.slane %v976_v1, 4 }
  0x4a   : > { %1241 = vmatpush.bf16.msrb.mxu2 %v1991_v60 }
  0x4b   : > { %1343 = vmatpush.bf16.msrb.mxu3 %v1999_v3  ;;  %v981_v37 = vrot.slane %v979_v9, 5 }
  0x4c   : > { %715 = vmatmul.bf16.vlgmr.msrb.gmra.mxu1 %v651_v44  ;;  %1054 = vmatmul.bf16.vlgmr.msrb.gmra.mxu0 %v990_v20  ;;  %v992_v44 = vpack.c.b16 %v2409_v53, %v2276_v14  ;;  %v654_v53 = vpack.c.b16 %v650_v29, %v649_v24 }
  0x4d   : > { %1145 = vmatpush.bf16.msra.mxu1 %v1990_v34  ;;  %1429 = vmatpush.bf16.msra.mxu0 %v2014_v38  ;;  %v2008_v34 = vld [vmem:[%s2725_s1 + $0x208] sm:$0xff]  ;;  %v982_v20 = vor.u32 %v981_v37, %v978_v36 }
  0x4e   : > { %956 = vmatmul.bf16.gmra.mxu3 %v884_v62  ;;  %2046 = vmatpush.bf16.msra.mxu2 %v2014_v38  ;;  %v280_v38 = vld [vmem:[%s2178_s12 + $0x44] sm:$0x1] }
  0x4f   : > { %861 = vmatmul.bf16.gmra.mxu2 %v2509_v40  ;;  %v983_v23 = vrot.slane %v982_v20, 4  ;;  %v1086_v55 = vrot.slane %v280_v38, 5 }
  0x51   : > { %1146 = vmatpush.bf16.msra.mxu1 %v1989_v43  ;;  %1430 = vmatpush.bf16.msra.mxu0 %v2013_v46  ;;  %v653_v43 = vpack.c.b16 %v648_v5, %v647_v2  ;;  %v282_v5 = vld [vmem:[%s2178_s12 + $0x4c] sm:$0x1] }
  0x52   : > { %2047 = vmatpush.bf16.msra.mxu2 %v2013_v46  ;;  %v985_v46 = vshll.u32 %v280_v38, 16  ;;  %v1281_v24 = vshll.u32 %v282_v5, 16 }
  0x54   : > { %v987_v62 = vrot.slane %v985_v46, 5  ;;  %v1283_v47 = vrot.slane %v1281_v24, 5 }
  0x55   : > { %1147 = vmatpush.bf16.msra.mxu1 %v1988_v28  ;;  %1431 = vmatpush.bf16.msra.mxu0 %v2012_v49  ;;  %v2007_v28 = vld [vmem:[%s2725_s1 + $0x200] sm:$0xff] }
  0x56   : > { %2048 = vmatpush.bf16.msra.mxu2 %v2012_v49  ;;  %v988_v10 = vsel %vm2230_vm4, %v983_v23, %v987_v62  ;;  %v1183_v49 = vunpack.c.l.b16 %v281_v48 }
  0x57   : > { %v989_v14 = vunpack.c.l.b16 %v988_v10 }
  0x58   : > { %v1184_v52 = vpack.c.b16 %v1183_v49, %v881_v31 }
  0x59   : > { %1148 = vmatpush.bf16.msra.mxu1 %v1987_v6  ;;  %1432 = vmatpush.bf16.msra.mxu0 %v2011_v30  ;;  %v993_v2 = vpack.c.b16 %v989_v14, %v2411_v54 }
  0x5a   : > { %2049 = vmatpush.bf16.msra.mxu2 %v2011_v30 }
  0x5c   : > { %720 = vmatmul.bf16.gmra.mxu1 %v652_v22  ;;  %1059 = vmatmul.bf16.gmra.mxu0 %v991_v26 }
  0x5d   : > { %1149 = vmatpush.bf16.msra.mxu1 %v1986_v16  ;;  %1433 = vmatpush.bf16.msra.mxu0 %v2010_v27 }
  0x5e   : > { %961 = vmatmul.bf16.gmra.mxu3 %v885_v11  ;;  %2050 = vmatpush.bf16.msra.mxu2 %v2010_v27 }
  0x5f   : > { %866 = vmatmul.bf16.gmra.mxu2 %v2578_v32 }
  0x61   : > { %1150 = vmatpush.bf16.msra.mxu1 %v1985_v21  ;;  %1434 = vmatpush.bf16.msra.mxu0 %v2009_v63 }
  0x62   : > { %2051 = vmatpush.bf16.msra.mxu2 %v2009_v63 }
  0x65   : > { %1151 = vmatpush.bf16.msra.mxu1 %v1984_v13  ;;  %1435 = vmatpush.bf16.msra.mxu0 %v2008_v34 }
  0x66   : > { %2052 = vmatpush.bf16.msra.mxu2 %v2008_v34 }
  0x69   : > { %1152 = vmatpush.bf16.msra.mxu1 %v1983_v56  ;;  %1436 = vmatpush.bf16.msra.mxu0 %v2007_v28 }
  0x6a   : > { %2053 = vmatpush.bf16.msra.mxu2 %v2007_v28 }
  0x6c   : > { %725 = vmatmul.bf16.gmra.mxu1 %v653_v43  ;;  %1064 = vmatmul.bf16.gmra.mxu0 %v992_v44 }
  0x6e   : > { %1344 = vmatmul.bf16.vlgmr.msrb.gmra.mxu3 %v2430_v0  ;;  %v1277_v0 = vrot.slane %v1275_v12, 5 }
  0x6f   : > { %1242 = vmatmul.bf16.vlgmr.msrb.gmra.mxu2 %v652_v22 }
  0x70   : > { %v1278_v58 = vor.u32 %v1277_v0, %v1274_v39 }
  0x72   : > { %v1279_v54 = vrot.slane %v1278_v58, 4 }
  0x7c   : > { %730 = vmatmul.bf16.gmra.mxu1 %v654_v53  ;;  %1069 = vmatmul.bf16.gmra.mxu0 %v993_v2 }
  0x7e   : > { %1349 = vmatmul.bf16.gmra.mxu3 %v2312_v35  ;;  %v1284_v35 = vsel %vm2230_vm4, %v1279_v54, %v1283_v47 }
  0x7f   : > { %1247 = vmatmul.bf16.gmra.mxu2 %v653_v43  ;;  %v1285_v50 = vunpack.c.l.b16 %v1284_v35 }
  0x8c   : > { %1153 = vmatmul.bf16.vlgmr.msra.gmra.mxu1 %v2374_v41  ;;  %1437 = vmatmul.bf16.vlgmr.msra.gmra.mxu0 %v2436_v4  ;;  %v1286_v41 = vpack.c.b16 %v1285_v50, %v989_v14  ;;  %v1810_v4 = vrot.slane %v2561_v19, 9 }
  0x8e   : > { %1354 = vmatmul.bf16.gmra.mxu3 %v2426_v61  ;;  %v1376_v61 = vrot.slane %v282_v5, 5  ;;  %v1087_v60 = vsel %vm2236_vm5, %v1810_v4, %v1086_v55 }
  0x8f   : > { %1252 = vmatmul.bf16.gmra.mxu2 %v654_v53  ;;  %v1088_v6 = vunpack.c.l.b16 %v1087_v60 }
  0x90   : > { %v1377_v45 = vsel %vm2236_vm5, %v1907_v59, %v1376_v61 }
  0x91   : > { %v1378_v25 = vunpack.c.l.b16 %v1377_v45  ;;  %v1092_v51 = vpack.c.b16 %v1088_v6, %v786_v18 }
  0x93   : > { %v1379_v19 = vpack.c.b16 %v1378_v25, %v1088_v6 }
  0x9c   : > { %1158 = vmatmul.bf16.gmra.mxu1 %v1090_v8  ;;  %1442 = vmatmul.bf16.gmra.mxu0 %v2509_v40  ;;  %v1091_v40 = vpack.c.b16 %v785_v17, %v784_v42 }
  0x9e   : > { %1359 = vmatmul.bf16.gmra.mxu3 %v1286_v41 }
  0x9f   : > { %1257 = vmatmul.bf16.gmra.mxu2 %v1184_v52 }
  0xa9   : > { %v625_v30 = vpop.f32.mrf.mxu1  ;;  %v615_v16 = vpop.f32.mrf.mxu0 }
  0xac   : > { %1163 = vmatmul.bf16.gmra.mxu1 %v1091_v40  ;;  %1447 = vmatmul.bf16.gmra.mxu0 %v2578_v32 }
  0xaf   : > { %1452 = vmatmul.bf16.vlgmr.msra.gmra.mxu2 %v1379_v19 }
  0xb1   : > { %v627_v22 = vpop.f32.mrf.mxu1  ;;  %v617_v26 = vpop.f32.mrf.mxu0 }
  0xb2   : > { %v852_v21 = vpop.f32.mrf.mxu2  ;;  %v947_v29 = vpop.f32.mrf.mxu3 }
  0xb9   : > { %v630_v11 = vpop.f32.mrf.mxu1  ;;  %v620_v33 = vpop.f32.mrf.mxu0 }
  0xba   : > { %v854_v31 = vpop.f32.mrf.mxu2  ;;  %v2646_v13 = vpop.f32.mrf.mxu3 }
  0xbc   : > { %1168 = vmatmul.bf16.gmra.mxu1 %v1092_v51 }
  0xc1   : > { %v632_v7 = vpop.f32.mrf.mxu1  ;;  %v622_v17 = vpop.f32.mrf.mxu0 }
  0xc2   : > { %v857_v42 = vpop.f32.mrf.mxu2  ;;  %v952_v3 = vpop.f32.mrf.mxu3 }
  0xc9   : > { %v716_v32 = vpop.f32.mrf.mxu1  ;;  %v1055_v63 = vpop.f32.mrf.mxu0 }
  0xca   : > { %v859_v27 = vpop.f32.mrf.mxu2  ;;  %v717_v56 = vadd.f32 %v716_v32, %v615_v16  ;;  %v2648_v9 = vpop.f32.mrf.mxu3 }
  0xcc   : > { %v872_v1 = vadd.f32 %v852_v21, %v717_v56 }
  0xce   : > { %v967_v34 = vadd.f32 %v947_v29, %v872_v1 }
  0xd0   : > { %v1075_v15 = vadd.f32 %v1055_v63, %v967_v34 }
  0xd1   : > { %v718_v36 = vpop.f32.mrf.mxu1  ;;  %v1057_v37 = vpop.f32.mrf.mxu0 }
  0xd2   : > { %v862_v18 = vpop.f32.mrf.mxu2  ;;  %v719_v38 = vadd.f32 %v718_v36, %v617_v26  ;;  %v957_v44 = vpop.f32.mrf.mxu3 }
  0xd4   : > { %v873_v43 = vadd.f32 %v854_v31, %v719_v38 }
  0xd9   : > { %v721_v46 = vpop.f32.mrf.mxu1  ;;  %v1060_v28 = vpop.f32.mrf.mxu0 }
  0xda   : > { %v864_v20 = vpop.f32.mrf.mxu2  ;;  %v722_v23 = vadd.f32 %v721_v46, %v620_v33  ;;  %v2650_v53 = vpop.f32.mrf.mxu3 }
  0xdc   : > { %v874_v62 = vadd.f32 %v857_v42, %v722_v23 }
  0xde   : > { %v969_v8 = vadd.f32 %v952_v3, %v874_v62 }
  0xe0   : > { %v1077_v10 = vadd.f32 %v1060_v28, %v969_v8 }
  0xe1   : > { %v723_v2 = vpop.f32.mrf.mxu1  ;;  %v2652_v48 = vpop.f32.mrf.mxu0 }
  0xe2   : > { %v867_v14 = vpop.f32.mrf.mxu2  ;;  %v724_v57 = vadd.f32 %v723_v2, %v622_v17  ;;  %v962_v24 = vpop.f32.mrf.mxu3  ;;  %v968_v17 = vadd.f32 %v2646_v13, %v873_v43  ;;  %v2678_v13 = vld [vmem:[%s2727_s3] ss:$0 sm:$0xff] }
  0xe4   : > { %v875_v12 = vadd.f32 %v859_v27, %v724_v57  ;;  %v1076_v27 = vadd.f32 %v1057_v37, %v968_v17 }
  0xe6   : > { %v970_v23 = vadd.f32 %v2648_v9, %v875_v12 }
  0xe9   : > { %v726_v0 = vpop.f32.mrf.mxu1  ;;  %v1065_v5 = vpop.f32.mrf.mxu0 }
  0xea   : > { %v869_v39 = vpop.f32.mrf.mxu2  ;;  %v727_v58 = vadd.f32 %v726_v0, %v625_v30  ;;  %v2660_v55 = vpop.f32.mrf.mxu3 }
  0xec   : > { %v876_v54 = vadd.f32 %v862_v18, %v727_v58 }
  0xee   : > { %v971_v47 = vadd.f32 %v957_v44, %v876_v54 }
  0xf0   : > { %v2654_v49 = vadd.f32 %v1065_v5, %v971_v47  ;;  %v1078_v5 = vadd.f32 %v2652_v48, %v970_v23 }
  0xf1   : > { %v728_v50 = vpop.f32.mrf.mxu1  ;;  %v2656_v52 = vpop.f32.mrf.mxu0 }
  0xf2   : > { %v1243_v35 = vpop.f32.mrf.mxu2  ;;  %v729_v41 = vadd.f32 %v728_v50, %v627_v22  ;;  %v1345_v40 = vpop.f32.mrf.mxu3 }
  0xf4   : > { %v2658_v4 = vadd.f32 %v864_v20, %v729_v41 }
  0xf9   : > { %v731_v61 = vpop.f32.mrf.mxu1  ;;  %v1070_v60 = vpop.f32.mrf.mxu0 }
  0xfa   : > { %v1245_v59 = vpop.f32.mrf.mxu2  ;;  %v732_v45 = vadd.f32 %v731_v61, %v630_v11  ;;  %v1347_v22 = vpop.f32.mrf.mxu3 }
  0xfc   : > { %v878_v6 = vadd.f32 %v867_v14, %v732_v45 }
  0xfe   : > { %v973_v25 = vadd.f32 %v962_v24, %v878_v6 }
 0x100   : > { %v2662_v30 = vadd.f32 %v1070_v60, %v973_v25  ;;  %v972_v25 = vadd.f32 %v2650_v53, %v2658_v4 }
 0x101   : > { %v733_v19 = vpop.f32.mrf.mxu1  ;;  %v2664_v21 = vpop.f32.mrf.mxu0 }
 0x102   : > { %v1248_v16 = vpop.f32.mrf.mxu2  ;;  %v734_v26 = vadd.f32 %v733_v19, %v632_v7  ;;  %v2672_v7 = vld [vmem:[%s2726_s2] ss:$0 sm:$0xff]  ;;  %v1350_v34 = vpop.f32.mrf.mxu3 }
 0x104   : > { %v2666_v29 = vadd.f32 %v869_v39, %v734_v26 }
 0x109   : > { %v1154_v51 = vpop.f32.mrf.mxu1  ;;  %v1438_v31 = vpop.f32.mrf.mxu0 }
 0x10a   : > { %v1174_v33 = vadd.f32 %v1154_v51, %v1075_v15  ;;  %v1250_v42 = vpop.f32.mrf.mxu2  ;;  %v1352_v14 = vpop.f32.mrf.mxu3  ;;  %v1080_v51 = vadd.f32 %v2656_v52, %v972_v25 }
 0x10c   : > { %v1263_v11 = vadd.f32 %v1243_v35, %v1174_v33 }
 0x10e   : > { %v1365_v3 = vadd.f32 %v1345_v40, %v1263_v11 }
 0x110   : > { %v1458_v56 = vadd.f32 %v1438_v31, %v1365_v3 }
 0x111   : > { %v1156_v32 = vpop.f32.mrf.mxu1  ;;  %v1440_v63 = vpop.f32.mrf.mxu0 }
 0x112   : > { %v1175_v1 = vadd.f32 %v1156_v32, %v1076_v27  ;;  %v1253_v36 = vpop.f32.mrf.mxu2  ;;  %v1470_v15 = vmul.f32 %v2672_v7, %v1458_v56  ;;  %v1355_v50 = vpop.f32.mrf.mxu3 }
 0x114   : > { %v1264_v18 = vadd.f32 %v1245_v59, %v1175_v1  ;;  %v1482_v20 = vadd.f32 %v2678_v13, %v1470_v15 }
 0x116   : > { %v1366_v37 = vadd.f32 %v1347_v22, %v1264_v18  ;;  %v1490_v2 = vmax.f32 %v1482_v20, 0.0  ;;  %v974_v18 = vadd.f32 %v2660_v55, %v2666_v29 }
 0x118   : > { %v1459_v38 = vadd.f32 %v1440_v63, %v1366_v37  ;;  %v1082_v20 = vadd.f32 %v2664_v21, %v974_v18 }
 0x119   : > { %v1159_v43 = vpop.f32.mrf.mxu1  ;;  %v1443_v44 = vpop.f32.mrf.mxu0 }
 0x11a   : > { %v1471_v46 = vmul.f32 %v2672_v7, %v1459_v38  ;;  %v1176_v28 = vadd.f32 %v1159_v43, %v1077_v10  ;;  %v1255_v0 = vpop.f32.mrf.mxu2  ;;  %v1357_v33 = vpop.f32.mrf.mxu3 }
 0x11c   : > { %v1483_v62 = vadd.f32 %v2678_v13, %v1471_v46  ;;  %v1265_v8 = vadd.f32 %v1248_v16, %v1176_v28 }
 0x11e   : > { %v1491_v57 = vmax.f32 %v1483_v62, 0.0  ;;  %v1367_v39 = vadd.f32 %v1350_v34, %v1265_v8 }
 0x120   : > { %v2018_v10 = vpack.c.bf16 %v1491_v57, %v1490_v2  ;;  %v1460_v12 = vadd.f32 %v1443_v44, %v1367_v39 }
 0x121   : > { %v1161_v58 = vpop.f32.mrf.mxu1  ;;  %v1445_v9 = vpop.f32.mrf.mxu0 }
 0x122   : > { %2019 = vst [vmem:[%s2688_s25] sm:$0xff] %v2018_v10   ;;  %v1177_v24 = vadd.f32 %v1161_v58, %v1078_v5  ;;  %v1472_v47 = vmul.f32 %v2672_v7, %v1460_v12  ;;  %v1258_v59 = vpop.f32.mrf.mxu2  ;;  %v1360_v34 = vpop.f32.mrf.mxu3 }
 0x124   : > { %v1266_v54 = vadd.f32 %v1250_v42, %v1177_v24  ;;  %v1484_v60 = vadd.f32 %v2678_v13, %v1472_v47 }
 0x126   : > { %v1368_v35 = vadd.f32 %v1352_v14, %v1266_v54  ;;  %v1492_v19 = vmax.f32 %v1484_v60, 0.0 }
 0x128   : > { %v1461_v41 = vadd.f32 %v1445_v9, %v1368_v35 }
 0x129   : > { %v1164_v61 = vpop.f32.mrf.mxu1  ;;  %v1448_v6 = vpop.f32.mrf.mxu0 }
 0x12a   : > { %v1473_v45 = vmul.f32 %v2672_v7, %v1461_v41  ;;  %v1178_v48 = vadd.f32 %v1164_v61, %v2654_v49  ;;  %v1260_v3 = vpop.f32.mrf.mxu2  ;;  %v1362_v8 = vpop.f32.mrf.mxu3 }
 0x12c   : > { %v1485_v40 = vadd.f32 %v2678_v13, %v1473_v45  ;;  %v1267_v16 = vadd.f32 %v1253_v36, %v1178_v48 }
 0x12e   : > { %v1493_v26 = vmax.f32 %v1485_v40, 0.0  ;;  %v1369_v22 = vadd.f32 %v1355_v50, %v1267_v16 }
 0x130   : > { %v2023_v31 = vpack.c.bf16 %v1493_v26, %v1492_v19  ;;  %v1462_v17 = vadd.f32 %v1448_v6, %v1369_v22 }
 0x131   : > { %v1166_v42 = vpop.f32.mrf.mxu1  ;;  %v1450_v27 = vpop.f32.mrf.mxu0 }
 0x132   : > { %2035 = vst [vmem:[%s2688_s25 + $0x8] sm:$0xff] %v2023_v31   ;;  %v1179_v11 = vadd.f32 %v1166_v42, %v1080_v51  ;;  %v1474_v32 = vmul.f32 %v2672_v7, %v1462_v17  ;;  %v1453_v37 = vpop.f32.mrf.mxu2 }
 0x134   : > { %v1268_v49 = vadd.f32 %v1255_v0, %v1179_v11  ;;  %v1486_v56 = vadd.f32 %v2678_v13, %v1474_v32 }
 0x136   : > { %v1370_v53 = vadd.f32 %v1357_v33, %v1268_v49  ;;  %v1494_v38 = vmax.f32 %v1486_v56, 0.0 }
 0x138   : > { %v1463_v4 = vadd.f32 %v1450_v27, %v1370_v53 }
 0x139   : > { %v1169_v63 = vpop.f32.mrf.mxu1 }
 0x13a   : > { %v1475_v1 = vmul.f32 %v2672_v7, %v1463_v4  ;;  %v1180_v52 = vadd.f32 %v1169_v63, %v2662_v30  ;;  %v1455_v29 = vpop.f32.mrf.mxu2 }
 0x13c   : > { %v1487_v36 = vadd.f32 %v2678_v13, %v1475_v1  ;;  %v1269_v15 = vadd.f32 %v1258_v59, %v1180_v52 }
 0x13e   : > { %v1495_v43 = vmax.f32 %v1487_v36, 0.0  ;;  %v1371_v44 = vadd.f32 %v1360_v34, %v1269_v15 }
 0x140   : > { %v2028_v46 = vpack.c.bf16 %v1495_v43, %v1494_v38  ;;  %v1464_v23 = vadd.f32 %v1453_v37, %v1371_v44 }
 0x141   : > { %v1171_v28 = vpop.f32.mrf.mxu1 }
 0x142   : > { %2036 = vst [vmem:[%s2688_s25 + $0x10] sm:$0xff] %v2028_v46   ;;  %v1181_v62 = vadd.f32 %v1171_v28, %v1082_v20  ;;  %v1476_v14 = vmul.f32 %v2672_v7, %v1464_v23 }
 0x144   : > { %v1270_v30 = vadd.f32 %v1260_v3, %v1181_v62  ;;  %v1488_v57 = vadd.f32 %v2678_v13, %v1476_v14 }
 0x146   : > { %v1372_v55 = vadd.f32 %v1362_v8, %v1270_v30  ;;  %v1496_v21 = vmax.f32 %v1488_v57, 0.0 }
 0x148   : > { %v1465_v2 = vadd.f32 %v1455_v29, %v1372_v55 }
 0x14a   : > { %v1477_v39 = vmul.f32 %v2672_v7, %v1465_v2 }
 0x14c   : > { %v1489_v0 = vadd.f32 %v2678_v13, %v1477_v39 }
 0x14e   : > { %v1497_v5 = vmax.f32 %v1489_v0, 0.0 }
 0x150   : > { %v2033_v10 = vpack.c.bf16 %v1497_v5, %v1496_v21 }
 0x152   : > { %2037 = vst [vmem:[%s2688_s25 + $0x18] sm:$0xff] %v2033_v10  }
 0x153 PF: > { %s14_s17 = sadd.s32 1, %s2103_s17   ;;  %s2733_s15 = smov %s2099_s16 }
 0x154   : > { %p11_p5 = scmp.ge.s32.totalorder %s14_s17, 4   ;;  %s2734_s16 = smov %s2736_s18 }
 0x156   :  { %13 = sbr.rel (!%p11_p5) target bundleno = 2 (0x2), region = 75 }

// kernel: _lambda_.39
= control target key start
LH: loop header
LB: loop body
LE: loop exit
PB: predicated region body
PF: predicated region fallthrough
CT: control target
= control target key end

     0   :  { %s285_s6 = smov 0   ;;  %s306_s0 = inlined_call_operand.vmem [shape: bf16[8,2,4,256], index: 0, kind: input, shape index: {}]   ;;  %s307_s1 = inlined_call_operand.vmem [shape: bf16[8,4,128], index: 1, kind: output, shape index: {}]  }
   0x1 LB: > { %s227_s7 = sadd.s32 4294967295, %s273_s6   ;;  %p231_p0 = scmp.ge.s32.totalorder %s273_s6, 1  ;;  %s273_s6 = sphi %s285_s6, %s11_s6  }
   0x2   : > { %p89_p1 = scmp.lt.s32.totalorder %s273_s6, 3 }
   0x4   : > { %p90_p2 = pnand %p231_p0, %p89_p1 }
   0x5   : > { %s232_s8 = sshll.u32 (!%p90_p2), %s227_s7, 2 }
   0x6   : > { %93 = sbr.rel (%p90_p2) target bundleno = 31 (0x1f), region = 24  ;;  %p111_p3 = scmp.lt.s32.totalorder (!%p90_p2), %s232_s8, 7 }
   0xb   : > { %s309_s8 = smov (!%p111_p3, %s232_s8), 7 }
   0xc   : > { %s239_s9 = sshll.u32 %s309_s8, 3  ;;  %s236_s13 = sshll.u32 %s309_s8, 1 }
   0xd   : > { %s115_s12 = scalar_lea.vmem %s306_s0, %s239_s9  ;;  %s121_s16 = scalar_lea.vmem %s307_s1, %s236_s13 }
   0xe   : > { %v241_v0 = vld [vmem:[%s115_s12] sm:$0xff]   ;;  %v256_v1 = vld [vmem:[%s115_s12 + $0x8] sm:$0xff]   ;;  %v257_v2 = vld [vmem:[%s115_s12 + $0x10] sm:$0xff]  }
   0xf   : > { %v242_v3 = vunpack.c.l.bf16 %v241_v0  ;;  %v243_v4 = vunpack.c.h.bf16 %v241_v0  ;;  %v246_v5 = vunpack.c.l.bf16 %v256_v1  ;;  %v247_v6 = vunpack.c.h.bf16 %v256_v1  ;;  %v258_v7 = vld [vmem:[%s115_s12 + $0x18] sm:$0xff]  }
  0x10   : > { %v250_v8 = vunpack.c.l.bf16 %v257_v2  ;;  %v251_v9 = vunpack.c.h.bf16 %v257_v2  ;;  %v254_v10 = vunpack.c.l.bf16 %v258_v7  ;;  %v255_v11 = vunpack.c.h.bf16 %v258_v7 }
  0x11   : > { %v139_v12 = vadd.f32 %v243_v4, %v242_v3  ;;  %v140_v13 = vadd.f32 %v247_v6, %v246_v5 }
  0x12   : > { %v141_v14 = vadd.f32 %v251_v9, %v250_v8  ;;  %v142_v15 = vadd.f32 %v255_v11, %v254_v10 }
  0x13   : > { %v147_v16 = vrot.slane %v139_v12, 4  ;;  %v148_v17 = vrot.slane %v140_v13, 4 }
  0x14   : > { %v149_v18 = vrot.slane %v141_v14, 4  ;;  %v150_v19 = vrot.slane %v142_v15, 4 }
  0x15   : > { %v155_v20 = vadd.f32 %v147_v16, %v139_v12  ;;  %v156_v21 = vadd.f32 %v148_v17, %v140_v13 }
  0x16   : > { %v157_v22 = vadd.f32 %v149_v18, %v141_v14  ;;  %v158_v23 = vadd.f32 %v150_v19, %v142_v15 }
  0x17   : > { %v159_v24 = vmul.f32 0.25, %v155_v20  ;;  %v160_v25 = vmul.f32 0.25, %v156_v21 }
  0x18   : > { %v161_v26 = vmul.f32 0.25, %v157_v22  ;;  %v162_v27 = vmul.f32 0.25, %v158_v23 }
  0x19   : > { %v163_v28 = vpack.c.bf16 %v159_v24, %v159_v24  ;;  %v164_v29 = vpack.c.bf16 %v160_v25, %v160_v25 }
  0x1a   : > { %v165_v30 = vpack.c.bf16 %v161_v26, %v161_v26  ;;  %v166_v31 = vpack.c.bf16 %v162_v27, %v162_v27 }
  0x1b   : > { %167 = vst [vmem:[%s121_s16] sm:$0x3] %v163_v28 }
  0x1c   : > { %168 = vst [vmem:[%s121_s16 + $0x2] sm:$0x3] %v164_v29 }
  0x1d   : > { %169 = vst [vmem:[%s121_s16 + $0x4] sm:$0x3] %v165_v30 }
  0x1e   : > { %170 = vst [vmem:[%s121_s16 + $0x6] sm:$0x3] %v166_v31 }
  0x1f PF: > { %s11_s6 = sadd.s32 1, %s273_s6  }
  0x20   : > { %p8_p4 = scmp.ge.s32.totalorder %s11_s6, 4  }
  0x22   :  { %10 = sbr.rel (!%p8_p4) target bundleno = 1 (0x1), region = 54 }

// kernel: _lambda_.36
= control target key start
LH: loop header
LB: loop body
LE: loop exit
PB: predicated region body
PF: predicated region fallthrough
CT: control target
= control target key end

     0   :  { %s784_s1 = inlined_call_operand.vmem [shape: bf16[128,128], index: 1, kind: input, shape index: {}]   ;;  %s785_s2 = inlined_call_operand.vmem [shape: f32[1,128], index: 2, kind: input, shape index: {}]   ;;  %s786_s3 = inlined_call_operand.vmem [shape: f32[1,128], index: 3, kind: input, shape index: {}]   ;;  %s787_s0 = inlined_call_operand.vmem [shape: bf16[128,128], index: 0, kind: input, shape index: {}]   ;;  %s788_s4 = inlined_call_operand.vmem [shape: bf16[128,128], index: 4, kind: input, shape index: {}]   ;;  %s789_s5 = inlined_call_operand.vmem [shape: bf16[128,128], index: 5, kind: output, shape index: {}]  }
   0x1   :  { %v503_v0 = vld [vmem:[%s784_s1 + $0x38] sm:$0xff]  ;;  %v502_v1 = vld [vmem:[%s784_s1 + $0x30] sm:$0xff]  ;;  %v501_v2 = vld [vmem:[%s784_s1 + $0x28] sm:$0xff] }
   0x2   :  { %184 = vmatpush.bf16.msra.mxu0 %v503_v0  ;;  %590 = vmatpush.bf16.msra.mxu1 %v503_v0  ;;  %v500_v3 = vld [vmem:[%s784_s1 + $0x20] sm:$0xff]  ;;  %v499_v4 = vld [vmem:[%s784_s1 + $0x18] sm:$0xff]  ;;  %v498_v5 = vld [vmem:[%s784_s1 + $0x10] sm:$0xff] }
   0x3   :  { %591 = vmatpush.bf16.msra.mxu2 %v503_v0  ;;  %592 = vmatpush.bf16.msra.mxu3 %v503_v0  ;;  %v497_v6 = vld [vmem:[%s784_s1 + $0x8] sm:$0xff]  ;;  %v496_v7 = vld [vmem:[%s784_s1] sm:$0xff]  ;;  %v490_v9 = vld [vmem:[%s787_s0 + $0x10] sm:$0xff] }
   0x4   :  { %v488_v8 = vld [vmem:[%s787_s0] sm:$0xff]  ;;  %v494_v11 = vld [vmem:[%s787_s0 + $0x30] sm:$0xff]  ;;  %v489_v12 = vld [vmem:[%s787_s0 + $0x8] sm:$0xff] }
   0x5   :  { %v492_v10 = vld [vmem:[%s787_s0 + $0x20] sm:$0xff]  ;;  %v491_v13 = vld [vmem:[%s787_s0 + $0x18] sm:$0xff]  ;;  %v493_v14 = vld [vmem:[%s787_s0 + $0x28] sm:$0xff] }
   0x6   :  { %185 = vmatpush.bf16.msra.mxu0 %v502_v1  ;;  %593 = vmatpush.bf16.msra.mxu1 %v502_v1  ;;  %v495_v15 = vld [vmem:[%s787_s0 + $0x38] sm:$0xff]  ;;  %v697_v16 = vld [vmem:[%s785_s2] ss:$0 sm:$0xff]  ;;  %v577_v23 = vld [vmem:[%s788_s4 + $0x10] sm:$0xff]  }
   0x7   :  { %594 = vmatpush.bf16.msra.mxu2 %v502_v1  ;;  %595 = vmatpush.bf16.msra.mxu3 %v502_v1  ;;  %v703_v20 = vld [vmem:[%s786_s3] ss:$0 sm:$0xff]  ;;  %v514_v27 = vunpack.c.l.bf16 %v577_v23  ;;  %v515_v35 = vunpack.c.h.bf16 %v577_v23  ;;  %v581_v41 = vld [vmem:[%s788_s4 + $0x30] sm:$0xff]  }
   0x8   :  { %v505_v22 = vld [vmem:[%s788_s4] sm:$0xff]   ;;  %v530_v49 = vunpack.c.l.bf16 %v581_v41  ;;  %v531_v59 = vunpack.c.h.bf16 %v581_v41 }
   0x9   :  { %v506_v25 = vunpack.c.l.bf16 %v505_v22  ;;  %v507_v33 = vunpack.c.h.bf16 %v505_v22  ;;  %v579_v40 = vld [vmem:[%s788_s4 + $0x20] sm:$0xff]  }
   0xa   :  { %186 = vmatpush.bf16.msra.mxu0 %v501_v2  ;;  %596 = vmatpush.bf16.msra.mxu1 %v501_v2  ;;  %v522_v47 = vunpack.c.l.bf16 %v579_v40  ;;  %v523_v57 = vunpack.c.h.bf16 %v579_v40 }
   0xb   :  { %597 = vmatpush.bf16.msra.mxu2 %v501_v2  ;;  %598 = vmatpush.bf16.msra.mxu3 %v501_v2 }
   0xe   :  { %187 = vmatpush.bf16.msra.mxu0 %v500_v3  ;;  %599 = vmatpush.bf16.msra.mxu1 %v500_v3 }
   0xf   :  { %600 = vmatpush.bf16.msra.mxu2 %v500_v3  ;;  %601 = vmatpush.bf16.msra.mxu3 %v500_v3 }
  0x12   :  { %188 = vmatpush.bf16.msra.mxu0 %v499_v4  ;;  %602 = vmatpush.bf16.msra.mxu1 %v499_v4 }
  0x13   :  { %603 = vmatpush.bf16.msra.mxu2 %v499_v4  ;;  %604 = vmatpush.bf16.msra.mxu3 %v499_v4 }
  0x16   :  { %189 = vmatpush.bf16.msra.mxu0 %v498_v5  ;;  %605 = vmatpush.bf16.msra.mxu1 %v498_v5 }
  0x17   :  { %606 = vmatpush.bf16.msra.mxu2 %v498_v5  ;;  %607 = vmatpush.bf16.msra.mxu3 %v498_v5 }
  0x1a   :  { %190 = vmatpush.bf16.msra.mxu0 %v497_v6  ;;  %608 = vmatpush.bf16.msra.mxu1 %v497_v6 }
  0x1b   :  { %609 = vmatpush.bf16.msra.mxu2 %v497_v6  ;;  %610 = vmatpush.bf16.msra.mxu3 %v497_v6 }
  0x1e   :  { %191 = vmatpush.bf16.msra.mxu0 %v496_v7  ;;  %611 = vmatpush.bf16.msra.mxu1 %v496_v7 }
  0x1f   :  { %612 = vmatpush.bf16.msra.mxu2 %v496_v7  ;;  %613 = vmatpush.bf16.msra.mxu3 %v496_v7 }
  0x21   :  { %192 = vmatmul.bf16.vlgmr.msra.gmra.mxu0 %v488_v8  ;;  %202 = vmatmul.bf16.vlgmr.msra.gmra.mxu1 %v490_v9  ;;  %v576_v8 = vld [vmem:[%s788_s4 + $0x8] sm:$0xff]   ;;  %v578_v9 = vld [vmem:[%s788_s4 + $0x18] sm:$0xff]  }
  0x22   :  { %212 = vmatmul.bf16.vlgmr.msra.gmra.mxu2 %v492_v10  ;;  %222 = vmatmul.bf16.vlgmr.msra.gmra.mxu3 %v494_v11 }
  0x31   :  { %197 = vmatmul.bf16.gmra.mxu0 %v489_v12  ;;  %207 = vmatmul.bf16.gmra.mxu1 %v491_v13 }
  0x32   :  { %217 = vmatmul.bf16.gmra.mxu2 %v493_v14  ;;  %227 = vmatmul.bf16.gmra.mxu3 %v495_v15  ;;  %v510_v15 = vunpack.c.l.bf16 %v576_v8 }
  0x9e   :  { %v193_v17 = vpop.f32.mrf.mxu0  ;;  %v203_v18 = vpop.f32.mrf.mxu1 }
  0x9f   :  { %v288_v19 = vmul.f32 %v697_v16, %v193_v17  ;;  %v292_v21 = vmul.f32 %v697_v16, %v203_v18  ;;  %v518_v18 = vunpack.c.l.bf16 %v578_v9 }
  0xa1   :  { %v308_v24 = vadd.f32 %v703_v20, %v288_v19  ;;  %v312_v26 = vadd.f32 %v703_v20, %v292_v21 }
  0xa3   :  { %v356_v38 = vadd.f32 %v506_v25, %v308_v24  ;;  %v360_v39 = vadd.f32 %v514_v27, %v312_v26  ;;  %v511_v27 = vunpack.c.h.bf16 %v576_v8 }
  0xa5   :  { %v213_v28 = vpop.f32.mrf.mxu2  ;;  %v223_v29 = vpop.f32.mrf.mxu3  ;;  %v372_v50 = vmax.f32 %v356_v38, 0.0  ;;  %v376_v51 = vmax.f32 %v360_v39, 0.0 }
  0xa6   :  { %v195_v30 = vpop.f32.mrf.mxu0  ;;  %v205_v31 = vpop.f32.mrf.mxu1  ;;  %v296_v36 = vmul.f32 %v697_v16, %v213_v28  ;;  %v300_v37 = vmul.f32 %v697_v16, %v223_v29  ;;  %v519_v29 = vunpack.c.h.bf16 %v578_v9 }
  0xa7   :  { %v289_v32 = vmul.f32 %v697_v16, %v195_v30  ;;  %v293_v34 = vmul.f32 %v697_v16, %v205_v31 }
  0xa8   :  { %v316_v46 = vadd.f32 %v703_v20, %v296_v36  ;;  %v320_v48 = vadd.f32 %v703_v20, %v300_v37 }
  0xa9   :  { %v309_v42 = vadd.f32 %v703_v20, %v289_v32  ;;  %v313_v43 = vadd.f32 %v703_v20, %v293_v34  ;;  %v580_v34 = vld [vmem:[%s788_s4 + $0x28] sm:$0xff]  }
  0xaa   :  { %v364_v0 = vadd.f32 %v522_v47, %v316_v46  ;;  %v368_v1 = vadd.f32 %v530_v49, %v320_v48  ;;  %v526_v41 = vunpack.c.l.bf16 %v580_v34 }
  0xab   :  { %v357_v44 = vadd.f32 %v507_v33, %v309_v42  ;;  %v361_v45 = vadd.f32 %v515_v35, %v313_v43  ;;  %v582_v35 = vld [vmem:[%s788_s4 + $0x38] sm:$0xff]  }
  0xac   :  { %v380_v10 = vmax.f32 %v364_v0, 0.0  ;;  %v384_v11 = vmax.f32 %v368_v1, 0.0  ;;  %v534_v43 = vunpack.c.l.bf16 %v582_v35 }
  0xad   :  { %v373_v52 = vmax.f32 %v357_v44, 0.0  ;;  %v377_v53 = vmax.f32 %v361_v45, 0.0  ;;  %v215_v54 = vpop.f32.mrf.mxu2  ;;  %v225_v55 = vpop.f32.mrf.mxu3 }
  0xae   :  { %v297_v56 = vmul.f32 %v697_v16, %v215_v54  ;;  %v301_v58 = vmul.f32 %v697_v16, %v225_v55  ;;  %v198_v60 = vpop.f32.mrf.mxu0  ;;  %v208_v61 = vpop.f32.mrf.mxu1 }
  0xaf   :  { %v539_v62 = vpack.c.bf16 %v373_v52, %v372_v50  ;;  %v549_v63 = vpack.c.bf16 %v377_v53, %v376_v51  ;;  %v290_v4 = vmul.f32 %v697_v16, %v198_v60  ;;  %v294_v5 = vmul.f32 %v697_v16, %v208_v61 }
  0xb0   :  { %v317_v2 = vadd.f32 %v703_v20, %v297_v56  ;;  %v321_v3 = vadd.f32 %v703_v20, %v301_v58  ;;  %v527_v51 = vunpack.c.h.bf16 %v580_v34  ;;  %v535_v53 = vunpack.c.h.bf16 %v582_v35 }
  0xb1   :  { %540 = vst [vmem:[%s789_s5] sm:$0xff] %v539_v62   ;;  %v310_v14 = vadd.f32 %v703_v20, %v290_v4  ;;  %v314_v17 = vadd.f32 %v703_v20, %v294_v5 }
  0xb2   :  { %584 = vst [vmem:[%s789_s5 + $0x10] sm:$0xff] %v549_v63   ;;  %v365_v6 = vadd.f32 %v523_v57, %v317_v2  ;;  %v369_v7 = vadd.f32 %v531_v59, %v321_v3 }
  0xb3   :  { %v358_v32 = vadd.f32 %v510_v15, %v310_v14  ;;  %v362_v33 = vadd.f32 %v518_v18, %v314_v17 }
  0xb4   :  { %v381_v12 = vmax.f32 %v365_v6, 0.0  ;;  %v385_v13 = vmax.f32 %v369_v7, 0.0 }
  0xb5   :  { %v218_v19 = vpop.f32.mrf.mxu2  ;;  %v228_v21 = vpop.f32.mrf.mxu3  ;;  %v374_v44 = vmax.f32 %v358_v32, 0.0  ;;  %v378_v45 = vmax.f32 %v362_v33, 0.0 }
  0xb6   :  { %v559_v22 = vpack.c.bf16 %v381_v12, %v380_v10  ;;  %v569_v23 = vpack.c.bf16 %v385_v13, %v384_v11  ;;  %v200_v24 = vpop.f32.mrf.mxu0  ;;  %v210_v25 = vpop.f32.mrf.mxu1  ;;  %v298_v30 = vmul.f32 %v697_v16, %v218_v19  ;;  %v302_v31 = vmul.f32 %v697_v16, %v228_v21 }
  0xb7   :  { %v291_v26 = vmul.f32 %v697_v16, %v200_v24  ;;  %v295_v28 = vmul.f32 %v697_v16, %v210_v25 }
  0xb8   :  { %586 = vst [vmem:[%s789_s5 + $0x20] sm:$0xff] %v559_v22   ;;  %v318_v40 = vadd.f32 %v703_v20, %v298_v30  ;;  %v322_v42 = vadd.f32 %v703_v20, %v302_v31 }
  0xb9   :  { %588 = vst [vmem:[%s789_s5 + $0x30] sm:$0xff] %v569_v23   ;;  %v311_v36 = vadd.f32 %v703_v20, %v291_v26  ;;  %v315_v37 = vadd.f32 %v703_v20, %v295_v28 }
  0xba   :  { %v366_v56 = vadd.f32 %v526_v41, %v318_v40  ;;  %v370_v57 = vadd.f32 %v534_v43, %v322_v42 }
  0xbb   :  { %v359_v38 = vadd.f32 %v511_v27, %v311_v36  ;;  %v363_v39 = vadd.f32 %v519_v29, %v315_v37 }
  0xbc   :  { %v386_v62 = vmax.f32 %v370_v57, 0.0 }
  0xbd   :  { %v375_v46 = vmax.f32 %v359_v38, 0.0  ;;  %v379_v47 = vmax.f32 %v363_v39, 0.0  ;;  %v220_v48 = vpop.f32.mrf.mxu2  ;;  %v230_v49 = vpop.f32.mrf.mxu3 }
  0xbe   :  { %v299_v50 = vmul.f32 %v697_v16, %v220_v48  ;;  %v303_v52 = vmul.f32 %v697_v16, %v230_v49  ;;  %v382_v16 = vmax.f32 %v366_v56, 0.0 }
  0xbf   :  { %v544_v54 = vpack.c.bf16 %v375_v46, %v374_v44  ;;  %v554_v55 = vpack.c.bf16 %v379_v47, %v378_v45 }
  0xc0   :  { %v319_v58 = vadd.f32 %v703_v20, %v299_v50  ;;  %v323_v59 = vadd.f32 %v703_v20, %v303_v52 }
  0xc1   :  { %583 = vst [vmem:[%s789_s5 + $0x8] sm:$0xff] %v544_v54  }
  0xc2   :  { %585 = vst [vmem:[%s789_s5 + $0x18] sm:$0xff] %v554_v55   ;;  %v367_v60 = vadd.f32 %v527_v51, %v319_v58  ;;  %v371_v61 = vadd.f32 %v535_v53, %v323_v59 }
  0xc4   :  { %v383_v63 = vmax.f32 %v367_v60, 0.0  ;;  %v387_v0 = vmax.f32 %v371_v61, 0.0 }
  0xc6   :  { %v564_v1 = vpack.c.bf16 %v383_v63, %v382_v16  ;;  %v574_v2 = vpack.c.bf16 %v387_v0, %v386_v62 }
  0xc8   :  { %587 = vst [vmem:[%s789_s5 + $0x28] sm:$0xff] %v564_v1  }
  0xc9   :  { %589 = vst [vmem:[%s789_s5 + $0x38] sm:$0xff] %v574_v2  }

// kernel: _lambda_.42
= control target key start
LH: loop header
LB: loop body
LE: loop exit
PB: predicated region body
PF: predicated region fallthrough
CT: control target
= control target key end

     0   :  { %s348_s1 = inlined_call_operand.vmem [shape: bf16[128,128], index: 1, kind: input, shape index: {}]   ;;  %s349_s2 = inlined_call_operand.vmem [shape: f32[1,128], index: 2, kind: input, shape index: {}]   ;;  %s350_s3 = inlined_call_operand.vmem [shape: f32[1,128], index: 3, kind: input, shape index: {}]   ;;  %s351_s0 = inlined_call_operand.vmem [shape: bf16[32,128], index: 0, kind: input, shape index: {}]   ;;  %s352_s4 = inlined_call_operand.vmem [shape: bf16[32,128], index: 4, kind: input, shape index: {}]   ;;  %s353_s5 = inlined_call_operand.vmem [shape: bf16[32,128], index: 5, kind: output, shape index: {}]  }
   0x1   :  { %v239_v0 = vld [vmem:[%s348_s1 + $0x38] sm:$0xff]  ;;  %v238_v1 = vld [vmem:[%s348_s1 + $0x30] sm:$0xff]  ;;  %v237_v2 = vld [vmem:[%s348_s1 + $0x28] sm:$0xff] }
   0x2   :  { %112 = vmatpush.bf16.msra.mxu0 %v239_v0  ;;  %260 = vmatpush.bf16.msra.mxu1 %v239_v0  ;;  %v236_v3 = vld [vmem:[%s348_s1 + $0x20] sm:$0xff]  ;;  %v235_v4 = vld [vmem:[%s348_s1 + $0x18] sm:$0xff]  ;;  %v234_v5 = vld [vmem:[%s348_s1 + $0x10] sm:$0xff] }
   0x3   :  { %v233_v6 = vld [vmem:[%s348_s1 + $0x8] sm:$0xff]  ;;  %v232_v7 = vld [vmem:[%s348_s1] sm:$0xff] }
   0x4   :  { %v230_v8 = vld [vmem:[%s351_s0] sm:$0xff]  ;;  %v231_v9 = vld [vmem:[%s351_s0 + $0x8] sm:$0xff] }
   0x5   :  { %v268_v10 = vld [vmem:[%s349_s2] ss:$0 sm:$0xff]  ;;  %v258_v17 = vld [vmem:[%s352_s4 + $0x8] sm:$0xff]  }
   0x6   :  { %113 = vmatpush.bf16.msra.mxu0 %v238_v1  ;;  %261 = vmatpush.bf16.msra.mxu1 %v238_v1  ;;  %v269_v14 = vld [vmem:[%s350_s3] ss:$0 sm:$0xff]  ;;  %v246_v21 = vunpack.c.l.bf16 %v258_v17  ;;  %v247_v27 = vunpack.c.h.bf16 %v258_v17 }
   0x7   :  { %v241_v16 = vld [vmem:[%s352_s4] sm:$0xff]  }
   0x8   :  { %v242_v19 = vunpack.c.l.bf16 %v241_v16  ;;  %v243_v25 = vunpack.c.h.bf16 %v241_v16 }
   0xa   :  { %114 = vmatpush.bf16.msra.mxu0 %v237_v2  ;;  %262 = vmatpush.bf16.msra.mxu1 %v237_v2 }
   0xe   :  { %115 = vmatpush.bf16.msra.mxu0 %v236_v3  ;;  %263 = vmatpush.bf16.msra.mxu1 %v236_v3 }
  0x12   :  { %116 = vmatpush.bf16.msra.mxu0 %v235_v4  ;;  %264 = vmatpush.bf16.msra.mxu1 %v235_v4 }
  0x16   :  { %117 = vmatpush.bf16.msra.mxu0 %v234_v5  ;;  %265 = vmatpush.bf16.msra.mxu1 %v234_v5 }
  0x1a   :  { %118 = vmatpush.bf16.msra.mxu0 %v233_v6  ;;  %266 = vmatpush.bf16.msra.mxu1 %v233_v6 }
  0x1e   :  { %119 = vmatpush.bf16.msra.mxu0 %v232_v7  ;;  %267 = vmatpush.bf16.msra.mxu1 %v232_v7 }
  0x21   :  { %120 = vmatmul.bf16.vlgmr.msra.gmra.mxu0 %v230_v8  ;;  %125 = vmatmul.bf16.vlgmr.msra.gmra.mxu1 %v231_v9 }
  0x9e   :  { %v121_v11 = vpop.f32.mrf.mxu0  ;;  %v126_v12 = vpop.f32.mrf.mxu1 }
  0x9f   :  { %v150_v13 = vmul.f32 %v268_v10, %v121_v11  ;;  %v152_v15 = vmul.f32 %v268_v10, %v126_v12 }
  0xa1   :  { %v158_v18 = vadd.f32 %v269_v14, %v150_v13  ;;  %v160_v20 = vadd.f32 %v269_v14, %v152_v15 }
  0xa3   :  { %v170_v28 = vadd.f32 %v242_v19, %v158_v18  ;;  %v172_v29 = vadd.f32 %v246_v21, %v160_v20 }
  0xa5   :  { %v174_v34 = vmax.f32 %v170_v28, 0.0  ;;  %v176_v35 = vmax.f32 %v172_v29, 0.0 }
  0xa6   :  { %v123_v22 = vpop.f32.mrf.mxu0  ;;  %v128_v23 = vpop.f32.mrf.mxu1 }
  0xa7   :  { %v151_v24 = vmul.f32 %v268_v10, %v123_v22  ;;  %v153_v26 = vmul.f32 %v268_v10, %v128_v23 }
  0xa9   :  { %v159_v30 = vadd.f32 %v269_v14, %v151_v24  ;;  %v161_v31 = vadd.f32 %v269_v14, %v153_v26 }
  0xab   :  { %v171_v32 = vadd.f32 %v243_v25, %v159_v30  ;;  %v173_v33 = vadd.f32 %v247_v27, %v161_v31 }
  0xad   :  { %v175_v36 = vmax.f32 %v171_v32, 0.0  ;;  %v177_v37 = vmax.f32 %v173_v33, 0.0 }
  0xaf   :  { %v251_v38 = vpack.c.bf16 %v175_v36, %v174_v34  ;;  %v256_v39 = vpack.c.bf16 %v177_v37, %v176_v35 }
  0xb1   :  { %252 = vst [vmem:[%s353_s5] sm:$0xff] %v251_v38  }
  0xb2   :  { %259 = vst [vmem:[%s353_s5 + $0x8] sm:$0xff] %v256_v39  }

// kernel: _lambda_.41
= control target key start
LH: loop header
LB: loop body
LE: loop exit
PB: predicated region body
PF: predicated region fallthrough
CT: control target
= control target key end

     0   :  { %s309_s1 = inlined_call_operand.vmem [shape: bf16[128,128], index: 1, kind: input, shape index: {}]   ;;  %s310_s2 = inlined_call_operand.vmem [shape: f32[1,128], index: 2, kind: input, shape index: {}]   ;;  %s311_s3 = inlined_call_operand.vmem [shape: f32[1,128], index: 3, kind: input, shape index: {}]   ;;  %s312_s0 = inlined_call_operand.vmem [shape: bf16[32,128], index: 0, kind: input, shape index: {}]   ;;  %s313_s4 = inlined_call_operand.vmem [shape: bf16[32,128], index: 4, kind: output, shape index: {}]  }
   0x1   :  { %v220_v0 = vld [vmem:[%s309_s1 + $0x38] sm:$0xff]  ;;  %v219_v1 = vld [vmem:[%s309_s1 + $0x30] sm:$0xff]  ;;  %v218_v2 = vld [vmem:[%s309_s1 + $0x28] sm:$0xff] }
   0x2   :  { %109 = vmatpush.bf16.msra.mxu0 %v220_v0  ;;  %232 = vmatpush.bf16.msra.mxu1 %v220_v0  ;;  %v217_v3 = vld [vmem:[%s309_s1 + $0x20] sm:$0xff]  ;;  %v216_v4 = vld [vmem:[%s309_s1 + $0x18] sm:$0xff]  ;;  %v215_v5 = vld [vmem:[%s309_s1 + $0x10] sm:$0xff] }
   0x3   :  { %v214_v6 = vld [vmem:[%s309_s1 + $0x8] sm:$0xff]  ;;  %v213_v7 = vld [vmem:[%s309_s1] sm:$0xff] }
   0x4   :  { %v211_v8 = vld [vmem:[%s312_s0] sm:$0xff]  ;;  %v212_v9 = vld [vmem:[%s312_s0 + $0x8] sm:$0xff] }
   0x5   :  { %v240_v12 = vld [vmem:[%s310_s2] ss:$0 sm:$0xff] }
   0x6   :  { %110 = vmatpush.bf16.msra.mxu0 %v219_v1  ;;  %233 = vmatpush.bf16.msra.mxu1 %v219_v1  ;;  %v241_v14 = vld [vmem:[%s311_s3] ss:$0 sm:$0xff] }
   0xa   :  { %111 = vmatpush.bf16.msra.mxu0 %v218_v2  ;;  %234 = vmatpush.bf16.msra.mxu1 %v218_v2 }
   0xe   :  { %112 = vmatpush.bf16.msra.mxu0 %v217_v3  ;;  %235 = vmatpush.bf16.msra.mxu1 %v217_v3 }
  0x12   :  { %113 = vmatpush.bf16.msra.mxu0 %v216_v4  ;;  %236 = vmatpush.bf16.msra.mxu1 %v216_v4 }
  0x16   :  { %114 = vmatpush.bf16.msra.mxu0 %v215_v5  ;;  %237 = vmatpush.bf16.msra.mxu1 %v215_v5 }
  0x1a   :  { %115 = vmatpush.bf16.msra.mxu0 %v214_v6  ;;  %238 = vmatpush.bf16.msra.mxu1 %v214_v6 }
  0x1e   :  { %116 = vmatpush.bf16.msra.mxu0 %v213_v7  ;;  %239 = vmatpush.bf16.msra.mxu1 %v213_v7 }
  0x21   :  { %117 = vmatmul.bf16.vlgmr.msra.gmra.mxu0 %v211_v8  ;;  %122 = vmatmul.bf16.vlgmr.msra.gmra.mxu1 %v212_v9 }
  0x9e   :  { %v118_v10 = vpop.f32.mrf.mxu0  ;;  %v123_v11 = vpop.f32.mrf.mxu1 }
  0x9f   :  { %v147_v13 = vmul.f32 %v240_v12, %v118_v10  ;;  %v149_v15 = vmul.f32 %v240_v12, %v123_v11 }
  0xa1   :  { %v155_v20 = vadd.f32 %v241_v14, %v147_v13  ;;  %v157_v21 = vadd.f32 %v241_v14, %v149_v15 }
  0xa6   :  { %v120_v16 = vpop.f32.mrf.mxu0  ;;  %v125_v17 = vpop.f32.mrf.mxu1 }
  0xa7   :  { %v148_v18 = vmul.f32 %v240_v12, %v120_v16  ;;  %v150_v19 = vmul.f32 %v240_v12, %v125_v17 }
  0xa9   :  { %v156_v22 = vadd.f32 %v241_v14, %v148_v18  ;;  %v158_v23 = vadd.f32 %v241_v14, %v150_v19 }
  0xab   :  { %v224_v24 = vpack.c.bf16 %v156_v22, %v155_v20  ;;  %v229_v25 = vpack.c.bf16 %v158_v23, %v157_v21 }
  0xad   :  { %225 = vst [vmem:[%s313_s4] sm:$0xff] %v224_v24  }
  0xae   :  { %231 = vst [vmem:[%s313_s4 + $0x8] sm:$0xff] %v229_v25  }

// kernel: _lambda_.43
= control target key start
LH: loop header
LB: loop body
LE: loop exit
PB: predicated region body
PF: predicated region fallthrough
CT: control target
= control target key end

     0   :  { %s313_s1 = inlined_call_operand.vmem [shape: bf16[128,128], index: 1, kind: input, shape index: {}]   ;;  %s314_s2 = inlined_call_operand.vmem [shape: f32[1,128], index: 2, kind: input, shape index: {}]   ;;  %s315_s3 = inlined_call_operand.vmem [shape: f32[1,128], index: 3, kind: input, shape index: {}]   ;;  %s316_s0 = inlined_call_operand.vmem [shape: bf16[32,128], index: 0, kind: input, shape index: {}]   ;;  %s317_s4 = inlined_call_operand.vmem [shape: bf16[32,128], index: 4, kind: output, shape index: {}]  }
   0x1   :  { %v224_v0 = vld [vmem:[%s313_s1 + $0x38] sm:$0xff]  ;;  %v223_v1 = vld [vmem:[%s313_s1 + $0x30] sm:$0xff]  ;;  %v222_v2 = vld [vmem:[%s313_s1 + $0x28] sm:$0xff] }
   0x2   :  { %109 = vmatpush.bf16.msra.mxu0 %v224_v0  ;;  %236 = vmatpush.bf16.msra.mxu1 %v224_v0  ;;  %v221_v3 = vld [vmem:[%s313_s1 + $0x20] sm:$0xff]  ;;  %v220_v4 = vld [vmem:[%s313_s1 + $0x18] sm:$0xff]  ;;  %v219_v5 = vld [vmem:[%s313_s1 + $0x10] sm:$0xff] }
   0x3   :  { %v218_v6 = vld [vmem:[%s313_s1 + $0x8] sm:$0xff]  ;;  %v217_v7 = vld [vmem:[%s313_s1] sm:$0xff] }
   0x4   :  { %v215_v8 = vld [vmem:[%s316_s0] sm:$0xff]  ;;  %v216_v9 = vld [vmem:[%s316_s0 + $0x8] sm:$0xff] }
   0x5   :  { %v244_v12 = vld [vmem:[%s314_s2] ss:$0 sm:$0xff] }
   0x6   :  { %110 = vmatpush.bf16.msra.mxu0 %v223_v1  ;;  %237 = vmatpush.bf16.msra.mxu1 %v223_v1  ;;  %v245_v14 = vld [vmem:[%s315_s3] ss:$0 sm:$0xff] }
   0xa   :  { %111 = vmatpush.bf16.msra.mxu0 %v222_v2  ;;  %238 = vmatpush.bf16.msra.mxu1 %v222_v2 }
   0xe   :  { %112 = vmatpush.bf16.msra.mxu0 %v221_v3  ;;  %239 = vmatpush.bf16.msra.mxu1 %v221_v3 }
  0x12   :  { %113 = vmatpush.bf16.msra.mxu0 %v220_v4  ;;  %240 = vmatpush.bf16.msra.mxu1 %v220_v4 }
  0x16   :  { %114 = vmatpush.bf16.msra.mxu0 %v219_v5  ;;  %241 = vmatpush.bf16.msra.mxu1 %v219_v5 }
  0x1a   :  { %115 = vmatpush.bf16.msra.mxu0 %v218_v6  ;;  %242 = vmatpush.bf16.msra.mxu1 %v218_v6 }
  0x1e   :  { %116 = vmatpush.bf16.msra.mxu0 %v217_v7  ;;  %243 = vmatpush.bf16.msra.mxu1 %v217_v7 }
  0x21   :  { %117 = vmatmul.bf16.vlgmr.msra.gmra.mxu0 %v215_v8  ;;  %122 = vmatmul.bf16.vlgmr.msra.gmra.mxu1 %v216_v9 }
  0x9e   :  { %v118_v10 = vpop.f32.mrf.mxu0  ;;  %v123_v11 = vpop.f32.mrf.mxu1 }
  0x9f   :  { %v147_v13 = vmul.f32 %v244_v12, %v118_v10  ;;  %v149_v15 = vmul.f32 %v244_v12, %v123_v11 }
  0xa1   :  { %v155_v18 = vadd.f32 %v245_v14, %v147_v13  ;;  %v157_v19 = vadd.f32 %v245_v14, %v149_v15 }
  0xa3   :  { %v159_v24 = vmax.f32 %v155_v18, 0.0  ;;  %v161_v25 = vmax.f32 %v157_v19, 0.0 }
  0xa6   :  { %v120_v16 = vpop.f32.mrf.mxu0  ;;  %v125_v17 = vpop.f32.mrf.mxu1 }
  0xa7   :  { %v148_v20 = vmul.f32 %v244_v12, %v120_v16  ;;  %v150_v21 = vmul.f32 %v244_v12, %v125_v17 }
  0xa9   :  { %v156_v22 = vadd.f32 %v245_v14, %v148_v20  ;;  %v158_v23 = vadd.f32 %v245_v14, %v150_v21 }
  0xab   :  { %v160_v26 = vmax.f32 %v156_v22, 0.0  ;;  %v162_v27 = vmax.f32 %v158_v23, 0.0 }
  0xad   :  { %v228_v28 = vpack.c.bf16 %v160_v26, %v159_v24  ;;  %v233_v29 = vpack.c.bf16 %v162_v27, %v161_v25 }
  0xaf   :  { %229 = vst [vmem:[%s317_s4] sm:$0xff] %v228_v28  }
  0xb0   :  { %235 = vst [vmem:[%s317_s4 + $0x8] sm:$0xff] %v233_v29  }

// kernel: _lambda_.45
= control target key start
LH: loop header
LB: loop body
LE: loop exit
PB: predicated region body
PF: predicated region fallthrough
CT: control target
= control target key end

     0   :  { %s228_s6 = smov 0   ;;  %s245_s0 = inlined_call_operand.vmem [shape: bf16[4,2,2,256], index: 0, kind: input, shape index: {}]   ;;  %s246_s1 = inlined_call_operand.vmem [shape: bf16[4,2,128], index: 1, kind: output, shape index: {}]  }
   0x1 LB: > { %s192_s7 = sadd.s32 4294967295, %s216_s6   ;;  %p196_p0 = scmp.ge.s32.totalorder %s216_s6, 1  ;;  %s216_s6 = sphi %s228_s6, %s11_s6  }
   0x2   : > { %p88_p1 = scmp.lt.s32.totalorder %s216_s6, 3 }
   0x4   : > { %p89_p2 = pnand %p196_p0, %p88_p1 }
   0x5   : > { %s197_s8 = sshll.u32 (!%p89_p2), %s192_s7, 1 }
   0x6   : > { %92 = sbr.rel (%p89_p2) target bundleno = 29 (0x1d), region = 24  ;;  %p108_p3 = scmp.lt.s32.totalorder (!%p89_p2), %s197_s8, 3 }
   0xb   : > { %s248_s8 = smov (!%p108_p3, %s197_s8), 3 }
   0xc   : > { %s198_s9 = sshll.u32 %s248_s8, 2  ;;  %s116_s15 = scalar_lea.vmem %s246_s1, %s248_s8 }
   0xd   : > { %s111_s12 = scalar_lea.vmem %s245_s0, %s198_s9 }
   0xe   : > { %v118_v0 = vld [vmem:[%s111_s12] sm:$0x3]  ;;  %v119_v1 = vld [vmem:[%s111_s12 + $0x2] sm:$0x3]  ;;  %v120_v2 = vld [vmem:[%s111_s12 + $0x4] sm:$0x3] }
   0xf   : > { %v121_v3 = vld [vmem:[%s111_s12 + $0x6] sm:$0x3]  ;;  %v122_v4 = vunpack.c.l.bf16 %v118_v0  ;;  %v123_v5 = vunpack.c.l.bf16 %v119_v1  ;;  %v124_v6 = vunpack.c.l.bf16 %v120_v2 }
  0x10   : > { %v125_v7 = vunpack.c.l.bf16 %v121_v3 }
  0x11   : > { %v126_v8 = vadd.f32 %v123_v5, %v122_v4 }
  0x12   : > { %v127_v9 = vadd.f32 %v125_v7, %v124_v6 }
  0x13   : > { %v130_v10 = vrot.slane %v126_v8, 2 }
  0x14   : > { %v131_v11 = vrot.slane %v127_v9, 2 }
  0x15   : > { %v134_v12 = vadd.f32 %v130_v10, %v126_v8 }
  0x16   : > { %v135_v13 = vadd.f32 %v131_v11, %v127_v9 }
  0x17   : > { %v136_v14 = vmul.f32 0.25, %v134_v12 }
  0x18   : > { %v137_v15 = vmul.f32 0.25, %v135_v13 }
  0x19   : > { %v138_v16 = vpack.c.bf16 %v136_v14, %v136_v14 }
  0x1a   : > { %v139_v17 = vpack.c.bf16 %v137_v15, %v137_v15 }
  0x1b   : > { %140 = vst [vmem:[%s116_s15] sm:$0x1] %v138_v16 }
  0x1c   : > { %141 = vst [vmem:[%s116_s15 + $0x1] sm:$0x1] %v139_v17 }
  0x1d PF: > { %s11_s6 = sadd.s32 1, %s216_s6  }
  0x1e   : > { %p8_p4 = scmp.ge.s32.totalorder %s11_s6, 4  }
  0x20   :  { %10 = sbr.rel (!%p8_p4) target bundleno = 1 (0x1), region = 54 }

// kernel: _lambda_.47
= control target key start
LH: loop header
LB: loop body
LE: loop exit
PB: predicated region body
PF: predicated region fallthrough
CT: control target
= control target key end

     0   :  { %s253_s1 = inlined_call_operand.vmem [shape: bf16[128,128], index: 1, kind: input, shape index: {}]   ;;  %s254_s2 = inlined_call_operand.vmem [shape: f32[1,128], index: 2, kind: input, shape index: {}]   ;;  %s255_s3 = inlined_call_operand.vmem [shape: f32[1,128], index: 3, kind: input, shape index: {}]   ;;  %s256_s0 = inlined_call_operand.vmem [shape: bf16[16,128], index: 0, kind: input, shape index: {}]   ;;  %s257_s4 = inlined_call_operand.vmem [shape: bf16[16,128], index: 4, kind: output, shape index: {}]  }
   0x1   :  { %v184_v0 = vld [vmem:[%s253_s1 + $0x38] sm:$0xff]  ;;  %v183_v1 = vld [vmem:[%s253_s1 + $0x30] sm:$0xff]  ;;  %v182_v2 = vld [vmem:[%s253_s1 + $0x28] sm:$0xff] }
   0x2   :  { %97 = vmatpush.bf16.msra.mxu0 %v184_v0  ;;  %v181_v3 = vld [vmem:[%s253_s1 + $0x20] sm:$0xff]  ;;  %v180_v4 = vld [vmem:[%s253_s1 + $0x18] sm:$0xff]  ;;  %v179_v5 = vld [vmem:[%s253_s1 + $0x10] sm:$0xff] }
   0x3   :  { %v178_v6 = vld [vmem:[%s253_s1 + $0x8] sm:$0xff]  ;;  %v177_v7 = vld [vmem:[%s253_s1] sm:$0xff] }
   0x4   :  { %v176_v8 = vld [vmem:[%s256_s0] sm:$0xff] }
   0x5   :  { %v190_v10 = vld [vmem:[%s254_s2] ss:$0 sm:$0xff] }
   0x6   :  { %98 = vmatpush.bf16.msra.mxu0 %v183_v1  ;;  %v191_v12 = vld [vmem:[%s255_s3] ss:$0 sm:$0xff] }
   0xa   :  { %99 = vmatpush.bf16.msra.mxu0 %v182_v2 }
   0xe   :  { %100 = vmatpush.bf16.msra.mxu0 %v181_v3 }
  0x12   :  { %101 = vmatpush.bf16.msra.mxu0 %v180_v4 }
  0x16   :  { %102 = vmatpush.bf16.msra.mxu0 %v179_v5 }
  0x1a   :  { %103 = vmatpush.bf16.msra.mxu0 %v178_v6 }
  0x1e   :  { %104 = vmatpush.bf16.msra.mxu0 %v177_v7 }
  0x21   :  { %105 = vmatmul.bf16.vlgmr.msra.gmra.mxu0 %v176_v8 }
  0x9e   :  { %v106_v9 = vpop.f32.mrf.mxu0 }
  0x9f   :  { %v124_v11 = vmul.f32 %v190_v10, %v106_v9 }
  0xa1   :  { %v130_v15 = vadd.f32 %v191_v12, %v124_v11 }
  0xa6   :  { %v108_v13 = vpop.f32.mrf.mxu0 }
  0xa7   :  { %v125_v14 = vmul.f32 %v190_v10, %v108_v13 }
  0xa9   :  { %v131_v16 = vadd.f32 %v191_v12, %v125_v14 }
  0xab   :  { %v188_v17 = vpack.c.bf16 %v131_v16, %v130_v15 }
  0xad   :  { %189 = vst [vmem:[%s257_s4] sm:$0xff] %v188_v17  }

// kernel: _lambda_.48
= control target key start
LH: loop header
LB: loop body
LE: loop exit
PB: predicated region body
PF: predicated region fallthrough
CT: control target
= control target key end

     0   :  { %s276_s1 = inlined_call_operand.vmem [shape: bf16[128,128], index: 1, kind: input, shape index: {}]   ;;  %s277_s2 = inlined_call_operand.vmem [shape: f32[1,128], index: 2, kind: input, shape index: {}]   ;;  %s278_s3 = inlined_call_operand.vmem [shape: f32[1,128], index: 3, kind: input, shape index: {}]   ;;  %s279_s0 = inlined_call_operand.vmem [shape: bf16[16,128], index: 0, kind: input, shape index: {}]   ;;  %s280_s4 = inlined_call_operand.vmem [shape: bf16[16,128], index: 4, kind: input, shape index: {}]   ;;  %s281_s5 = inlined_call_operand.vmem [shape: bf16[16,128], index: 5, kind: output, shape index: {}]  }
   0x1   :  { %v195_v0 = vld [vmem:[%s276_s1 + $0x38] sm:$0xff]  ;;  %v194_v1 = vld [vmem:[%s276_s1 + $0x30] sm:$0xff]  ;;  %v193_v2 = vld [vmem:[%s276_s1 + $0x28] sm:$0xff] }
   0x2   :  { %100 = vmatpush.bf16.msra.mxu0 %v195_v0  ;;  %v192_v3 = vld [vmem:[%s276_s1 + $0x20] sm:$0xff]  ;;  %v191_v4 = vld [vmem:[%s276_s1 + $0x18] sm:$0xff]  ;;  %v190_v5 = vld [vmem:[%s276_s1 + $0x10] sm:$0xff] }
   0x3   :  { %v189_v6 = vld [vmem:[%s276_s1 + $0x8] sm:$0xff]  ;;  %v188_v7 = vld [vmem:[%s276_s1] sm:$0xff] }
   0x4   :  { %v187_v8 = vld [vmem:[%s279_s0] sm:$0xff] }
   0x5   :  { %v205_v9 = vld [vmem:[%s277_s2] ss:$0 sm:$0xff] }
   0x6   :  { %101 = vmatpush.bf16.msra.mxu0 %v194_v1  ;;  %v206_v12 = vld [vmem:[%s278_s3] ss:$0 sm:$0xff] }
   0x7   :  { %v197_v13 = vld [vmem:[%s280_s4] sm:$0xff]  }
   0x8   :  { %v198_v15 = vunpack.c.l.bf16 %v197_v13  ;;  %v199_v18 = vunpack.c.h.bf16 %v197_v13 }
   0xa   :  { %102 = vmatpush.bf16.msra.mxu0 %v193_v2 }
   0xe   :  { %103 = vmatpush.bf16.msra.mxu0 %v192_v3 }
  0x12   :  { %104 = vmatpush.bf16.msra.mxu0 %v191_v4 }
  0x16   :  { %105 = vmatpush.bf16.msra.mxu0 %v190_v5 }
  0x1a   :  { %106 = vmatpush.bf16.msra.mxu0 %v189_v6 }
  0x1e   :  { %107 = vmatpush.bf16.msra.mxu0 %v188_v7 }
  0x21   :  { %108 = vmatmul.bf16.vlgmr.msra.gmra.mxu0 %v187_v8 }
  0x9e   :  { %v109_v10 = vpop.f32.mrf.mxu0 }
  0x9f   :  { %v127_v11 = vmul.f32 %v205_v9, %v109_v10 }
  0xa1   :  { %v133_v14 = vadd.f32 %v206_v12, %v127_v11 }
  0xa3   :  { %v139_v19 = vadd.f32 %v198_v15, %v133_v14 }
  0xa5   :  { %v141_v22 = vmax.f32 %v139_v19, 0.0 }
  0xa6   :  { %v111_v16 = vpop.f32.mrf.mxu0 }
  0xa7   :  { %v128_v17 = vmul.f32 %v205_v9, %v111_v16 }
  0xa9   :  { %v134_v20 = vadd.f32 %v206_v12, %v128_v17 }
  0xab   :  { %v140_v21 = vadd.f32 %v199_v18, %v134_v20 }
  0xad   :  { %v142_v23 = vmax.f32 %v140_v21, 0.0 }
  0xaf   :  { %v203_v24 = vpack.c.bf16 %v142_v23, %v141_v22 }
  0xb1   :  { %204 = vst [vmem:[%s281_s5] sm:$0xff] %v203_v24  }

// kernel: _lambda_.44
= control target key start
LH: loop header
LB: loop body
LE: loop exit
PB: predicated region body
PF: predicated region fallthrough
CT: control target
= control target key end

     0   :  { %s1851_s15 = smov 0   ;;  %s1853_s16 = smov 0   ;;  %s2301_s0 = inlined_call_operand.vmem [shape: bf16[2,6,6,128], index: 0, kind: input, shape index: {}]   ;;  %s2302_s1 = inlined_call_operand.vmem [shape: bf16[3,3,128,128], index: 1, kind: input, shape index: {}]   ;;  %s2303_s2 = inlined_call_operand.vmem [shape: f32[1,128], index: 2, kind: input, shape index: {}]   ;;  %s2304_s3 = inlined_call_operand.vmem [shape: f32[1,128], index: 3, kind: input, shape index: {}]   ;;  %s2305_s4 = inlined_call_operand.vmem [shape: bf16[2,4,4,128], index: 4, kind: output, shape index: {}]  }
   0x1   :  { %s1855_s17 = smov 0  }
   0x2 LB: > { %s26_s18 = sadd.s32 1, %s1820_s16  ;;  %p1402_p0 = scmp.ge.s32.totalorder %s1824_s17, 1  ;;  %s1824_s17 = sphi %s1855_s17, %s14_s17   ;;  %s1820_s16 = sphi %s1853_s16, %s2315_s16   ;;  %s1816_s15 = sphi %s1851_s15, %s2314_s15  }
   0x3   : > { %p28_p1 = scmp.ge.s32.totalorder %s26_s18, 2  ;;  %p201_p2 = scmp.lt.s32.totalorder %s1824_s17, 3 }
   0x5   : > { %s2317_s18 = smov (%p28_p1, %s26_s18), 0  ;;  %p202_p3 = pnand %p1402_p0, %p201_p2 }
   0x6   : > { %p240_p4 = scmp.lt.s32.totalorder (!%p202_p3), %s1816_s15, 1 }
   0x7   : > { %205 = sbr.rel (%p202_p3) target bundleno = 279 (0x117), region = 36 }
   0xc   : > { %v1718_v0 = vld [vmem:[%s2302_s1 + $0x78] sm:$0xff]  ;;  %v1717_v2 = vld [vmem:[%s2302_s1 + $0x70] sm:$0xff]  ;;  %s2319_s15 = smov (!%p240_p4, %s1816_s15), 1  ;;  %v1716_v8 = vld [vmem:[%s2302_s1 + $0x68] sm:$0xff]  ;;  %vm421_vm0 = vcmask 1041408   ;;  %vm425_vm2 = vcmask 1043458  }
   0xd   : > { %v1710_v1 = vld [vmem:[%s2302_s1 + $0x38] sm:$0xff]  ;;  %567 = vmatpush.bf16.msra.mxu0 %v1718_v0  ;;  %v1709_v3 = vld [vmem:[%s2302_s1 + $0x30] sm:$0xff]  ;;  %v1708_v9 = vld [vmem:[%s2302_s1 + $0x28] sm:$0xff]  ;;  %s1775_s13 = smul.u32 24, %s2319_s15  ;;  %vm447_vm1 = vsmask.f32 1280 }
   0xe   : > { %638 = vmatpush.bf16.msra.mxu1 %v1710_v1  ;;  %v1726_v4 = vld [vmem:[%s2302_s1 + $0xb8] sm:$0xff]  ;;  %v1725_v6 = vld [vmem:[%s2302_s1 + $0xb0] sm:$0xff]  ;;  %v1724_v10 = vld [vmem:[%s2302_s1 + $0xa8] sm:$0xff]  ;;  %vm448_vm3 = vsmask.f32 3336  ;;  %vm656_vm9 = vcmask 1040384  }
   0xf   : > { %v1734_v5 = vld [vmem:[%s2302_s1 + $0xf8] sm:$0xff]  ;;  %740 = vmatpush.bf16.msra.mxu2 %v1726_v4  ;;  %v1733_v7 = vld [vmem:[%s2302_s1 + $0xf0] sm:$0xff]  ;;  %v1732_v11 = vld [vmem:[%s2302_s1 + $0xe8] sm:$0xff]  ;;  %s1917_s28 = scalar_lea.vmem %s2301_s0, %s1775_s13  ;;  %vm450_vm4 = vsmask.f32 5392  ;;  %vm657_vm10 = vcmask 1042434  }
  0x10   : > { %814 = vmatpush.bf16.msra.mxu3 %v1734_v5  ;;  %v1715_v12 = vld [vmem:[%s2302_s1 + $0x60] sm:$0xff]  ;;  %v1714_v14 = vld [vmem:[%s2302_s1 + $0x58] sm:$0xff]  ;;  %v1935_v19 = vld [vmem:[%s1917_s28 + $0x8] sm:$0x7]  ;;  %vm452_vm7 = vsmask.f32 7448 }
  0x11   : > { %568 = vmatpush.bf16.msra.mxu0 %v1717_v2  ;;  %v1707_v13 = vld [vmem:[%s2302_s1 + $0x20] sm:$0xff]  ;;  %v1706_v20 = vld [vmem:[%s2302_s1 + $0x18] sm:$0xff]  ;;  %v1941_v21 = vld [vmem:[%s1917_s28 + $0xc] sm:$0x7]  ;;  %v419_v24 = vrot.slane %v1935_v19, 2  ;;  %vm659_vm12 = vcmask 1044484  }
  0x12   : > { %639 = vmatpush.bf16.msra.mxu1 %v1709_v3  ;;  %v1723_v15 = vld [vmem:[%s2302_s1 + $0xa0] sm:$0xff]  ;;  %v420_v25 = vrot.slane %v1941_v21, 2  ;;  %v1722_v26 = vld [vmem:[%s2302_s1 + $0x98] sm:$0xff]  ;;  %v1713_v36 = vld [vmem:[%s2302_s1 + $0x50] sm:$0xff]  ;;  %vm661_vm14 = vcmask 1046534   ;;  %s1702_s20 = sshll.u32 %s2319_s15, 3 }
  0x13   : > { %741 = vmatpush.bf16.msra.mxu2 %v1725_v6  ;;  %v1731_v16 = vld [vmem:[%s2302_s1 + $0xe0] sm:$0xff]  ;;  %v1730_v31 = vld [vmem:[%s2302_s1 + $0xd8] sm:$0xff]  ;;  %v1973_v34 = vsel %vm421_vm0, %v1935_v19, %v419_v24  ;;  %v1977_v35 = vsel %vm425_vm2, %v1935_v19, %v419_v24  ;;  %v1705_v37 = vld [vmem:[%s2302_s1 + $0x10] sm:$0xff]  ;;  %s262_s23 = scalar_lea.vmem %s2305_s4, %s1702_s20 }
  0x14   : > { %815 = vmatpush.bf16.msra.mxu3 %v1733_v7  ;;  %v1929_v17 = vld [vmem:[%s1917_s28] sm:$0x7]  ;;  %v1932_v18 = vld [vmem:[%s1917_s28 + $0x4] sm:$0x7]  ;;  %v440_v38 = vrot.slane %v1977_v35, 2  ;;  %v1988_v39 = vsel %vm421_vm0, %v1941_v21, %v420_v25  ;;  %v1992_v40 = vsel %vm425_vm2, %v1941_v21, %v420_v25  ;;  %vm449_vm5 = vmor %vm447_vm1, %vm448_vm3  ;;  %v480_v50 = vshrl.u32 %v1973_v34, 16 }
  0x15   : > { %569 = vmatpush.bf16.msra.mxu0 %v1716_v8  ;;  %v417_v22 = vrot.slane %v1929_v17, 2  ;;  %v418_v23 = vrot.slane %v1932_v18, 2  ;;  %v446_v42 = vrot.slane %v1992_v40, 2  ;;  %v1721_v46 = vld [vmem:[%s2302_s1 + $0x90] sm:$0xff]  ;;  %vm2013_vm6 = vmor %vm449_vm5, %vm450_vm4  ;;  %v483_v55 = vshll.u32 %v1973_v34, 16  ;;  %v1712_v56 = vld [vmem:[%s2302_s1 + $0x48] sm:$0xff] }
  0x16   : > { %640 = vmatpush.bf16.msra.mxu1 %v1708_v9  ;;  %v1729_v51 = vld [vmem:[%s2302_s1 + $0xd0] sm:$0xff]  ;;  %v1704_v57 = vld [vmem:[%s2302_s1 + $0x8] sm:$0xff]  ;;  %v482_v60 = vrot.slane %v480_v50, 6  ;;  %v489_v61 = vshll.u32 %v440_v38, 16  ;;  %v493_v0 = vshrl.u32 %v1988_v39, 16  ;;  %v496_v1 = vshll.u32 %v1988_v39, 16  ;;  %vm2034_vm8 = vmor %vm2013_vm6, %vm452_vm7 }
  0x17   : > { %742 = vmatpush.bf16.msra.mxu2 %v1724_v10  ;;  %v1952_v27 = vsel %vm421_vm0, %v1929_v17, %v417_v22  ;;  %v1956_v28 = vsel %vm425_vm2, %v1929_v17, %v417_v22  ;;  %v1960_v29 = vsel %vm421_vm0, %v1932_v18, %v418_v23  ;;  %v1964_v30 = vsel %vm425_vm2, %v1932_v18, %v418_v23  ;;  %v1720_v2 = vld [vmem:[%s2302_s1 + $0x88] sm:$0xff]  ;;  %v1739_v50 = vld [vmem:[%s2302_s1 + $0x120] sm:$0xff]  ;;  %vm658_vm11 = vmor %vm656_vm9, %vm657_vm10 }
  0x18   : > { %816 = vmatpush.bf16.msra.mxu3 %v1732_v11  ;;  %v428_v32 = vrot.slane %v1956_v28, 2  ;;  %v434_v33 = vrot.slane %v1964_v30, 2  ;;  %v454_v41 = vshrl.u32 %v1952_v27, 16  ;;  %v457_v43 = vshll.u32 %v1952_v27, 16  ;;  %v1728_v8 = vld [vmem:[%s2302_s1 + $0xc8] sm:$0xff]  ;;  %v1747_v52 = vld [vmem:[%s2302_s1 + $0x160] sm:$0xff]  ;;  %vm2105_vm13 = vmor %vm658_vm11, %vm659_vm12 }
  0x19   : > { %570 = vmatpush.bf16.msra.mxu0 %v1715_v12  ;;  %v467_v45 = vshrl.u32 %v1960_v29, 16  ;;  %v470_v48 = vshll.u32 %v1960_v29, 16  ;;  %v485_v63 = vrot.slane %v483_v55, 7  ;;  %v491_v6 = vrot.slane %v489_v61, 7  ;;  %v1766_v55 = vld [vmem:[%s2302_s1 + $0x1f8] sm:$0xff]  ;;  %vm2133_vm15 = vmor %vm2105_vm13, %vm661_vm14 }
  0x1a   : > { %641 = vmatpush.bf16.msra.mxu1 %v1707_v13  ;;  %v463_v44 = vshll.u32 %v428_v32, 16  ;;  %v456_v47 = vrot.slane %v454_v41, 6  ;;  %v476_v49 = vshll.u32 %v434_v33, 16  ;;  %v459_v53 = vrot.slane %v457_v43, 7  ;;  %v1711_v13 = vld [vmem:[%s2302_s1 + $0x40] sm:$0xff]  ;;  %v1741_v43 = vld [vmem:[%s2302_s1 + $0x130] sm:$0xff] }
  0x1b   : > { %743 = vmatpush.bf16.msra.mxu2 %v1723_v15  ;;  %v469_v54 = vrot.slane %v467_v45, 6  ;;  %v472_v59 = vrot.slane %v470_v48, 7  ;;  %v502_v7 = vshll.u32 %v446_v42, 16  ;;  %v486_v10 = vor.u32 %v485_v63, %v482_v60  ;;  %v1740_v48 = vld [vmem:[%s2302_s1 + $0x128] sm:$0xff]  ;;  %v1765_v60 = vld [vmem:[%s2302_s1 + $0x1f0] sm:$0xff] }
  0x1c   : > { %817 = vmatpush.bf16.msra.mxu3 %v1731_v16  ;;  %v465_v58 = vrot.slane %v463_v44, 7  ;;  %v460_v62 = vor.u32 %v459_v53, %v456_v47  ;;  %v478_v5 = vrot.slane %v476_v49, 7  ;;  %v495_v11 = vrot.slane %v493_v0, 6  ;;  %v1742_v16 = vld [vmem:[%s2302_s1 + $0x138] sm:$0xff]  ;;  %v1749_v44 = vld [vmem:[%s2302_s1 + $0x170] sm:$0xff]  ;;  %v1748_v49 = vld [vmem:[%s2302_s1 + $0x168] sm:$0xff] }
  0x1d   : > { %571 = vmatpush.bf16.msra.mxu0 %v1714_v14  ;;  %v473_v4 = vor.u32 %v472_v59, %v469_v54  ;;  %v498_v12 = vrot.slane %v496_v1, 7  ;;  %v1703_v14 = vld [vmem:[%s2302_s1] sm:$0xff]  ;;  %v487_v23 = vrot.slane %v486_v10, 2  ;;  %v504_v25 = vrot.slane %v502_v7, 7  ;;  %v1757_v47 = vld [vmem:[%s2302_s1 + $0x1b0] sm:$0xff]  ;;  %v1756_v54 = vld [vmem:[%s2302_s1 + $0x1a8] sm:$0xff] }
  0x1e   : > { %642 = vmatpush.bf16.msra.mxu1 %v1706_v20  ;;  %v461_v9 = vrot.slane %v460_v62, 2  ;;  %v1750_v20 = vld [vmem:[%s2302_s1 + $0x178] sm:$0xff]  ;;  %v1755_v59 = vld [vmem:[%s2302_s1 + $0x1a0] sm:$0xff]  ;;  %v669_v28 = vrot.slane %v434_v33, 7  ;;  %v673_v62 = vrot.slane %v440_v38, 7  ;;  %v1473_v0 = vrot.slane %v1988_v39, 9 }
  0x1f   : > { %744 = vmatpush.bf16.msra.mxu2 %v1722_v26  ;;  %v474_v15 = vrot.slane %v473_v4, 2  ;;  %v499_v24 = vor.u32 %v498_v12, %v495_v11  ;;  %v1719_v26 = vld [vmem:[%s2302_s1 + $0x80] sm:$0xff]  ;;  %v2144_v63 = vld [vmem:[%s1917_s28 + $0x10] sm:$0x7]  ;;  %v677_v1 = vrot.slane %v446_v42, 7  ;;  %v1764_v38 = vld [vmem:[%s2302_s1 + $0x1e8] sm:$0xff] }
  0x20   : > { %818 = vmatpush.bf16.msra.mxu3 %v1730_v31  ;;  %v466_v22 = vsel %vm2034_vm8, %v461_v9, %v465_v58  ;;  %v665_v58 = vrot.slane %v428_v32, 7  ;;  %v1472_v32 = vrot.slane %v1973_v34, 9  ;;  %v1745_v33 = vld [vmem:[%s2302_s1 + $0x150] sm:$0xff]  ;;  %v1754_v34 = vld [vmem:[%s2302_s1 + $0x198] sm:$0xff]  ;;  %v831_v39 = vrot.slane %v2144_v63, 2  ;;  %v1736_v4 = vld [vmem:[%s2302_s1 + $0x108] sm:$0xff] }
  0x21   : > { %572 = vmatpush.bf16.msra.mxu0 %v1713_v36  ;;  %v2062_v31 = vsel %vm2034_vm8, %v474_v15, %v478_v5  ;;  %507 = vst [vmem:[#allocation1] ss:$4 sm:$0xff] %v466_v22  ;;  %v1758_v36 = vld [vmem:[%s2302_s1 + $0x1b8] sm:$0xff]  ;;  %v500_v41 = vrot.slane %v499_v24, 2  ;;  %v1744_v5 = vld [vmem:[%s2302_s1 + $0x148] sm:$0xff]  ;;  %v1753_v7 = vld [vmem:[%s2302_s1 + $0x190] sm:$0xff] }
  0x22   : > { %643 = vmatpush.bf16.msra.mxu1 %v1705_v37  ;;  %v2069_v37 = vsel %vm2034_vm8, %v487_v23, %v491_v6  ;;  %510 = vst [vmem:[#allocation1 + $0x1] ss:$4 sm:$0xff] %v2062_v31  ;;  %v2170_v42 = vsel %vm2133_vm15, %v1472_v32, %v673_v62  ;;  %v2186_v6 = vsel %vm421_vm0, %v2144_v63, %v831_v39  ;;  %v1735_v9 = vld [vmem:[%s2302_s1 + $0x100] sm:$0xff]  ;;  %v1774_v10 = vld [vmem:[%s2302_s1 + $0x238] sm:$0xff]  ;;  %v2212_v24 = vld [vmem:[%s1917_s28 + $0x14] sm:$0x7] }
  0x23   : > { %745 = vmatpush.bf16.msra.mxu2 %v1721_v46  ;;  %513 = vst [vmem:[#allocation1 + $0x2] ss:$4 sm:$0xff] %v2069_v37  ;;  %v2081_v45 = vsel %vm2034_vm8, %v500_v41, %v504_v25  ;;  %v1727_v46 = vld [vmem:[%s2302_s1 + $0xc0] sm:$0xff]  ;;  %v837_v11 = vshrl.u32 %v2186_v6, 16  ;;  %v840_v12 = vshll.u32 %v2186_v6, 16  ;;  %v1772_v41 = vld [vmem:[%s2302_s1 + $0x228] sm:$0xff] }
  0x24   : > { %819 = vmatpush.bf16.msra.mxu3 %v1729_v51  ;;  %516 = vst [vmem:[#allocation1 + $0x3] ss:$4 sm:$0xff] %v2081_v45  ;;  %v1770_v32 = vld [vmem:[%s2302_s1 + $0x218] sm:$0xff]  ;;  %v1759_v62 = vld [vmem:[%s2302_s1 + $0x1c0] sm:$0xff] }
  0x25   : > { %573 = vmatpush.bf16.msra.mxu0 %v1712_v56  ;;  %v1746_v56 = vld [vmem:[%s2302_s1 + $0x158] sm:$0xff]  ;;  %v839_v15 = vrot.slane %v837_v11, 6 }
  0x26   : > { %644 = vmatpush.bf16.msra.mxu1 %v1704_v57  ;;  %v1470_v57 = vrot.slane %v1952_v27, 9  ;;  %v1471_v27 = vrot.slane %v1960_v29, 9  ;;  %v1737_v29 = vld [vmem:[%s2302_s1 + $0x110] sm:$0xff] }
  0x27   : > { %746 = vmatpush.bf16.msra.mxu2 %v1720_v2  ;;  %v2174_v2 = vsel %vm2133_vm15, %v1473_v0, %v677_v1  ;;  %v1769_v0 = vld [vmem:[%s2302_s1 + $0x210] sm:$0xff]  ;;  %v1570_v1 = vrot.slane %v2186_v6, 9 }
  0x28   : > { %820 = vmatpush.bf16.msra.mxu3 %v1728_v8  ;;  %v666_v30 = vsel %vm2133_vm15, %v1470_v57, %v665_v58  ;;  %v2162_v35 = vsel %vm2133_vm15, %v1471_v27, %v669_v28  ;;  %v1763_v8 = vld [vmem:[%s2302_s1 + $0x1e0] sm:$0xff]  ;;  %v1760_v28 = vld [vmem:[%s2302_s1 + $0x1c8] sm:$0xff] }
  0x29   : > { %574 = vmatpush.bf16.msra.mxu0 %v1711_v13  ;;  %v1743_v13 = vld [vmem:[%s2302_s1 + $0x140] sm:$0xff] }
  0x2a   : > { %645 = vmatpush.bf16.msra.mxu1 %v1703_v14  ;;  %v834_v14 = vsel %vm425_vm2, %v2144_v63, %v831_v39  ;;  %v1768_v39 = vld [vmem:[%s2302_s1 + $0x208] sm:$0xff] }
  0x2b   : > { %747 = vmatpush.bf16.msra.mxu2 %v1719_v26  ;;  %v517_v51 = vld.sshfl [vmem:[#allocation1] sm:$0xff pattern:$0x73625140]  ;;  %v836_v23 = vrot.slane %v834_v14, 2  ;;  %v1752_v26 = vld [vmem:[%s2302_s1 + $0x188] sm:$0xff] }
  0x2c   : > { %821 = vmatpush.bf16.msra.mxu3 %v1727_v46  ;;  %575 = vmatmul.bf16.vlgmr.msra.gmra.mxu0 %v517_v51  ;;  %581 = vst [vmem:[#allocation1] ss:$4 sm:$0xff] %v1929_v17  ;;  %v1738_v17 = vld [vmem:[%s2302_s1 + $0x118] sm:$0xff]  ;;  %v1761_v46 = vld [vmem:[%s2302_s1 + $0x1d0] sm:$0xff]  ;;  %v1771_v51 = vld [vmem:[%s2302_s1 + $0x220] sm:$0xff] }
  0x2d   : > { %908 = vmatpush.bf16.msrb.mxu0 %v1742_v16  ;;  %583 = vst [vmem:[#allocation1 + $0x1] ss:$4 sm:$0xff] %v1932_v18  ;;  %v842_v16 = vrot.slane %v840_v12, 7 }
  0x2e   : > { %987 = vmatpush.bf16.msrb.mxu1 %v1750_v20  ;;  %585 = vst [vmem:[#allocation1 + $0x2] ss:$4 sm:$0xff] %v1935_v19  ;;  %v1773_v20 = vld [vmem:[%s2302_s1 + $0x230] sm:$0xff] }
  0x2f   : > { %1061 = vmatpush.bf16.msrb.mxu2 %v1758_v36  ;;  %587 = vst [vmem:[#allocation1 + $0x3] ss:$4 sm:$0xff] %v1941_v21  ;;  %v843_v25 = vor.u32 %v842_v16, %v839_v15  ;;  %v1762_v36 = vld [vmem:[%s2302_s1 + $0x1d8] sm:$0xff] }
  0x30   : > { %1155 = vmatpush.bf16.msrb.mxu3 %v1766_v55 }
  0x31   : > { %909 = vmatpush.bf16.msrb.mxu0 %v1741_v43  ;;  %v846_v43 = vshll.u32 %v836_v23, 16 }
  0x32   : > { %988 = vmatpush.bf16.msrb.mxu1 %v1749_v44  ;;  %v1751_v44 = vld [vmem:[%s2302_s1 + $0x180] sm:$0xff] }
  0x33   : > { %1062 = vmatpush.bf16.msrb.mxu2 %v1757_v47  ;;  %v848_v53 = vrot.slane %v846_v43, 7 }
  0x34   : > { %1156 = vmatpush.bf16.msrb.mxu3 %v1765_v60 }
  0x35   : > { %910 = vmatpush.bf16.msrb.mxu0 %v1740_v48 }
  0x36   : > { %989 = vmatpush.bf16.msrb.mxu1 %v1748_v49  ;;  %v588_v40 = vld.sshfl [vmem:[#allocation1] sm:$0xff pattern:$0x73625140] }
  0x37   : > { %1063 = vmatpush.bf16.msrb.mxu2 %v1756_v54  ;;  %680 = vst [vmem:[#allocation1] ss:$4 sm:$0xff] %v666_v30  ;;  %646 = vmatmul.bf16.vlgmr.msra.gmra.mxu1 %v588_v40 }
  0x38   : > { %683 = vst [vmem:[#allocation1 + $0x1] ss:$4 sm:$0xff] %v2162_v35  ;;  %1157 = vmatpush.bf16.msrb.mxu3 %v1764_v38 }
  0x39   : > { %911 = vmatpush.bf16.msrb.mxu0 %v1739_v50  ;;  %686 = vst [vmem:[#allocation1 + $0x2] ss:$4 sm:$0xff] %v2170_v42  ;;  %v844_v50 = vrot.slane %v843_v25, 2 }
  0x3a   : > { %990 = vmatpush.bf16.msrb.mxu1 %v1747_v52  ;;  %689 = vst [vmem:[#allocation1 + $0x3] ss:$4 sm:$0xff] %v2174_v2 }
  0x3b   : > { %1064 = vmatpush.bf16.msrb.mxu2 %v1755_v59  ;;  %v849_v59 = vsel %vm2034_vm8, %v844_v50, %v848_v53 }
  0x3c   : > { %1158 = vmatpush.bf16.msrb.mxu3 %v1763_v8 }
  0x3d   : > { %912 = vmatpush.bf16.msrb.mxu0 %v1738_v17 }
  0x3e   : > { %991 = vmatpush.bf16.msrb.mxu1 %v1746_v56 }
  0x3f   : > { %1065 = vmatpush.bf16.msrb.mxu2 %v1754_v34 }
  0x40   : > { %1159 = vmatpush.bf16.msrb.mxu3 %v1762_v36 }
  0x41   : > { %913 = vmatpush.bf16.msrb.mxu0 %v1737_v29  ;;  %v690_v22 = vld.sshfl [vmem:[#allocation1] sm:$0xff pattern:$0x73625140]  ;;  %v927_v29 = vrot.slane %v836_v23, 7 }
  0x42   : > { %992 = vmatpush.bf16.msrb.mxu1 %v1745_v33  ;;  %748 = vmatmul.bf16.vlgmr.msra.gmra.mxu2 %v690_v22  ;;  %756 = vst [vmem:[#allocation1] ss:$4 sm:$0xff] %v1932_v18  ;;  %v1078_v18 = vrot.slane %v2212_v24, 2 }
  0x43   : > { %1066 = vmatpush.bf16.msrb.mxu2 %v1753_v7  ;;  %758 = vst [vmem:[#allocation1 + $0x1] ss:$4 sm:$0xff] %v1935_v19  ;;  %v928_v34 = vsel %vm2133_vm15, %v1570_v1, %v927_v29 }
  0x44   : > { %760 = vst [vmem:[#allocation1 + $0x2] ss:$4 sm:$0xff] %v1941_v21  ;;  %v1080_v47 = vsel %vm421_vm0, %v2212_v24, %v1078_v18  ;;  %v1081_v52 = vsel %vm425_vm2, %v2212_v24, %v1078_v18  ;;  %1160 = vmatpush.bf16.msrb.mxu3 %v1761_v46 }
  0x45   : > { %914 = vmatpush.bf16.msrb.mxu0 %v1736_v4  ;;  %763 = vst [vmem:[#allocation1 + $0x3] ss:$4 sm:$0xff] %v2144_v63  ;;  %v1084_v48 = vshrl.u32 %v1080_v47, 16  ;;  %v1087_v49 = vshll.u32 %v1080_v47, 16  ;;  %v1083_v54 = vrot.slane %v1081_v52, 2  ;;  %v1667_v30 = vrot.slane %v1080_v47, 9 }
  0x46   : > { %993 = vmatpush.bf16.msrb.mxu1 %v1744_v5  ;;  %v1801_v47 = vld [vmem:[%s2304_s3] ss:$0 sm:$0xff] }
  0x47   : > { %1067 = vmatpush.bf16.msrb.mxu2 %v1752_v26  ;;  %v1086_v55 = vrot.slane %v1084_v48, 6  ;;  %v1089_v17 = vrot.slane %v1087_v49, 7  ;;  %v1093_v57 = vshll.u32 %v1083_v54, 16  ;;  %v1174_v33 = vrot.slane %v1083_v54, 7 }
  0x48   : > { %1161 = vmatpush.bf16.msrb.mxu3 %v1760_v28 }
  0x49   : > { %915 = vmatpush.bf16.msrb.mxu0 %v1735_v9  ;;  %v1090_v56 = vor.u32 %v1089_v17, %v1086_v55  ;;  %v1095_v27 = vrot.slane %v1093_v57, 7  ;;  %v1175_v38 = vsel %vm2133_vm15, %v1667_v30, %v1174_v33 }
  0x4a   : > { %994 = vmatpush.bf16.msrb.mxu1 %v1743_v13 }
  0x4b   : > { %1068 = vmatpush.bf16.msrb.mxu2 %v1751_v44  ;;  %v1091_v60 = vrot.slane %v1090_v56, 2 }
  0x4c   : > { %v764_v58 = vld.sshfl [vmem:[#allocation1] sm:$0xff pattern:$0x73625140]  ;;  %1162 = vmatpush.bf16.msrb.mxu3 %v1759_v62 }
  0x4d   : > { %1234 = vmatpush.bf16.msra.mxu0 %v1774_v10  ;;  %822 = vmatmul.bf16.vlgmr.msra.gmra.mxu3 %v764_v58  ;;  %850 = vst [vmem:[#allocation1] ss:$4 sm:$0xff] %v2062_v31  ;;  %v1096_v31 = vsel %vm2034_vm8, %v1091_v60, %v1095_v27 }
  0x4e   : > { %852 = vst [vmem:[#allocation1 + $0x1] ss:$4 sm:$0xff] %v2069_v37 }
  0x4f   : > { %854 = vst [vmem:[#allocation1 + $0x2] ss:$4 sm:$0xff] %v2081_v45 }
  0x50   : > { %857 = vst [vmem:[#allocation1 + $0x3] ss:$4 sm:$0xff] %v849_v59 }
  0x51   : > { %1235 = vmatpush.bf16.msra.mxu0 %v1773_v20 }
  0x55   : > { %1236 = vmatpush.bf16.msra.mxu0 %v1772_v41  ;;  %v1800_v41 = vld [vmem:[%s2303_s2] ss:$0 sm:$0xff] }
  0x57   : > { %v858_v3 = vld.sshfl [vmem:[#allocation1] sm:$0xff pattern:$0x73625140] }
  0x58   : > { %916 = vmatmul.bf16.vlgmr.msrb.gmra.mxu0 %v858_v3  ;;  %929 = vst [vmem:[#allocation1] ss:$4 sm:$0xff] %v2162_v35  ;;  %v1767_v35 = vld [vmem:[%s2302_s1 + $0x200] sm:$0xff] }
  0x59   : > { %1237 = vmatpush.bf16.msra.mxu0 %v1771_v51  ;;  %931 = vst [vmem:[#allocation1 + $0x1] ss:$4 sm:$0xff] %v2170_v42 }
  0x5a   : > { %933 = vst [vmem:[#allocation1 + $0x2] ss:$4 sm:$0xff] %v2174_v2 }
  0x5b   : > { %936 = vst [vmem:[#allocation1 + $0x3] ss:$4 sm:$0xff] %v928_v34 }
  0x5d   : > { %1238 = vmatpush.bf16.msra.mxu0 %v1770_v32 }
  0x61   : > { %1239 = vmatpush.bf16.msra.mxu0 %v1769_v0 }
  0x62   : > { %v937_v40 = vld.sshfl [vmem:[#allocation1] sm:$0xff pattern:$0x73625140] }
  0x63   : > { %995 = vmatmul.bf16.vlgmr.msrb.gmra.mxu1 %v937_v40  ;;  %1003 = vst [vmem:[#allocation1] ss:$4 sm:$0xff] %v1935_v19 }
  0x64   : > { %1005 = vst [vmem:[#allocation1 + $0x1] ss:$4 sm:$0xff] %v1941_v21 }
  0x65   : > { %1240 = vmatpush.bf16.msra.mxu0 %v1768_v39  ;;  %1007 = vst [vmem:[#allocation1 + $0x2] ss:$4 sm:$0xff] %v2144_v63 }
  0x66   : > { %1010 = vst [vmem:[#allocation1 + $0x3] ss:$4 sm:$0xff] %v2212_v24 }
  0x69   : > { %1241 = vmatpush.bf16.msra.mxu0 %v1767_v35 }
  0x6d   : > { %v1011_v61 = vld.sshfl [vmem:[#allocation1] sm:$0xff pattern:$0x73625140] }
  0x6e   : > { %1069 = vmatmul.bf16.vlgmr.msrb.gmra.mxu2 %v1011_v61  ;;  %1097 = vst [vmem:[#allocation1] ss:$4 sm:$0xff] %v2069_v37 }
  0x6f   : > { %1099 = vst [vmem:[#allocation1 + $0x1] ss:$4 sm:$0xff] %v2081_v45 }
  0x70   : > { %1101 = vst [vmem:[#allocation1 + $0x2] ss:$4 sm:$0xff] %v849_v59 }
  0x71   : > { %1104 = vst [vmem:[#allocation1 + $0x3] ss:$4 sm:$0xff] %v1096_v31 }
  0x78   : > { %v1105_v4 = vld.sshfl [vmem:[#allocation1] sm:$0xff pattern:$0x73625140] }
  0x79   : > { %1163 = vmatmul.bf16.vlgmr.msrb.gmra.mxu3 %v1105_v4  ;;  %1176 = vst [vmem:[#allocation1] ss:$4 sm:$0xff] %v2170_v42 }
  0x7a   : > { %1178 = vst [vmem:[#allocation1 + $0x1] ss:$4 sm:$0xff] %v2174_v2 }
  0x7b   : > { %1180 = vst [vmem:[#allocation1 + $0x2] ss:$4 sm:$0xff] %v928_v34 }
  0x7c   : > { %1183 = vst [vmem:[#allocation1 + $0x3] ss:$4 sm:$0xff] %v1175_v38 }
  0x83   : > { %v1184_v19 = vld.sshfl [vmem:[#allocation1] sm:$0xff pattern:$0x73625140] }
  0x84   : > { %1242 = vmatmul.bf16.vlgmr.msra.gmra.mxu0 %v1184_v19 }
  0xa9   : > { %v576_v21 = vpop.f32.mrf.mxu0 }
  0xb1   : > { %v578_v6 = vpop.f32.mrf.mxu0 }
  0xb4   : > { %v647_v63 = vpop.f32.mrf.mxu1 }
  0xb5   : > { %v648_v7 = vadd.f32 %v647_v63, %v576_v21 }
  0xbc   : > { %v649_v8 = vpop.f32.mrf.mxu1 }
  0xbd   : > { %v650_v2 = vadd.f32 %v649_v8, %v578_v6 }
  0xc5   : > { %v749_v5 = vpop.f32.mrf.mxu2 }
  0xc6   : > { %v754_v45 = vadd.f32 %v749_v5, %v648_v7 }
  0xcd   : > { %v751_v9 = vpop.f32.mrf.mxu2 }
  0xce   : > { %v755_v20 = vadd.f32 %v751_v9, %v650_v2 }
  0xd0   : > { %v823_v37 = vpop.f32.mrf.mxu3 }
  0xd1   : > { %v828_v11 = vadd.f32 %v823_v37, %v754_v45 }
  0xd5   : > { %v917_v10 = vpop.f32.mrf.mxu0 }
  0xd6   : > { %v922_v42 = vadd.f32 %v917_v10, %v828_v11 }
  0xd8   : > { %v825_v12 = vpop.f32.mrf.mxu3 }
  0xd9   : > { %v829_v24 = vadd.f32 %v825_v12, %v755_v20 }
  0xdd   : > { %v919_v15 = vpop.f32.mrf.mxu0 }
  0xde   : > { %v923_v36 = vadd.f32 %v919_v15, %v829_v24 }
  0xe0   : > { %v996_v13 = vpop.f32.mrf.mxu1 }
  0xe1   : > { %v1001_v16 = vadd.f32 %v996_v13, %v922_v42 }
  0xe8   : > { %v998_v26 = vpop.f32.mrf.mxu1 }
  0xe9   : > { %v1002_v44 = vadd.f32 %v998_v26, %v923_v36 }
  0xf1   : > { %v1070_v14 = vpop.f32.mrf.mxu2 }
  0xf2   : > { %v1075_v22 = vadd.f32 %v1070_v14, %v1001_v16 }
  0xf9   : > { %v1072_v18 = vpop.f32.mrf.mxu2 }
  0xfa   : > { %v1076_v48 = vadd.f32 %v1072_v18, %v1002_v44 }
  0xfc   : > { %v1164_v23 = vpop.f32.mrf.mxu3 }
  0xfd   : > { %v1169_v25 = vadd.f32 %v1164_v23, %v1075_v22 }
 0x101   : > { %v1243_v43 = vpop.f32.mrf.mxu0 }
 0x102   : > { %v1248_v46 = vadd.f32 %v1243_v43, %v1169_v25 }
 0x104   : > { %v1254_v49 = vmul.f32 %v1800_v41, %v1248_v46  ;;  %v1166_v50 = vpop.f32.mrf.mxu3 }
 0x105   : > { %v1170_v52 = vadd.f32 %v1166_v50, %v1076_v48 }
 0x106   : > { %v1260_v51 = vadd.f32 %v1801_v47, %v1254_v49 }
 0x108   : > { %v1262_v53 = vmax.f32 %v1260_v51, 0.0 }
 0x109   : > { %v1245_v54 = vpop.f32.mrf.mxu0 }
 0x10a   : > { %v1266_v55 = vrot.slane %v1262_v53, 4  ;;  %v1270_v17 = vpack.c.bf16 %v1262_v53, %v1262_v53  ;;  %v1249_v56 = vadd.f32 %v1245_v54, %v1170_v52 }
 0x10c   : > { %v1271_v57 = vpack.c.bf16 %v1266_v55, %v1266_v55  ;;  %1274 = vst [vmem:[%s262_s23] sm:$0x3] %v1270_v17  ;;  %v1255_v58 = vmul.f32 %v1800_v41, %v1249_v56 }
 0x10e   : > { %1275 = vst [vmem:[%s262_s23 + $0x2] sm:$0x3] %v1271_v57  ;;  %v1261_v59 = vadd.f32 %v1801_v47, %v1255_v58 }
 0x110   : > { %v1263_v60 = vmax.f32 %v1261_v59, 0.0 }
 0x112   : > { %v1267_v27 = vrot.slane %v1263_v60, 4  ;;  %v1272_v28 = vpack.c.bf16 %v1263_v60, %v1263_v60 }
 0x114   : > { %v1273_v32 = vpack.c.bf16 %v1267_v27, %v1267_v27  ;;  %1276 = vst [vmem:[%s262_s23 + $0x4] sm:$0x3] %v1272_v28 }
 0x116   : > { %1277 = vst [vmem:[%s262_s23 + $0x6] sm:$0x3] %v1273_v32 }
 0x117 PF: > { %s14_s17 = sadd.s32 1, %s1824_s17   ;;  %s2314_s15 = smov %s1820_s16 }
 0x118   : > { %p11_p5 = scmp.ge.s32.totalorder %s14_s17, 4   ;;  %s2315_s16 = smov %s2317_s18 }
 0x11a   :  { %13 = sbr.rel (!%p11_p5) target bundleno = 2 (0x2), region = 102 }

// kernel: _lambda_.49
= control target key start
LH: loop header
LB: loop body
LE: loop exit
PB: predicated region body
PF: predicated region fallthrough
CT: control target
= control target key end

     0   :  { %s255_s1 = inlined_call_operand.vmem [shape: bf16[128,128], index: 1, kind: input, shape index: {}]   ;;  %s256_s2 = inlined_call_operand.vmem [shape: f32[1,128], index: 2, kind: input, shape index: {}]   ;;  %s257_s3 = inlined_call_operand.vmem [shape: f32[1,128], index: 3, kind: input, shape index: {}]   ;;  %s258_s0 = inlined_call_operand.vmem [shape: bf16[16,128], index: 0, kind: input, shape index: {}]   ;;  %s259_s4 = inlined_call_operand.vmem [shape: bf16[16,128], index: 4, kind: output, shape index: {}]  }
   0x1   :  { %v186_v0 = vld [vmem:[%s255_s1 + $0x38] sm:$0xff]  ;;  %v185_v1 = vld [vmem:[%s255_s1 + $0x30] sm:$0xff]  ;;  %v184_v2 = vld [vmem:[%s255_s1 + $0x28] sm:$0xff] }
   0x2   :  { %97 = vmatpush.bf16.msra.mxu0 %v186_v0  ;;  %v183_v3 = vld [vmem:[%s255_s1 + $0x20] sm:$0xff]  ;;  %v182_v4 = vld [vmem:[%s255_s1 + $0x18] sm:$0xff]  ;;  %v181_v5 = vld [vmem:[%s255_s1 + $0x10] sm:$0xff] }
   0x3   :  { %v180_v6 = vld [vmem:[%s255_s1 + $0x8] sm:$0xff]  ;;  %v179_v7 = vld [vmem:[%s255_s1] sm:$0xff] }
   0x4   :  { %v178_v8 = vld [vmem:[%s258_s0] sm:$0xff] }
   0x5   :  { %v192_v10 = vld [vmem:[%s256_s2] ss:$0 sm:$0xff] }
   0x6   :  { %98 = vmatpush.bf16.msra.mxu0 %v185_v1  ;;  %v193_v12 = vld [vmem:[%s257_s3] ss:$0 sm:$0xff] }
   0xa   :  { %99 = vmatpush.bf16.msra.mxu0 %v184_v2 }
   0xe   :  { %100 = vmatpush.bf16.msra.mxu0 %v183_v3 }
  0x12   :  { %101 = vmatpush.bf16.msra.mxu0 %v182_v4 }
  0x16   :  { %102 = vmatpush.bf16.msra.mxu0 %v181_v5 }
  0x1a   :  { %103 = vmatpush.bf16.msra.mxu0 %v180_v6 }
  0x1e   :  { %104 = vmatpush.bf16.msra.mxu0 %v179_v7 }
  0x21   :  { %105 = vmatmul.bf16.vlgmr.msra.gmra.mxu0 %v178_v8 }
  0x9e   :  { %v106_v9 = vpop.f32.mrf.mxu0 }
  0x9f   :  { %v124_v11 = vmul.f32 %v192_v10, %v106_v9 }
  0xa1   :  { %v130_v14 = vadd.f32 %v193_v12, %v124_v11 }
  0xa3   :  { %v132_v17 = vmax.f32 %v130_v14, 0.0 }
  0xa6   :  { %v108_v13 = vpop.f32.mrf.mxu0 }
  0xa7   :  { %v125_v15 = vmul.f32 %v192_v10, %v108_v13 }
  0xa9   :  { %v131_v16 = vadd.f32 %v193_v12, %v125_v15 }
  0xab   :  { %v133_v18 = vmax.f32 %v131_v16, 0.0 }
  0xad   :  { %v190_v19 = vpack.c.bf16 %v133_v18, %v132_v17 }
  0xaf   :  { %191 = vst [vmem:[%s259_s4] sm:$0xff] %v190_v19  }

// kernel: _lambda_.51
= control target key start
LH: loop header
LB: loop body
LE: loop exit
PB: predicated region body
PF: predicated region fallthrough
CT: control target
= control target key end

     0   :  { %s208_s6 = smov 0   ;;  %s225_s0 = inlined_call_operand.vmem [shape: bf16[2,2,1,256], index: 0, kind: input, shape index: {}]   ;;  %s226_s1 = inlined_call_operand.vmem [shape: bf16[2,1,128], index: 1, kind: output, shape index: {}]  }
   0x1 LB: > { %s174_s7 = sadd.s32 4294967295, %s196_s6   ;;  %p178_p0 = scmp.ge.s32.totalorder %s196_s6, 1  ;;  %s196_s6 = sphi %s208_s6, %s11_s6  }
   0x2   : > { %p86_p1 = scmp.lt.s32.totalorder %s196_s6, 3 }
   0x4   : > { %p87_p2 = pnand %p178_p0, %p86_p1 }
   0x5   : > { %p103_p3 = scmp.lt.s32.totalorder (!%p87_p2), %s174_s7, 1 }
   0x6   : > { %90 = sbr.rel (%p87_p2) target bundleno = 29 (0x1d), region = 24 }
   0xb   : > { %s228_s7 = smov (!%p103_p3, %s174_s7), 1  ;;  %vm121_vm0 = vcmask 1040384   ;;  %vm122_vm1 = vsmask.f32 256 }
   0xc   : > { %s179_s8 = sshll.u32 %s228_s7, 2  ;;  %s109_s14 = scalar_lea.vmem %s226_s1, %s228_s7  ;;  %vm123_vm2 = vmand %vm121_vm0, %vm122_vm1 }
   0xd   : > { %s106_s11 = scalar_lea.vmem %s225_s0, %s179_s8  ;;  %v124_v8 = vld [vmem:[%s109_s14] sm:$0x1] }
   0xe   : > { %v110_v0 = vld [vmem:[%s106_s11] sm:$0x3]  ;;  %v111_v1 = vld [vmem:[%s106_s11 + $0x2] sm:$0x3] }
   0xf   : > { %v112_v2 = vunpack.c.l.bf16 %v110_v0  ;;  %v113_v3 = vunpack.c.l.bf16 %v111_v1 }
  0x11   : > { %v114_v4 = vadd.f32 %v113_v3, %v112_v2 }
  0x13   : > { %v116_v5 = vrot.slane %v114_v4, 2 }
  0x15   : > { %v118_v6 = vadd.f32 %v116_v5, %v114_v4 }
  0x17   : > { %v119_v7 = vmul.f32 0.25, %v118_v6 }
  0x19   : > { %v120_v9 = vpack.c.bf16 %v119_v7, %v119_v7 }
  0x1b   : > { %v125_v10 = vsel %vm123_vm2, %v120_v9, %v124_v8 }
  0x1c   : > { %126 = vst [vmem:[%s109_s14] sm:$0x1] %v125_v10 }
  0x1d PF: > { %s11_s6 = sadd.s32 1, %s196_s6  }
  0x1e   : > { %p8_p4 = scmp.ge.s32.totalorder %s11_s6, 4  }
  0x20   :  { %10 = sbr.rel (!%p8_p4) target bundleno = 1 (0x1), region = 54 }

// kernel: _lambda_.50
= control target key start
LH: loop header
LB: loop body
LE: loop exit
PB: predicated region body
PF: predicated region fallthrough
CT: control target
= control target key end

     0   :  { %s1731_s15 = smov 0   ;;  %s1733_s16 = smov 0   ;;  %s2087_s0 = inlined_call_operand.vmem [shape: bf16[2,4,4,128], index: 0, kind: input, shape index: {}]   ;;  %s2088_s1 = inlined_call_operand.vmem [shape: bf16[3,3,128,128], index: 1, kind: input, shape index: {}]   ;;  %s2089_s2 = inlined_call_operand.vmem [shape: f32[1,128], index: 2, kind: input, shape index: {}]   ;;  %s2090_s3 = inlined_call_operand.vmem [shape: f32[1,128], index: 3, kind: input, shape index: {}]   ;;  %s2091_s4 = inlined_call_operand.vmem [shape: bf16[2,2,2,128], index: 4, kind: output, shape index: {}]  }
   0x1   :  { %s1735_s17 = smov 0  }
   0x2 LB: > { %s26_s18 = sadd.s32 1, %s1700_s16  ;;  %p1285_p0 = scmp.ge.s32.totalorder %s1704_s17, 1  ;;  %s1704_s17 = sphi %s1735_s17, %s14_s17   ;;  %s1700_s16 = sphi %s1733_s16, %s2095_s16   ;;  %s1696_s15 = sphi %s1731_s15, %s2094_s15  }
   0x3   : > { %p28_p1 = scmp.ge.s32.totalorder %s26_s18, 2  ;;  %p201_p2 = scmp.lt.s32.totalorder %s1704_s17, 3 }
   0x5   : > { %s2097_s18 = smov (%p28_p1, %s26_s18), 0  ;;  %p202_p3 = pnand %p1285_p0, %p201_p2 }
   0x6   : > { %p239_p4 = scmp.lt.s32.totalorder (!%p202_p3), %s1696_s15, 1 }
   0x7   : > { %205 = sbr.rel (%p202_p3) target bundleno = 275 (0x113), region = 36 }
   0xc   : > { %v1599_v0 = vld [vmem:[%s2088_s1 + $0x78] sm:$0xff]  ;;  %v1598_v3 = vld [vmem:[%s2088_s1 + $0x70] sm:$0xff]  ;;  %s2099_s15 = smov (!%p239_p4, %s1696_s15), 1  ;;  %v1597_v8 = vld [vmem:[%s2088_s1 + $0x68] sm:$0xff]  ;;  %vm417_vm0 = vcmask 1040384   ;;  %vm421_vm1 = vcmask 1042434  }
   0xd   : > { %v1591_v1 = vld [vmem:[%s2088_s1 + $0x38] sm:$0xff]  ;;  %533 = vmatpush.bf16.msra.mxu0 %v1599_v0  ;;  %v1590_v4 = vld [vmem:[%s2088_s1 + $0x30] sm:$0xff]  ;;  %v1589_v9 = vld [vmem:[%s2088_s1 + $0x28] sm:$0xff]  ;;  %s1583_s21 = sshll.u32 %s2099_s15, 3  ;;  %vm425_vm2 = vcmask 1041408   ;;  %vm427_vm3 = vcmask 1041409  }
   0xe   : > { %v1607_v2 = vld [vmem:[%s2088_s1 + $0xb8] sm:$0xff]  ;;  %599 = vmatpush.bf16.msra.mxu1 %v1591_v1  ;;  %v1606_v5 = vld [vmem:[%s2088_s1 + $0xb0] sm:$0xff]  ;;  %v1605_v10 = vld [vmem:[%s2088_s1 + $0xa8] sm:$0xff]  ;;  %s1800_s30 = scalar_lea.vmem %s2087_s0, %s1583_s21  ;;  %vm429_vm4 = vcmask 1043459   ;;  %vm431_vm5 = vcmask 1042433   ;;  %s1288_s20 = sshll.u32 %s2099_s15, 1 }
   0xf   : > { %671 = vmatpush.bf16.msra.mxu2 %v1607_v2  ;;  %v1615_v6 = vld [vmem:[%s2088_s1 + $0xf8] sm:$0xff]  ;;  %v1614_v7 = vld [vmem:[%s2088_s1 + $0xf0] sm:$0xff]  ;;  %v1613_v11 = vld [vmem:[%s2088_s1 + $0xe8] sm:$0xff]  ;;  %vm447_vm6 = vsmask.f32 256  ;;  %s260_s23 = scalar_lea.vmem %s2091_s4, %s1288_s20 }
  0x10   : > { %739 = vmatpush.bf16.msra.mxu3 %v1615_v6  ;;  %v1596_v12 = vld [vmem:[%s2088_s1 + $0x60] sm:$0xff]  ;;  %vm448_vm7 = vsmask.f32 1284  ;;  %v1595_v16 = vld [vmem:[%s2088_s1 + $0x58] sm:$0xff]  ;;  %vm450_vm8 = vsmask.f32 2312 }
  0x11   : > { %534 = vmatpush.bf16.msra.mxu0 %v1598_v3  ;;  %v1588_v13 = vld [vmem:[%s2088_s1 + $0x20] sm:$0xff]  ;;  %v1587_v17 = vld [vmem:[%s2088_s1 + $0x18] sm:$0xff]  ;;  %vm452_vm9 = vsmask.f32 3340  ;;  %vm454_vm10 = vsmask.f32 4368  ;;  %vm449_vm13 = vmor %vm447_vm6, %vm448_vm7 }
  0x12   : > { %600 = vmatpush.bf16.msra.mxu1 %v1590_v4  ;;  %v1604_v14 = vld [vmem:[%s2088_s1 + $0xa0] sm:$0xff]  ;;  %v1603_v18 = vld [vmem:[%s2088_s1 + $0x98] sm:$0xff]  ;;  %v1594_v21 = vld [vmem:[%s2088_s1 + $0x50] sm:$0xff]  ;;  %vm456_vm11 = vsmask.f32 5396 }
  0x13   : > { %672 = vmatpush.bf16.msra.mxu2 %v1606_v5  ;;  %v1612_v15 = vld [vmem:[%s2088_s1 + $0xe0] sm:$0xff]  ;;  %v1611_v19 = vld [vmem:[%s2088_s1 + $0xd8] sm:$0xff]  ;;  %v1586_v22 = vld [vmem:[%s2088_s1 + $0x10] sm:$0xff]  ;;  %vm458_vm12 = vsmask.f32 6424 }
  0x14   : > { %740 = vmatpush.bf16.msra.mxu3 %v1614_v7  ;;  %v1818_v20 = vld [vmem:[%s1800_s30] sm:$0x3]  ;;  %v1827_v23 = vld [vmem:[%s1800_s30 + $0x2] sm:$0x3]  ;;  %vm451_vm14 = vmor %vm449_vm13, %vm450_vm8  ;;  %vm460_vm15 = vsmask.f32 7452 }
  0x15   : > { %535 = vmatpush.bf16.msra.mxu0 %v1597_v8  ;;  %v411_v24 = vrot.slane %v1818_v20, 1  ;;  %v412_v25 = vrot.slane %v1818_v20, 2  ;;  %v413_v26 = vrot.slane %v1818_v20, 3  ;;  %v414_v27 = vrot.slane %v1827_v23, 1  ;;  %v1602_v30 = vld [vmem:[%s2088_s1 + $0x90] sm:$0xff]  ;;  %vm453_vm6 = vmor %vm451_vm14, %vm452_vm9  ;;  %v1593_v45 = vld [vmem:[%s2088_s1 + $0x48] sm:$0xff] }
  0x16   : > { %601 = vmatpush.bf16.msra.mxu1 %v1589_v9  ;;  %v415_v28 = vrot.slane %v1827_v23, 2  ;;  %v416_v29 = vrot.slane %v1827_v23, 3  ;;  %vm455_vm7 = vmor %vm453_vm6, %vm454_vm10  ;;  %v1610_v39 = vld [vmem:[%s2088_s1 + $0xd0] sm:$0xff]  ;;  %v1858_v40 = vld [vmem:[%s1800_s30 + $0x6] sm:$0x3] }
  0x17   : > { %673 = vmatpush.bf16.msra.mxu2 %v1605_v10  ;;  %v420_v31 = vsel %vm417_vm0, %v1818_v20, %v411_v24  ;;  %v424_v32 = vsel %vm421_vm1, %v412_v25, %v413_v26  ;;  %v428_v33 = vsel %vm427_vm3, %v1818_v20, %v411_v24  ;;  %v430_v34 = vsel %vm429_vm4, %v412_v25, %v413_v26  ;;  %vm457_vm8 = vmor %vm455_vm7, %vm456_vm11  ;;  %v1585_v46 = vld [vmem:[%s2088_s1 + $0x8] sm:$0xff]  ;;  %v1592_v59 = vld [vmem:[%s2088_s1 + $0x40] sm:$0xff] }
  0x18   : > { %741 = vmatpush.bf16.msra.mxu3 %v1613_v11  ;;  %v426_v35 = vsel %vm425_vm2, %v420_v31, %v424_v32  ;;  %v432_v36 = vsel %vm431_vm5, %v428_v33, %v430_v34  ;;  %v437_v37 = vsel %vm417_vm0, %v1827_v23, %v414_v27  ;;  %v440_v38 = vsel %vm421_vm1, %v415_v28, %v416_v29  ;;  %vm459_vm9 = vmor %vm457_vm8, %vm458_vm12  ;;  %v1601_v49 = vld [vmem:[%s2088_s1 + $0x88] sm:$0xff]  ;;  %v1584_v60 = vld [vmem:[%s2088_s1] sm:$0xff] }
  0x19   : > { %536 = vmatpush.bf16.msra.mxu0 %v1596_v12  ;;  %v434_v41 = vrot.slane %v432_v36, 1  ;;  %v441_v42 = vsel %vm425_vm2, %v437_v37, %v440_v38  ;;  %v442_v43 = vsel %vm427_vm3, %v1827_v23, %v414_v27  ;;  %v443_v44 = vsel %vm429_vm4, %v415_v28, %v416_v29  ;;  %vm1877_vm10 = vmor %vm459_vm9, %vm460_vm15  ;;  %v1609_v56 = vld [vmem:[%s2088_s1 + $0xc8] sm:$0xff]  ;;  %v1623_v63 = vld [vmem:[%s2088_s1 + $0x138] sm:$0xff] }
  0x1a   : > { %602 = vmatpush.bf16.msra.mxu1 %v1588_v13  ;;  %v444_v47 = vsel %vm431_vm5, %v442_v43, %v443_v44  ;;  %v462_v48 = vshrl.u32 %v426_v35, 16  ;;  %v470_v53 = vshrl.u32 %v441_v42, 16  ;;  %v986_v54 = vrot.slane %v1858_v40, 1  ;;  %v1600_v0 = vld [vmem:[%s2088_s1 + $0x80] sm:$0xff]  ;;  %v1631_v3 = vld [vmem:[%s2088_s1 + $0x178] sm:$0xff]  ;;  %v1622_v13 = vld [vmem:[%s2088_s1 + $0x130] sm:$0xff] }
  0x1b   : > { %674 = vmatpush.bf16.msra.mxu2 %v1604_v14  ;;  %v446_v50 = vrot.slane %v444_v47, 1  ;;  %v467_v52 = vshll.u32 %v434_v41, 16  ;;  %v987_v55 = vrot.slane %v1858_v40, 2  ;;  %v988_v61 = vrot.slane %v1858_v40, 3  ;;  %v1639_v4 = vld [vmem:[%s2088_s1 + $0x1b8] sm:$0xff]  ;;  %v1608_v7 = vld [vmem:[%s2088_s1 + $0xc0] sm:$0xff] }
  0x1c   : > { %742 = vmatpush.bf16.msra.mxu3 %v1612_v15  ;;  %v990_v62 = vsel %vm417_vm0, %v1858_v40, %v986_v54  ;;  %v995_v2 = vsel %vm427_vm3, %v1858_v40, %v986_v54  ;;  %v1647_v10 = vld [vmem:[%s2088_s1 + $0x1f8] sm:$0xff]  ;;  %v1630_v14 = vld [vmem:[%s2088_s1 + $0x170] sm:$0xff]  ;;  %v1637_v24 = vld [vmem:[%s2088_s1 + $0x1a8] sm:$0xff] }
  0x1d   : > { %537 = vmatpush.bf16.msra.mxu0 %v1595_v16  ;;  %v469_v57 = vsel %vm1877_vm10, %v462_v48, %v467_v52  ;;  %v475_v58 = vshll.u32 %v446_v50, 16  ;;  %v993_v5 = vsel %vm421_vm1, %v987_v55, %v988_v61  ;;  %v996_v6 = vsel %vm429_vm4, %v987_v55, %v988_v61  ;;  %v1638_v15 = vld [vmem:[%s2088_s1 + $0x1b0] sm:$0xff]  ;;  %v1645_v25 = vld [vmem:[%s2088_s1 + $0x1e8] sm:$0xff]  ;;  %v1620_v26 = vld [vmem:[%s2088_s1 + $0x120] sm:$0xff] }
  0x1e   : > { %603 = vmatpush.bf16.msra.mxu1 %v1587_v17  ;;  %479 = vst [vmem:[#allocation1] ss:$9 sm:$0xff] %v469_v57  ;;  %v994_v8 = vsel %vm425_vm2, %v990_v62, %v993_v5  ;;  %v997_v9 = vsel %vm431_vm5, %v995_v2, %v996_v6  ;;  %v1646_v17 = vld [vmem:[%s2088_s1 + $0x1f0] sm:$0xff]  ;;  %v1628_v27 = vld [vmem:[%s2088_s1 + $0x160] sm:$0xff]  ;;  %v1627_v32 = vld [vmem:[%s2088_s1 + $0x158] sm:$0xff] }
  0x1f   : > { %675 = vmatpush.bf16.msra.mxu2 %v1603_v18  ;;  %v1905_v1 = vsel %vm1877_vm10, %v470_v53, %v475_v58  ;;  %v999_v11 = vrot.slane %v997_v9, 1  ;;  %v1000_v12 = vshrl.u32 %v994_v8, 16  ;;  %v1636_v28 = vld [vmem:[%s2088_s1 + $0x1a0] sm:$0xff]  ;;  %v1635_v33 = vld [vmem:[%s2088_s1 + $0x198] sm:$0xff]  ;;  %v1618_v34 = vld [vmem:[%s2088_s1 + $0x110] sm:$0xff] }
  0x20   : > { %743 = vmatpush.bf16.msra.mxu3 %v1611_v19  ;;  %482 = vst [vmem:[#allocation1 + $0x1] ss:$9 sm:$0xff] %v1905_v1  ;;  %v1621_v19 = vld [vmem:[%s2088_s1 + $0x128] sm:$0xff]  ;;  %v1644_v29 = vld [vmem:[%s2088_s1 + $0x1e0] sm:$0xff]  ;;  %v1626_v36 = vld [vmem:[%s2088_s1 + $0x150] sm:$0xff] }
  0x21   : > { %538 = vmatpush.bf16.msra.mxu0 %v1594_v21  ;;  %v1005_v16 = vshll.u32 %v999_v11, 16  ;;  %v1983_v35 = vld [vmem:[%s1800_s30 + $0x4] sm:$0x3]  ;;  %v1634_v37 = vld [vmem:[%s2088_s1 + $0x190] sm:$0xff]  ;;  %v1617_v43 = vld [vmem:[%s2088_s1 + $0x108] sm:$0xff] }
  0x22   : > { %604 = vmatpush.bf16.msra.mxu1 %v1586_v22  ;;  %v1629_v22 = vld [vmem:[%s2088_s1 + $0x168] sm:$0xff]  ;;  %v755_v41 = vrot.slane %v1983_v35, 2  ;;  %v756_v42 = vrot.slane %v1983_v35, 3  ;;  %v1642_v44 = vld [vmem:[%s2088_s1 + $0x1d0] sm:$0xff]  ;;  %v1616_v50 = vld [vmem:[%s2088_s1 + $0x100] sm:$0xff] }
  0x23   : > { %676 = vmatpush.bf16.msra.mxu2 %v1602_v30  ;;  %v1940_v18 = vsel %vm1877_vm10, %v1000_v12, %v1005_v16  ;;  %v1619_v30 = vld [vmem:[%s2088_s1 + $0x118] sm:$0xff]  ;;  %v1633_v47 = vld [vmem:[%s2088_s1 + $0x188] sm:$0xff]  ;;  %v1624_v53 = vld [vmem:[%s2088_s1 + $0x140] sm:$0xff] }
  0x24   : > { %744 = vmatpush.bf16.msra.mxu3 %v1610_v39  ;;  %v754_v39 = vrot.slane %v1983_v35, 1  ;;  %v1655_v52 = vld [vmem:[%s2088_s1 + $0x238] sm:$0xff]  ;;  %v1632_v54 = vld [vmem:[%s2088_s1 + $0x180] sm:$0xff]  ;;  %v761_v57 = vsel %vm421_vm1, %v755_v41, %v756_v42  ;;  %v1654_v58 = vld [vmem:[%s2088_s1 + $0x230] sm:$0xff] }
  0x25   : > { %539 = vmatpush.bf16.msra.mxu0 %v1593_v45  ;;  %v1640_v51 = vld [vmem:[%s2088_s1 + $0x1c0] sm:$0xff]  ;;  %v1651_v6 = vld [vmem:[%s2088_s1 + $0x218] sm:$0xff]  ;;  %v1650_v9 = vld [vmem:[%s2088_s1 + $0x210] sm:$0xff] }
  0x26   : > { %605 = vmatpush.bf16.msra.mxu1 %v1585_v46  ;;  %v1625_v46 = vld [vmem:[%s2088_s1 + $0x148] sm:$0xff]  ;;  %v763_v48 = vsel %vm427_vm3, %v1983_v35, %v754_v39 }
  0x27   : > { %677 = vmatpush.bf16.msra.mxu2 %v1601_v49  ;;  %v483_v21 = vld [vmem:[#allocation1] sm:$0xff]  ;;  %v764_v49 = vsel %vm429_vm4, %v755_v41, %v756_v42 }
  0x28   : > { %745 = vmatpush.bf16.msra.mxu3 %v1609_v56  ;;  %546 = vst [vmem:[#allocation1] ss:$9 sm:$0xff] %v1818_v20  ;;  %v765_v55 = vsel %vm431_vm5, %v763_v48, %v764_v49  ;;  %v758_v56 = vsel %vm417_vm0, %v1983_v35, %v754_v39  ;;  %v1680_v41 = vld [vmem:[%s2089_s2] ss:$0 sm:$0xff] }
  0x29   : > { %540 = vmatpush.bf16.msra.mxu0 %v1592_v59  ;;  %548 = vst [vmem:[#allocation1 + $0x1] ss:$9 sm:$0xff] %v1827_v23  ;;  %v767_v59 = vrot.slane %v765_v55, 1  ;;  %v762_v61 = vsel %vm425_vm2, %v758_v56, %v761_v57 }
  0x2a   : > { %606 = vmatpush.bf16.msra.mxu1 %v1584_v60  ;;  %615 = vst [vmem:[#allocation1 + $0x10] sm:$0xff] %v1827_v23  ;;  %v768_v62 = vshrl.u32 %v762_v61, 16 }
  0x2b   : > { %678 = vmatpush.bf16.msra.mxu2 %v1600_v0 }
  0x2c   : > { %746 = vmatpush.bf16.msra.mxu3 %v1608_v7  ;;  %541 = vmatmul.bf16.vlgmr.msra.gmra.mxu0 %v483_v21 }
  0x2d   : > { %830 = vmatpush.bf16.msrb.mxu0 %v1623_v63  ;;  %v773_v63 = vshll.u32 %v767_v59, 16 }
  0x2e   : > { %903 = vmatpush.bf16.msrb.mxu1 %v1631_v3  ;;  %v1641_v3 = vld [vmem:[%s2088_s1 + $0x1c8] sm:$0xff] }
  0x2f   : > { %971 = vmatpush.bf16.msrb.mxu2 %v1639_v4  ;;  %v775_v0 = vsel %vm1877_vm10, %v768_v62, %v773_v63  ;;  %v1653_v4 = vld [vmem:[%s2088_s1 + $0x228] sm:$0xff] }
  0x30   : > { %1062 = vmatpush.bf16.msrb.mxu3 %v1647_v10  ;;  %v549_v31 = vld [vmem:[#allocation1] sm:$0xff] }
  0x31   : > { %831 = vmatpush.bf16.msrb.mxu0 %v1622_v13  ;;  %607 = vmatmul.bf16.vlgmr.msra.gmra.mxu1 %v549_v31  ;;  %612 = vst [vmem:[#allocation1] sm:$0xff] %v1818_v20  ;;  %v1643_v20 = vld [vmem:[%s2088_s1 + $0x1d8] sm:$0xff]  ;;  %v1648_v10 = vld [vmem:[%s2088_s1 + $0x200] sm:$0xff] }
  0x32   : > { %904 = vmatpush.bf16.msrb.mxu1 %v1630_v14  ;;  %v617_v38 = vld [vmem:[#allocation1 + $0x11] ss:$2 sm:$0xff] }
  0x33   : > { %972 = vmatpush.bf16.msrb.mxu2 %v1638_v15 }
  0x34   : > { %1063 = vmatpush.bf16.msrb.mxu3 %v1646_v17 }
  0x35   : > { %832 = vmatpush.bf16.msrb.mxu0 %v1621_v19 }
  0x36   : > { %905 = vmatpush.bf16.msrb.mxu1 %v1629_v22 }
  0x37   : > { %973 = vmatpush.bf16.msrb.mxu2 %v1637_v24 }
  0x38   : > { %1064 = vmatpush.bf16.msrb.mxu3 %v1645_v25  ;;  %v614_v45 = vld [vmem:[#allocation1 + $0x1] ss:$2 sm:$0xff] }
  0x39   : > { %833 = vmatpush.bf16.msrb.mxu0 %v1620_v26  ;;  %618 = vst [vmem:[#allocation1] ss:$9 sm:$0xff] %v614_v45 }
  0x3a   : > { %906 = vmatpush.bf16.msrb.mxu1 %v1628_v27  ;;  %620 = vst [vmem:[#allocation1 + $0x1] ss:$9 sm:$0xff] %v617_v38 }
  0x3b   : > { %974 = vmatpush.bf16.msrb.mxu2 %v1636_v28 }
  0x3c   : > { %1065 = vmatpush.bf16.msrb.mxu3 %v1644_v29 }
  0x3d   : > { %834 = vmatpush.bf16.msrb.mxu0 %v1619_v30 }
  0x3e   : > { %907 = vmatpush.bf16.msrb.mxu1 %v1627_v32 }
  0x3f   : > { %975 = vmatpush.bf16.msrb.mxu2 %v1635_v33 }
  0x40   : > { %1066 = vmatpush.bf16.msrb.mxu3 %v1643_v20 }
  0x41   : > { %835 = vmatpush.bf16.msrb.mxu0 %v1618_v34  ;;  %v621_v60 = vld [vmem:[#allocation1] sm:$0xff] }
  0x42   : > { %908 = vmatpush.bf16.msrb.mxu1 %v1626_v36  ;;  %679 = vmatmul.bf16.vlgmr.msra.gmra.mxu2 %v621_v60  ;;  %685 = vst [vmem:[#allocation1] ss:$9 sm:$0xff] %v1827_v23 }
  0x43   : > { %976 = vmatpush.bf16.msrb.mxu2 %v1634_v37  ;;  %688 = vst [vmem:[#allocation1 + $0x1] ss:$9 sm:$0xff] %v1983_v35 }
  0x44   : > { %1067 = vmatpush.bf16.msrb.mxu3 %v1642_v44  ;;  %v1681_v44 = vld [vmem:[%s2090_s3] ss:$0 sm:$0xff] }
  0x45   : > { %836 = vmatpush.bf16.msrb.mxu0 %v1617_v43 }
  0x46   : > { %909 = vmatpush.bf16.msrb.mxu1 %v1625_v46 }
  0x47   : > { %977 = vmatpush.bf16.msrb.mxu2 %v1633_v47 }
  0x48   : > { %1068 = vmatpush.bf16.msrb.mxu3 %v1641_v3 }
  0x49   : > { %837 = vmatpush.bf16.msrb.mxu0 %v1616_v50 }
  0x4a   : > { %910 = vmatpush.bf16.msrb.mxu1 %v1624_v53  ;;  %v689_v2 = vld [vmem:[#allocation1] sm:$0xff] }
  0x4b   : > { %978 = vmatpush.bf16.msrb.mxu2 %v1632_v54  ;;  %747 = vmatmul.bf16.vlgmr.msra.gmra.mxu3 %v689_v2  ;;  %776 = vst [vmem:[#allocation1] ss:$9 sm:$0xff] %v1905_v1  ;;  %v1652_v1 = vld [vmem:[%s2088_s1 + $0x220] sm:$0xff] }
  0x4c   : > { %779 = vst [vmem:[#allocation1 + $0x1] ss:$9 sm:$0xff] %v775_v0  ;;  %1069 = vmatpush.bf16.msrb.mxu3 %v1640_v51 }
  0x4d   : > { %1135 = vmatpush.bf16.msra.mxu0 %v1655_v52  ;;  %847 = vst [vmem:[#allocation1 + $0x10] sm:$0xff] %v1983_v35 }
  0x51   : > { %1136 = vmatpush.bf16.msra.mxu0 %v1654_v58 }
  0x53   : > { %v780_v5 = vld [vmem:[#allocation1] sm:$0xff] }
  0x54   : > { %838 = vmatmul.bf16.vlgmr.msrb.gmra.mxu0 %v780_v5  ;;  %844 = vst [vmem:[#allocation1] sm:$0xff] %v1827_v23  ;;  %v849_v7 = vld [vmem:[#allocation1 + $0x11] ss:$2 sm:$0xff]  ;;  %v1649_v23 = vld [vmem:[%s2088_s1 + $0x208] sm:$0xff] }
  0x55   : > { %1137 = vmatpush.bf16.msra.mxu0 %v1653_v4 }
  0x59   : > { %1138 = vmatpush.bf16.msra.mxu0 %v1652_v1 }
  0x5b   : > { %v846_v8 = vld [vmem:[#allocation1 + $0x1] ss:$2 sm:$0xff] }
  0x5c   : > { %850 = vst [vmem:[#allocation1] ss:$9 sm:$0xff] %v846_v8 }
  0x5d   : > { %1139 = vmatpush.bf16.msra.mxu0 %v1651_v6  ;;  %852 = vst [vmem:[#allocation1 + $0x1] ss:$9 sm:$0xff] %v849_v7 }
  0x61   : > { %1140 = vmatpush.bf16.msra.mxu0 %v1650_v9 }
  0x64   : > { %v853_v11 = vld [vmem:[#allocation1] sm:$0xff] }
  0x65   : > { %1141 = vmatpush.bf16.msra.mxu0 %v1649_v23  ;;  %911 = vmatmul.bf16.vlgmr.msrb.gmra.mxu1 %v853_v11  ;;  %917 = vst [vmem:[#allocation1] ss:$9 sm:$0xff] %v1983_v35 }
  0x66   : > { %920 = vst [vmem:[#allocation1 + $0x1] ss:$9 sm:$0xff] %v1858_v40 }
  0x69   : > { %1142 = vmatpush.bf16.msra.mxu0 %v1648_v10 }
  0x6d   : > { %v921_v12 = vld [vmem:[#allocation1] sm:$0xff] }
  0x6e   : > { %979 = vmatmul.bf16.vlgmr.msrb.gmra.mxu2 %v921_v12  ;;  %1008 = vst [vmem:[#allocation1] ss:$9 sm:$0xff] %v775_v0 }
  0x6f   : > { %1011 = vst [vmem:[#allocation1 + $0x1] ss:$9 sm:$0xff] %v1940_v18 }
  0x70   : > { %1079 = vst [vmem:[#allocation1 + $0x10] sm:$0xff] %v1858_v40 }
  0x76   : > { %v1012_v13 = vld [vmem:[#allocation1] sm:$0xff] }
  0x77   : > { %1070 = vmatmul.bf16.vlgmr.msrb.gmra.mxu3 %v1012_v13  ;;  %1076 = vst [vmem:[#allocation1] sm:$0xff] %v1983_v35  ;;  %v1081_v14 = vld [vmem:[#allocation1 + $0x11] ss:$2 sm:$0xff] }
  0x7e   : > { %v1078_v15 = vld [vmem:[#allocation1 + $0x1] ss:$2 sm:$0xff] }
  0x7f   : > { %1082 = vst [vmem:[#allocation1] ss:$9 sm:$0xff] %v1078_v15 }
  0x80   : > { %1084 = vst [vmem:[#allocation1 + $0x1] ss:$9 sm:$0xff] %v1081_v14 }
  0x87   : > { %v1085_v16 = vld [vmem:[#allocation1] sm:$0xff] }
  0x88   : > { %1143 = vmatmul.bf16.vlgmr.msra.gmra.mxu0 %v1085_v16 }
  0xa9   : > { %v542_v17 = vpop.f32.mrf.mxu0 }
  0xae   : > { %v608_v19 = vpop.f32.mrf.mxu1 }
  0xaf   : > { %v609_v22 = vadd.f32 %v608_v19, %v542_v17 }
  0xb1   : > { %v544_v21 = vpop.f32.mrf.mxu0 }
  0xb6   : > { %v610_v24 = vpop.f32.mrf.mxu1 }
  0xc5   : > { %v680_v25 = vpop.f32.mrf.mxu2 }
  0xc6   : > { %v684_v32 = vadd.f32 %v680_v25, %v609_v22 }
  0xcd   : > { %v682_v26 = vpop.f32.mrf.mxu2 }
  0xce   : > { %v748_v18 = vpop.f32.mrf.mxu3 }
  0xcf   : > { %v752_v33 = vadd.f32 %v748_v18, %v684_v32 }
  0xd1   : > { %v839_v27 = vpop.f32.mrf.mxu0 }
  0xd2   : > { %v843_v36 = vadd.f32 %v839_v27, %v752_v33 }
  0xd6   : > { %v750_v40 = vpop.f32.mrf.mxu3 }
  0xd9   : > { %v841_v28 = vpop.f32.mrf.mxu0 }
  0xe2   : > { %v912_v29 = vpop.f32.mrf.mxu1 }
  0xe3   : > { %v916_v37 = vadd.f32 %v912_v29, %v843_v36 }
  0xea   : > { %v914_v30 = vpop.f32.mrf.mxu1 }
  0xf1   : > { %v980_v31 = vpop.f32.mrf.mxu2 }
  0xf2   : > { %v984_v20 = vadd.f32 %v980_v31, %v916_v37 }
  0xf9   : > { %v982_v34 = vpop.f32.mrf.mxu2 }
  0xfa   : > { %v1071_v35 = vpop.f32.mrf.mxu3 }
  0xfb   : > { %v1075_v39 = vadd.f32 %v1071_v35, %v984_v20 }
 0x102   : > { %v1073_v38 = vpop.f32.mrf.mxu3 }
 0x105   : > { %v1144_v42 = vpop.f32.mrf.mxu0 }
 0x106   : > { %v1148_v43 = vadd.f32 %v1144_v42, %v1075_v39 }
 0x108   : > { %v1153_v45 = vmul.f32 %v1680_v41, %v1148_v43 }
 0x10a   : > { %v1158_v46 = vadd.f32 %v1681_v44, %v1153_v45 }
 0x10c   : > { %v1159_v47 = vmax.f32 %v1158_v46, 0.0 }
 0x10d   : > { %v1146_v48 = vpop.f32.mrf.mxu0 }
 0x10e   : > { %v1161_v49 = vrot.slane %v1159_v47, 2  ;;  %v1163_v50 = vpack.c.bf16 %v1159_v47, %v1159_v47 }
 0x110   : > { %v1164_v52 = vpack.c.bf16 %v1161_v49, %v1161_v49  ;;  %1165 = vst [vmem:[%s260_s23] sm:$0x1] %v1163_v50 }
 0x112   : > { %1166 = vst [vmem:[%s260_s23 + $0x1] sm:$0x1] %v1164_v52 }
 0x113 PF: > { %s14_s17 = sadd.s32 1, %s1704_s17   ;;  %s2094_s15 = smov %s1700_s16 }
 0x114   : > { %p11_p5 = scmp.ge.s32.totalorder %s14_s17, 4   ;;  %s2095_s16 = smov %s2097_s18 }
 0x116   :  { %13 = sbr.rel (!%p11_p5) target bundleno = 2 (0x2), region = 90 }

// kernel: _lambda_.55
= control target key start
LH: loop header
LB: loop body
LE: loop exit
PB: predicated region body
PF: predicated region fallthrough
CT: control target
= control target key end

     0   :  { %s594_s1 = inlined_call_operand.vmem [shape: bf16[128,384], index: 1, kind: input, shape index: {}]   ;;  %s595_s0 = inlined_call_operand.vmem [shape: bf16[16,128], index: 0, kind: input, shape index: {}]   ;;  %s596_s2 = inlined_call_operand.vmem [shape: f32[1,384], index: 2, kind: input, shape index: {}]   ;;  %s597_s3 = inlined_call_operand.vmem [shape: bf16[16,384], index: 3, kind: output, shape index: {}]  }
   0x1   :  { %v377_v0 = vld [vmem:[%s594_s1 + $0xa8] sm:$0xf]  ;;  %v410_v1 = vld [vmem:[%s594_s1 + $0xb0] sm:$0xf0]  ;;  %v409_v2 = vld [vmem:[%s594_s1 + $0xac] sm:$0xf] }
   0x2   :  { %v378_v3 = vor.u32 %v410_v1, %v377_v0  ;;  %v379_v4 = vld [vmem:[%s594_s1 + $0xb4] sm:$0xf0]  ;;  %v385_v5 = vld [vmem:[%s594_s1 + $0xb0] sm:$0xf]  ;;  %v411_v6 = vld [vmem:[%s594_s1 + $0xb8] sm:$0xf0] }
   0x3   :  { %v382_v7 = vor.u32 %v409_v2, %v379_v4  ;;  %v386_v8 = vor.u32 %v411_v6, %v385_v5  ;;  %v365_v9 = vld [vmem:[%s594_s1 + $0x90] sm:$0xf]  ;;  %v407_v10 = vld [vmem:[%s594_s1 + $0x98] sm:$0xf0]  ;;  %v406_v11 = vld [vmem:[%s594_s1 + $0x94] sm:$0xf] }
   0x4   :  { %198 = vmatpush.bf16.msra.mxu0 %v378_v3  ;;  %v366_v12 = vor.u32 %v407_v10, %v365_v9  ;;  %v367_v13 = vld [vmem:[%s594_s1 + $0x9c] sm:$0xf0]  ;;  %v373_v14 = vld [vmem:[%s594_s1 + $0x98] sm:$0xf]  ;;  %v408_v15 = vld [vmem:[%s594_s1 + $0xa0] sm:$0xf0] }
   0x5   :  { %212 = vmatpush.bf16.msra.mxu1 %v382_v7  ;;  %226 = vmatpush.bf16.msra.mxu2 %v386_v8  ;;  %v370_v16 = vor.u32 %v406_v11, %v367_v13  ;;  %v374_v17 = vor.u32 %v408_v15, %v373_v14  ;;  %v353_v18 = vld [vmem:[%s594_s1 + $0x78] sm:$0xf]  ;;  %v404_v19 = vld [vmem:[%s594_s1 + $0x80] sm:$0xf0]  ;;  %v403_v20 = vld [vmem:[%s594_s1 + $0x7c] sm:$0xf] }
   0x6   :  { %v355_v21 = vld [vmem:[%s594_s1 + $0x84] sm:$0xf0]  ;;  %v361_v22 = vld [vmem:[%s594_s1 + $0x80] sm:$0xf]  ;;  %v405_v23 = vld [vmem:[%s594_s1 + $0x88] sm:$0xf0]  ;;  %v354_v24 = vor.u32 %v404_v19, %v353_v18 }
   0x7   :  { %v358_v25 = vor.u32 %v403_v20, %v355_v21  ;;  %v362_v26 = vor.u32 %v405_v23, %v361_v22  ;;  %v341_v27 = vld [vmem:[%s594_s1 + $0x60] sm:$0xf]  ;;  %v401_v28 = vld [vmem:[%s594_s1 + $0x68] sm:$0xf0]  ;;  %v400_v29 = vld [vmem:[%s594_s1 + $0x64] sm:$0xf] }
   0x8   :  { %199 = vmatpush.bf16.msra.mxu0 %v366_v12  ;;  %v343_v30 = vld [vmem:[%s594_s1 + $0x6c] sm:$0xf0]  ;;  %v349_v31 = vld [vmem:[%s594_s1 + $0x68] sm:$0xf]  ;;  %v402_v32 = vld [vmem:[%s594_s1 + $0x70] sm:$0xf0]  ;;  %v342_v33 = vor.u32 %v401_v28, %v341_v27 }
   0x9   :  { %213 = vmatpush.bf16.msra.mxu1 %v370_v16  ;;  %227 = vmatpush.bf16.msra.mxu2 %v374_v17  ;;  %v346_v34 = vor.u32 %v400_v29, %v343_v30  ;;  %v350_v35 = vor.u32 %v402_v32, %v349_v31  ;;  %v329_v36 = vld [vmem:[%s594_s1 + $0x48] sm:$0xf]  ;;  %v398_v37 = vld [vmem:[%s594_s1 + $0x50] sm:$0xf0]  ;;  %v397_v38 = vld [vmem:[%s594_s1 + $0x4c] sm:$0xf] }
   0xa   :  { %v331_v39 = vld [vmem:[%s594_s1 + $0x54] sm:$0xf0]  ;;  %v337_v40 = vld [vmem:[%s594_s1 + $0x50] sm:$0xf]  ;;  %v399_v41 = vld [vmem:[%s594_s1 + $0x58] sm:$0xf0]  ;;  %v330_v42 = vor.u32 %v398_v37, %v329_v36 }
   0xb   :  { %v334_v43 = vor.u32 %v397_v38, %v331_v39  ;;  %v338_v44 = vor.u32 %v399_v41, %v337_v40  ;;  %v317_v45 = vld [vmem:[%s594_s1 + $0x30] sm:$0xf]  ;;  %v395_v46 = vld [vmem:[%s594_s1 + $0x38] sm:$0xf0]  ;;  %v394_v47 = vld [vmem:[%s594_s1 + $0x34] sm:$0xf] }
   0xc   :  { %200 = vmatpush.bf16.msra.mxu0 %v354_v24  ;;  %v319_v48 = vld [vmem:[%s594_s1 + $0x3c] sm:$0xf0]  ;;  %v325_v49 = vld [vmem:[%s594_s1 + $0x38] sm:$0xf]  ;;  %v396_v50 = vld [vmem:[%s594_s1 + $0x40] sm:$0xf0]  ;;  %v318_v51 = vor.u32 %v395_v46, %v317_v45 }
   0xd   :  { %214 = vmatpush.bf16.msra.mxu1 %v358_v25  ;;  %228 = vmatpush.bf16.msra.mxu2 %v362_v26  ;;  %v322_v52 = vor.u32 %v394_v47, %v319_v48  ;;  %v326_v53 = vor.u32 %v396_v50, %v325_v49  ;;  %v305_v54 = vld [vmem:[%s594_s1 + $0x18] sm:$0xf]  ;;  %v392_v55 = vld [vmem:[%s594_s1 + $0x20] sm:$0xf0]  ;;  %v391_v56 = vld [vmem:[%s594_s1 + $0x1c] sm:$0xf] }
   0xe   :  { %v307_v57 = vld [vmem:[%s594_s1 + $0x24] sm:$0xf0]  ;;  %v313_v58 = vld [vmem:[%s594_s1 + $0x20] sm:$0xf]  ;;  %v393_v59 = vld [vmem:[%s594_s1 + $0x28] sm:$0xf0]  ;;  %v306_v60 = vor.u32 %v392_v55, %v305_v54 }
   0xf   :  { %v310_v61 = vor.u32 %v391_v56, %v307_v57  ;;  %v314_v62 = vor.u32 %v393_v59, %v313_v58  ;;  %v293_v63 = vld [vmem:[%s594_s1] sm:$0xf]  ;;  %v389_v0 = vld [vmem:[%s594_s1 + $0x8] sm:$0xf0]  ;;  %v388_v1 = vld [vmem:[%s594_s1 + $0x4] sm:$0xf] }
  0x10   :  { %201 = vmatpush.bf16.msra.mxu0 %v342_v33  ;;  %v295_v2 = vld [vmem:[%s594_s1 + $0xc] sm:$0xf0]  ;;  %v301_v3 = vld [vmem:[%s594_s1 + $0x8] sm:$0xf]  ;;  %v390_v4 = vld [vmem:[%s594_s1 + $0x10] sm:$0xf0]  ;;  %v294_v5 = vor.u32 %v389_v0, %v293_v63 }
  0x11   :  { %215 = vmatpush.bf16.msra.mxu1 %v346_v34  ;;  %229 = vmatpush.bf16.msra.mxu2 %v350_v35  ;;  %v298_v6 = vor.u32 %v388_v1, %v295_v2  ;;  %v302_v7 = vor.u32 %v390_v4, %v301_v3  ;;  %v387_v8 = vld [vmem:[%s595_s0] sm:$0xff] }
  0x12   :  { %v261_v9 = vld [vmem:[%s596_s2] sm:$0x7] }
  0x13   :  { %v263_v10 = vperm.slane %v261_v9, 0  ;;  %v264_v11 = vperm.slane %v261_v9, 1  ;;  %v265_v17 = vperm.slane %v261_v9, 2 }
  0x14   :  { %202 = vmatpush.bf16.msra.mxu0 %v330_v42 }
  0x15   :  { %216 = vmatpush.bf16.msra.mxu1 %v334_v43  ;;  %230 = vmatpush.bf16.msra.mxu2 %v338_v44 }
  0x18   :  { %203 = vmatpush.bf16.msra.mxu0 %v318_v51 }
  0x19   :  { %217 = vmatpush.bf16.msra.mxu1 %v322_v52  ;;  %231 = vmatpush.bf16.msra.mxu2 %v326_v53 }
  0x1c   :  { %204 = vmatpush.bf16.msra.mxu0 %v306_v60 }
  0x1d   :  { %218 = vmatpush.bf16.msra.mxu1 %v310_v61  ;;  %232 = vmatpush.bf16.msra.mxu2 %v314_v62 }
  0x20   :  { %205 = vmatpush.bf16.msra.mxu0 %v294_v5 }
  0x21   :  { %219 = vmatpush.bf16.msra.mxu1 %v298_v6  ;;  %233 = vmatpush.bf16.msra.mxu2 %v302_v7 }
  0x23   :  { %206 = vmatmul.bf16.vlgmr.msra.gmra.mxu0 %v387_v8 }
  0x24   :  { %220 = vmatmul.bf16.vlgmr.msra.gmra.mxu1 %v387_v8  ;;  %234 = vmatmul.bf16.vlgmr.msra.gmra.mxu2 %v387_v8 }
  0xa0   :  { %v207_v12 = vpop.f32.mrf.mxu0 }
  0xa1   :  { %v269_v13 = vadd.f32 %v263_v10, %v207_v12  ;;  %v221_v14 = vpop.f32.mrf.mxu1 }
  0xa2   :  { %v270_v15 = vadd.f32 %v264_v11, %v221_v14 }
  0xa4   :  { %v275_v16 = vpack.c.bf16 %v270_v15, %v269_v13 }
  0xa6   :  { %279 = vst [vmem:[%s597_s3] sm:$0xff] %v275_v16 }
  0xa7   :  { %v235_v18 = vpop.f32.mrf.mxu2 }
  0xa8   :  { %v271_v19 = vadd.f32 %v265_v17, %v235_v18  ;;  %v209_v20 = vpop.f32.mrf.mxu0 }
  0xa9   :  { %v272_v21 = vadd.f32 %v263_v10, %v209_v20  ;;  %v223_v22 = vpop.f32.mrf.mxu1 }
  0xaa   :  { %v276_v23 = vpack.c.bf16 %v271_v19, %v271_v19  ;;  %v273_v24 = vadd.f32 %v264_v11, %v223_v22 }
  0xac   :  { %280 = vst [vmem:[%s597_s3 + $0x8] sm:$0xf] %v276_v23  ;;  %v277_v25 = vpack.c.bf16 %v273_v24, %v272_v21 }
  0xae   :  { %281 = vst [vmem:[%s597_s3 + $0xc] sm:$0xff] %v277_v25 }
  0xaf   :  { %v237_v26 = vpop.f32.mrf.mxu2 }
  0xb0   :  { %v274_v27 = vadd.f32 %v265_v17, %v237_v26 }
  0xb2   :  { %v278_v28 = vpack.c.bf16 %v274_v27, %v274_v27 }
  0xb4   :  { %282 = vst [vmem:[%s597_s3 + $0x14] sm:$0xf] %v278_v28 }

// kernel: _lambda_.56
= control target key start
LH: loop header
LB: loop body
LE: loop exit
PB: predicated region body
PF: predicated region fallthrough
CT: control target
= control target key end

     0   :  { %vm31_vm0 = vcmask 261120   ;;  %vm184_vm1 = vcmask 8192   ;;  %vm293_vm2 = vcmask 1040384   ;;  %vm289_vm3 = vcmask 15360   ;;  %s708_s1 = inlined_call_operand.vmem [shape: bf16[8,2,32], index: 1, kind: input, shape index: {}]   ;;  %s709_s0 = inlined_call_operand.vmem [shape: bf16[8,1,32], index: 0, kind: input, shape index: {}]   ;;  %s710_s2 = inlined_call_operand.vmem [shape: bf16[8,2,32], index: 2, kind: input, shape index: {}]   ;;  %s711_s3 = inlined_call_operand.vmem [shape: f32[8,1,32], index: 3, kind: output, shape index: {}]  }
   0x1   :  { %v23_v0 = vld [vmem:[%s708_s1] sm:$0x1]  ;;  %v24_v1 = vld [vmem:[%s708_s1 + $0x1] sm:$0x1]  ;;  %v25_v2 = vld [vmem:[%s708_s1 + $0x2] sm:$0x1] }
   0x2   :  { %v36_v3 = vsel %vm31_vm0, %v23_v0, 0  ;;  %v55_v4 = vsel %vm31_vm0, %v24_v1, 0  ;;  %v74_v5 = vsel %vm31_vm0, %v25_v2, 0  ;;  %v26_v6 = vld [vmem:[%s708_s1 + $0x3] sm:$0x1]  ;;  %vm443_vm4 = vcmask 253952  }
   0x3   :  { %45 = vmatpush.bf16.xpose.msra.mxu0 %v36_v3  ;;  %64 = vmatpush.bf16.xpose.msra.mxu1 %v55_v4  ;;  %v93_v7 = vsel %vm31_vm0, %v26_v6, 0  ;;  %v29_v8 = vld [vmem:[%s708_s1 + $0x6] sm:$0x1]  ;;  %v30_v10 = vld [vmem:[%s708_s1 + $0x7] sm:$0x1] }
   0x4   :  { %83 = vmatpush.bf16.xpose.msra.mxu2 %v74_v5  ;;  %102 = vmatpush.bf16.xpose.msra.mxu3 %v93_v7  ;;  %v150_v9 = vsel %vm31_vm0, %v29_v8, 0  ;;  %v28_v11 = vld [vmem:[%s708_s1 + $0x5] sm:$0x1]  ;;  %v169_v12 = vsel %vm31_vm0, %v30_v10, 0  ;;  %v27_v14 = vld [vmem:[%s708_s1 + $0x4] sm:$0x1] }
   0x5   :  { %v131_v13 = vsel %vm31_vm0, %v28_v11, 0  ;;  %v15_v15 = vld [vmem:[%s709_s0] sm:$0x1]  ;;  %v16_v16 = vld [vmem:[%s709_s0 + $0x1] sm:$0x1]  ;;  %v112_v17 = vsel %vm31_vm0, %v27_v14, 0 }
   0x6   :  { %v17_v18 = vld [vmem:[%s709_s0 + $0x2] sm:$0x1]  ;;  %v18_v19 = vld [vmem:[%s709_s0 + $0x3] sm:$0x1]  ;;  %v20_v20 = vld [vmem:[%s709_s0 + $0x5] sm:$0x1] }
   0x7   :  { %v19_v21 = vld [vmem:[%s709_s0 + $0x4] sm:$0x1]  ;;  %v21_v22 = vld [vmem:[%s709_s0 + $0x6] sm:$0x1]  ;;  %v22_v23 = vld [vmem:[%s709_s0 + $0x7] sm:$0x1] }
   0xa   :  { %456 = vmatmul.msk.bf16.vlgmr.msra.gmra.mxu0 %vm31_vm0, %v15_v15  ;;  %457 = vmatmul.msk.bf16.vlgmr.msra.gmra.mxu1 %vm31_vm0, %v16_v16 }
   0xb   :  { %140 = vmatpush.bf16.xpose.msrb.mxu1 %v131_v13  ;;  %121 = vmatpush.bf16.xpose.msrb.mxu0 %v112_v17 }
   0xc   :  { %159 = vmatpush.bf16.xpose.msrb.mxu2 %v150_v9  ;;  %178 = vmatpush.bf16.xpose.msrb.mxu3 %v169_v12 }
   0xd   :  { %458 = vmatmul.msk.bf16.vlgmr.msra.gmra.mxu2 %vm31_vm0, %v17_v18  ;;  %459 = vmatmul.msk.bf16.vlgmr.msra.gmra.mxu3 %vm31_vm0, %v18_v19 }
  0x1a   :  { %461 = vmatmul.msk.bf16.vlgmr.msrb.gmra.mxu1 %vm31_vm0, %v20_v20  ;;  %460 = vmatmul.msk.bf16.vlgmr.msrb.gmra.mxu0 %vm31_vm0, %v19_v21 }
  0x1d   :  { %462 = vmatmul.msk.bf16.vlgmr.msrb.gmra.mxu2 %vm31_vm0, %v21_v22  ;;  %463 = vmatmul.msk.bf16.vlgmr.msrb.gmra.mxu3 %vm31_vm0, %v22_v23 }
  0x87   :  { %v47_v24 = vpop.f32.mrf.mxu0  ;;  %v66_v25 = vpop.f32.mrf.mxu1 }
  0x88   :  { %v185_v26 = vsel %vm184_vm1, %v47_v24, -inf  ;;  %v188_v29 = vsel %vm184_vm1, %v66_v25, -inf }
  0x89   :  { %186 = vmax.xlane.f32.xlu1 %v185_v26  ;;  %v283_v26 = vld [vmem:[%s710_s2 + $0x2] sm:$0x1] }
  0x8f   :  { %v68_v31 = vpop.f32.mrf.mxu1  ;;  %v49_v32 = vpop.f32.mrf.mxu0 }
  0x90   :  { %v85_v27 = vpop.f32.mrf.mxu2  ;;  %v104_v28 = vpop.f32.mrf.mxu3  ;;  %v287_v32 = vld [vmem:[%s710_s2 + $0x6] sm:$0x1] }
  0x91   :  { %v191_v30 = vsel %vm184_vm1, %v85_v27, -inf  ;;  %189 = vmax.xlane.f32.xlu1 %v188_v29  ;;  %v194_v33 = vsel %vm184_vm1, %v104_v28, -inf }
  0x92   :  { %192 = vmax.xlane.f32.xlu0 %v191_v30  ;;  %v282_v30 = vld [vmem:[%s710_s2 + $0x1] sm:$0x1] }
  0x93   :  { %v314_v31 = vsel %vm293_vm2, %v282_v30, 0 }
  0x94   :  { %323 = vmatpush.bf16.msra.mxu1 %v314_v31 }
  0x97   :  { %v142_v36 = vpop.f32.mrf.mxu1  ;;  %v123_v37 = vpop.f32.mrf.mxu0 }
  0x98   :  { %v87_v34 = vpop.f32.mrf.mxu2  ;;  %v106_v35 = vpop.f32.mrf.mxu3  ;;  %v200_v38 = vsel %vm184_vm1, %v142_v36, -inf  ;;  %v197_v39 = vsel %vm184_vm1, %v123_v37, -inf }
  0x99   :  { %201 = vmax.xlane.f32.xlu1 %v200_v38  ;;  %v409_v35 = vsel %vm293_vm2, %v287_v32, 0 }
  0x9a   :  { %195 = vmax.xlane.f32.xlu0 %v194_v33  ;;  %v285_v33 = vld [vmem:[%s710_s2 + $0x4] sm:$0x1] }
  0x9f   :  { %v125_v43 = vpop.f32.mrf.mxu0  ;;  %v144_v44 = vpop.f32.mrf.mxu1 }
  0xa0   :  { %v161_v40 = vpop.f32.mrf.mxu2  ;;  %v180_v41 = vpop.f32.mrf.mxu3 }
  0xa1   :  { %v203_v42 = vsel %vm184_vm1, %v161_v40, -inf  ;;  %v206_v45 = vsel %vm184_vm1, %v180_v41, -inf }
  0xa2   :  { %204 = vmax.xlane.f32.xlu2 %v203_v42  ;;  %198 = vmax.xlane.f32.xlu0 %v197_v39 }
  0xa8   :  { %v163_v46 = vpop.f32.mrf.mxu2  ;;  %v182_v47 = vpop.f32.mrf.mxu3 }
  0xaa   :  { %207 = vmax.xlane.f32.xlu2 %v206_v45 }
  0xfc   :  { %v187_v48 = vpop.xlane.xlu1 %186 }
  0xfd   :  { %v209_v49 = vsub.f32 %v47_v24, %v187_v48  ;;  %v281_v24 = vld [vmem:[%s710_s2] sm:$0x1] }
  0xff   :  { %v217_v50 = vmul.f32 1.442695, %v209_v49 }
 0x101   :  { %472 = vpow2.f32 %v217_v50 }
 0x104   :  { %v190_v53 = vpop.xlane.xlu1 %189 }
 0x105   :  { %v193_v51 = vpop.xlane.xlu0 %192  ;;  %v210_v55 = vsub.f32 %v66_v25, %v190_v53  ;;  %v295_v25 = vsel %vm293_vm2, %v281_v24, 0 }
 0x106   :  { %v211_v52 = vsub.f32 %v85_v27, %v193_v51  ;;  %304 = vmatpush.bf16.msra.mxu0 %v295_v25  ;;  %v333_v27 = vsel %vm293_vm2, %v283_v26, 0 }
 0x107   :  { %v596_v56 = vpop.eup %472  ;;  %v219_v58 = vmul.f32 1.442695, %v210_v55  ;;  %342 = vmatpush.bf16.msra.mxu2 %v333_v27 }
 0x108   :  { %v221_v54 = vmul.f32 1.442695, %v211_v52  ;;  %v233_v57 = vsel %vm184_vm1, %v596_v56, 0.0 }
 0x109   :  { %234 = vadd.xlane.f32.xlu1 %v233_v57 }
 0x10a   :  { %474 = vpow2.f32 %v221_v54 }
 0x10b   :  { %476 = vpow2.f32 %v219_v58  ;;  %418 = vmatpush.bf16.msrb.mxu2 %v409_v35 }
 0x10c   :  { %v202_v0 = vpop.xlane.xlu1 %201 }
 0x10d   :  { %v196_v59 = vpop.xlane.xlu0 %195  ;;  %v214_v7 = vsub.f32 %v142_v36, %v202_v0  ;;  %v371_v36 = vsel %vm293_vm2, %v285_v33, 0 }
 0x10e   :  { %v212_v60 = vsub.f32 %v104_v28, %v196_v59  ;;  %v284_v28 = vld [vmem:[%s710_s2 + $0x3] sm:$0x1]  ;;  %380 = vmatpush.bf16.msrb.mxu0 %v371_v36 }
 0x10f   :  { %v227_v12 = vmul.f32 1.442695, %v214_v7  ;;  %v352_v29 = vsel %vm293_vm2, %v284_v28, 0 }
 0x110   :  { %v600_v61 = vpop.eup %474  ;;  %v223_v62 = vmul.f32 1.442695, %v212_v60  ;;  %361 = vmatpush.bf16.msra.mxu3 %v352_v29 }
 0x111   :  { %v239_v63 = vsel %vm184_vm1, %v600_v61, 0.0  ;;  %v604_v3 = vpop.eup %476 }
 0x112   :  { %478 = vpow2.f32 %v223_v62  ;;  %240 = vadd.xlane.f32.xlu2 %v239_v63  ;;  %v236_v10 = vsel %vm184_vm1, %v604_v3, 0.0 }
 0x115   :  { %v205_v1 = vpop.xlane.xlu2 %204  ;;  %v199_v2 = vpop.xlane.xlu0 %198 }
 0x116   :  { %v215_v4 = vsub.f32 %v161_v40, %v205_v1  ;;  %v213_v5 = vsub.f32 %v123_v37, %v199_v2  ;;  %v288_v37 = vld [vmem:[%s710_s2 + $0x7] sm:$0x1] }
 0x117   :  { %v428_v38 = vsel %vm293_vm2, %v288_v37, 0 }
 0x118   :  { %v606_v6 = vpop.eup %478  ;;  %v229_v8 = vmul.f32 1.442695, %v215_v4  ;;  %v225_v9 = vmul.f32 1.442695, %v213_v5  ;;  %437 = vmatpush.bf16.msrb.mxu3 %v428_v38 }
 0x119   :  { %v242_v11 = vsel %vm184_vm1, %v606_v6, 0.0 }
 0x11a   :  { %480 = vpow2.f32 %v229_v8  ;;  %237 = vadd.xlane.f32.xlu2 %v236_v10  ;;  %243 = vadd.xlane.f32.xlu0 %v242_v11 }
 0x11b   :  { %482 = vpow2.f32 %v225_v9 }
 0x11c   :  { %484 = vpow2.f32 %v227_v12 }
 0x11d   :  { %v208_v13 = vpop.xlane.xlu2 %207 }
 0x11e   :  { %v216_v14 = vsub.f32 %v180_v41, %v208_v13  ;;  %v286_v41 = vld [vmem:[%s710_s2 + $0x5] sm:$0x1] }
 0x11f   :  { %v390_v43 = vsel %vm293_vm2, %v286_v41, 0 }
 0x120   :  { %v612_v15 = vpop.eup %480  ;;  %v231_v16 = vmul.f32 1.442695, %v216_v14  ;;  %399 = vmatpush.bf16.msrb.mxu1 %v390_v43 }
 0x121   :  { %v614_v17 = vpop.eup %482  ;;  %v251_v18 = vsel %vm184_vm1, %v612_v15, 0.0 }
 0x122   :  { %486 = vpow2.f32 %v231_v16  ;;  %252 = vadd.xlane.f32.xlu0 %v251_v18  ;;  %v245_v19 = vsel %vm184_vm1, %v614_v17, 0.0  ;;  %v620_v20 = vpop.eup %484 }
 0x123   :  { %246 = vadd.xlane.f32.xlu2 %v245_v19  ;;  %v248_v23 = vsel %vm184_vm1, %v620_v20, 0.0 }
 0x128   :  { %v622_v21 = vpop.eup %486 }
 0x129   :  { %v254_v22 = vsel %vm184_vm1, %v622_v21, 0.0 }
 0x12a   :  { %255 = vadd.xlane.f32.xlu1 %v254_v22  ;;  %249 = vadd.xlane.f32.xlu0 %v248_v23 }
 0x17c   :  { %v235_v34 = vpop.xlane.xlu1 %234 }
 0x17d   :  { %488 = vrcp.f32 %v235_v34 }
 0x183   :  { %v489_v39 = vpop.eup %488 }
 0x184   :  { %v265_v42 = vmul.f32 %v489_v39, %v596_v56 }
 0x185   :  { %v241_v40 = vpop.xlane.xlu2 %240 }
 0x186   :  { %490 = vrcp.f32 %v241_v40  ;;  %v273_v44 = vpack.c.bf16 %v265_v42, %v265_v42 }
 0x188   :  { %464 = vmatmul.msk.bf16.vlgmr.msra.gmra.mxu0 %vm289_vm3, %v273_v44 }
 0x18c   :  { %v491_v45 = vpop.eup %490 }
 0x18d   :  { %v267_v46 = vmul.f32 %v491_v45, %v600_v61  ;;  %v238_v47 = vpop.xlane.xlu2 %237  ;;  %v244_v48 = vpop.xlane.xlu0 %243 }
 0x18e   :  { %492 = vrcp.f32 %v238_v47 }
 0x18f   :  { %v275_v49 = vpack.c.bf16 %v267_v46, %v267_v46  ;;  %494 = vrcp.f32 %v244_v48 }
 0x191   :  { %466 = vmatmul.msk.bf16.vlgmr.msra.gmra.mxu2 %vm289_vm3, %v275_v49 }
 0x194   :  { %v493_v50 = vpop.eup %492 }
 0x195   :  { %v495_v51 = vpop.eup %494  ;;  %v266_v52 = vmul.f32 %v493_v50, %v604_v3  ;;  %v253_v53 = vpop.xlane.xlu0 %252 }
 0x196   :  { %v268_v54 = vmul.f32 %v495_v51, %v606_v6  ;;  %v247_v55 = vpop.xlane.xlu2 %246  ;;  %496 = vrcp.f32 %v253_v53 }
 0x197   :  { %v274_v56 = vpack.c.bf16 %v266_v52, %v266_v52  ;;  %498 = vrcp.f32 %v247_v55 }
 0x198   :  { %v276_v57 = vpack.c.bf16 %v268_v54, %v268_v54 }
 0x199   :  { %465 = vmatmul.msk.bf16.vlgmr.msra.gmra.mxu1 %vm289_vm3, %v274_v56 }
 0x19a   :  { %467 = vmatmul.msk.bf16.vlgmr.msra.gmra.mxu3 %vm289_vm3, %v276_v57 }
 0x19c   :  { %v497_v58 = vpop.eup %496 }
 0x19d   :  { %v499_v59 = vpop.eup %498  ;;  %v271_v60 = vmul.f32 %v497_v58, %v612_v15  ;;  %v256_v61 = vpop.xlane.xlu1 %255 }
 0x19e   :  { %v250_v62 = vpop.xlane.xlu0 %249  ;;  %v269_v63 = vmul.f32 %v499_v59, %v614_v17  ;;  %500 = vrcp.f32 %v256_v61 }
 0x19f   :  { %v279_v0 = vpack.c.bf16 %v271_v60, %v271_v60  ;;  %502 = vrcp.f32 %v250_v62 }
 0x1a0   :  { %v277_v1 = vpack.c.bf16 %v269_v63, %v269_v63 }
 0x1a1   :  { %470 = vmatmul.msk.bf16.vlgmr.msrb.gmra.mxu2 %vm289_vm3, %v279_v0 }
 0x1a2   :  { %468 = vmatmul.msk.bf16.vlgmr.msrb.gmra.mxu0 %vm289_vm3, %v277_v1 }
 0x1a4   :  { %v501_v2 = vpop.eup %500 }
 0x1a5   :  { %v503_v3 = vpop.eup %502  ;;  %v272_v4 = vmul.f32 %v501_v2, %v622_v21 }
 0x1a6   :  { %v270_v5 = vmul.f32 %v503_v3, %v620_v20 }
 0x1a7   :  { %v280_v6 = vpack.c.bf16 %v272_v4, %v272_v4 }
 0x1a8   :  { %v278_v7 = vpack.c.bf16 %v270_v5, %v270_v5 }
 0x1aa   :  { %469 = vmatmul.msk.bf16.vlgmr.msrb.gmra.mxu1 %vm289_vm3, %v278_v7  ;;  %471 = vmatmul.msk.bf16.vlgmr.msrb.gmra.mxu3 %vm289_vm3, %v280_v6 }
 0x205   :  { %v306_v8 = vpop.f32.mrf.mxu0 }
 0x206   :  { %444 = vst.msk [vmem:[%s711_s3] sm:$0x1] %vm443_vm4, %v306_v8 }
 0x20d   :  { %v308_v9 = vpop.f32.mrf.mxu0 }
 0x214   :  { %v344_v10 = vpop.f32.mrf.mxu2 }
 0x215   :  { %446 = vst.msk [vmem:[%s711_s3 + $0x2] sm:$0x1] %vm443_vm4, %v344_v10 }
 0x216   :  { %v325_v11 = vpop.f32.mrf.mxu1 }
 0x217   :  { %445 = vst.msk [vmem:[%s711_s3 + $0x1] sm:$0x1] %vm443_vm4, %v325_v11 }
 0x21c   :  { %v346_v12 = vpop.f32.mrf.mxu2 }
 0x21d   :  { %v363_v13 = vpop.f32.mrf.mxu3 }
 0x21e   :  { %447 = vst.msk [vmem:[%s711_s3 + $0x3] sm:$0x1] %vm443_vm4, %v363_v13  ;;  %v327_v14 = vpop.f32.mrf.mxu1 }
 0x21f   :  { %v382_v15 = vpop.f32.mrf.mxu0 }
 0x220   :  { %448 = vst.msk [vmem:[%s711_s3 + $0x4] sm:$0x1] %vm443_vm4, %v382_v15 }
 0x224   :  { %v420_v16 = vpop.f32.mrf.mxu2 }
 0x225   :  { %v365_v17 = vpop.f32.mrf.mxu3  ;;  %450 = vst.msk [vmem:[%s711_s3 + $0x6] sm:$0x1] %vm443_vm4, %v420_v16 }
 0x227   :  { %v384_v18 = vpop.f32.mrf.mxu0  ;;  %v401_v19 = vpop.f32.mrf.mxu1 }
 0x228   :  { %449 = vst.msk [vmem:[%s711_s3 + $0x5] sm:$0x1] %vm443_vm4, %v401_v19 }
 0x22c   :  { %v422_v20 = vpop.f32.mrf.mxu2 }
 0x22d   :  { %v439_v21 = vpop.f32.mrf.mxu3 }
 0x22e   :  { %451 = vst.msk [vmem:[%s711_s3 + $0x7] sm:$0x1] %vm443_vm4, %v439_v21 }
 0x22f   :  { %v403_v22 = vpop.f32.mrf.mxu1 }
 0x235   :  { %v441_v23 = vpop.f32.mrf.mxu3 }

// kernel: _lambda_.57
= control target key start
LH: loop header
LB: loop body
LE: loop exit
PB: predicated region body
PF: predicated region fallthrough
CT: control target
= control target key end

     0   :  { %s231_s1 = inlined_call_operand.vmem [shape: bf16[128,128], index: 1, kind: input, shape index: {}]   ;;  %s232_s2 = inlined_call_operand.vmem [shape: f32[1,128], index: 2, kind: input, shape index: {}]   ;;  %s233_s0 = inlined_call_operand.vmem [shape: bf16[16,128], index: 0, kind: input, shape index: {}]   ;;  %s234_s3 = inlined_call_operand.vmem [shape: f32[16,128], index: 3, kind: output, shape index: {}]  }
   0x1   :  { %v173_v0 = vld [vmem:[%s231_s1 + $0x38] sm:$0xff]  ;;  %v172_v1 = vld [vmem:[%s231_s1 + $0x30] sm:$0xff]  ;;  %v171_v2 = vld [vmem:[%s231_s1 + $0x28] sm:$0xff] }
   0x2   :  { %94 = vmatpush.bf16.msra.mxu0 %v173_v0  ;;  %v170_v3 = vld [vmem:[%s231_s1 + $0x20] sm:$0xff]  ;;  %v169_v4 = vld [vmem:[%s231_s1 + $0x18] sm:$0xff]  ;;  %v168_v5 = vld [vmem:[%s231_s1 + $0x10] sm:$0xff] }
   0x3   :  { %v167_v6 = vld [vmem:[%s231_s1 + $0x8] sm:$0xff]  ;;  %v166_v7 = vld [vmem:[%s231_s1] sm:$0xff] }
   0x4   :  { %v165_v8 = vld [vmem:[%s233_s0] sm:$0xff] }
   0x5   :  { %v174_v9 = vld [vmem:[%s232_s2] ss:$0 sm:$0xff] }
   0x6   :  { %95 = vmatpush.bf16.msra.mxu0 %v172_v1 }
   0xa   :  { %96 = vmatpush.bf16.msra.mxu0 %v171_v2 }
   0xe   :  { %97 = vmatpush.bf16.msra.mxu0 %v170_v3 }
  0x12   :  { %98 = vmatpush.bf16.msra.mxu0 %v169_v4 }
  0x16   :  { %99 = vmatpush.bf16.msra.mxu0 %v168_v5 }
  0x1a   :  { %100 = vmatpush.bf16.msra.mxu0 %v167_v6 }
  0x1e   :  { %101 = vmatpush.bf16.msra.mxu0 %v166_v7 }
  0x21   :  { %102 = vmatmul.bf16.vlgmr.msra.gmra.mxu0 %v165_v8 }
  0x9e   :  { %v103_v10 = vpop.f32.mrf.mxu0 }
  0x9f   :  { %v121_v11 = vadd.f32 %v174_v9, %v103_v10 }
  0xa1   :  { %123 = vst [vmem:[%s234_s3] sm:$0xff] %v121_v11 }
  0xa6   :  { %v105_v12 = vpop.f32.mrf.mxu0 }
  0xa7   :  { %v122_v13 = vadd.f32 %v174_v9, %v105_v12 }
  0xa9   :  { %124 = vst [vmem:[%s234_s3 + $0x8] sm:$0xff] %v122_v13 }

</bundles_post_ra>
